<compile_context>
chip_gen: v6e
topology: v6e:2x2x1
jax: 0.10.0
libtpu: 0.0.40
codegen_flags: <defaults>
</compile_context>

<pallas_src>
import numpy as np
import jax
import jax.numpy as jnp
from jax.experimental import pallas as pl
from jax.experimental.pallas import tpu as pltpu

BN_EPS = 1e-5
MXU_DTYPE = jnp.bfloat16      # MXU operand dtype (accumulation stays f32)
C1, C2, C3 = 32, 64, 128      # channel widths fixed by the PyTorch module


# -----------------------------------------------------------------------------
# Fused forward: conv1+BN+ReLU -> pool -> conv2+BN+ReLU -> pool
#                -> conv3+BN+ReLU -> linear -> sigmoid, all inside one kernel.
# -----------------------------------------------------------------------------
def our_model_forward(x_nchw, prep, hp, N):
    H1 = hp["i_size"]
    assert (hp["k_size"], hp["k_stride"], hp["k_pad"]) == (3, 1, 1)
    assert (hp["p_size"], hp["p_stride"], hp["p_pad"]) == (2, 2, 0)
    assert H1 % 4 == 0

    H2, H3 = H1 // 2, H1 // 4                   # spatial size after each pool
    P1 = N * H1 * H1                            # conv1 output rows
    B1 = P1 // 4                                # rows per pool-parity block
    Wp2, Wp3 = H2 + 2, H3 + 2                   # zero-padded spatial widths
    R2, R3 = N * Wp2 * Wp2, N * Wp3 * Wp3       # "wide" conv2/conv3 row counts
    XP2, XP3 = R2 + 2 * Wp2 + 4, R3 + 2 * Wp3 + 4
    NV2, NV3 = N * H2 * H2, N * H3 * H3         # valid rows (BN sample counts)
    NPAD = 8 * ((N + 7) // 8)

    def kernel(p1_ref, w1_ref, g1_ref, be1_ref,
               w2_ref, g2_ref, be2_ref,
               w3_ref, g3_ref, be3_ref,
               wlin_ref, blin_ref, m2_ref, m3_ref, sel_ref,
               o_ref, xp2_ref, y2_ref, xp3_ref):
        f32 = jnp.float32

        # zero-fill padded conv-input scratches (conv padding + shift tails)
        xp2_ref[...] = jnp.zeros(xp2_ref.shape, f32)
        xp3_ref[...] = jnp.zeros(xp3_ref.shape, f32)

        def bn_relu(y, g, be, mask, count):
            # one-pass training-mode BatchNorm (biased variance) + ReLU
            ym = y if mask is None else y * mask
            s = jnp.sum(ym, axis=0, keepdims=True)
            q = jnp.sum(ym * ym, axis=0, keepdims=True)
            mean = s * (1.0 / count)
            var = q * (1.0 / count) - mean * mean
            scale = g * jax.lax.rsqrt(var + BN_EPS)
            return jnp.maximum((y - mean) * scale + be, 0.0)

        # ---- layer 1: conv1 as a single im2col matmul (K padded to 16) -----
        y1 = jnp.dot(p1_ref[...], w1_ref[...], preferred_element_type=f32)
        y1 = bn_relu(y1, g1_ref[...], be1_ref[...], None, P1)          # (P1, C1)

        # ---- maxpool1: rows arrive pre-ordered in 4 pool-parity blocks -----
        pooled1 = jnp.maximum(
            jnp.maximum(y1[0:B1, :], y1[B1:2 * B1, :]),
            jnp.maximum(y1[2 * B1:3 * B1, :], y1[3 * B1:4 * B1, :]),
        )                                                               # (N*H2*H2, C1)
        # scatter into zero-padded conv2 input: row = n*Wp2^2 + (h+1)*Wp2 + (w+1)
        for n in range(N):
            for h in range(H2):
                dst = n * Wp2 * Wp2 + (h + 1) * Wp2 + 1
                src = pooled1[(n * H2 + h) * H2:(n * H2 + h + 1) * H2, :]
                xp2_ref[dst:dst + H2, :] = src

        # ---- layer 2: conv2 as 9 shifted MXU matmuls over "wide" rows ------
        acc2 = jnp.zeros((R2, C2), f32)
        for kh in range(3):
            for kw in range(3):
                s = kh * Wp2 + kw
                lhs = xp2_ref[s:s + R2, :].astype(MXU_DTYPE)
                rhs = w2_ref[(kh * 3 + kw) * C1:(kh * 3 + kw + 1) * C1, :]
                acc2 = acc2 + jnp.dot(lhs, rhs, preferred_element_type=f32)
        y2_ref[...] = bn_relu(acc2, g2_ref[...], be2_ref[...], m2_ref[...], NV2)

        # ---- maxpool2: 2x2/2 window max, scattered into padded conv3 input -
        for n in range(N):
            for h in range(H3):
                for w in range(H3):
                    r = n * Wp2 * Wp2 + (2 * h) * Wp2 + 2 * w
                    quad = jnp.maximum(y2_ref[r:r + 2, :],
                                       y2_ref[r + Wp2:r + Wp2 + 2, :])   # (2, C2)
                    mx = jnp.maximum(quad[0:1, :], quad[1:2, :])         # (1, C2)
                    dst = n * Wp3 * Wp3 + (h + 1) * Wp3 + (w + 1)
                    xp3_ref[dst:dst + 1, :] = mx

        # ---- layer 3: conv3 as 9 shifted MXU matmuls over "wide" rows ------
        acc3 = jnp.zeros((R3, C3), f32)
        for kh in range(3):
            for kw in range(3):
                s = kh * Wp3 + kw
                lhs = xp3_ref[s:s + R3, :].astype(MXU_DTYPE)
                rhs = w3_ref[(kh * 3 + kw) * C2:(kh * 3 + kw + 1) * C2, :]
                acc3 = acc3 + jnp.dot(lhs, rhs, preferred_element_type=f32)
        r3 = bn_relu(acc3, g3_ref[...], be3_ref[...], m3_ref[...], NV3)  # (R3, C3)

        # ---- linear + sigmoid: VPU multiply, segmented row-sum, lane-sum ---
        prod = r3 * wlin_ref[...]                                        # (R3, C3)
        seg = jnp.dot(sel_ref[...], prod, preferred_element_type=f32)    # (NPAD, C3)
        lin = jnp.sum(seg, axis=1, keepdims=True) + blin_ref[...]        # (NPAD, 1)
        sig = pl.reciprocal(1.0 + jnp.exp(-lin), approx=True)
        o_ref[...] = sig[0:N, :]

    # --- input prep (tiny XLA): NCHW->NHWC, pad, 3x3 im2col, pool-parity order
    x = jnp.transpose(x_nchw, (0, 2, 3, 1))
    xp = jnp.pad(x, ((0, 0), (1, 1), (1, 1), (0, 0)))
    cols = [xp[:, kh:kh + H1, kw:kw + H1, 0] for kh in range(3) for kw in range(3)]
    p1 = jnp.stack(cols, axis=-1)                                        # (N,H1,H1,9)
    p1 = p1.reshape(N, H2, 2, H2, 2, 9)
    p1 = jnp.transpose(p1, (2, 4, 0, 1, 3, 5)).reshape(P1, 9)            # 4 parity blocks
    p1 = jnp.pad(p1, ((0, 0), (0, 16 - 9))).astype(MXU_DTYPE)

    out = pl.pallas_call(
        kernel,
        out_shape=jax.ShapeDtypeStruct((N, 1), jnp.float32),
        in_specs=[pl.BlockSpec(memory_space=pltpu.MemorySpace.VMEM) for _ in range(15)],
        out_specs=pl.BlockSpec(memory_space=pltpu.MemorySpace.VMEM),
        scratch_shapes=[
            pltpu.VMEM((XP2, C1), jnp.float32),   # zero-padded conv2 input
            pltpu.VMEM((R2, C2), jnp.float32),    # conv2 output (wide) for pooling
            pltpu.VMEM((XP3, C2), jnp.float32),   # zero-padded conv3 input
        ],
    )(p1, prep["w1"], prep["g1"], prep["be1"],
      prep["w2"], prep["g2"], prep["be2"],
      prep["w3"], prep["g3"], prep["be3"],
      prep["wlin"], prep["blin"], prep["m2"], prep["m3"], prep["sel"])
    return out.reshape(-1)


# -----------------------------------------------------------------------------
# One-time parameter preparation (layout permutations done at init, not per fwd)
# -----------------------------------------------------------------------------
def prepare_kernel_params(params, hp, N):
    H1 = hp["i_size"]
    H2, H3 = H1 // 2, H1 // 4
    Wp2, Wp3 = H2 + 2, H3 + 2
    R3 = N * Wp3 * Wp3
    NPAD = 8 * ((N + 7) // 8)

    def conv_w_mat(w):   # (Cout,Cin,kh,kw) -> (kh*kw*Cin, Cout)
        return jnp.transpose(w, (2, 3, 1, 0)).reshape(-1, w.shape[0])

    w1, _, g1, be1 = params["conv0"]   # conv bias unused: cancels under train-mode BN
    w2, _, g2, be2 = params["conv1"]
    w3, _, g3, be3 = params["conv2"]
    wl, bl = params["linear"]

    w1m = conv_w_mat(w1)
    w1m = jnp.pad(w1m, ((0, 16 - w1m.shape[0]), (0, 0))).astype(MXU_DTYPE)

    # linear weight permuted once into the kernel's y3 "wide" row layout
    wlw = jnp.transpose(wl.reshape(C3, H3, H3), (1, 2, 0))              # (H3,H3,C3)
    wlw = jnp.pad(wlw, ((0, Wp3 - H3), (0, Wp3 - H3), (0, 0)))          # (Wp3,Wp3,C3)
    wlw = jnp.tile(wlw.reshape(Wp3 * Wp3, C3), (N, 1))                  # (R3, C3)

    def wide_mask(wp, h):   # 1.0 on valid "wide" output rows, 0.0 on padding rows
        m = np.zeros((N * wp * wp, 1), np.float32)
        for n in range(N):
            for a in range(h):
                for b in range(h):
                    m[n * wp * wp + a * wp + b, 0] = 1.0
        return jnp.asarray(m)

    sel = np.zeros((NPAD, R3), np.float32)   # per-sample row-block selector
    for n in range(N):
        sel[n, n * Wp3 * Wp3:(n + 1) * Wp3 * Wp3] = 1.0

    return dict(
        w1=w1m, g1=g1.reshape(1, -1), be1=be1.reshape(1, -1),
        w2=conv_w_mat(w2).astype(MXU_DTYPE), g2=g2.reshape(1, -1), be2=be2.reshape(1, -1),
        w3=conv_w_mat(w3).astype(MXU_DTYPE), g3=g3.reshape(1, -1), be3=be3.reshape(1, -1),
        wlin=wlw, blin=bl.reshape(1, 1),
        m2=wide_mask(Wp2, H2), m3=wide_mask(Wp3, H3), sel=jnp.asarray(sel),
    )


# -----------------------------------------------------------------------------
# Model definition glue
# -----------------------------------------------------------------------------
def calc_dim(hp):
    def conv_o(s, k, st, p):
        return (s + 2 * p - k) / st + 1
    H = hp["i_size"]
    H = conv_o(H, hp["k_size"], hp["k_stride"], hp["k_pad"])
    H = conv_o(H, hp["p_size"], hp["p_stride"], hp["p_pad"])
    H = conv_o(H, hp["k_size"], hp["k_stride"], hp["k_pad"])
    H = conv_o(H, hp["p_size"], hp["p_stride"], hp["p_pad"])
    H = conv_o(H, hp["k_size"], hp["k_stride"], hp["k_pad"])
    return int(H) * int(H)


def init_params(key, hp):
    k = hp["k_size"]
    chans = [(1, C1), (C1, C2), (C2, C3)]
    keys = jax.random.split(key, 14)
    params = {}
    for i, (cin, cout) in enumerate(chans):
        w = 0.1 * jax.random.normal(keys[4 * i], (cout, cin, k, k), jnp.float32)
        b = 0.01 * jax.random.normal(keys[4 * i + 1], (cout,), jnp.float32)
        gamma = 1.0 + 0.1 * jax.random.normal(keys[4 * i + 2], (cout,), jnp.float32)
        beta = 0.1 * jax.random.normal(keys[4 * i + 3], (cout,), jnp.float32)
        params[f"conv{i}"] = (w, b, gamma, beta)
    flat_dim = C3 * calc_dim(hp)
    wl = 0.05 * jax.random.normal(keys[12], (flat_dim, 1), jnp.float32)
    bl = 0.01 * jax.random.normal(keys[13], (1,), jnp.float32)
    params["linear"] = (wl, bl)
    return params


# -----------------------------------------------------------------------------
# Pure-JAX (f32) reference for the correctness check
# -----------------------------------------------------------------------------
def reference_forward(x_nchw, params, hp):
    x = x_nchw
    for i in range(3):
        w, b, gamma, beta = params[f"conv{i}"]
        x = jax.lax.conv_general_dilated(
            x, w, (hp["k_stride"], hp["k_stride"]),
            padding=[(hp["k_pad"], hp["k_pad"])] * 2,
            dimension_numbers=("NCHW", "OIHW", "NCHW"),
        ) + b.reshape(1, -1, 1, 1)
        mean = jnp.mean(x, axis=(0, 2, 3), keepdims=True)
        var = jnp.mean(jnp.square(x - mean), axis=(0, 2, 3), keepdims=True)
        x = (x - mean) * jax.lax.rsqrt(var + BN_EPS)
        x = x * gamma.reshape(1, -1, 1, 1) + beta.reshape(1, -1, 1, 1)
        x = jnp.maximum(x, 0.0)
        if i < 2:
            x = jax.lax.reduce_window(
                x, -jnp.inf, jax.lax.max,
                (1, 1, hp["p_size"], hp["p_size"]),
                (1, 1, hp["p_stride"], hp["p_stride"]),
                ((0, 0), (0, 0), (hp["p_pad"], hp["p_pad"]), (hp["p_pad"], hp["p_pad"])),
            )
    N = x.shape[0]
    flat = x.reshape(N, -1)
    wl, bl = params["linear"]
    return jax.nn.sigmoid(flat @ wl + bl).reshape(-1)


# -----------------------------------------------------------------------------
if __name__ == "__main__":
    hp = dict(k_size=3, k_stride=1, k_pad=1, p_size=2, p_stride=2, p_pad=0, i_size=16)
    batch = 2

    key = jax.random.PRNGKey(0)
    kx, kp = jax.random.split(key)
    x = jax.random.normal(kx, (batch, 1, hp["i_size"], hp["i_size"]), jnp.float32)
    params = init_params(kp, hp)
    prep = prepare_kernel_params(params, hp, batch)   # layout prep done once

    fwd = jax.jit(lambda xx: our_model_forward(xx, prep, hp, batch))
    pred = jax.block_until_ready(fwd(x))
    ref = jax.block_until_ready(reference_forward(x, params, hp))

    assert pred.shape == (batch,), pred.shape
    # bf16 MXU operands + one-pass BN stats vs. full-f32 reference -> loose tol
    assert jnp.allclose(pred, ref, rtol=3e-2, atol=3e-2), (pred, ref)
    print("KERNEL_OK")
</pallas_src>

<mosaic_0001>
module attributes {stable_mosaic.version = 11 : i64} {
  func.func @kernel(%arg0: memref<512x16xbf16, #tpu.memory_space<vmem>>, %arg1: memref<16x32xbf16, #tpu.memory_space<vmem>>, %arg2: memref<1x32xf32, #tpu.memory_space<vmem>>, %arg3: memref<1x32xf32, #tpu.memory_space<vmem>>, %arg4: memref<288x64xbf16, #tpu.memory_space<vmem>>, %arg5: memref<1x64xf32, #tpu.memory_space<vmem>>, %arg6: memref<1x64xf32, #tpu.memory_space<vmem>>, %arg7: memref<576x128xbf16, #tpu.memory_space<vmem>>, %arg8: memref<1x128xf32, #tpu.memory_space<vmem>>, %arg9: memref<1x128xf32, #tpu.memory_space<vmem>>, %arg10: memref<72x128xf32, #tpu.memory_space<vmem>>, %arg11: memref<1x1xf32, #tpu.memory_space<vmem>>, %arg12: memref<200x1xf32, #tpu.memory_space<vmem>>, %arg13: memref<72x1xf32, #tpu.memory_space<vmem>>, %arg14: memref<8x72xf32, #tpu.memory_space<vmem>>, %arg15: memref<2x1xf32, #tpu.memory_space<vmem>>, %arg16: memref<224x32xf32, #tpu.memory_space<vmem>>, %arg17: memref<200x64xf32, #tpu.memory_space<vmem>>, %arg18: memref<88x64xf32, #tpu.memory_space<vmem>>) attributes {dimension_semantics = [], scalar_prefetch = 0 : i64, scratch_operands = 3 : i64, tpu.core_type = #tpu.core_type<tc>} {
    %cst = arith.constant 0.000000e+00 : f32
    %0 = vector.broadcast %cst : f32 to vector<224x32xf32>
    %c0 = arith.constant 0 : index
    %c0_0 = arith.constant 0 : index
    %1 = vector.load %arg16[%c0, %c0_0] : memref<224x32xf32, #tpu.memory_space<vmem>>, vector<224x32xf32>
    tpu.vector_store %arg16[%c0, %c0_0], %0 {strides = array<i32>} : memref<224x32xf32, #tpu.memory_space<vmem>>, vector<224x32xf32>,
    %cst_1 = arith.constant 0.000000e+00 : f32
    %2 = vector.broadcast %cst_1 : f32 to vector<88x64xf32>
    %c0_2 = arith.constant 0 : index
    %c0_3 = arith.constant 0 : index
    %3 = vector.load %arg18[%c0_2, %c0_3] : memref<88x64xf32, #tpu.memory_space<vmem>>, vector<88x64xf32>
    tpu.vector_store %arg18[%c0_2, %c0_3], %2 {strides = array<i32>} : memref<88x64xf32, #tpu.memory_space<vmem>>, vector<88x64xf32>,
    %c0_4 = arith.constant 0 : index
    %c0_5 = arith.constant 0 : index
    %4 = vector.load %arg0[%c0_4, %c0_5] : memref<512x16xbf16, #tpu.memory_space<vmem>>, vector<512x16xbf16>
    %c0_6 = arith.constant 0 : index
    %c0_7 = arith.constant 0 : index
    %5 = vector.load %arg1[%c0_6, %c0_7] : memref<16x32xbf16, #tpu.memory_space<vmem>>, vector<16x32xbf16>
    %cst_8 = arith.constant dense<0.000000e+00> : vector<512x32xf32>
    %6 = tpu.matmul %4, %5, %cst_8 {dimension_numbers = #tpu.dot_dimension_numbers<[1], [0], [0], [1], [0, 0, 1, 1], [], []>} : vector<512x16xbf16>, vector<16x32xbf16>, vector<512x32xf32> -> vector<512x32xf32>
    %c0_9 = arith.constant 0 : index
    %c0_10 = arith.constant 0 : index
    %7 = vector.load %arg2[%c0_9, %c0_10] : memref<1x32xf32, #tpu.memory_space<vmem>>, vector<1x32xf32>
    %c0_11 = arith.constant 0 : index
    %c0_12 = arith.constant 0 : index
    %8 = vector.load %arg3[%c0_11, %c0_12] : memref<1x32xf32, #tpu.memory_space<vmem>>, vector<1x32xf32>
    %cst_13 = arith.constant dense<0.000000e+00> : vector<32xf32>
    %9 = vector.multi_reduction <add>, %6, %cst_13 [0] : vector<512x32xf32> to vector<32xf32>
    %10 = vector.shape_cast %9 : vector<32xf32> to vector<1x32xf32>
    %11 = arith.mulf %6, %6 : vector<512x32xf32>
    %cst_14 = arith.constant dense<0.000000e+00> : vector<32xf32>
    %12 = vector.multi_reduction <add>, %11, %cst_14 [0] : vector<512x32xf32> to vector<32xf32>
    %13 = vector.shape_cast %12 : vector<32xf32> to vector<1x32xf32>
    %cst_15 = arith.constant 0.001953125 : f32
    %14 = vector.broadcast %cst_15 : f32 to vector<1x32xf32>
    %15 = arith.mulf %10, %14 : vector<1x32xf32>
    %cst_16 = arith.constant 0.001953125 : f32
    %16 = vector.broadcast %cst_16 : f32 to vector<1x32xf32>
    %17 = arith.mulf %13, %16 : vector<1x32xf32>
    %18 = arith.mulf %15, %15 : vector<1x32xf32>
    %19 = arith.subf %17, %18 : vector<1x32xf32>
    %cst_17 = arith.constant 9.99999974E-6 : f32
    %20 = vector.broadcast %cst_17 : f32 to vector<1x32xf32>
    %21 = arith.addf %19, %20 : vector<1x32xf32>
    %22 = math.rsqrt %21 : vector<1x32xf32>
    %23 = arith.mulf %7, %22 : vector<1x32xf32>
    %24 = vector.broadcast %15 : vector<1x32xf32> to vector<512x32xf32>
    %25 = arith.subf %6, %24 : vector<512x32xf32>
    %26 = vector.broadcast %23 : vector<1x32xf32> to vector<512x32xf32>
    %27 = arith.mulf %25, %26 : vector<512x32xf32>
    %28 = vector.broadcast %8 : vector<1x32xf32> to vector<512x32xf32>
    %29 = arith.addf %27, %28 : vector<512x32xf32>
    %cst_18 = arith.constant 0.000000e+00 : f32
    %30 = vector.broadcast %cst_18 : f32 to vector<512x32xf32>
    %31 = arith.maximumf %29, %30 : vector<512x32xf32>
    %32 = vector.extract_strided_slice %31 {offsets = [0, 0], sizes = [128, 32], strides = [1, 1]} : vector<512x32xf32> to vector<128x32xf32>
    %33 = vector.extract_strided_slice %31 {offsets = [128, 0], sizes = [128, 32], strides = [1, 1]} : vector<512x32xf32> to vector<128x32xf32>
    %34 = arith.maximumf %32, %33 : vector<128x32xf32>
    %35 = vector.extract_strided_slice %31 {offsets = [256, 0], sizes = [128, 32], strides = [1, 1]} : vector<512x32xf32> to vector<128x32xf32>
    %36 = vector.extract_strided_slice %31 {offsets = [384, 0], sizes = [128, 32], strides = [1, 1]} : vector<512x32xf32> to vector<128x32xf32>
    %37 = arith.maximumf %35, %36 : vector<128x32xf32>
    %38 = arith.maximumf %34, %37 : vector<128x32xf32>
    %39 = vector.extract_strided_slice %38 {offsets = [0, 0], sizes = [8, 32], strides = [1, 1]} : vector<128x32xf32> to vector<8x32xf32>
    %c11 = arith.constant 11 : index
    %c0_19 = arith.constant 0 : index
    %40 = vector.load %arg16[%c11, %c0_19] : memref<224x32xf32, #tpu.memory_space<vmem>>, vector<8x32xf32>
    tpu.vector_store %arg16[%c11, %c0_19], %39 {strides = array<i32>} : memref<224x32xf32, #tpu.memory_space<vmem>>, vector<8x32xf32>,
    %41 = vector.extract_strided_slice %38 {offsets = [8, 0], sizes = [8, 32], strides = [1, 1]} : vector<128x32xf32> to vector<8x32xf32>
    %c21 = arith.constant 21 : index
    %c0_20 = arith.constant 0 : index
    %42 = vector.load %arg16[%c21, %c0_20] : memref<224x32xf32, #tpu.memory_space<vmem>>, vector<8x32xf32>
    tpu.vector_store %arg16[%c21, %c0_20], %41 {strides = array<i32>} : memref<224x32xf32, #tpu.memory_space<vmem>>, vector<8x32xf32>,
    %43 = vector.extract_strided_slice %38 {offsets = [16, 0], sizes = [8, 32], strides = [1, 1]} : vector<128x32xf32> to vector<8x32xf32>
    %c31 = arith.constant 31 : index
    %c0_21 = arith.constant 0 : index
    %44 = vector.load %arg16[%c31, %c0_21] : memref<224x32xf32, #tpu.memory_space<vmem>>, vector<8x32xf32>
    tpu.vector_store %arg16[%c31, %c0_21], %43 {strides = array<i32>} : memref<224x32xf32, #tpu.memory_space<vmem>>, vector<8x32xf32>,
    %45 = vector.extract_strided_slice %38 {offsets = [24, 0], sizes = [8, 32], strides = [1, 1]} : vector<128x32xf32> to vector<8x32xf32>
    %c41 = arith.constant 41 : index
    %c0_22 = arith.constant 0 : index
    %46 = vector.load %arg16[%c41, %c0_22] : memref<224x32xf32, #tpu.memory_space<vmem>>, vector<8x32xf32>
    tpu.vector_store %arg16[%c41, %c0_22], %45 {strides = array<i32>} : memref<224x32xf32, #tpu.memory_space<vmem>>, vector<8x32xf32>,
    %47 = vector.extract_strided_slice %38 {offsets = [32, 0], sizes = [8, 32], strides = [1, 1]} : vector<128x32xf32> to vector<8x32xf32>
    %c51 = arith.constant 51 : index
    %c0_23 = arith.constant 0 : index
    %48 = vector.load %arg16[%c51, %c0_23] : memref<224x32xf32, #tpu.memory_space<vmem>>, vector<8x32xf32>
    tpu.vector_store %arg16[%c51, %c0_23], %47 {strides = array<i32>} : memref<224x32xf32, #tpu.memory_space<vmem>>, vector<8x32xf32>,
    %49 = vector.extract_strided_slice %38 {offsets = [40, 0], sizes = [8, 32], strides = [1, 1]} : vector<128x32xf32> to vector<8x32xf32>
    %c61 = arith.constant 61 : index
    %c0_24 = arith.constant 0 : index
    %50 = vector.load %arg16[%c61, %c0_24] : memref<224x32xf32, #tpu.memory_space<vmem>>, vector<8x32xf32>
    tpu.vector_store %arg16[%c61, %c0_24], %49 {strides = array<i32>} : memref<224x32xf32, #tpu.memory_space<vmem>>, vector<8x32xf32>,
    %51 = vector.extract_strided_slice %38 {offsets = [48, 0], sizes = [8, 32], strides = [1, 1]} : vector<128x32xf32> to vector<8x32xf32>
    %c71 = arith.constant 71 : index
    %c0_25 = arith.constant 0 : index
    %52 = vector.load %arg16[%c71, %c0_25] : memref<224x32xf32, #tpu.memory_space<vmem>>, vector<8x32xf32>
    tpu.vector_store %arg16[%c71, %c0_25], %51 {strides = array<i32>} : memref<224x32xf32, #tpu.memory_space<vmem>>, vector<8x32xf32>,
    %53 = vector.extract_strided_slice %38 {offsets = [56, 0], sizes = [8, 32], strides = [1, 1]} : vector<128x32xf32> to vector<8x32xf32>
    %c81 = arith.constant 81 : index
    %c0_26 = arith.constant 0 : index
    %54 = vector.load %arg16[%c81, %c0_26] : memref<224x32xf32, #tpu.memory_space<vmem>>, vector<8x32xf32>
    tpu.vector_store %arg16[%c81, %c0_26], %53 {strides = array<i32>} : memref<224x32xf32, #tpu.memory_space<vmem>>, vector<8x32xf32>,
    %55 = vector.extract_strided_slice %38 {offsets = [64, 0], sizes = [8, 32], strides = [1, 1]} : vector<128x32xf32> to vector<8x32xf32>
    %c111 = arith.constant 111 : index
    %c0_27 = arith.constant 0 : index
    %56 = vector.load %arg16[%c111, %c0_27] : memref<224x32xf32, #tpu.memory_space<vmem>>, vector<8x32xf32>
    tpu.vector_store %arg16[%c111, %c0_27], %55 {strides = array<i32>} : memref<224x32xf32, #tpu.memory_space<vmem>>, vector<8x32xf32>,
    %57 = vector.extract_strided_slice %38 {offsets = [72, 0], sizes = [8, 32], strides = [1, 1]} : vector<128x32xf32> to vector<8x32xf32>
    %c121 = arith.constant 121 : index
    %c0_28 = arith.constant 0 : index
    %58 = vector.load %arg16[%c121, %c0_28] : memref<224x32xf32, #tpu.memory_space<vmem>>, vector<8x32xf32>
    tpu.vector_store %arg16[%c121, %c0_28], %57 {strides = array<i32>} : memref<224x32xf32, #tpu.memory_space<vmem>>, vector<8x32xf32>,
    %59 = vector.extract_strided_slice %38 {offsets = [80, 0], sizes = [8, 32], strides = [1, 1]} : vector<128x32xf32> to vector<8x32xf32>
    %c131 = arith.constant 131 : index
    %c0_29 = arith.constant 0 : index
    %60 = vector.load %arg16[%c131, %c0_29] : memref<224x32xf32, #tpu.memory_space<vmem>>, vector<8x32xf32>
    tpu.vector_store %arg16[%c131, %c0_29], %59 {strides = array<i32>} : memref<224x32xf32, #tpu.memory_space<vmem>>, vector<8x32xf32>,
    %61 = vector.extract_strided_slice %38 {offsets = [88, 0], sizes = [8, 32], strides = [1, 1]} : vector<128x32xf32> to vector<8x32xf32>
    %c141 = arith.constant 141 : index
    %c0_30 = arith.constant 0 : index
    %62 = vector.load %arg16[%c141, %c0_30] : memref<224x32xf32, #tpu.memory_space<vmem>>, vector<8x32xf32>
    tpu.vector_store %arg16[%c141, %c0_30], %61 {strides = array<i32>} : memref<224x32xf32, #tpu.memory_space<vmem>>, vector<8x32xf32>,
    %63 = vector.extract_strided_slice %38 {offsets = [96, 0], sizes = [8, 32], strides = [1, 1]} : vector<128x32xf32> to vector<8x32xf32>
    %c151 = arith.constant 151 : index
    %c0_31 = arith.constant 0 : index
    %64 = vector.load %arg16[%c151, %c0_31] : memref<224x32xf32, #tpu.memory_space<vmem>>, vector<8x32xf32>
    tpu.vector_store %arg16[%c151, %c0_31], %63 {strides = array<i32>} : memref<224x32xf32, #tpu.memory_space<vmem>>, vector<8x32xf32>,
    %65 = vector.extract_strided_slice %38 {offsets = [104, 0], sizes = [8, 32], strides = [1, 1]} : vector<128x32xf32> to vector<8x32xf32>
    %c161 = arith.constant 161 : index
    %c0_32 = arith.constant 0 : index
    %66 = vector.load %arg16[%c161, %c0_32] : memref<224x32xf32, #tpu.memory_space<vmem>>, vector<8x32xf32>
    tpu.vector_store %arg16[%c161, %c0_32], %65 {strides = array<i32>} : memref<224x32xf32, #tpu.memory_space<vmem>>, vector<8x32xf32>,
    %67 = vector.extract_strided_slice %38 {offsets = [112, 0], sizes = [8, 32], strides = [1, 1]} : vector<128x32xf32> to vector<8x32xf32>
    %c171 = arith.constant 171 : index
    %c0_33 = arith.constant 0 : index
    %68 = vector.load %arg16[%c171, %c0_33] : memref<224x32xf32, #tpu.memory_space<vmem>>, vector<8x32xf32>
    tpu.vector_store %arg16[%c171, %c0_33], %67 {strides = array<i32>} : memref<224x32xf32, #tpu.memory_space<vmem>>, vector<8x32xf32>,
    %69 = vector.extract_strided_slice %38 {offsets = [120, 0], sizes = [8, 32], strides = [1, 1]} : vector<128x32xf32> to vector<8x32xf32>
    %c181 = arith.constant 181 : index
    %c0_34 = arith.constant 0 : index
    %70 = vector.load %arg16[%c181, %c0_34] : memref<224x32xf32, #tpu.memory_space<vmem>>, vector<8x32xf32>
    tpu.vector_store %arg16[%c181, %c0_34], %69 {strides = array<i32>} : memref<224x32xf32, #tpu.memory_space<vmem>>, vector<8x32xf32>,
    %cst_35 = arith.constant 0.000000e+00 : f32
    %71 = vector.broadcast %cst_35 : f32 to vector<200x64xf32>
    %c0_36 = arith.constant 0 : index
    %c0_37 = arith.constant 0 : index
    %72 = vector.load %arg16[%c0_36, %c0_37] : memref<224x32xf32, #tpu.memory_space<vmem>>, vector<200x32xf32>
    %73 = arith.truncf %72 : vector<200x32xf32> to vector<200x32xbf16>
    %c0_38 = arith.constant 0 : index
    %c0_39 = arith.constant 0 : index
    %74 = vector.load %arg4[%c0_38, %c0_39] : memref<288x64xbf16, #tpu.memory_space<vmem>>, vector<32x64xbf16>
    %cst_40 = arith.constant dense<0.000000e+00> : vector<200x64xf32>
    %75 = tpu.matmul %73, %74, %cst_40 {dimension_numbers = #tpu.dot_dimension_numbers<[1], [0], [0], [1], [0, 0, 1, 1], [], []>} : vector<200x32xbf16>, vector<32x64xbf16>, vector<200x64xf32> -> vector<200x64xf32>
    %76 = arith.addf %71, %75 : vector<200x64xf32>
    %c1 = arith.constant 1 : index
    %c0_41 = arith.constant 0 : index
    %77 = vector.load %arg16[%c1, %c0_41] : memref<224x32xf32, #tpu.memory_space<vmem>>, vector<200x32xf32>
    %78 = arith.truncf %77 : vector<200x32xf32> to vector<200x32xbf16>
    %c32 = arith.constant 32 : index
    %c0_42 = arith.constant 0 : index
    %79 = vector.load %arg4[%c32, %c0_42] : memref<288x64xbf16, #tpu.memory_space<vmem>>, vector<32x64xbf16>
    %cst_43 = arith.constant dense<0.000000e+00> : vector<200x64xf32>
    %80 = tpu.matmul %78, %79, %cst_43 {dimension_numbers = #tpu.dot_dimension_numbers<[1], [0], [0], [1], [0, 0, 1, 1], [], []>} : vector<200x32xbf16>, vector<32x64xbf16>, vector<200x64xf32> -> vector<200x64xf32>
    %81 = arith.addf %76, %80 : vector<200x64xf32>
    %c2 = arith.constant 2 : index
    %c0_44 = arith.constant 0 : index
    %82 = vector.load %arg16[%c2, %c0_44] : memref<224x32xf32, #tpu.memory_space<vmem>>, vector<200x32xf32>
    %83 = arith.truncf %82 : vector<200x32xf32> to vector<200x32xbf16>
    %c64 = arith.constant 64 : index
    %c0_45 = arith.constant 0 : index
    %84 = vector.load %arg4[%c64, %c0_45] : memref<288x64xbf16, #tpu.memory_space<vmem>>, vector<32x64xbf16>
    %cst_46 = arith.constant dense<0.000000e+00> : vector<200x64xf32>
    %85 = tpu.matmul %83, %84, %cst_46 {dimension_numbers = #tpu.dot_dimension_numbers<[1], [0], [0], [1], [0, 0, 1, 1], [], []>} : vector<200x32xbf16>, vector<32x64xbf16>, vector<200x64xf32> -> vector<200x64xf32>
    %86 = arith.addf %81, %85 : vector<200x64xf32>
    %c10 = arith.constant 10 : index
    %c0_47 = arith.constant 0 : index
    %87 = vector.load %arg16[%c10, %c0_47] : memref<224x32xf32, #tpu.memory_space<vmem>>, vector<200x32xf32>
    %88 = arith.truncf %87 : vector<200x32xf32> to vector<200x32xbf16>
    %c96 = arith.constant 96 : index
    %c0_48 = arith.constant 0 : index
    %89 = vector.load %arg4[%c96, %c0_48] : memref<288x64xbf16, #tpu.memory_space<vmem>>, vector<32x64xbf16>
    %cst_49 = arith.constant dense<0.000000e+00> : vector<200x64xf32>
    %90 = tpu.matmul %88, %89, %cst_49 {dimension_numbers = #tpu.dot_dimension_numbers<[1], [0], [0], [1], [0, 0, 1, 1], [], []>} : vector<200x32xbf16>, vector<32x64xbf16>, vector<200x64xf32> -> vector<200x64xf32>
    %91 = arith.addf %86, %90 : vector<200x64xf32>
    %c11_50 = arith.constant 11 : index
    %c0_51 = arith.constant 0 : index
    %92 = vector.load %arg16[%c11_50, %c0_51] : memref<224x32xf32, #tpu.memory_space<vmem>>, vector<200x32xf32>
    %93 = arith.truncf %92 : vector<200x32xf32> to vector<200x32xbf16>
    %c128 = arith.constant 128 : index
    %c0_52 = arith.constant 0 : index
    %94 = vector.load %arg4[%c128, %c0_52] : memref<288x64xbf16, #tpu.memory_space<vmem>>, vector<32x64xbf16>
    %cst_53 = arith.constant dense<0.000000e+00> : vector<200x64xf32>
    %95 = tpu.matmul %93, %94, %cst_53 {dimension_numbers = #tpu.dot_dimension_numbers<[1], [0], [0], [1], [0, 0, 1, 1], [], []>} : vector<200x32xbf16>, vector<32x64xbf16>, vector<200x64xf32> -> vector<200x64xf32>
    %96 = arith.addf %91, %95 : vector<200x64xf32>
    %c12 = arith.constant 12 : index
    %c0_54 = arith.constant 0 : index
    %97 = vector.load %arg16[%c12, %c0_54] : memref<224x32xf32, #tpu.memory_space<vmem>>, vector<200x32xf32>
    %98 = arith.truncf %97 : vector<200x32xf32> to vector<200x32xbf16>
    %c160 = arith.constant 160 : index
    %c0_55 = arith.constant 0 : index
    %99 = vector.load %arg4[%c160, %c0_55] : memref<288x64xbf16, #tpu.memory_space<vmem>>, vector<32x64xbf16>
    %cst_56 = arith.constant dense<0.000000e+00> : vector<200x64xf32>
    %100 = tpu.matmul %98, %99, %cst_56 {dimension_numbers = #tpu.dot_dimension_numbers<[1], [0], [0], [1], [0, 0, 1, 1], [], []>} : vector<200x32xbf16>, vector<32x64xbf16>, vector<200x64xf32> -> vector<200x64xf32>
    %101 = arith.addf %96, %100 : vector<200x64xf32>
    %c20 = arith.constant 20 : index
    %c0_57 = arith.constant 0 : index
    %102 = vector.load %arg16[%c20, %c0_57] : memref<224x32xf32, #tpu.memory_space<vmem>>, vector<200x32xf32>
    %103 = arith.truncf %102 : vector<200x32xf32> to vector<200x32xbf16>
    %c192 = arith.constant 192 : index
    %c0_58 = arith.constant 0 : index
    %104 = vector.load %arg4[%c192, %c0_58] : memref<288x64xbf16, #tpu.memory_space<vmem>>, vector<32x64xbf16>
    %cst_59 = arith.constant dense<0.000000e+00> : vector<200x64xf32>
    %105 = tpu.matmul %103, %104, %cst_59 {dimension_numbers = #tpu.dot_dimension_numbers<[1], [0], [0], [1], [0, 0, 1, 1], [], []>} : vector<200x32xbf16>, vector<32x64xbf16>, vector<200x64xf32> -> vector<200x64xf32>
    %106 = arith.addf %101, %105 : vector<200x64xf32>
    %c21_60 = arith.constant 21 : index
    %c0_61 = arith.constant 0 : index
    %107 = vector.load %arg16[%c21_60, %c0_61] : memref<224x32xf32, #tpu.memory_space<vmem>>, vector<200x32xf32>
    %108 = arith.truncf %107 : vector<200x32xf32> to vector<200x32xbf16>
    %c224 = arith.constant 224 : index
    %c0_62 = arith.constant 0 : index
    %109 = vector.load %arg4[%c224, %c0_62] : memref<288x64xbf16, #tpu.memory_space<vmem>>, vector<32x64xbf16>
    %cst_63 = arith.constant dense<0.000000e+00> : vector<200x64xf32>
    %110 = tpu.matmul %108, %109, %cst_63 {dimension_numbers = #tpu.dot_dimension_numbers<[1], [0], [0], [1], [0, 0, 1, 1], [], []>} : vector<200x32xbf16>, vector<32x64xbf16>, vector<200x64xf32> -> vector<200x64xf32>
    %111 = arith.addf %106, %110 : vector<200x64xf32>
    %c22 = arith.constant 22 : index
    %c0_64 = arith.constant 0 : index
    %112 = vector.load %arg16[%c22, %c0_64] : memref<224x32xf32, #tpu.memory_space<vmem>>, vector<200x32xf32>
    %113 = arith.truncf %112 : vector<200x32xf32> to vector<200x32xbf16>
    %c256 = arith.constant 256 : index
    %c0_65 = arith.constant 0 : index
    %114 = vector.load %arg4[%c256, %c0_65] : memref<288x64xbf16, #tpu.memory_space<vmem>>, vector<32x64xbf16>
    %cst_66 = arith.constant dense<0.000000e+00> : vector<200x64xf32>
    %115 = tpu.matmul %113, %114, %cst_66 {dimension_numbers = #tpu.dot_dimension_numbers<[1], [0], [0], [1], [0, 0, 1, 1], [], []>} : vector<200x32xbf16>, vector<32x64xbf16>, vector<200x64xf32> -> vector<200x64xf32>
    %116 = arith.addf %111, %115 : vector<200x64xf32>
    %c0_67 = arith.constant 0 : index
    %c0_68 = arith.constant 0 : index
    %117 = vector.load %arg5[%c0_67, %c0_68] : memref<1x64xf32, #tpu.memory_space<vmem>>, vector<1x64xf32>
    %c0_69 = arith.constant 0 : index
    %c0_70 = arith.constant 0 : index
    %118 = vector.load %arg6[%c0_69, %c0_70] : memref<1x64xf32, #tpu.memory_space<vmem>>, vector<1x64xf32>
    %c0_71 = arith.constant 0 : index
    %c0_72 = arith.constant 0 : index
    %119 = vector.load %arg12[%c0_71, %c0_72] : memref<200x1xf32, #tpu.memory_space<vmem>>, vector<200x1xf32>
    %120 = vector.broadcast %119 : vector<200x1xf32> to vector<200x64xf32>
    %121 = arith.mulf %116, %120 : vector<200x64xf32>
    %cst_73 = arith.constant dense<0.000000e+00> : vector<64xf32>
    %122 = vector.multi_reduction <add>, %121, %cst_73 [0] : vector<200x64xf32> to vector<64xf32>
    %123 = vector.shape_cast %122 : vector<64xf32> to vector<1x64xf32>
    %124 = arith.mulf %121, %121 : vector<200x64xf32>
    %cst_74 = arith.constant dense<0.000000e+00> : vector<64xf32>
    %125 = vector.multi_reduction <add>, %124, %cst_74 [0] : vector<200x64xf32> to vector<64xf32>
    %126 = vector.shape_cast %125 : vector<64xf32> to vector<1x64xf32>
    %cst_75 = arith.constant 7.812500e-03 : f32
    %127 = vector.broadcast %cst_75 : f32 to vector<1x64xf32>
    %128 = arith.mulf %123, %127 : vector<1x64xf32>
    %cst_76 = arith.constant 7.812500e-03 : f32
    %129 = vector.broadcast %cst_76 : f32 to vector<1x64xf32>
    %130 = arith.mulf %126, %129 : vector<1x64xf32>
    %131 = arith.mulf %128, %128 : vector<1x64xf32>
    %132 = arith.subf %130, %131 : vector<1x64xf32>
    %cst_77 = arith.constant 9.99999974E-6 : f32
    %133 = vector.broadcast %cst_77 : f32 to vector<1x64xf32>
    %134 = arith.addf %132, %133 : vector<1x64xf32>
    %135 = math.rsqrt %134 : vector<1x64xf32>
    %136 = arith.mulf %117, %135 : vector<1x64xf32>
    %137 = vector.broadcast %128 : vector<1x64xf32> to vector<200x64xf32>
    %138 = arith.subf %116, %137 : vector<200x64xf32>
    %139 = vector.broadcast %136 : vector<1x64xf32> to vector<200x64xf32>
    %140 = arith.mulf %138, %139 : vector<200x64xf32>
    %141 = vector.broadcast %118 : vector<1x64xf32> to vector<200x64xf32>
    %142 = arith.addf %140, %141 : vector<200x64xf32>
    %cst_78 = arith.constant 0.000000e+00 : f32
    %143 = vector.broadcast %cst_78 : f32 to vector<200x64xf32>
    %144 = arith.maximumf %142, %143 : vector<200x64xf32>
    %c0_79 = arith.constant 0 : index
    %c0_80 = arith.constant 0 : index
    %145 = vector.load %arg17[%c0_79, %c0_80] : memref<200x64xf32, #tpu.memory_space<vmem>>, vector<200x64xf32>
    tpu.vector_store %arg17[%c0_79, %c0_80], %144 {strides = array<i32>} : memref<200x64xf32, #tpu.memory_space<vmem>>, vector<200x64xf32>,
    %c0_81 = arith.constant 0 : index
    %c0_82 = arith.constant 0 : index
    %146 = vector.load %arg17[%c0_81, %c0_82] : memref<200x64xf32, #tpu.memory_space<vmem>>, vector<2x64xf32>
    %c10_83 = arith.constant 10 : index
    %c0_84 = arith.constant 0 : index
    %147 = vector.load %arg17[%c10_83, %c0_84] : memref<200x64xf32, #tpu.memory_space<vmem>>, vector<2x64xf32>
    %148 = arith.maximumf %146, %147 : vector<2x64xf32>
    %149 = vector.extract_strided_slice %148 {offsets = [0, 0], sizes = [1, 64], strides = [1, 1]} : vector<2x64xf32> to vector<1x64xf32>
    %150 = vector.extract_strided_slice %148 {offsets = [1, 0], sizes = [1, 64], strides = [1, 1]} : vector<2x64xf32> to vector<1x64xf32>
    %151 = arith.maximumf %149, %150 : vector<1x64xf32>
    %c7 = arith.constant 7 : index
    %c0_85 = arith.constant 0 : index
    %152 = vector.load %arg18[%c7, %c0_85] : memref<88x64xf32, #tpu.memory_space<vmem>>, vector<1x64xf32>
    tpu.vector_store %arg18[%c7, %c0_85], %151 {strides = array<i32>} : memref<88x64xf32, #tpu.memory_space<vmem>>, vector<1x64xf32>,
    %c2_86 = arith.constant 2 : index
    %c0_87 = arith.constant 0 : index
    %153 = vector.load %arg17[%c2_86, %c0_87] : memref<200x64xf32, #tpu.memory_space<vmem>>, vector<2x64xf32>
    %c12_88 = arith.constant 12 : index
    %c0_89 = arith.constant 0 : index
    %154 = vector.load %arg17[%c12_88, %c0_89] : memref<200x64xf32, #tpu.memory_space<vmem>>, vector<2x64xf32>
    %155 = arith.maximumf %153, %154 : vector<2x64xf32>
    %156 = vector.extract_strided_slice %155 {offsets = [0, 0], sizes = [1, 64], strides = [1, 1]} : vector<2x64xf32> to vector<1x64xf32>
    %157 = vector.extract_strided_slice %155 {offsets = [1, 0], sizes = [1, 64], strides = [1, 1]} : vector<2x64xf32> to vector<1x64xf32>
    %158 = arith.maximumf %156, %157 : vector<1x64xf32>
    %c8 = arith.constant 8 : index
    %c0_90 = arith.constant 0 : index
    %159 = vector.load %arg18[%c8, %c0_90] : memref<88x64xf32, #tpu.memory_space<vmem>>, vector<1x64xf32>
    tpu.vector_store %arg18[%c8, %c0_90], %158 {strides = array<i32>} : memref<88x64xf32, #tpu.memory_space<vmem>>, vector<1x64xf32>,
    %c4 = arith.constant 4 : index
    %c0_91 = arith.constant 0 : index
    %160 = vector.load %arg17[%c4, %c0_91] : memref<200x64xf32, #tpu.memory_space<vmem>>, vector<2x64xf32>
    %c14 = arith.constant 14 : index
    %c0_92 = arith.constant 0 : index
    %161 = vector.load %arg17[%c14, %c0_92] : memref<200x64xf32, #tpu.memory_space<vmem>>, vector<2x64xf32>
    %162 = arith.maximumf %160, %161 : vector<2x64xf32>
    %163 = vector.extract_strided_slice %162 {offsets = [0, 0], sizes = [1, 64], strides = [1, 1]} : vector<2x64xf32> to vector<1x64xf32>
    %164 = vector.extract_strided_slice %162 {offsets = [1, 0], sizes = [1, 64], strides = [1, 1]} : vector<2x64xf32> to vector<1x64xf32>
    %165 = arith.maximumf %163, %164 : vector<1x64xf32>
    %c9 = arith.constant 9 : index
    %c0_93 = arith.constant 0 : index
    %166 = vector.load %arg18[%c9, %c0_93] : memref<88x64xf32, #tpu.memory_space<vmem>>, vector<1x64xf32>
    tpu.vector_store %arg18[%c9, %c0_93], %165 {strides = array<i32>} : memref<88x64xf32, #tpu.memory_space<vmem>>, vector<1x64xf32>,
    %c6 = arith.constant 6 : index
    %c0_94 = arith.constant 0 : index
    %167 = vector.load %arg17[%c6, %c0_94] : memref<200x64xf32, #tpu.memory_space<vmem>>, vector<2x64xf32>
    %c16 = arith.constant 16 : index
    %c0_95 = arith.constant 0 : index
    %168 = vector.load %arg17[%c16, %c0_95] : memref<200x64xf32, #tpu.memory_space<vmem>>, vector<2x64xf32>
    %169 = arith.maximumf %167, %168 : vector<2x64xf32>
    %170 = vector.extract_strided_slice %169 {offsets = [0, 0], sizes = [1, 64], strides = [1, 1]} : vector<2x64xf32> to vector<1x64xf32>
    %171 = vector.extract_strided_slice %169 {offsets = [1, 0], sizes = [1, 64], strides = [1, 1]} : vector<2x64xf32> to vector<1x64xf32>
    %172 = arith.maximumf %170, %171 : vector<1x64xf32>
    %c10_96 = arith.constant 10 : index
    %c0_97 = arith.constant 0 : index
    %173 = vector.load %arg18[%c10_96, %c0_97] : memref<88x64xf32, #tpu.memory_space<vmem>>, vector<1x64xf32>
    tpu.vector_store %arg18[%c10_96, %c0_97], %172 {strides = array<i32>} : memref<88x64xf32, #tpu.memory_space<vmem>>, vector<1x64xf32>,
    %c20_98 = arith.constant 20 : index
    %c0_99 = arith.constant 0 : index
    %174 = vector.load %arg17[%c20_98, %c0_99] : memref<200x64xf32, #tpu.memory_space<vmem>>, vector<2x64xf32>
    %c30 = arith.constant 30 : index
    %c0_100 = arith.constant 0 : index
    %175 = vector.load %arg17[%c30, %c0_100] : memref<200x64xf32, #tpu.memory_space<vmem>>, vector<2x64xf32>
    %176 = arith.maximumf %174, %175 : vector<2x64xf32>
    %177 = vector.extract_strided_slice %176 {offsets = [0, 0], sizes = [1, 64], strides = [1, 1]} : vector<2x64xf32> to vector<1x64xf32>
    %178 = vector.extract_strided_slice %176 {offsets = [1, 0], sizes = [1, 64], strides = [1, 1]} : vector<2x64xf32> to vector<1x64xf32>
    %179 = arith.maximumf %177, %178 : vector<1x64xf32>
    %c13 = arith.constant 13 : index
    %c0_101 = arith.constant 0 : index
    %180 = vector.load %arg18[%c13, %c0_101] : memref<88x64xf32, #tpu.memory_space<vmem>>, vector<1x64xf32>
    tpu.vector_store %arg18[%c13, %c0_101], %179 {strides = array<i32>} : memref<88x64xf32, #tpu.memory_space<vmem>>, vector<1x64xf32>,
    %c22_102 = arith.constant 22 : index
    %c0_103 = arith.constant 0 : index
    %181 = vector.load %arg17[%c22_102, %c0_103] : memref<200x64xf32, #tpu.memory_space<vmem>>, vector<2x64xf32>
    %c32_104 = arith.constant 32 : index
    %c0_105 = arith.constant 0 : index
    %182 = vector.load %arg17[%c32_104, %c0_105] : memref<200x64xf32, #tpu.memory_space<vmem>>, vector<2x64xf32>
    %183 = arith.maximumf %181, %182 : vector<2x64xf32>
    %184 = vector.extract_strided_slice %183 {offsets = [0, 0], sizes = [1, 64], strides = [1, 1]} : vector<2x64xf32> to vector<1x64xf32>
    %185 = vector.extract_strided_slice %183 {offsets = [1, 0], sizes = [1, 64], strides = [1, 1]} : vector<2x64xf32> to vector<1x64xf32>
    %186 = arith.maximumf %184, %185 : vector<1x64xf32>
    %c14_106 = arith.constant 14 : index
    %c0_107 = arith.constant 0 : index
    %187 = vector.load %arg18[%c14_106, %c0_107] : memref<88x64xf32, #tpu.memory_space<vmem>>, vector<1x64xf32>
    tpu.vector_store %arg18[%c14_106, %c0_107], %186 {strides = array<i32>} : memref<88x64xf32, #tpu.memory_space<vmem>>, vector<1x64xf32>,
    %c24 = arith.constant 24 : index
    %c0_108 = arith.constant 0 : index
    %188 = vector.load %arg17[%c24, %c0_108] : memref<200x64xf32, #tpu.memory_space<vmem>>, vector<2x64xf32>
    %c34 = arith.constant 34 : index
    %c0_109 = arith.constant 0 : index
    %189 = vector.load %arg17[%c34, %c0_109] : memref<200x64xf32, #tpu.memory_space<vmem>>, vector<2x64xf32>
    %190 = arith.maximumf %188, %189 : vector<2x64xf32>
    %191 = vector.extract_strided_slice %190 {offsets = [0, 0], sizes = [1, 64], strides = [1, 1]} : vector<2x64xf32> to vector<1x64xf32>
    %192 = vector.extract_strided_slice %190 {offsets = [1, 0], sizes = [1, 64], strides = [1, 1]} : vector<2x64xf32> to vector<1x64xf32>
    %193 = arith.maximumf %191, %192 : vector<1x64xf32>
    %c15 = arith.constant 15 : index
    %c0_110 = arith.constant 0 : index
    %194 = vector.load %arg18[%c15, %c0_110] : memref<88x64xf32, #tpu.memory_space<vmem>>, vector<1x64xf32>
    tpu.vector_store %arg18[%c15, %c0_110], %193 {strides = array<i32>} : memref<88x64xf32, #tpu.memory_space<vmem>>, vector<1x64xf32>,
    %c26 = arith.constant 26 : index
    %c0_111 = arith.constant 0 : index
    %195 = vector.load %arg17[%c26, %c0_111] : memref<200x64xf32, #tpu.memory_space<vmem>>, vector<2x64xf32>
    %c36 = arith.constant 36 : index
    %c0_112 = arith.constant 0 : index
    %196 = vector.load %arg17[%c36, %c0_112] : memref<200x64xf32, #tpu.memory_space<vmem>>, vector<2x64xf32>
    %197 = arith.maximumf %195, %196 : vector<2x64xf32>
    %198 = vector.extract_strided_slice %197 {offsets = [0, 0], sizes = [1, 64], strides = [1, 1]} : vector<2x64xf32> to vector<1x64xf32>
    %199 = vector.extract_strided_slice %197 {offsets = [1, 0], sizes = [1, 64], strides = [1, 1]} : vector<2x64xf32> to vector<1x64xf32>
    %200 = arith.maximumf %198, %199 : vector<1x64xf32>
    %c16_113 = arith.constant 16 : index
    %c0_114 = arith.constant 0 : index
    %201 = vector.load %arg18[%c16_113, %c0_114] : memref<88x64xf32, #tpu.memory_space<vmem>>, vector<1x64xf32>
    tpu.vector_store %arg18[%c16_113, %c0_114], %200 {strides = array<i32>} : memref<88x64xf32, #tpu.memory_space<vmem>>, vector<1x64xf32>,
    %c40 = arith.constant 40 : index
    %c0_115 = arith.constant 0 : index
    %202 = vector.load %arg17[%c40, %c0_115] : memref<200x64xf32, #tpu.memory_space<vmem>>, vector<2x64xf32>
    %c50 = arith.constant 50 : index
    %c0_116 = arith.constant 0 : index
    %203 = vector.load %arg17[%c50, %c0_116] : memref<200x64xf32, #tpu.memory_space<vmem>>, vector<2x64xf32>
    %204 = arith.maximumf %202, %203 : vector<2x64xf32>
    %205 = vector.extract_strided_slice %204 {offsets = [0, 0], sizes = [1, 64], strides = [1, 1]} : vector<2x64xf32> to vector<1x64xf32>
    %206 = vector.extract_strided_slice %204 {offsets = [1, 0], sizes = [1, 64], strides = [1, 1]} : vector<2x64xf32> to vector<1x64xf32>
    %207 = arith.maximumf %205, %206 : vector<1x64xf32>
    %c19 = arith.constant 19 : index
    %c0_117 = arith.constant 0 : index
    %208 = vector.load %arg18[%c19, %c0_117] : memref<88x64xf32, #tpu.memory_space<vmem>>, vector<1x64xf32>
    tpu.vector_store %arg18[%c19, %c0_117], %207 {strides = array<i32>} : memref<88x64xf32, #tpu.memory_space<vmem>>, vector<1x64xf32>,
    %c42 = arith.constant 42 : index
    %c0_118 = arith.constant 0 : index
    %209 = vector.load %arg17[%c42, %c0_118] : memref<200x64xf32, #tpu.memory_space<vmem>>, vector<2x64xf32>
    %c52 = arith.constant 52 : index
    %c0_119 = arith.constant 0 : index
    %210 = vector.load %arg17[%c52, %c0_119] : memref<200x64xf32, #tpu.memory_space<vmem>>, vector<2x64xf32>
    %211 = arith.maximumf %209, %210 : vector<2x64xf32>
    %212 = vector.extract_strided_slice %211 {offsets = [0, 0], sizes = [1, 64], strides = [1, 1]} : vector<2x64xf32> to vector<1x64xf32>
    %213 = vector.extract_strided_slice %211 {offsets = [1, 0], sizes = [1, 64], strides = [1, 1]} : vector<2x64xf32> to vector<1x64xf32>
    %214 = arith.maximumf %212, %213 : vector<1x64xf32>
    %c20_120 = arith.constant 20 : index
    %c0_121 = arith.constant 0 : index
    %215 = vector.load %arg18[%c20_120, %c0_121] : memref<88x64xf32, #tpu.memory_space<vmem>>, vector<1x64xf32>
    tpu.vector_store %arg18[%c20_120, %c0_121], %214 {strides = array<i32>} : memref<88x64xf32, #tpu.memory_space<vmem>>, vector<1x64xf32>,
    %c44 = arith.constant 44 : index
    %c0_122 = arith.constant 0 : index
    %216 = vector.load %arg17[%c44, %c0_122] : memref<200x64xf32, #tpu.memory_space<vmem>>, vector<2x64xf32>
    %c54 = arith.constant 54 : index
    %c0_123 = arith.constant 0 : index
    %217 = vector.load %arg17[%c54, %c0_123] : memref<200x64xf32, #tpu.memory_space<vmem>>, vector<2x64xf32>
    %218 = arith.maximumf %216, %217 : vector<2x64xf32>
    %219 = vector.extract_strided_slice %218 {offsets = [0, 0], sizes = [1, 64], strides = [1, 1]} : vector<2x64xf32> to vector<1x64xf32>
    %220 = vector.extract_strided_slice %218 {offsets = [1, 0], sizes = [1, 64], strides = [1, 1]} : vector<2x64xf32> to vector<1x64xf32>
    %221 = arith.maximumf %219, %220 : vector<1x64xf32>
    %c21_124 = arith.constant 21 : index
    %c0_125 = arith.constant 0 : index
    %222 = vector.load %arg18[%c21_124, %c0_125] : memref<88x64xf32, #tpu.memory_space<vmem>>, vector<1x64xf32>
    tpu.vector_store %arg18[%c21_124, %c0_125], %221 {strides = array<i32>} : memref<88x64xf32, #tpu.memory_space<vmem>>, vector<1x64xf32>,
    %c46 = arith.constant 46 : index
    %c0_126 = arith.constant 0 : index
    %223 = vector.load %arg17[%c46, %c0_126] : memref<200x64xf32, #tpu.memory_space<vmem>>, vector<2x64xf32>
    %c56 = arith.constant 56 : index
    %c0_127 = arith.constant 0 : index
    %224 = vector.load %arg17[%c56, %c0_127] : memref<200x64xf32, #tpu.memory_space<vmem>>, vector<2x64xf32>
    %225 = arith.maximumf %223, %224 : vector<2x64xf32>
    %226 = vector.extract_strided_slice %225 {offsets = [0, 0], sizes = [1, 64], strides = [1, 1]} : vector<2x64xf32> to vector<1x64xf32>
    %227 = vector.extract_strided_slice %225 {offsets = [1, 0], sizes = [1, 64], strides = [1, 1]} : vector<2x64xf32> to vector<1x64xf32>
    %228 = arith.maximumf %226, %227 : vector<1x64xf32>
    %c22_128 = arith.constant 22 : index
    %c0_129 = arith.constant 0 : index
    %229 = vector.load %arg18[%c22_128, %c0_129] : memref<88x64xf32, #tpu.memory_space<vmem>>, vector<1x64xf32>
    tpu.vector_store %arg18[%c22_128, %c0_129], %228 {strides = array<i32>} : memref<88x64xf32, #tpu.memory_space<vmem>>, vector<1x64xf32>,
    %c60 = arith.constant 60 : index
    %c0_130 = arith.constant 0 : index
    %230 = vector.load %arg17[%c60, %c0_130] : memref<200x64xf32, #tpu.memory_space<vmem>>, vector<2x64xf32>
    %c70 = arith.constant 70 : index
    %c0_131 = arith.constant 0 : index
    %231 = vector.load %arg17[%c70, %c0_131] : memref<200x64xf32, #tpu.memory_space<vmem>>, vector<2x64xf32>
    %232 = arith.maximumf %230, %231 : vector<2x64xf32>
    %233 = vector.extract_strided_slice %232 {offsets = [0, 0], sizes = [1, 64], strides = [1, 1]} : vector<2x64xf32> to vector<1x64xf32>
    %234 = vector.extract_strided_slice %232 {offsets = [1, 0], sizes = [1, 64], strides = [1, 1]} : vector<2x64xf32> to vector<1x64xf32>
    %235 = arith.maximumf %233, %234 : vector<1x64xf32>
    %c25 = arith.constant 25 : index
    %c0_132 = arith.constant 0 : index
    %236 = vector.load %arg18[%c25, %c0_132] : memref<88x64xf32, #tpu.memory_space<vmem>>, vector<1x64xf32>
    tpu.vector_store %arg18[%c25, %c0_132], %235 {strides = array<i32>} : memref<88x64xf32, #tpu.memory_space<vmem>>, vector<1x64xf32>,
    %c62 = arith.constant 62 : index
    %c0_133 = arith.constant 0 : index
    %237 = vector.load %arg17[%c62, %c0_133] : memref<200x64xf32, #tpu.memory_space<vmem>>, vector<2x64xf32>
    %c72 = arith.constant 72 : index
    %c0_134 = arith.constant 0 : index
    %238 = vector.load %arg17[%c72, %c0_134] : memref<200x64xf32, #tpu.memory_space<vmem>>, vector<2x64xf32>
    %239 = arith.maximumf %237, %238 : vector<2x64xf32>
    %240 = vector.extract_strided_slice %239 {offsets = [0, 0], sizes = [1, 64], strides = [1, 1]} : vector<2x64xf32> to vector<1x64xf32>
    %241 = vector.extract_strided_slice %239 {offsets = [1, 0], sizes = [1, 64], strides = [1, 1]} : vector<2x64xf32> to vector<1x64xf32>
    %242 = arith.maximumf %240, %241 : vector<1x64xf32>
    %c26_135 = arith.constant 26 : index
    %c0_136 = arith.constant 0 : index
    %243 = vector.load %arg18[%c26_135, %c0_136] : memref<88x64xf32, #tpu.memory_space<vmem>>, vector<1x64xf32>
    tpu.vector_store %arg18[%c26_135, %c0_136], %242 {strides = array<i32>} : memref<88x64xf32, #tpu.memory_space<vmem>>, vector<1x64xf32>,
    %c64_137 = arith.constant 64 : index
    %c0_138 = arith.constant 0 : index
    %244 = vector.load %arg17[%c64_137, %c0_138] : memref<200x64xf32, #tpu.memory_space<vmem>>, vector<2x64xf32>
    %c74 = arith.constant 74 : index
    %c0_139 = arith.constant 0 : index
    %245 = vector.load %arg17[%c74, %c0_139] : memref<200x64xf32, #tpu.memory_space<vmem>>, vector<2x64xf32>
    %246 = arith.maximumf %244, %245 : vector<2x64xf32>
    %247 = vector.extract_strided_slice %246 {offsets = [0, 0], sizes = [1, 64], strides = [1, 1]} : vector<2x64xf32> to vector<1x64xf32>
    %248 = vector.extract_strided_slice %246 {offsets = [1, 0], sizes = [1, 64], strides = [1, 1]} : vector<2x64xf32> to vector<1x64xf32>
    %249 = arith.maximumf %247, %248 : vector<1x64xf32>
    %c27 = arith.constant 27 : index
    %c0_140 = arith.constant 0 : index
    %250 = vector.load %arg18[%c27, %c0_140] : memref<88x64xf32, #tpu.memory_space<vmem>>, vector<1x64xf32>
    tpu.vector_store %arg18[%c27, %c0_140], %249 {strides = array<i32>} : memref<88x64xf32, #tpu.memory_space<vmem>>, vector<1x64xf32>,
    %c66 = arith.constant 66 : index
    %c0_141 = arith.constant 0 : index
    %251 = vector.load %arg17[%c66, %c0_141] : memref<200x64xf32, #tpu.memory_space<vmem>>, vector<2x64xf32>
    %c76 = arith.constant 76 : index
    %c0_142 = arith.constant 0 : index
    %252 = vector.load %arg17[%c76, %c0_142] : memref<200x64xf32, #tpu.memory_space<vmem>>, vector<2x64xf32>
    %253 = arith.maximumf %251, %252 : vector<2x64xf32>
    %254 = vector.extract_strided_slice %253 {offsets = [0, 0], sizes = [1, 64], strides = [1, 1]} : vector<2x64xf32> to vector<1x64xf32>
    %255 = vector.extract_strided_slice %253 {offsets = [1, 0], sizes = [1, 64], strides = [1, 1]} : vector<2x64xf32> to vector<1x64xf32>
    %256 = arith.maximumf %254, %255 : vector<1x64xf32>
    %c28 = arith.constant 28 : index
    %c0_143 = arith.constant 0 : index
    %257 = vector.load %arg18[%c28, %c0_143] : memref<88x64xf32, #tpu.memory_space<vmem>>, vector<1x64xf32>
    tpu.vector_store %arg18[%c28, %c0_143], %256 {strides = array<i32>} : memref<88x64xf32, #tpu.memory_space<vmem>>, vector<1x64xf32>,
    %c100 = arith.constant 100 : index
    %c0_144 = arith.constant 0 : index
    %258 = vector.load %arg17[%c100, %c0_144] : memref<200x64xf32, #tpu.memory_space<vmem>>, vector<2x64xf32>
    %c110 = arith.constant 110 : index
    %c0_145 = arith.constant 0 : index
    %259 = vector.load %arg17[%c110, %c0_145] : memref<200x64xf32, #tpu.memory_space<vmem>>, vector<2x64xf32>
    %260 = arith.maximumf %258, %259 : vector<2x64xf32>
    %261 = vector.extract_strided_slice %260 {offsets = [0, 0], sizes = [1, 64], strides = [1, 1]} : vector<2x64xf32> to vector<1x64xf32>
    %262 = vector.extract_strided_slice %260 {offsets = [1, 0], sizes = [1, 64], strides = [1, 1]} : vector<2x64xf32> to vector<1x64xf32>
    %263 = arith.maximumf %261, %262 : vector<1x64xf32>
    %c43 = arith.constant 43 : index
    %c0_146 = arith.constant 0 : index
    %264 = vector.load %arg18[%c43, %c0_146] : memref<88x64xf32, #tpu.memory_space<vmem>>, vector<1x64xf32>
    tpu.vector_store %arg18[%c43, %c0_146], %263 {strides = array<i32>} : memref<88x64xf32, #tpu.memory_space<vmem>>, vector<1x64xf32>,
    %c102 = arith.constant 102 : index
    %c0_147 = arith.constant 0 : index
    %265 = vector.load %arg17[%c102, %c0_147] : memref<200x64xf32, #tpu.memory_space<vmem>>, vector<2x64xf32>
    %c112 = arith.constant 112 : index
    %c0_148 = arith.constant 0 : index
    %266 = vector.load %arg17[%c112, %c0_148] : memref<200x64xf32, #tpu.memory_space<vmem>>, vector<2x64xf32>
    %267 = arith.maximumf %265, %266 : vector<2x64xf32>
    %268 = vector.extract_strided_slice %267 {offsets = [0, 0], sizes = [1, 64], strides = [1, 1]} : vector<2x64xf32> to vector<1x64xf32>
    %269 = vector.extract_strided_slice %267 {offsets = [1, 0], sizes = [1, 64], strides = [1, 1]} : vector<2x64xf32> to vector<1x64xf32>
    %270 = arith.maximumf %268, %269 : vector<1x64xf32>
    %c44_149 = arith.constant 44 : index
    %c0_150 = arith.constant 0 : index
    %271 = vector.load %arg18[%c44_149, %c0_150] : memref<88x64xf32, #tpu.memory_space<vmem>>, vector<1x64xf32>
    tpu.vector_store %arg18[%c44_149, %c0_150], %270 {strides = array<i32>} : memref<88x64xf32, #tpu.memory_space<vmem>>, vector<1x64xf32>,
    %c104 = arith.constant 104 : index
    %c0_151 = arith.constant 0 : index
    %272 = vector.load %arg17[%c104, %c0_151] : memref<200x64xf32, #tpu.memory_space<vmem>>, vector<2x64xf32>
    %c114 = arith.constant 114 : index
    %c0_152 = arith.constant 0 : index
    %273 = vector.load %arg17[%c114, %c0_152] : memref<200x64xf32, #tpu.memory_space<vmem>>, vector<2x64xf32>
    %274 = arith.maximumf %272, %273 : vector<2x64xf32>
    %275 = vector.extract_strided_slice %274 {offsets = [0, 0], sizes = [1, 64], strides = [1, 1]} : vector<2x64xf32> to vector<1x64xf32>
    %276 = vector.extract_strided_slice %274 {offsets = [1, 0], sizes = [1, 64], strides = [1, 1]} : vector<2x64xf32> to vector<1x64xf32>
    %277 = arith.maximumf %275, %276 : vector<1x64xf32>
    %c45 = arith.constant 45 : index
    %c0_153 = arith.constant 0 : index
    %278 = vector.load %arg18[%c45, %c0_153] : memref<88x64xf32, #tpu.memory_space<vmem>>, vector<1x64xf32>
    tpu.vector_store %arg18[%c45, %c0_153], %277 {strides = array<i32>} : memref<88x64xf32, #tpu.memory_space<vmem>>, vector<1x64xf32>,
    %c106 = arith.constant 106 : index
    %c0_154 = arith.constant 0 : index
    %279 = vector.load %arg17[%c106, %c0_154] : memref<200x64xf32, #tpu.memory_space<vmem>>, vector<2x64xf32>
    %c116 = arith.constant 116 : index
    %c0_155 = arith.constant 0 : index
    %280 = vector.load %arg17[%c116, %c0_155] : memref<200x64xf32, #tpu.memory_space<vmem>>, vector<2x64xf32>
    %281 = arith.maximumf %279, %280 : vector<2x64xf32>
    %282 = vector.extract_strided_slice %281 {offsets = [0, 0], sizes = [1, 64], strides = [1, 1]} : vector<2x64xf32> to vector<1x64xf32>
    %283 = vector.extract_strided_slice %281 {offsets = [1, 0], sizes = [1, 64], strides = [1, 1]} : vector<2x64xf32> to vector<1x64xf32>
    %284 = arith.maximumf %282, %283 : vector<1x64xf32>
    %c46_156 = arith.constant 46 : index
    %c0_157 = arith.constant 0 : index
    %285 = vector.load %arg18[%c46_156, %c0_157] : memref<88x64xf32, #tpu.memory_space<vmem>>, vector<1x64xf32>
    tpu.vector_store %arg18[%c46_156, %c0_157], %284 {strides = array<i32>} : memref<88x64xf32, #tpu.memory_space<vmem>>, vector<1x64xf32>,
    %c120 = arith.constant 120 : index
    %c0_158 = arith.constant 0 : index
    %286 = vector.load %arg17[%c120, %c0_158] : memref<200x64xf32, #tpu.memory_space<vmem>>, vector<2x64xf32>
    %c130 = arith.constant 130 : index
    %c0_159 = arith.constant 0 : index
    %287 = vector.load %arg17[%c130, %c0_159] : memref<200x64xf32, #tpu.memory_space<vmem>>, vector<2x64xf32>
    %288 = arith.maximumf %286, %287 : vector<2x64xf32>
    %289 = vector.extract_strided_slice %288 {offsets = [0, 0], sizes = [1, 64], strides = [1, 1]} : vector<2x64xf32> to vector<1x64xf32>
    %290 = vector.extract_strided_slice %288 {offsets = [1, 0], sizes = [1, 64], strides = [1, 1]} : vector<2x64xf32> to vector<1x64xf32>
    %291 = arith.maximumf %289, %290 : vector<1x64xf32>
    %c49 = arith.constant 49 : index
    %c0_160 = arith.constant 0 : index
    %292 = vector.load %arg18[%c49, %c0_160] : memref<88x64xf32, #tpu.memory_space<vmem>>, vector<1x64xf32>
    tpu.vector_store %arg18[%c49, %c0_160], %291 {strides = array<i32>} : memref<88x64xf32, #tpu.memory_space<vmem>>, vector<1x64xf32>,
    %c122 = arith.constant 122 : index
    %c0_161 = arith.constant 0 : index
    %293 = vector.load %arg17[%c122, %c0_161] : memref<200x64xf32, #tpu.memory_space<vmem>>, vector<2x64xf32>
    %c132 = arith.constant 132 : index
    %c0_162 = arith.constant 0 : index
    %294 = vector.load %arg17[%c132, %c0_162] : memref<200x64xf32, #tpu.memory_space<vmem>>, vector<2x64xf32>
    %295 = arith.maximumf %293, %294 : vector<2x64xf32>
    %296 = vector.extract_strided_slice %295 {offsets = [0, 0], sizes = [1, 64], strides = [1, 1]} : vector<2x64xf32> to vector<1x64xf32>
    %297 = vector.extract_strided_slice %295 {offsets = [1, 0], sizes = [1, 64], strides = [1, 1]} : vector<2x64xf32> to vector<1x64xf32>
    %298 = arith.maximumf %296, %297 : vector<1x64xf32>
    %c50_163 = arith.constant 50 : index
    %c0_164 = arith.constant 0 : index
    %299 = vector.load %arg18[%c50_163, %c0_164] : memref<88x64xf32, #tpu.memory_space<vmem>>, vector<1x64xf32>
    tpu.vector_store %arg18[%c50_163, %c0_164], %298 {strides = array<i32>} : memref<88x64xf32, #tpu.memory_space<vmem>>, vector<1x64xf32>,
    %c124 = arith.constant 124 : index
    %c0_165 = arith.constant 0 : index
    %300 = vector.load %arg17[%c124, %c0_165] : memref<200x64xf32, #tpu.memory_space<vmem>>, vector<2x64xf32>
    %c134 = arith.constant 134 : index
    %c0_166 = arith.constant 0 : index
    %301 = vector.load %arg17[%c134, %c0_166] : memref<200x64xf32, #tpu.memory_space<vmem>>, vector<2x64xf32>
    %302 = arith.maximumf %300, %301 : vector<2x64xf32>
    %303 = vector.extract_strided_slice %302 {offsets = [0, 0], sizes = [1, 64], strides = [1, 1]} : vector<2x64xf32> to vector<1x64xf32>
    %304 = vector.extract_strided_slice %302 {offsets = [1, 0], sizes = [1, 64], strides = [1, 1]} : vector<2x64xf32> to vector<1x64xf32>
    %305 = arith.maximumf %303, %304 : vector<1x64xf32>
    %c51_167 = arith.constant 51 : index
    %c0_168 = arith.constant 0 : index
    %306 = vector.load %arg18[%c51_167, %c0_168] : memref<88x64xf32, #tpu.memory_space<vmem>>, vector<1x64xf32>
    tpu.vector_store %arg18[%c51_167, %c0_168], %305 {strides = array<i32>} : memref<88x64xf32, #tpu.memory_space<vmem>>, vector<1x64xf32>,
    %c126 = arith.constant 126 : index
    %c0_169 = arith.constant 0 : index
    %307 = vector.load %arg17[%c126, %c0_169] : memref<200x64xf32, #tpu.memory_space<vmem>>, vector<2x64xf32>
    %c136 = arith.constant 136 : index
    %c0_170 = arith.constant 0 : index
    %308 = vector.load %arg17[%c136, %c0_170] : memref<200x64xf32, #tpu.memory_space<vmem>>, vector<2x64xf32>
    %309 = arith.maximumf %307, %308 : vector<2x64xf32>
    %310 = vector.extract_strided_slice %309 {offsets = [0, 0], sizes = [1, 64], strides = [1, 1]} : vector<2x64xf32> to vector<1x64xf32>
    %311 = vector.extract_strided_slice %309 {offsets = [1, 0], sizes = [1, 64], strides = [1, 1]} : vector<2x64xf32> to vector<1x64xf32>
    %312 = arith.maximumf %310, %311 : vector<1x64xf32>
    %c52_171 = arith.constant 52 : index
    %c0_172 = arith.constant 0 : index
    %313 = vector.load %arg18[%c52_171, %c0_172] : memref<88x64xf32, #tpu.memory_space<vmem>>, vector<1x64xf32>
    tpu.vector_store %arg18[%c52_171, %c0_172], %312 {strides = array<i32>} : memref<88x64xf32, #tpu.memory_space<vmem>>, vector<1x64xf32>,
    %c140 = arith.constant 140 : index
    %c0_173 = arith.constant 0 : index
    %314 = vector.load %arg17[%c140, %c0_173] : memref<200x64xf32, #tpu.memory_space<vmem>>, vector<2x64xf32>
    %c150 = arith.constant 150 : index
    %c0_174 = arith.constant 0 : index
    %315 = vector.load %arg17[%c150, %c0_174] : memref<200x64xf32, #tpu.memory_space<vmem>>, vector<2x64xf32>
    %316 = arith.maximumf %314, %315 : vector<2x64xf32>
    %317 = vector.extract_strided_slice %316 {offsets = [0, 0], sizes = [1, 64], strides = [1, 1]} : vector<2x64xf32> to vector<1x64xf32>
    %318 = vector.extract_strided_slice %316 {offsets = [1, 0], sizes = [1, 64], strides = [1, 1]} : vector<2x64xf32> to vector<1x64xf32>
    %319 = arith.maximumf %317, %318 : vector<1x64xf32>
    %c55 = arith.constant 55 : index
    %c0_175 = arith.constant 0 : index
    %320 = vector.load %arg18[%c55, %c0_175] : memref<88x64xf32, #tpu.memory_space<vmem>>, vector<1x64xf32>
    tpu.vector_store %arg18[%c55, %c0_175], %319 {strides = array<i32>} : memref<88x64xf32, #tpu.memory_space<vmem>>, vector<1x64xf32>,
    %c142 = arith.constant 142 : index
    %c0_176 = arith.constant 0 : index
    %321 = vector.load %arg17[%c142, %c0_176] : memref<200x64xf32, #tpu.memory_space<vmem>>, vector<2x64xf32>
    %c152 = arith.constant 152 : index
    %c0_177 = arith.constant 0 : index
    %322 = vector.load %arg17[%c152, %c0_177] : memref<200x64xf32, #tpu.memory_space<vmem>>, vector<2x64xf32>
    %323 = arith.maximumf %321, %322 : vector<2x64xf32>
    %324 = vector.extract_strided_slice %323 {offsets = [0, 0], sizes = [1, 64], strides = [1, 1]} : vector<2x64xf32> to vector<1x64xf32>
    %325 = vector.extract_strided_slice %323 {offsets = [1, 0], sizes = [1, 64], strides = [1, 1]} : vector<2x64xf32> to vector<1x64xf32>
    %326 = arith.maximumf %324, %325 : vector<1x64xf32>
    %c56_178 = arith.constant 56 : index
    %c0_179 = arith.constant 0 : index
    %327 = vector.load %arg18[%c56_178, %c0_179] : memref<88x64xf32, #tpu.memory_space<vmem>>, vector<1x64xf32>
    tpu.vector_store %arg18[%c56_178, %c0_179], %326 {strides = array<i32>} : memref<88x64xf32, #tpu.memory_space<vmem>>, vector<1x64xf32>,
    %c144 = arith.constant 144 : index
    %c0_180 = arith.constant 0 : index
    %328 = vector.load %arg17[%c144, %c0_180] : memref<200x64xf32, #tpu.memory_space<vmem>>, vector<2x64xf32>
    %c154 = arith.constant 154 : index
    %c0_181 = arith.constant 0 : index
    %329 = vector.load %arg17[%c154, %c0_181] : memref<200x64xf32, #tpu.memory_space<vmem>>, vector<2x64xf32>
    %330 = arith.maximumf %328, %329 : vector<2x64xf32>
    %331 = vector.extract_strided_slice %330 {offsets = [0, 0], sizes = [1, 64], strides = [1, 1]} : vector<2x64xf32> to vector<1x64xf32>
    %332 = vector.extract_strided_slice %330 {offsets = [1, 0], sizes = [1, 64], strides = [1, 1]} : vector<2x64xf32> to vector<1x64xf32>
    %333 = arith.maximumf %331, %332 : vector<1x64xf32>
    %c57 = arith.constant 57 : index
    %c0_182 = arith.constant 0 : index
    %334 = vector.load %arg18[%c57, %c0_182] : memref<88x64xf32, #tpu.memory_space<vmem>>, vector<1x64xf32>
    tpu.vector_store %arg18[%c57, %c0_182], %333 {strides = array<i32>} : memref<88x64xf32, #tpu.memory_space<vmem>>, vector<1x64xf32>,
    %c146 = arith.constant 146 : index
    %c0_183 = arith.constant 0 : index
    %335 = vector.load %arg17[%c146, %c0_183] : memref<200x64xf32, #tpu.memory_space<vmem>>, vector<2x64xf32>
    %c156 = arith.constant 156 : index
    %c0_184 = arith.constant 0 : index
    %336 = vector.load %arg17[%c156, %c0_184] : memref<200x64xf32, #tpu.memory_space<vmem>>, vector<2x64xf32>
    %337 = arith.maximumf %335, %336 : vector<2x64xf32>
    %338 = vector.extract_strided_slice %337 {offsets = [0, 0], sizes = [1, 64], strides = [1, 1]} : vector<2x64xf32> to vector<1x64xf32>
    %339 = vector.extract_strided_slice %337 {offsets = [1, 0], sizes = [1, 64], strides = [1, 1]} : vector<2x64xf32> to vector<1x64xf32>
    %340 = arith.maximumf %338, %339 : vector<1x64xf32>
    %c58 = arith.constant 58 : index
    %c0_185 = arith.constant 0 : index
    %341 = vector.load %arg18[%c58, %c0_185] : memref<88x64xf32, #tpu.memory_space<vmem>>, vector<1x64xf32>
    tpu.vector_store %arg18[%c58, %c0_185], %340 {strides = array<i32>} : memref<88x64xf32, #tpu.memory_space<vmem>>, vector<1x64xf32>,
    %c160_186 = arith.constant 160 : index
    %c0_187 = arith.constant 0 : index
    %342 = vector.load %arg17[%c160_186, %c0_187] : memref<200x64xf32, #tpu.memory_space<vmem>>, vector<2x64xf32>
    %c170 = arith.constant 170 : index
    %c0_188 = arith.constant 0 : index
    %343 = vector.load %arg17[%c170, %c0_188] : memref<200x64xf32, #tpu.memory_space<vmem>>, vector<2x64xf32>
    %344 = arith.maximumf %342, %343 : vector<2x64xf32>
    %345 = vector.extract_strided_slice %344 {offsets = [0, 0], sizes = [1, 64], strides = [1, 1]} : vector<2x64xf32> to vector<1x64xf32>
    %346 = vector.extract_strided_slice %344 {offsets = [1, 0], sizes = [1, 64], strides = [1, 1]} : vector<2x64xf32> to vector<1x64xf32>
    %347 = arith.maximumf %345, %346 : vector<1x64xf32>
    %c61_189 = arith.constant 61 : index
    %c0_190 = arith.constant 0 : index
    %348 = vector.load %arg18[%c61_189, %c0_190] : memref<88x64xf32, #tpu.memory_space<vmem>>, vector<1x64xf32>
    tpu.vector_store %arg18[%c61_189, %c0_190], %347 {strides = array<i32>} : memref<88x64xf32, #tpu.memory_space<vmem>>, vector<1x64xf32>,
    %c162 = arith.constant 162 : index
    %c0_191 = arith.constant 0 : index
    %349 = vector.load %arg17[%c162, %c0_191] : memref<200x64xf32, #tpu.memory_space<vmem>>, vector<2x64xf32>
    %c172 = arith.constant 172 : index
    %c0_192 = arith.constant 0 : index
    %350 = vector.load %arg17[%c172, %c0_192] : memref<200x64xf32, #tpu.memory_space<vmem>>, vector<2x64xf32>
    %351 = arith.maximumf %349, %350 : vector<2x64xf32>
    %352 = vector.extract_strided_slice %351 {offsets = [0, 0], sizes = [1, 64], strides = [1, 1]} : vector<2x64xf32> to vector<1x64xf32>
    %353 = vector.extract_strided_slice %351 {offsets = [1, 0], sizes = [1, 64], strides = [1, 1]} : vector<2x64xf32> to vector<1x64xf32>
    %354 = arith.maximumf %352, %353 : vector<1x64xf32>
    %c62_193 = arith.constant 62 : index
    %c0_194 = arith.constant 0 : index
    %355 = vector.load %arg18[%c62_193, %c0_194] : memref<88x64xf32, #tpu.memory_space<vmem>>, vector<1x64xf32>
    tpu.vector_store %arg18[%c62_193, %c0_194], %354 {strides = array<i32>} : memref<88x64xf32, #tpu.memory_space<vmem>>, vector<1x64xf32>,
    %c164 = arith.constant 164 : index
    %c0_195 = arith.constant 0 : index
    %356 = vector.load %arg17[%c164, %c0_195] : memref<200x64xf32, #tpu.memory_space<vmem>>, vector<2x64xf32>
    %c174 = arith.constant 174 : index
    %c0_196 = arith.constant 0 : index
    %357 = vector.load %arg17[%c174, %c0_196] : memref<200x64xf32, #tpu.memory_space<vmem>>, vector<2x64xf32>
    %358 = arith.maximumf %356, %357 : vector<2x64xf32>
    %359 = vector.extract_strided_slice %358 {offsets = [0, 0], sizes = [1, 64], strides = [1, 1]} : vector<2x64xf32> to vector<1x64xf32>
    %360 = vector.extract_strided_slice %358 {offsets = [1, 0], sizes = [1, 64], strides = [1, 1]} : vector<2x64xf32> to vector<1x64xf32>
    %361 = arith.maximumf %359, %360 : vector<1x64xf32>
    %c63 = arith.constant 63 : index
    %c0_197 = arith.constant 0 : index
    %362 = vector.load %arg18[%c63, %c0_197] : memref<88x64xf32, #tpu.memory_space<vmem>>, vector<1x64xf32>
    tpu.vector_store %arg18[%c63, %c0_197], %361 {strides = array<i32>} : memref<88x64xf32, #tpu.memory_space<vmem>>, vector<1x64xf32>,
    %c166 = arith.constant 166 : index
    %c0_198 = arith.constant 0 : index
    %363 = vector.load %arg17[%c166, %c0_198] : memref<200x64xf32, #tpu.memory_space<vmem>>, vector<2x64xf32>
    %c176 = arith.constant 176 : index
    %c0_199 = arith.constant 0 : index
    %364 = vector.load %arg17[%c176, %c0_199] : memref<200x64xf32, #tpu.memory_space<vmem>>, vector<2x64xf32>
    %365 = arith.maximumf %363, %364 : vector<2x64xf32>
    %366 = vector.extract_strided_slice %365 {offsets = [0, 0], sizes = [1, 64], strides = [1, 1]} : vector<2x64xf32> to vector<1x64xf32>
    %367 = vector.extract_strided_slice %365 {offsets = [1, 0], sizes = [1, 64], strides = [1, 1]} : vector<2x64xf32> to vector<1x64xf32>
    %368 = arith.maximumf %366, %367 : vector<1x64xf32>
    %c64_200 = arith.constant 64 : index
    %c0_201 = arith.constant 0 : index
    %369 = vector.load %arg18[%c64_200, %c0_201] : memref<88x64xf32, #tpu.memory_space<vmem>>, vector<1x64xf32>
    tpu.vector_store %arg18[%c64_200, %c0_201], %368 {strides = array<i32>} : memref<88x64xf32, #tpu.memory_space<vmem>>, vector<1x64xf32>,
    %cst_202 = arith.constant 0.000000e+00 : f32
    %370 = vector.broadcast %cst_202 : f32 to vector<72x128xf32>
    %c0_203 = arith.constant 0 : index
    %c0_204 = arith.constant 0 : index
    %371 = vector.load %arg18[%c0_203, %c0_204] : memref<88x64xf32, #tpu.memory_space<vmem>>, vector<72x64xf32>
    %372 = arith.truncf %371 : vector<72x64xf32> to vector<72x64xbf16>
    %c0_205 = arith.constant 0 : index
    %c0_206 = arith.constant 0 : index
    %373 = vector.load %arg7[%c0_205, %c0_206] : memref<576x128xbf16, #tpu.memory_space<vmem>>, vector<64x128xbf16>
    %cst_207 = arith.constant dense<0.000000e+00> : vector<72x128xf32>
    %374 = tpu.matmul %372, %373, %cst_207 {dimension_numbers = #tpu.dot_dimension_numbers<[1], [0], [0], [1], [0, 0, 1, 1], [], []>} : vector<72x64xbf16>, vector<64x128xbf16>, vector<72x128xf32> -> vector<72x128xf32>
    %375 = arith.addf %370, %374 : vector<72x128xf32>
    %c1_208 = arith.constant 1 : index
    %c0_209 = arith.constant 0 : index
    %376 = vector.load %arg18[%c1_208, %c0_209] : memref<88x64xf32, #tpu.memory_space<vmem>>, vector<72x64xf32>
    %377 = arith.truncf %376 : vector<72x64xf32> to vector<72x64xbf16>
    %c64_210 = arith.constant 64 : index
    %c0_211 = arith.constant 0 : index
    %378 = vector.load %arg7[%c64_210, %c0_211] : memref<576x128xbf16, #tpu.memory_space<vmem>>, vector<64x128xbf16>
    %cst_212 = arith.constant dense<0.000000e+00> : vector<72x128xf32>
    %379 = tpu.matmul %377, %378, %cst_212 {dimension_numbers = #tpu.dot_dimension_numbers<[1], [0], [0], [1], [0, 0, 1, 1], [], []>} : vector<72x64xbf16>, vector<64x128xbf16>, vector<72x128xf32> -> vector<72x128xf32>
    %380 = arith.addf %375, %379 : vector<72x128xf32>
    %c2_213 = arith.constant 2 : index
    %c0_214 = arith.constant 0 : index
    %381 = vector.load %arg18[%c2_213, %c0_214] : memref<88x64xf32, #tpu.memory_space<vmem>>, vector<72x64xf32>
    %382 = arith.truncf %381 : vector<72x64xf32> to vector<72x64xbf16>
    %c128_215 = arith.constant 128 : index
    %c0_216 = arith.constant 0 : index
    %383 = vector.load %arg7[%c128_215, %c0_216] : memref<576x128xbf16, #tpu.memory_space<vmem>>, vector<64x128xbf16>
    %cst_217 = arith.constant dense<0.000000e+00> : vector<72x128xf32>
    %384 = tpu.matmul %382, %383, %cst_217 {dimension_numbers = #tpu.dot_dimension_numbers<[1], [0], [0], [1], [0, 0, 1, 1], [], []>} : vector<72x64xbf16>, vector<64x128xbf16>, vector<72x128xf32> -> vector<72x128xf32>
    %385 = arith.addf %380, %384 : vector<72x128xf32>
    %c6_218 = arith.constant 6 : index
    %c0_219 = arith.constant 0 : index
    %386 = vector.load %arg18[%c6_218, %c0_219] : memref<88x64xf32, #tpu.memory_space<vmem>>, vector<72x64xf32>
    %387 = arith.truncf %386 : vector<72x64xf32> to vector<72x64xbf16>
    %c192_220 = arith.constant 192 : index
    %c0_221 = arith.constant 0 : index
    %388 = vector.load %arg7[%c192_220, %c0_221] : memref<576x128xbf16, #tpu.memory_space<vmem>>, vector<64x128xbf16>
    %cst_222 = arith.constant dense<0.000000e+00> : vector<72x128xf32>
    %389 = tpu.matmul %387, %388, %cst_222 {dimension_numbers = #tpu.dot_dimension_numbers<[1], [0], [0], [1], [0, 0, 1, 1], [], []>} : vector<72x64xbf16>, vector<64x128xbf16>, vector<72x128xf32> -> vector<72x128xf32>
    %390 = arith.addf %385, %389 : vector<72x128xf32>
    %c7_223 = arith.constant 7 : index
    %c0_224 = arith.constant 0 : index
    %391 = vector.load %arg18[%c7_223, %c0_224] : memref<88x64xf32, #tpu.memory_space<vmem>>, vector<72x64xf32>
    %392 = arith.truncf %391 : vector<72x64xf32> to vector<72x64xbf16>
    %c256_225 = arith.constant 256 : index
    %c0_226 = arith.constant 0 : index
    %393 = vector.load %arg7[%c256_225, %c0_226] : memref<576x128xbf16, #tpu.memory_space<vmem>>, vector<64x128xbf16>
    %cst_227 = arith.constant dense<0.000000e+00> : vector<72x128xf32>
    %394 = tpu.matmul %392, %393, %cst_227 {dimension_numbers = #tpu.dot_dimension_numbers<[1], [0], [0], [1], [0, 0, 1, 1], [], []>} : vector<72x64xbf16>, vector<64x128xbf16>, vector<72x128xf32> -> vector<72x128xf32>
    %395 = arith.addf %390, %394 : vector<72x128xf32>
    %c8_228 = arith.constant 8 : index
    %c0_229 = arith.constant 0 : index
    %396 = vector.load %arg18[%c8_228, %c0_229] : memref<88x64xf32, #tpu.memory_space<vmem>>, vector<72x64xf32>
    %397 = arith.truncf %396 : vector<72x64xf32> to vector<72x64xbf16>
    %c320 = arith.constant 320 : index
    %c0_230 = arith.constant 0 : index
    %398 = vector.load %arg7[%c320, %c0_230] : memref<576x128xbf16, #tpu.memory_space<vmem>>, vector<64x128xbf16>
    %cst_231 = arith.constant dense<0.000000e+00> : vector<72x128xf32>
    %399 = tpu.matmul %397, %398, %cst_231 {dimension_numbers = #tpu.dot_dimension_numbers<[1], [0], [0], [1], [0, 0, 1, 1], [], []>} : vector<72x64xbf16>, vector<64x128xbf16>, vector<72x128xf32> -> vector<72x128xf32>
    %400 = arith.addf %395, %399 : vector<72x128xf32>
    %c12_232 = arith.constant 12 : index
    %c0_233 = arith.constant 0 : index
    %401 = vector.load %arg18[%c12_232, %c0_233] : memref<88x64xf32, #tpu.memory_space<vmem>>, vector<72x64xf32>
    %402 = arith.truncf %401 : vector<72x64xf32> to vector<72x64xbf16>
    %c384 = arith.constant 384 : index
    %c0_234 = arith.constant 0 : index
    %403 = vector.load %arg7[%c384, %c0_234] : memref<576x128xbf16, #tpu.memory_space<vmem>>, vector<64x128xbf16>
    %cst_235 = arith.constant dense<0.000000e+00> : vector<72x128xf32>
    %404 = tpu.matmul %402, %403, %cst_235 {dimension_numbers = #tpu.dot_dimension_numbers<[1], [0], [0], [1], [0, 0, 1, 1], [], []>} : vector<72x64xbf16>, vector<64x128xbf16>, vector<72x128xf32> -> vector<72x128xf32>
    %405 = arith.addf %400, %404 : vector<72x128xf32>
    %c13_236 = arith.constant 13 : index
    %c0_237 = arith.constant 0 : index
    %406 = vector.load %arg18[%c13_236, %c0_237] : memref<88x64xf32, #tpu.memory_space<vmem>>, vector<72x64xf32>
    %407 = arith.truncf %406 : vector<72x64xf32> to vector<72x64xbf16>
    %c448 = arith.constant 448 : index
    %c0_238 = arith.constant 0 : index
    %408 = vector.load %arg7[%c448, %c0_238] : memref<576x128xbf16, #tpu.memory_space<vmem>>, vector<64x128xbf16>
    %cst_239 = arith.constant dense<0.000000e+00> : vector<72x128xf32>
    %409 = tpu.matmul %407, %408, %cst_239 {dimension_numbers = #tpu.dot_dimension_numbers<[1], [0], [0], [1], [0, 0, 1, 1], [], []>} : vector<72x64xbf16>, vector<64x128xbf16>, vector<72x128xf32> -> vector<72x128xf32>
    %410 = arith.addf %405, %409 : vector<72x128xf32>
    %c14_240 = arith.constant 14 : index
    %c0_241 = arith.constant 0 : index
    %411 = vector.load %arg18[%c14_240, %c0_241] : memref<88x64xf32, #tpu.memory_space<vmem>>, vector<72x64xf32>
    %412 = arith.truncf %411 : vector<72x64xf32> to vector<72x64xbf16>
    %c512 = arith.constant 512 : index
    %c0_242 = arith.constant 0 : index
    %413 = vector.load %arg7[%c512, %c0_242] : memref<576x128xbf16, #tpu.memory_space<vmem>>, vector<64x128xbf16>
    %cst_243 = arith.constant dense<0.000000e+00> : vector<72x128xf32>
    %414 = tpu.matmul %412, %413, %cst_243 {dimension_numbers = #tpu.dot_dimension_numbers<[1], [0], [0], [1], [0, 0, 1, 1], [], []>} : vector<72x64xbf16>, vector<64x128xbf16>, vector<72x128xf32> -> vector<72x128xf32>
    %415 = arith.addf %410, %414 : vector<72x128xf32>
    %c0_244 = arith.constant 0 : index
    %c0_245 = arith.constant 0 : index
    %416 = vector.load %arg8[%c0_244, %c0_245] : memref<1x128xf32, #tpu.memory_space<vmem>>, vector<1x128xf32>
    %c0_246 = arith.constant 0 : index
    %c0_247 = arith.constant 0 : index
    %417 = vector.load %arg9[%c0_246, %c0_247] : memref<1x128xf32, #tpu.memory_space<vmem>>, vector<1x128xf32>
    %c0_248 = arith.constant 0 : index
    %c0_249 = arith.constant 0 : index
    %418 = vector.load %arg13[%c0_248, %c0_249] : memref<72x1xf32, #tpu.memory_space<vmem>>, vector<72x1xf32>
    %419 = vector.broadcast %418 : vector<72x1xf32> to vector<72x128xf32>
    %420 = arith.mulf %415, %419 : vector<72x128xf32>
    %cst_250 = arith.constant dense<0.000000e+00> : vector<128xf32>
    %421 = vector.multi_reduction <add>, %420, %cst_250 [0] : vector<72x128xf32> to vector<128xf32>
    %422 = vector.shape_cast %421 : vector<128xf32> to vector<1x128xf32>
    %423 = arith.mulf %420, %420 : vector<72x128xf32>
    %cst_251 = arith.constant dense<0.000000e+00> : vector<128xf32>
    %424 = vector.multi_reduction <add>, %423, %cst_251 [0] : vector<72x128xf32> to vector<128xf32>
    %425 = vector.shape_cast %424 : vector<128xf32> to vector<1x128xf32>
    %cst_252 = arith.constant 3.125000e-02 : f32
    %426 = vector.broadcast %cst_252 : f32 to vector<1x128xf32>
    %427 = arith.mulf %422, %426 : vector<1x128xf32>
    %cst_253 = arith.constant 3.125000e-02 : f32
    %428 = vector.broadcast %cst_253 : f32 to vector<1x128xf32>
    %429 = arith.mulf %425, %428 : vector<1x128xf32>
    %430 = arith.mulf %427, %427 : vector<1x128xf32>
    %431 = arith.subf %429, %430 : vector<1x128xf32>
    %cst_254 = arith.constant 9.99999974E-6 : f32
    %432 = vector.broadcast %cst_254 : f32 to vector<1x128xf32>
    %433 = arith.addf %431, %432 : vector<1x128xf32>
    %434 = math.rsqrt %433 : vector<1x128xf32>
    %435 = arith.mulf %416, %434 : vector<1x128xf32>
    %436 = vector.broadcast %427 : vector<1x128xf32> to vector<72x128xf32>
    %437 = arith.subf %415, %436 : vector<72x128xf32>
    %438 = vector.broadcast %435 : vector<1x128xf32> to vector<72x128xf32>
    %439 = arith.mulf %437, %438 : vector<72x128xf32>
    %440 = vector.broadcast %417 : vector<1x128xf32> to vector<72x128xf32>
    %441 = arith.addf %439, %440 : vector<72x128xf32>
    %cst_255 = arith.constant 0.000000e+00 : f32
    %442 = vector.broadcast %cst_255 : f32 to vector<72x128xf32>
    %443 = arith.maximumf %441, %442 : vector<72x128xf32>
    %c0_256 = arith.constant 0 : index
    %c0_257 = arith.constant 0 : index
    %444 = vector.load %arg10[%c0_256, %c0_257] : memref<72x128xf32, #tpu.memory_space<vmem>>, vector<72x128xf32>
    %445 = arith.mulf %443, %444 : vector<72x128xf32>
    %c0_258 = arith.constant 0 : index
    %c0_259 = arith.constant 0 : index
    %446 = vector.load %arg14[%c0_258, %c0_259] : memref<8x72xf32, #tpu.memory_space<vmem>>, vector<8x72xf32>
    %cst_260 = arith.constant dense<0.000000e+00> : vector<8x128xf32>
    %447 = tpu.matmul %446, %445, %cst_260 {dimension_numbers = #tpu.dot_dimension_numbers<[1], [0], [0], [1], [0, 0, 1, 1], [], []>} : vector<8x72xf32>, vector<72x128xf32>, vector<8x128xf32> -> vector<8x128xf32>
    %cst_261 = arith.constant dense<0.000000e+00> : vector<8xf32>
    %448 = vector.multi_reduction <add>, %447, %cst_261 [1] : vector<8x128xf32> to vector<8xf32>
    %449 = vector.shape_cast %448 : vector<8xf32> to vector<8x1xf32>
    %c0_262 = arith.constant 0 : index
    %c0_263 = arith.constant 0 : index
    %450 = vector.load %arg11[%c0_262, %c0_263] : memref<1x1xf32, #tpu.memory_space<vmem>>, vector<1x1xf32>
    %451 = vector.broadcast %450 : vector<1x1xf32> to vector<8x1xf32>
    %452 = arith.addf %449, %451 : vector<8x1xf32>
    %cst_264 = arith.constant 0.000000e+00 : f32
    %453 = vector.broadcast %cst_264 : f32 to vector<8x1xf32>
    %454 = arith.subf %453, %452 : vector<8x1xf32>
    %455 = math.exp %454 : vector<8x1xf32>
    %cst_265 = arith.constant 1.000000e+00 : f32
    %456 = vector.broadcast %cst_265 : f32 to vector<8x1xf32>
    %457 = arith.addf %456, %455 : vector<8x1xf32>
    %458 = tpu.reciprocal %457 {approx = true} : vector<8x1xf32> -> vector<8x1xf32>
    %459 = vector.extract_strided_slice %458 {offsets = [0, 0], sizes = [2, 1], strides = [1, 1]} : vector<8x1xf32> to vector<2x1xf32>
    %c0_266 = arith.constant 0 : index
    %c0_267 = arith.constant 0 : index
    %460 = vector.load %arg15[%c0_266, %c0_267] : memref<2x1xf32, #tpu.memory_space<vmem>>, vector<2x1xf32>
    tpu.vector_store %arg15[%c0_266, %c0_267], %459 {strides = array<i32>} : memref<2x1xf32, #tpu.memory_space<vmem>>, vector<2x1xf32>,
    return
  }
}

</mosaic_0001>

<bundles_post_ra>
// kernel: _lambda_.1
= control target key start
LH: loop header
LB: loop body
LE: loop exit
PB: predicated region body
PF: predicated region fallthrough
CT: control target
= control target key end

     0   :  { %vm326_vm0 = vcmask 130048   ;;  %vm53_vm1 = vcmask 261120   ;;  %v10991_v33 = vmov 0.0   ;;  %vm7358_vm2 = vmmov 0   ;;  %s10975_s1 = inlined_call_operand.vmem [shape: bf16[16,32], index: 1, kind: input, shape index: {}]   ;;  %s10976_s0 = inlined_call_operand.vmem [shape: bf16[512,16], index: 0, kind: input, shape index: {}]   ;;  %s10977_s4 = inlined_call_operand.vmem [shape: bf16[288,64], index: 4, kind: input, shape index: {}]   ;;  %s10978_s2 = inlined_call_operand.vmem [shape: f32[1,32], index: 2, kind: input, shape index: {}]   ;;  %s10979_s3 = inlined_call_operand.vmem [shape: f32[1,32], index: 3, kind: input, shape index: {}]   ;;  %s10980_s12 = inlined_call_operand.vmem [shape: f32[200,1], index: 12, kind: input, shape index: {}]   ;;  %s10981_s13 = inlined_call_operand.vmem [shape: f32[72,1], index: 13, kind: input, shape index: {}]   ;;  %s10982_s7 = inlined_call_operand.vmem [shape: bf16[576,128], index: 7, kind: input, shape index: {}]   ;;  %s10983_s5 = inlined_call_operand.vmem [shape: f32[1,64], index: 5, kind: input, shape index: {}]   ;;  %s10984_s6 = inlined_call_operand.vmem [shape: f32[1,64], index: 6, kind: input, shape index: {}]   ;;  %s10985_s8 = inlined_call_operand.vmem [shape: f32[1,128], index: 8, kind: input, shape index: {}]   ;;  %s10986_s9 = inlined_call_operand.vmem [shape: f32[1,128], index: 9, kind: input, shape index: {}]   ;;  %s10987_s10 = inlined_call_operand.vmem [shape: f32[72,128], index: 10, kind: input, shape index: {}]   ;;  %s10988_s14 = inlined_call_operand.vmem [shape: f32[8,72], index: 14, kind: input, shape index: {}]   ;;  %s10989_s11 = inlined_call_operand.<no memory space> [shape: f32[1,1], index: 11, kind: input, shape index: {}]   ;;  %s10990_s15 = inlined_call_operand.vmem [shape: f32[2,1], index: 15, kind: output, shape index: {}]  }
   0x1   :  { %v7260_v0 = vld [vmem:[%s10975_s1] sm:$0xff]   ;;  %v7262_v2 = vld [vmem:[%s10976_s0 + $0x8] sm:$0xff]   ;;  %v7263_v3 = vld [vmem:[%s10976_s0 + $0x10] sm:$0xff]   ;;  %57 = vst.msk [vmem:[#allocation2 + $0x18] sm:$0xff] %vm53_vm1, %v10991_v33  ;;  %7251 = vmatprep.subr.bf16.mxu1 %v10991_v33  ;;  %vm82_vm3 = vcmask 523264   ;;  %vm4082_vm4 = vcmask 516096  }
   0x2   :  { %v7261_v1 = vld [vmem:[%s10976_s0] sm:$0xff]   ;;  %6408 = vmatprep.subr.bf16.mxu0 %v7260_v0  ;;  %v7264_v4 = vld [vmem:[%s10976_s0 + $0x18] sm:$0xff]   ;;  %v7266_v6 = vld [vmem:[%s10976_s0 + $0x28] sm:$0xff]   ;;  %58 = vst.msk [vmem:[#allocation2 + $0x20] sm:$0xff] %vm53_vm1, %v10991_v33  ;;  %vm5768_vm5 = vcmask 588800   ;;  %vm5857_vm6 = vcmask 1024  }
   0x3   :  { %6409 = vmatpush3.bf16.msra.mxu0 %v7260_v0  ;;  %6410 = vmatprep.mubr.msk.bf16.mxu0 %vm326_vm0, %v7261_v1  ;;  %v7265_v5 = vld [vmem:[%s10976_s0 + $0x20] sm:$0xff]   ;;  %v7267_v7 = vld [vmem:[%s10976_s0 + $0x30] sm:$0xff]   ;;  %v7268_v8 = vld [vmem:[%s10976_s0 + $0x38] sm:$0xff]   ;;  %54 = vst.msk [vmem:[#allocation2] sm:$0xff] %vm53_vm1, %v10991_v33 }
   0x4   :  { %v7269_v9 = vld [vmem:[%s10976_s0 + $0x40] sm:$0xff]   ;;  %v7270_v10 = vld [vmem:[%s10976_s0 + $0x48] sm:$0xff]   ;;  %v7271_v11 = vld [vmem:[%s10976_s0 + $0x50] sm:$0xff]   ;;  %55 = vst.msk [vmem:[#allocation2 + $0x8] sm:$0xff] %vm53_vm1, %v10991_v33  ;;  %6474 = vmatprep.subr.bf16.mxu0 %v10991_v33 }
   0x5   :  { %v7272_v12 = vld [vmem:[%s10976_s0 + $0x58] sm:$0xff]   ;;  %v7273_v13 = vld [vmem:[%s10976_s0 + $0x60] sm:$0xff]   ;;  %v7274_v14 = vld [vmem:[%s10976_s0 + $0x68] sm:$0xff]   ;;  %56 = vst.msk [vmem:[#allocation2 + $0x10] sm:$0xff] %vm53_vm1, %v10991_v33 }
   0x6   :  { %6411 = vmatmul.mubr.msk.bf16.vlgmr.msra.gmra.mxu0 %vm326_vm0, %v7262_v2  ;;  %v7275_v15 = vld [vmem:[%s10976_s0 + $0x70] sm:$0xff]   ;;  %v7276_v16 = vld [vmem:[%s10976_s0 + $0x78] sm:$0xff]   ;;  %v7277_v17 = vld [vmem:[%s10976_s0 + $0x80] sm:$0xff]   ;;  %59 = vst.msk [vmem:[#allocation2 + $0x28] sm:$0xff] %vm53_vm1, %v10991_v33 }
   0x7   :  { %6414 = vmatprep.mubr.msk.bf16.mxu0 %vm326_vm0, %v7263_v3  ;;  %v7278_v18 = vld [vmem:[%s10976_s0 + $0x88] sm:$0xff]   ;;  %v7279_v19 = vld [vmem:[%s10976_s0 + $0x90] sm:$0xff]   ;;  %v7280_v20 = vld [vmem:[%s10976_s0 + $0x98] sm:$0xff]   ;;  %60 = vst.msk [vmem:[#allocation2 + $0x30] sm:$0xff] %vm53_vm1, %v10991_v33 }
   0x8   :  { %v7281_v21 = vld [vmem:[%s10976_s0 + $0xa0] sm:$0xff]   ;;  %v7282_v22 = vld [vmem:[%s10976_s0 + $0xa8] sm:$0xff]   ;;  %v7283_v23 = vld [vmem:[%s10976_s0 + $0xb0] sm:$0xff]   ;;  %61 = vst.msk [vmem:[#allocation2 + $0x38] sm:$0xff] %vm53_vm1, %v10991_v33 }
   0x9   :  { %v7284_v24 = vld [vmem:[%s10976_s0 + $0xb8] sm:$0xff]   ;;  %v7285_v25 = vld [vmem:[%s10976_s0 + $0xc0] sm:$0xff]   ;;  %v7286_v26 = vld [vmem:[%s10976_s0 + $0xc8] sm:$0xff]   ;;  %62 = vst.msk [vmem:[#allocation2 + $0x40] sm:$0xff] %vm53_vm1, %v10991_v33 }
   0xa   :  { %v7287_v27 = vld [vmem:[%s10976_s0 + $0xd0] sm:$0xff]   ;;  %v7288_v28 = vld [vmem:[%s10976_s0 + $0xd8] sm:$0xff]   ;;  %v7289_v29 = vld [vmem:[%s10976_s0 + $0xe0] sm:$0xff]   ;;  %63 = vst.msk [vmem:[#allocation2 + $0x48] sm:$0xff] %vm53_vm1, %v10991_v33 }
   0xb   :  { %v7290_v30 = vld [vmem:[%s10976_s0 + $0xe8] sm:$0xff]   ;;  %v7291_v31 = vld [vmem:[%s10976_s0 + $0xf0] sm:$0xff]   ;;  %v7292_v32 = vld [vmem:[%s10976_s0 + $0xf8] sm:$0xff]   ;;  %64 = vst.msk [vmem:[#allocation2 + $0x50] sm:$0xff] %vm53_vm1, %v10991_v33 }
   0xc   :  { %65 = vst.msk [vmem:[#allocation2 + $0x58] sm:$0xff] %vm53_vm1, %v10991_v33  ;;  %66 = vst.msk [vmem:[#allocation2 + $0x60] sm:$0xff] %vm53_vm1, %v10991_v33 }
   0xd   :  { %67 = vst.msk [vmem:[#allocation2 + $0x68] sm:$0xff] %vm53_vm1, %v10991_v33  ;;  %68 = vst.msk [vmem:[#allocation2 + $0x70] sm:$0xff] %vm53_vm1, %v10991_v33 }
   0xe   :  { %6415 = vmatmul.mubr.msk.bf16.gmra.mxu0 %vm326_vm0, %v7264_v4  ;;  %69 = vst.msk [vmem:[#allocation2 + $0x78] sm:$0xff] %vm53_vm1, %v10991_v33  ;;  %70 = vst.msk [vmem:[#allocation2 + $0x80] sm:$0xff] %vm53_vm1, %v10991_v33 }
   0xf   :  { %6418 = vmatprep.mubr.msk.bf16.mxu0 %vm326_vm0, %v7265_v5  ;;  %71 = vst.msk [vmem:[#allocation2 + $0x88] sm:$0xff] %vm53_vm1, %v10991_v33  ;;  %72 = vst.msk [vmem:[#allocation2 + $0x90] sm:$0xff] %vm53_vm1, %v10991_v33 }
  0x10   :  { %73 = vst.msk [vmem:[#allocation2 + $0x98] sm:$0xff] %vm53_vm1, %v10991_v33  ;;  %74 = vst.msk [vmem:[#allocation2 + $0xa0] sm:$0xff] %vm53_vm1, %v10991_v33 }
  0x11   :  { %75 = vst.msk [vmem:[#allocation2 + $0xa8] sm:$0xff] %vm53_vm1, %v10991_v33  ;;  %76 = vst.msk [vmem:[#allocation2 + $0xb0] sm:$0xff] %vm53_vm1, %v10991_v33 }
  0x12   :  { %77 = vst.msk [vmem:[#allocation2 + $0xb8] sm:$0xff] %vm53_vm1, %v10991_v33  ;;  %78 = vst.msk [vmem:[#allocation2 + $0xc0] sm:$0xff] %vm53_vm1, %v10991_v33 }
  0x13   :  { %79 = vst.msk [vmem:[#allocation2 + $0xc8] sm:$0xff] %vm53_vm1, %v10991_v33  ;;  %80 = vst.msk [vmem:[#allocation2 + $0xd0] sm:$0xff] %vm53_vm1, %v10991_v33 }
  0x14   :  { %81 = vst.msk [vmem:[#allocation2 + $0xd8] sm:$0xff] %vm53_vm1, %v10991_v33 }
  0x16   :  { %6419 = vmatmul.mubr.msk.bf16.gmra.mxu0 %vm326_vm0, %v7266_v6 }
  0x17   :  { %6422 = vmatprep.mubr.msk.bf16.mxu0 %vm326_vm0, %v7267_v7 }
  0x1e   :  { %6423 = vmatmul.mubr.msk.bf16.gmra.mxu0 %vm326_vm0, %v7268_v8 }
  0x1f   :  { %6426 = vmatprep.mubr.msk.bf16.mxu0 %vm326_vm0, %v7269_v9 }
  0x26   :  { %6427 = vmatmul.mubr.msk.bf16.gmra.mxu0 %vm326_vm0, %v7270_v10 }
  0x27   :  { %6430 = vmatprep.mubr.msk.bf16.mxu0 %vm326_vm0, %v7271_v11 }
  0x2e   :  { %6431 = vmatmul.mubr.msk.bf16.gmra.mxu0 %vm326_vm0, %v7272_v12 }
  0x2f   :  { %6434 = vmatprep.mubr.msk.bf16.mxu0 %vm326_vm0, %v7273_v13 }
  0x36   :  { %6435 = vmatmul.mubr.msk.bf16.gmra.mxu0 %vm326_vm0, %v7274_v14 }
  0x37   :  { %6438 = vmatprep.mubr.msk.bf16.mxu0 %vm326_vm0, %v7275_v15 }
  0x3e   :  { %6439 = vmatmul.mubr.msk.bf16.gmra.mxu0 %vm326_vm0, %v7276_v16 }
  0x3f   :  { %6442 = vmatprep.mubr.msk.bf16.mxu0 %vm326_vm0, %v7277_v17 }
  0x46   :  { %6443 = vmatmul.mubr.msk.bf16.gmra.mxu0 %vm326_vm0, %v7278_v18 }
  0x47   :  { %6446 = vmatprep.mubr.msk.bf16.mxu0 %vm326_vm0, %v7279_v19 }
  0x4e   :  { %6447 = vmatmul.mubr.msk.bf16.gmra.mxu0 %vm326_vm0, %v7280_v20 }
  0x4f   :  { %6450 = vmatprep.mubr.msk.bf16.mxu0 %vm326_vm0, %v7281_v21 }
  0x56   :  { %6451 = vmatmul.mubr.msk.bf16.gmra.mxu0 %vm326_vm0, %v7282_v22 }
  0x57   :  { %6454 = vmatprep.mubr.msk.bf16.mxu0 %vm326_vm0, %v7283_v23 }
  0x5e   :  { %6455 = vmatmul.mubr.msk.bf16.gmra.mxu0 %vm326_vm0, %v7284_v24 }
  0x5f   :  { %6458 = vmatprep.mubr.msk.bf16.mxu0 %vm326_vm0, %v7285_v25 }
  0x66   :  { %6459 = vmatmul.mubr.msk.bf16.gmra.mxu0 %vm326_vm0, %v7286_v26 }
  0x67   :  { %6462 = vmatprep.mubr.msk.bf16.mxu0 %vm326_vm0, %v7287_v27 }
  0x6e   :  { %6463 = vmatmul.mubr.msk.bf16.gmra.mxu0 %vm326_vm0, %v7288_v28 }
  0x6f   :  { %6466 = vmatprep.mubr.msk.bf16.mxu0 %vm326_vm0, %v7289_v29 }
  0x76   :  { %6467 = vmatmul.mubr.msk.bf16.gmra.mxu0 %vm326_vm0, %v7290_v30 }
  0x77   :  { %6470 = vmatprep.mubr.msk.bf16.mxu0 %vm326_vm0, %v7291_v31 }
  0x7e   :  { %6471 = vmatmul.mubr.msk.bf16.gmra.mxu0 %vm326_vm0, %v7292_v32 }
  0xc6   :  { %v7629_v34 = vpop.f32.mrf.mxu0 }
  0xc7   :  { %v849_v39 = vmul.f32 %v7629_v34, %v7629_v34  ;;  %v717_v45 = vsel %vm53_vm1, %v7629_v34, 0.0 }
  0xc8   :  { %v7631_v35 = vpop.f32.mrf.mxu0 }
  0xc9   :  { %v847_v37 = vmul.f32 %v7631_v35, %v7631_v35  ;;  %v714_v40 = vsel %vm53_vm1, %v7631_v35, 0.0  ;;  %v914_v52 = vsel %vm53_vm1, %v849_v39, 0.0 }
  0xca   :  { %v7633_v36 = vpop.f32.mrf.mxu0 }
  0xcb   :  { %v911_v46 = vsel %vm53_vm1, %v847_v37, 0.0  ;;  %v850_v47 = vmul.f32 %v7633_v36, %v7633_v36  ;;  %v719_v53 = vsel %vm53_vm1, %v7633_v36, 0.0 }
  0xcc   :  { %v7637_v38 = vpop.f32.mrf.mxu0 }
  0xcd   :  { %v715_v41 = vsel %vm53_vm1, %v7637_v38, 0.0  ;;  %v848_v42 = vmul.f32 %v7637_v38, %v7637_v38  ;;  %v916_v58 = vsel %vm53_vm1, %v850_v47, 0.0 }
  0xce   :  { %v716_v43 = vadd.f32 %v715_v41, %v714_v40  ;;  %v7647_v44 = vpop.f32.mrf.mxu0 }
  0xcf   :  { %v912_v48 = vsel %vm53_vm1, %v848_v42, 0.0  ;;  %v853_v63 = vmul.f32 %v7647_v44, %v7647_v44  ;;  %v725_v6 = vsel %vm53_vm1, %v7647_v44, 0.0 }
  0xd0   :  { %v913_v49 = vadd.f32 %v912_v48, %v911_v46  ;;  %v7655_v50 = vpop.f32.mrf.mxu0  ;;  %v718_v51 = vadd.f32 %v717_v45, %v716_v43 }
  0xd1   :  { %v851_v54 = vmul.f32 %v7655_v50, %v7655_v50  ;;  %v721_v59 = vsel %vm53_vm1, %v7655_v50, 0.0  ;;  %v922_v12 = vsel %vm53_vm1, %v853_v63, 0.0 }
  0xd2   :  { %v720_v55 = vadd.f32 %v719_v53, %v718_v51  ;;  %v915_v56 = vadd.f32 %v914_v52, %v913_v49  ;;  %v7662_v57 = vpop.f32.mrf.mxu0 }
  0xd3   :  { %v918_v0 = vsel %vm53_vm1, %v851_v54, 0.0  ;;  %v854_v7 = vmul.f32 %v7662_v57, %v7662_v57  ;;  %v727_v13 = vsel %vm53_vm1, %v7662_v57, 0.0 }
  0xd4   :  { %v722_v60 = vadd.f32 %v721_v59, %v720_v55  ;;  %v917_v61 = vadd.f32 %v916_v58, %v915_v56  ;;  %v7667_v62 = vpop.f32.mrf.mxu0 }
  0xd5   :  { %v723_v1 = vsel %vm53_vm1, %v7667_v62, 0.0  ;;  %v852_v2 = vmul.f32 %v7667_v62, %v7667_v62  ;;  %v924_v18 = vsel %vm53_vm1, %v854_v7, 0.0 }
  0xd6   :  { %v919_v3 = vadd.f32 %v918_v0, %v917_v61  ;;  %v724_v4 = vadd.f32 %v723_v1, %v722_v60  ;;  %v7676_v5 = vpop.f32.mrf.mxu0 }
  0xd7   :  { %v920_v8 = vsel %vm53_vm1, %v852_v2, 0.0  ;;  %v857_v23 = vmul.f32 %v7676_v5, %v7676_v5  ;;  %v733_v30 = vsel %vm53_vm1, %v7676_v5, 0.0 }
  0xd8   :  { %v921_v9 = vadd.f32 %v920_v8, %v919_v3  ;;  %v7683_v10 = vpop.f32.mrf.mxu0  ;;  %v726_v11 = vadd.f32 %v725_v6, %v724_v4 }
  0xd9   :  { %v855_v14 = vmul.f32 %v7683_v10, %v7683_v10  ;;  %v729_v19 = vsel %vm53_vm1, %v7683_v10, 0.0  ;;  %v930_v41 = vsel %vm53_vm1, %v857_v23, 0.0 }
  0xda   :  { %v728_v15 = vadd.f32 %v727_v13, %v726_v11  ;;  %v923_v16 = vadd.f32 %v922_v12, %v921_v9  ;;  %v7690_v17 = vpop.f32.mrf.mxu0 }
  0xdb   :  { %v926_v24 = vsel %vm53_vm1, %v855_v14, 0.0  ;;  %v858_v31 = vmul.f32 %v7690_v17, %v7690_v17  ;;  %v735_v42 = vsel %vm53_vm1, %v7690_v17, 0.0 }
  0xdc   :  { %v730_v20 = vadd.f32 %v729_v19, %v728_v15  ;;  %v925_v21 = vadd.f32 %v924_v18, %v923_v16  ;;  %v7695_v22 = vpop.f32.mrf.mxu0 }
  0xdd   :  { %v731_v25 = vsel %vm53_vm1, %v7695_v22, 0.0  ;;  %v856_v26 = vmul.f32 %v7695_v22, %v7695_v22  ;;  %v932_v48 = vsel %vm53_vm1, %v858_v31, 0.0 }
  0xde   :  { %v927_v27 = vadd.f32 %v926_v24, %v925_v21  ;;  %v732_v28 = vadd.f32 %v731_v25, %v730_v20  ;;  %v7704_v29 = vpop.f32.mrf.mxu0 }
  0xdf   :  { %v928_v32 = vsel %vm53_vm1, %v856_v26, 0.0  ;;  %v861_v54 = vmul.f32 %v7704_v29, %v7704_v29  ;;  %v741_v63 = vsel %vm53_vm1, %v7704_v29, 0.0 }
  0xe0   :  { %v929_v37 = vadd.f32 %v928_v32, %v927_v27  ;;  %v7711_v39 = vpop.f32.mrf.mxu0  ;;  %v734_v40 = vadd.f32 %v733_v30, %v732_v28 }
  0xe1   :  { %v859_v43 = vmul.f32 %v7711_v39, %v7711_v39  ;;  %v737_v49 = vsel %vm53_vm1, %v7711_v39, 0.0  ;;  %v938_v6 = vsel %vm53_vm1, %v861_v54, 0.0 }
  0xe2   :  { %v736_v45 = vadd.f32 %v735_v42, %v734_v40  ;;  %v931_v46 = vadd.f32 %v930_v41, %v929_v37  ;;  %v7718_v47 = vpop.f32.mrf.mxu0 }
  0xe3   :  { %v934_v55 = vsel %vm53_vm1, %v859_v43, 0.0  ;;  %v862_v0 = vmul.f32 %v7718_v47, %v7718_v47  ;;  %v743_v7 = vsel %vm53_vm1, %v7718_v47, 0.0 }
  0xe4   :  { %v738_v51 = vadd.f32 %v737_v49, %v736_v45  ;;  %v933_v52 = vadd.f32 %v932_v48, %v931_v46  ;;  %v7723_v53 = vpop.f32.mrf.mxu0 }
  0xe5   :  { %v739_v56 = vsel %vm53_vm1, %v7723_v53, 0.0  ;;  %v860_v58 = vmul.f32 %v7723_v53, %v7723_v53  ;;  %v940_v13 = vsel %vm53_vm1, %v862_v0, 0.0 }
  0xe6   :  { %v935_v59 = vadd.f32 %v934_v55, %v933_v52  ;;  %v740_v60 = vadd.f32 %v739_v56, %v738_v51  ;;  %v7732_v61 = vpop.f32.mrf.mxu0 }
  0xe7   :  { %v936_v1 = vsel %vm53_vm1, %v860_v58, 0.0  ;;  %v865_v19 = vmul.f32 %v7732_v61, %v7732_v61  ;;  %v749_v27 = vsel %vm53_vm1, %v7732_v61, 0.0 }
  0xe8   :  { %v937_v2 = vadd.f32 %v936_v1, %v935_v59  ;;  %v7739_v3 = vpop.f32.mrf.mxu0  ;;  %v742_v4 = vadd.f32 %v741_v63, %v740_v60 }
  0xe9   :  { %v863_v8 = vmul.f32 %v7739_v3, %v7739_v3  ;;  %v745_v14 = vsel %vm53_vm1, %v7739_v3, 0.0  ;;  %v946_v40 = vsel %vm53_vm1, %v865_v19, 0.0 }
  0xea   :  { %v744_v9 = vadd.f32 %v743_v7, %v742_v4  ;;  %v939_v11 = vadd.f32 %v938_v6, %v937_v2  ;;  %v7746_v12 = vpop.f32.mrf.mxu0 }
  0xeb   :  { %v942_v20 = vsel %vm53_vm1, %v863_v8, 0.0  ;;  %v866_v28 = vmul.f32 %v7746_v12, %v7746_v12  ;;  %v751_v41 = vsel %vm53_vm1, %v7746_v12, 0.0 }
  0xec   :  { %v746_v15 = vadd.f32 %v745_v14, %v744_v9  ;;  %v941_v16 = vadd.f32 %v940_v13, %v939_v11  ;;  %v7751_v18 = vpop.f32.mrf.mxu0 }
  0xed   :  { %v747_v21 = vsel %vm53_vm1, %v7751_v18, 0.0  ;;  %v864_v23 = vmul.f32 %v7751_v18, %v7751_v18  ;;  %v948_v48 = vsel %vm53_vm1, %v866_v28, 0.0 }
  0xee   :  { %v943_v24 = vadd.f32 %v942_v20, %v941_v16  ;;  %v748_v25 = vadd.f32 %v747_v21, %v746_v15  ;;  %v7760_v26 = vpop.f32.mrf.mxu0 }
  0xef   :  { %v944_v30 = vsel %vm53_vm1, %v864_v23, 0.0  ;;  %v869_v55 = vmul.f32 %v7760_v26, %v7760_v26  ;;  %v757_v1 = vsel %vm53_vm1, %v7760_v26, 0.0 }
  0xf0   :  { %v945_v31 = vadd.f32 %v944_v30, %v943_v24  ;;  %v7767_v32 = vpop.f32.mrf.mxu0  ;;  %v750_v37 = vadd.f32 %v749_v27, %v748_v25 }
  0xf1   :  { %v867_v42 = vmul.f32 %v7767_v32, %v7767_v32  ;;  %v753_v49 = vsel %vm53_vm1, %v7767_v32, 0.0  ;;  %v954_v9 = vsel %vm53_vm1, %v869_v55, 0.0 }
  0xf2   :  { %v752_v43 = vadd.f32 %v751_v41, %v750_v37  ;;  %v947_v45 = vadd.f32 %v946_v40, %v945_v31  ;;  %v7774_v46 = vpop.f32.mrf.mxu0 }
  0xf3   :  { %v950_v56 = vsel %vm53_vm1, %v867_v42, 0.0  ;;  %v870_v2 = vmul.f32 %v7774_v46, %v7774_v46  ;;  %v759_v11 = vsel %vm53_vm1, %v7774_v46, 0.0 }
  0xf4   :  { %v754_v51 = vadd.f32 %v753_v49, %v752_v43  ;;  %v949_v52 = vadd.f32 %v948_v48, %v947_v45  ;;  %v7779_v54 = vpop.f32.mrf.mxu0 }
  0xf5   :  { %v755_v58 = vsel %vm53_vm1, %v7779_v54, 0.0  ;;  %v868_v59 = vmul.f32 %v7779_v54, %v7779_v54  ;;  %v956_v19 = vsel %vm53_vm1, %v870_v2, 0.0 }
  0xf6   :  { %v951_v60 = vadd.f32 %v950_v56, %v949_v52  ;;  %v756_v63 = vadd.f32 %v755_v58, %v754_v51  ;;  %v7788_v0 = vpop.f32.mrf.mxu0 }
  0xf7   :  { %v952_v4 = vsel %vm53_vm1, %v868_v59, 0.0  ;;  %v873_v25 = vmul.f32 %v7788_v0, %v7788_v0  ;;  %v765_v41 = vsel %vm53_vm1, %v7788_v0, 0.0 }
  0xf8   :  { %v953_v6 = vadd.f32 %v952_v4, %v951_v60  ;;  %v7795_v7 = vpop.f32.mrf.mxu0  ;;  %v758_v8 = vadd.f32 %v757_v1, %v756_v63 }
  0xf9   :  { %v871_v13 = vmul.f32 %v7795_v7, %v7795_v7  ;;  %v761_v20 = vsel %vm53_vm1, %v7795_v7, 0.0  ;;  %v962_v51 = vsel %vm53_vm1, %v873_v25, 0.0 }
  0xfa   :  { %v760_v14 = vadd.f32 %v759_v11, %v758_v8  ;;  %v955_v15 = vadd.f32 %v954_v9, %v953_v6  ;;  %v7802_v16 = vpop.f32.mrf.mxu0 }
  0xfb   :  { %v958_v27 = vsel %vm53_vm1, %v871_v13, 0.0  ;;  %v874_v42 = vmul.f32 %v7802_v16, %v7802_v16  ;;  %v767_v52 = vsel %vm53_vm1, %v7802_v16, 0.0 }
  0xfc   :  { %v762_v21 = vadd.f32 %v761_v20, %v760_v14  ;;  %v957_v23 = vadd.f32 %v956_v19, %v955_v15  ;;  %v7807_v24 = vpop.f32.mrf.mxu0 }
  0xfd   :  { %v763_v28 = vsel %vm53_vm1, %v7807_v24, 0.0  ;;  %v872_v30 = vmul.f32 %v7807_v24, %v7807_v24  ;;  %v964_v60 = vsel %vm53_vm1, %v874_v42, 0.0 }
  0xfe   :  { %v959_v31 = vadd.f32 %v958_v27, %v957_v23  ;;  %v764_v37 = vadd.f32 %v763_v28, %v762_v21  ;;  %v7816_v40 = vpop.f32.mrf.mxu0 }
  0xff   :  { %11052 = vst [vmem:[#allocation6_spill] sm:$0xff] %v7816_v40  ;;  %v960_v43 = vsel %vm53_vm1, %v872_v30, 0.0  ;;  %v877_v6 = vmul.f32 %v7816_v40, %v7816_v40  ;;  %v773_v19 = vsel %vm53_vm1, %v7816_v40, 0.0 }
 0x100   :  { %v961_v45 = vadd.f32 %v960_v43, %v959_v31  ;;  %v7823_v48 = vpop.f32.mrf.mxu0  ;;  %v766_v49 = vadd.f32 %v765_v41, %v764_v37 }
 0x101   :  { %11053 = vst [vmem:[#allocation7_spill] sm:$0xff] %v7823_v48  ;;  %v875_v55 = vmul.f32 %v7823_v48, %v7823_v48  ;;  %v769_v63 = vsel %vm53_vm1, %v7823_v48, 0.0  ;;  %v970_v28 = vsel %vm53_vm1, %v877_v6, 0.0 }
 0x102   :  { %v768_v56 = vadd.f32 %v767_v52, %v766_v49  ;;  %v963_v58 = vadd.f32 %v962_v51, %v961_v45  ;;  %v7830_v59 = vpop.f32.mrf.mxu0 }
 0x103   :  { %11054 = vst [vmem:[#allocation8_spill] sm:$0xff] %v7830_v59  ;;  %v966_v8 = vsel %vm53_vm1, %v875_v55, 0.0  ;;  %v878_v20 = vmul.f32 %v7830_v59, %v7830_v59  ;;  %v775_v30 = vsel %vm53_vm1, %v7830_v59, 0.0 }
 0x104   :  { %v770_v1 = vadd.f32 %v769_v63, %v768_v56  ;;  %v965_v2 = vadd.f32 %v964_v60, %v963_v58  ;;  %v7835_v4 = vpop.f32.mrf.mxu0 }
 0x105   :  { %v771_v9 = vsel %vm53_vm1, %v7835_v4, 0.0  ;;  %v876_v11 = vmul.f32 %v7835_v4, %v7835_v4  ;;  %v972_v43 = vsel %vm53_vm1, %v878_v20, 0.0 }
 0x106   :  { %v967_v13 = vadd.f32 %v966_v8, %v965_v2  ;;  %v772_v14 = vadd.f32 %v771_v9, %v770_v1  ;;  %v7844_v15 = vpop.f32.mrf.mxu0 }
 0x107   :  { %11055 = vst [vmem:[#allocation9_spill] sm:$0xff] %v7844_v15  ;;  %v968_v21 = vsel %vm53_vm1, %v876_v11, 0.0  ;;  %v881_v55 = vmul.f32 %v7844_v15, %v7844_v15  ;;  %v781_v6 = vsel %vm53_vm1, %v7844_v15, 0.0 }
 0x108   :  { %v969_v23 = vadd.f32 %v968_v21, %v967_v13  ;;  %v7851_v25 = vpop.f32.mrf.mxu0  ;;  %v774_v27 = vadd.f32 %v773_v19, %v772_v14 }
 0x109   :  { %11056 = vst [vmem:[#allocation10_spill] sm:$0xff] %v7851_v25  ;;  %v879_v31 = vmul.f32 %v7851_v25, %v7851_v25  ;;  %v777_v45 = vsel %vm53_vm1, %v7851_v25, 0.0  ;;  %v978_v19 = vsel %vm53_vm1, %v881_v55, 0.0 }
 0x10a   :  { %v776_v37 = vadd.f32 %v775_v30, %v774_v27  ;;  %v971_v41 = vadd.f32 %v970_v28, %v969_v23  ;;  %v7858_v42 = vpop.f32.mrf.mxu0 }
 0x10b   :  { %11057 = vst [vmem:[#allocation11_spill] sm:$0xff] %v7858_v42  ;;  %v974_v56 = vsel %vm53_vm1, %v879_v31, 0.0  ;;  %v882_v8 = vmul.f32 %v7858_v42, %v7858_v42  ;;  %v783_v20 = vsel %vm53_vm1, %v7858_v42, 0.0 }
 0x10c   :  { %v778_v49 = vadd.f32 %v777_v45, %v776_v37  ;;  %v973_v51 = vadd.f32 %v972_v43, %v971_v41  ;;  %v7863_v52 = vpop.f32.mrf.mxu0 }
 0x10d   :  { %11058 = vst [vmem:[#allocation12_spill] sm:$0xff] %v7863_v52  ;;  %v779_v58 = vsel %vm53_vm1, %v7863_v52, 0.0  ;;  %v880_v60 = vmul.f32 %v7863_v52, %v7863_v52  ;;  %v980_v30 = vsel %vm53_vm1, %v882_v8, 0.0 }
 0x10e   :  { %v975_v63 = vadd.f32 %v974_v56, %v973_v51  ;;  %v780_v1 = vadd.f32 %v779_v58, %v778_v49  ;;  %v7872_v2 = vpop.f32.mrf.mxu0 }
 0x10f   :  { %11059 = vst [vmem:[#allocation13_spill] sm:$0xff] %v7872_v2  ;;  %v976_v9 = vsel %vm53_vm1, %v880_v60, 0.0  ;;  %v885_v45 = vmul.f32 %v7872_v2, %v7872_v2 }
 0x110   :  { %v977_v11 = vadd.f32 %v976_v9, %v975_v63  ;;  %v7879_v13 = vpop.f32.mrf.mxu0  ;;  %v782_v14 = vadd.f32 %v781_v6, %v780_v1  ;;  %v789_v63 = vsel %vm53_vm1, %v7872_v2, 0.0 }
 0x111   :  { %11060 = vst [vmem:[#allocation14_spill] sm:$0xff] %v7879_v13  ;;  %v883_v21 = vmul.f32 %v7879_v13, %v7879_v13  ;;  %v785_v31 = vsel %vm53_vm1, %v7879_v13, 0.0 }
 0x112   :  { %v784_v23 = vadd.f32 %v783_v20, %v782_v14  ;;  %v979_v27 = vadd.f32 %v978_v19, %v977_v11  ;;  %v7886_v28 = vpop.f32.mrf.mxu0  ;;  %v986_v14 = vsel %vm53_vm1, %v885_v45, 0.0 }
 0x113   :  { %11061 = vst [vmem:[#allocation15_spill] sm:$0xff] %v7886_v28  ;;  %v982_v49 = vsel %vm53_vm1, %v883_v21, 0.0  ;;  %v886_v1 = vmul.f32 %v7886_v28, %v7886_v28  ;;  %v791_v19 = vsel %vm53_vm1, %v7886_v28, 0.0 }
 0x114   :  { %v786_v37 = vadd.f32 %v785_v31, %v784_v23  ;;  %v981_v41 = vadd.f32 %v980_v30, %v979_v27  ;;  %v7891_v43 = vpop.f32.mrf.mxu0 }
 0x115   :  { %11062 = vst [vmem:[#allocation16_spill] sm:$0xff] %v7891_v43  ;;  %v787_v51 = vsel %vm53_vm1, %v7891_v43, 0.0  ;;  %v884_v55 = vmul.f32 %v7891_v43, %v7891_v43  ;;  %v988_v30 = vsel %vm53_vm1, %v886_v1, 0.0 }
 0x116   :  { %v983_v56 = vadd.f32 %v982_v49, %v981_v41  ;;  %v788_v58 = vadd.f32 %v787_v51, %v786_v37  ;;  %v7900_v60 = vpop.f32.mrf.mxu0 }
 0x117   :  { %11063 = vst [vmem:[#allocation17_spill] sm:$0xff] %v7900_v60  ;;  %v984_v6 = vsel %vm53_vm1, %v884_v55, 0.0  ;;  %v889_v45 = vmul.f32 %v7900_v60, %v7900_v60 }
 0x118   :  { %v985_v8 = vadd.f32 %v984_v6, %v983_v56  ;;  %v7907_v9 = vpop.f32.mrf.mxu0  ;;  %v790_v11 = vadd.f32 %v789_v63, %v788_v58  ;;  %v797_v6 = vsel %vm53_vm1, %v7900_v60, 0.0 }
 0x119   :  { %11064 = vst [vmem:[#allocation18_spill] sm:$0xff] %v7907_v9  ;;  %v887_v20 = vmul.f32 %v7907_v9, %v7907_v9  ;;  %v793_v31 = vsel %vm53_vm1, %v7907_v9, 0.0 }
 0x11a   :  { %v792_v21 = vadd.f32 %v791_v19, %v790_v11  ;;  %v987_v23 = vadd.f32 %v986_v14, %v985_v8  ;;  %v7914_v27 = vpop.f32.mrf.mxu0 }
 0x11b   :  { %11065 = vst [vmem:[#allocation19_spill] sm:$0xff] %v7914_v27  ;;  %v990_v51 = vsel %vm53_vm1, %v887_v20, 0.0  ;;  %v890_v8 = vmul.f32 %v7914_v27, %v7914_v27 }
 0x11c   :  { %v794_v37 = vadd.f32 %v793_v31, %v792_v21  ;;  %v989_v41 = vadd.f32 %v988_v30, %v987_v23  ;;  %v7919_v49 = vpop.f32.mrf.mxu0  ;;  %v994_v21 = vsel %vm53_vm1, %v889_v45, 0.0  ;;  %v799_v23 = vsel %vm53_vm1, %v7914_v27, 0.0 }
 0x11d   :  { %11066 = vst [vmem:[#allocation20_spill] sm:$0xff] %v7919_v49  ;;  %v795_v55 = vsel %vm53_vm1, %v7919_v49, 0.0  ;;  %v888_v56 = vmul.f32 %v7919_v49, %v7919_v49 }
 0x11e   :  { %v991_v58 = vadd.f32 %v990_v51, %v989_v41  ;;  %v796_v63 = vadd.f32 %v795_v55, %v794_v37  ;;  %v7928_v1 = vpop.f32.mrf.mxu0  ;;  %v996_v51 = vsel %vm53_vm1, %v890_v8, 0.0 }
 0x11f   :  { %11067 = vst [vmem:[#allocation21_spill] sm:$0xff] %v7928_v1  ;;  %v992_v11 = vsel %vm53_vm1, %v888_v56, 0.0  ;;  %v893_v45 = vmul.f32 %v7928_v1, %v7928_v1 }
 0x120   :  { %v993_v14 = vadd.f32 %v992_v11, %v991_v58  ;;  %v7935_v19 = vpop.f32.mrf.mxu0  ;;  %v798_v20 = vadd.f32 %v797_v6, %v796_v63 }
 0x121   :  { %11068 = vst [vmem:[#allocation22_spill] sm:$0xff] %v7935_v19  ;;  %v891_v30 = vmul.f32 %v7935_v19, %v7935_v19  ;;  %v801_v55 = vsel %vm53_vm1, %v7935_v19, 0.0  ;;  %v1002_v33 = vsel %vm53_vm1, %v893_v45, 0.0 }
 0x122   :  { %v800_v31 = vadd.f32 %v799_v23, %v798_v20  ;;  %v995_v37 = vadd.f32 %v994_v21, %v993_v14  ;;  %v7942_v41 = vpop.f32.mrf.mxu0  ;;  %v805_v23 = vsel %vm53_vm1, %v7928_v1, 0.0 }
 0x123   :  { %11069 = vst [vmem:[#allocation23_spill] sm:$0xff] %v7942_v41  ;;  %v998_v6 = vsel %vm53_vm1, %v891_v30, 0.0 }
 0x124   :  { %v802_v56 = vadd.f32 %v801_v55, %v800_v31  ;;  %v997_v58 = vadd.f32 %v996_v51, %v995_v37  ;;  %v7947_v63 = vpop.f32.mrf.mxu0  ;;  %v894_v31 = vmul.f32 %v7942_v41, %v7942_v41 }
 0x125   :  { %v803_v11 = vsel %vm53_vm1, %v7947_v63, 0.0  ;;  %v892_v14 = vmul.f32 %v7947_v63, %v7947_v63 }
 0x126   :  { %v999_v20 = vadd.f32 %v998_v6, %v997_v58  ;;  %v804_v8 = vadd.f32 %v803_v11, %v802_v56  ;;  %v7956_v21 = vpop.f32.mrf.mxu0  ;;  %v807_v58 = vsel %vm53_vm1, %v7942_v41, 0.0  ;;  %v1004_v19 = vsel %vm53_vm1, %v894_v31, 0.0 }
 0x127   :  { %11070 = vst [vmem:[#allocation24_spill] sm:$0xff] %v7956_v21  ;;  %v1000_v37 = vsel %vm53_vm1, %v892_v14, 0.0  ;;  %v897_v45 = vmul.f32 %v7956_v21, %v7956_v21 }
 0x128   :  { %v1001_v51 = vadd.f32 %v1000_v37, %v999_v20  ;;  %v7963_v30 = vpop.f32.mrf.mxu0  ;;  %v806_v55 = vadd.f32 %v805_v23, %v804_v8 }
 0x129   :  { %11071 = vst [vmem:[#allocation25_spill] sm:$0xff] %v7963_v30  ;;  %v895_v56 = vmul.f32 %v7963_v30, %v7963_v30  ;;  %v809_v14 = vsel %vm53_vm1, %v7963_v30, 0.0 }
 0x12a   :  { %v808_v6 = vadd.f32 %v807_v58, %v806_v55  ;;  %v1003_v11 = vadd.f32 %v1002_v33, %v1001_v51  ;;  %v7970_v1 = vpop.f32.mrf.mxu0 }
 0x12b   :  { %11072 = vst [vmem:[#allocation26_spill] sm:$0xff] %v7970_v1  ;;  %v1006_v23 = vsel %vm53_vm1, %v895_v56, 0.0 }
 0x12c   :  { %v810_v20 = vadd.f32 %v809_v14, %v808_v6  ;;  %v1005_v37 = vadd.f32 %v1004_v19, %v1003_v11  ;;  %v7975_v8 = vpop.f32.mrf.mxu0  ;;  %v813_v19 = vsel %vm53_vm1, %v7956_v21, 0.0  ;;  %v898_v6 = vmul.f32 %v7970_v1, %v7970_v1 }
 0x12d   :  { %11073 = vst [vmem:[#allocation27_spill] sm:$0xff] %v7975_v8  ;;  %v811_v55 = vsel %vm53_vm1, %v7975_v8, 0.0  ;;  %v896_v33 = vmul.f32 %v7975_v8, %v7975_v8  ;;  %v7293_v8 = vld [vmem:[%s10977_s4 + $0x18] sm:$0xff]  }
 0x12e   :  { %v1007_v51 = vadd.f32 %v1006_v23, %v1005_v37  ;;  %v812_v31 = vadd.f32 %v811_v55, %v810_v20  ;;  %v7984_v58 = vpop.f32.mrf.mxu0  ;;  %v11076_v20 = vmov 0.0   ;;  %v1010_v37 = vsel %vm53_vm1, %v897_v45, 0.0  ;;  %6475 = vmatpush3.bf16.msra.mxu0 %v7293_v8  ;;  %7253 = vmatpush3.bf16.msra.mxu1 %v7293_v8 }
 0x12f   :  { %11074 = vst [vmem:[#allocation28_spill] sm:$0xff] %v7984_v58  ;;  %v1008_v11 = vsel %vm53_vm1, %v896_v33, 0.0  ;;  %6478 = vmatprep.mubr.msk.bf16.mxu0 %vm7358_vm2, %v11076_v20  ;;  %6482 = vmatprep.mubr.msk.bf16.mxu1 %vm7358_vm2, %v11076_v20  ;;  %v815_v23 = vsel %vm53_vm1, %v7970_v1, 0.0  ;;  %v901_v8 = vmul.f32 %v7984_v58, %v7984_v58 }
 0x130   :  { %v1009_v14 = vadd.f32 %v1008_v11, %v1007_v51  ;;  %v7991_v56 = vpop.f32.mrf.mxu0  ;;  %v814_v41 = vadd.f32 %v813_v19, %v812_v31  ;;  %v7294_v19 = vld [vmem:[%s10977_s4 + $0x10] sm:$0xff]   ;;  %v1012_v11 = vsel %vm53_vm1, %v898_v6, 0.0  ;;  %6476 = vmatprep.subr.bf16.mxu0 %v11076_v20  ;;  %7252 = vmatprep.subr.bf16.mxu1 %v11076_v20 }
 0x131   :  { %11075 = vst [vmem:[#allocation29_spill] sm:$0xff] %v7991_v56  ;;  %v899_v55 = vmul.f32 %v7991_v56, %v7991_v56  ;;  %v817_v45 = vsel %vm53_vm1, %v7991_v56, 0.0 }
 0x132   :  { %v816_v33 = vadd.f32 %v815_v23, %v814_v41  ;;  %v1011_v51 = vadd.f32 %v1010_v37, %v1009_v14  ;;  %v8005_v31 = vpop.f32.mrf.mxu0  ;;  %6477 = vmatpush3.bf16.msra.mxu0 %v7294_v19  ;;  %7254 = vmatpush3.bf16.msra.mxu1 %v7294_v19 }
 0x133   :  { %11077 = vst [vmem:[#allocation30_spill] sm:$0xff] %v8005_v31  ;;  %v1014_v37 = vsel %vm53_vm1, %v899_v55, 0.0  ;;  %6586 = vmatprep.subr.bf16.mxu0 %v11076_v20  ;;  %6530 = vmatprep.subr.bf16.mxu1 %v11076_v20  ;;  %v823_v19 = vsel %vm53_vm1, %v8005_v31, 0.0 }
 0x134   :  { %v818_v21 = vadd.f32 %v817_v45, %v816_v33  ;;  %v1013_v41 = vadd.f32 %v1012_v11, %v1011_v51  ;;  %v8015_v14 = vpop.f32.mrf.mxu0  ;;  %v821_v33 = vsel %vm53_vm1, %v7984_v58, 0.0  ;;  %v902_v51 = vmul.f32 %v8005_v31, %v8005_v31 }
 0x135   :  { %11078 = vst [vmem:[#allocation31_spill] sm:$0xff] %v8015_v14  ;;  %v819_v23 = vsel %vm53_vm1, %v8015_v14, 0.0  ;;  %v900_v6 = vmul.f32 %v8015_v14, %v8015_v14 }
 0x136   :  { %v1015_v27 = vadd.f32 %v1014_v37, %v1013_v41  ;;  %v820_v60 = vadd.f32 %v819_v23, %v818_v21  ;;  %v8024_v49 = vpop.f32.mrf.mxu0  ;;  %v1018_v41 = vsel %vm53_vm1, %v901_v8, 0.0 }
 0x137   :  { %11079 = vst [vmem:[#allocation32_spill] sm:$0xff] %v8024_v49  ;;  %v1016_v55 = vsel %vm53_vm1, %v900_v6, 0.0  ;;  %v1020_v6 = vsel %vm53_vm1, %v902_v51, 0.0  ;;  %v905_v8 = vmul.f32 %v8024_v49, %v8024_v49 }
 0x138   :  { %v1017_v11 = vadd.f32 %v1016_v55, %v1015_v27  ;;  %v8033_v45 = vpop.f32.mrf.mxu0  ;;  %v822_v21 = vadd.f32 %v821_v33, %v820_v60 }
 0x139   :  { %11080 = vst [vmem:[#allocation33_spill] sm:$0xff] %v8033_v45  ;;  %v903_v37 = vmul.f32 %v8033_v45, %v8033_v45  ;;  %v825_v27 = vsel %vm53_vm1, %v8033_v45, 0.0  ;;  %v1026_v2 = vsel %vm53_vm1, %v905_v8, 0.0 }
 0x13a   :  { %v824_v23 = vadd.f32 %v823_v19, %v822_v21  ;;  %v1019_v14 = vadd.f32 %v1018_v41, %v1017_v11  ;;  %v8040_v9 = vpop.f32.mrf.mxu0 }
 0x13b   :  { %11081 = vst [vmem:[#allocation34_spill] sm:$0xff] %v8040_v9  ;;  %v1022_v33 = vsel %vm53_vm1, %v903_v37, 0.0 }
 0x13c   :  { %v826_v55 = vadd.f32 %v825_v27, %v824_v23  ;;  %v1021_v20 = vadd.f32 %v1020_v6, %v1019_v14  ;;  %v8045_v60 = vpop.f32.mrf.mxu0  ;;  %v829_v14 = vsel %vm53_vm1, %v8024_v49, 0.0  ;;  %v906_v23 = vmul.f32 %v8040_v9, %v8040_v9  ;;  %v11108_v31 = vld [vmem:[#allocation31_spill] sm:$0xff] }
 0x13d   :  { %11082 = vst [vmem:[#allocation35_spill] sm:$0xff] %v8045_v60  ;;  %v827_v21 = vsel %vm53_vm1, %v8045_v60, 0.0  ;;  %v904_v11 = vmul.f32 %v8045_v60, %v8045_v60 }
 0x13e   :  { %v1023_v41 = vadd.f32 %v1022_v33, %v1021_v20  ;;  %v828_v51 = vadd.f32 %v827_v21, %v826_v55  ;;  %v8054_v19 = vpop.f32.mrf.mxu0  ;;  %v831_v20 = vsel %vm53_vm1, %v8040_v9, 0.0  ;;  %v1028_v43 = vsel %vm53_vm1, %v906_v23, 0.0  ;;  %v11106_v9 = vld [vmem:[#allocation27_spill] sm:$0xff] }
 0x13f   :  { %11083 = vst [vmem:[#allocation36_spill] sm:$0xff] %v8054_v19  ;;  %v1024_v6 = vsel %vm53_vm1, %v904_v11, 0.0  ;;  %v909_v8 = vmul.f32 %v8054_v19, %v8054_v19 }
 0x140   :  { %v1025_v27 = vadd.f32 %v1024_v6, %v1023_v41  ;;  %v8061_v37 = vpop.f32.mrf.mxu0  ;;  %v830_v28 = vadd.f32 %v829_v14, %v828_v51 }
 0x141   :  { %11084 = vst [vmem:[#allocation37_spill] sm:$0xff] %v8061_v37  ;;  %v907_v55 = vmul.f32 %v8061_v37, %v8061_v37  ;;  %v833_v11 = vsel %vm53_vm1, %v8061_v37, 0.0  ;;  %v8226_v37 = vld [vmem:[%s10979_s3] ss:$0 sm:$0xff] }
 0x142   :  { %v832_v33 = vadd.f32 %v831_v20, %v830_v28  ;;  %v1027_v21 = vadd.f32 %v1026_v2, %v1025_v27  ;;  %v8068_v60 = vpop.f32.mrf.mxu0  ;;  %v837_v20 = vsel %vm53_vm1, %v8054_v19, 0.0  ;;  %v11105_v19 = vld [vmem:[#allocation23_spill] sm:$0xff] }
 0x143   :  { %11085 = vst [vmem:[#allocation38_spill] sm:$0xff] %v8068_v60  ;;  %v1030_v14 = vsel %vm53_vm1, %v907_v55, 0.0  ;;  %v1034_v55 = vsel %vm53_vm1, %v909_v8, 0.0  ;;  %v839_v13 = vsel %vm53_vm1, %v8068_v60, 0.0 }
 0x144   :  { %v834_v41 = vadd.f32 %v833_v11, %v832_v33  ;;  %v1029_v6 = vadd.f32 %v1028_v43, %v1027_v21  ;;  %v8073_v51 = vpop.f32.mrf.mxu0  ;;  %v910_v43 = vmul.f32 %v8068_v60, %v8068_v60  ;;  %v1116_v60 = vlaneseq  ;;  %v11109_v58 = vld [vmem:[#allocation35_spill] sm:$0xff] }
 0x145   :  { %v835_v28 = vsel %vm53_vm1, %v8073_v51, 0.0  ;;  %v908_v2 = vmul.f32 %v8073_v51, %v8073_v51 }
 0x146   :  { %v1031_v27 = vadd.f32 %v1030_v14, %v1029_v6  ;;  %v836_v23 = vadd.f32 %v835_v28, %v834_v41  ;;  %v1036_v6 = vsel %vm53_vm1, %v910_v43, 0.0 }
 0x147   :  { %v1032_v33 = vsel %vm53_vm1, %v908_v2, 0.0 }
 0x148   :  { %v838_v21 = vadd.f32 %v837_v20, %v836_v23  ;;  %v1033_v11 = vadd.f32 %v1032_v33, %v1031_v27 }
 0x14a   :  { %v840_v42 = vadd.f32 %v839_v13, %v838_v21  ;;  %v1035_v15 = vadd.f32 %v1034_v55, %v1033_v11  ;;  %v11099_v55 = vld [vmem:[#allocation18_spill] sm:$0xff]  ;;  %v11101_v11 = vld [vmem:[#allocation17_spill] sm:$0xff] }
 0x14c   :  { %v841_v41 = vrot.slane %v840_v42, 4  ;;  %v1037_v14 = vadd.f32 %v1036_v6, %v1035_v15  ;;  %v1117_v15 = vshrl.u32 %v1116_v60, 7  ;;  %v11100_v60 = vld [vmem:[#allocation20_spill] sm:$0xff] }
 0x14e   :  { %v842_v28 = vadd.f32 %v841_v41, %v840_v42  ;;  %v1038_v52 = vrot.slane %v1037_v14, 4  ;;  %v11103_v41 = vld [vmem:[#allocation22_spill] sm:$0xff] }
 0x150   :  { %v843_v25 = vrot.slane %v842_v28, 2  ;;  %v1039_v59 = vadd.f32 %v1038_v52, %v1037_v14 }
 0x152   :  { %v844_v40 = vadd.f32 %v843_v25, %v842_v28  ;;  %v1040_v48 = vrot.slane %v1039_v59, 2  ;;  %v11090_v28 = vld [vmem:[#allocation8_spill] sm:$0xff]  ;;  %v11098_v25 = vld [vmem:[#allocation15_spill] sm:$0xff] }
 0x154   :  { %v845_v2 = vrot.slane %v844_v40, 1  ;;  %v1041_v23 = vadd.f32 %v1040_v48, %v1039_v59  ;;  %v11096_v59 = vld [vmem:[#allocation16_spill] sm:$0xff]  ;;  %v11097_v48 = vld [vmem:[#allocation13_spill] sm:$0xff] }
 0x156   :  { %v846_v27 = vadd.f32 %v845_v2, %v844_v40  ;;  %v1042_v20 = vrot.slane %v1041_v23, 1  ;;  %v8099_v40 = vsub.s32 0, %v1117_v15  ;;  %v11092_v15 = vld [vmem:[#allocation12_spill] sm:$0xff] }
 0x158   :  { %v1043_v8 = vadd.f32 %v1042_v20, %v1041_v23  ;;  %v8091_v33 = vmul.f32 0.001953125, %v846_v27  ;;  %11086 = vst [vmem:[#allocation39_spill] sm:$0xff] %v8099_v40  ;;  %v11094_v27 = vld [vmem:[#allocation11_spill] sm:$0xff]  ;;  %v11095_v23 = vld [vmem:[#allocation14_spill] sm:$0xff]  ;;  %v11104_v20 = vld [vmem:[#allocation21_spill] sm:$0xff] }
 0x15a   :  { %v1045_v13 = vmul.f32 0.001953125, %v1043_v8  ;;  %v1046_v43 = vmul.f32 %v8091_v33, %v8091_v33  ;;  %v11088_v8 = vld [vmem:[#allocation7_spill] sm:$0xff]  ;;  %v11110_v45 = vsub.f32 %v7723_v53, %v8091_v33  ;;  %v11111_v1 = vsub.f32 %v7835_v4, %v8091_v33 }
 0x15b   :  { %v11113_v52 = vsub.f32 %v8073_v51, %v8091_v33  ;;  %v11114_v53 = vsub.f32 %v7631_v35, %v8091_v33  ;;  %v11115_v4 = vsub.f32 %v7637_v38, %v8091_v33  ;;  %v11117_v51 = vsub.f32 %v7633_v36, %v8091_v33 }
 0x15c   :  { %v1047_v21 = vsub.f32 %v1045_v13, %v1046_v43  ;;  %v712_v43 = vld [vmem:[%s10978_s2] sm:$0x1]  ;;  %v11089_v13 = vld [vmem:[#allocation6_spill] sm:$0xff]  ;;  %v11121_v36 = vsub.f32 %v7667_v62, %v8091_v33  ;;  %v11125_v62 = vsub.f32 %v7683_v10, %v8091_v33 }
 0x15e   :  { %v1048_v42 = vadd.f32 1e-05, %v1047_v21  ;;  %v11091_v21 = vld [vmem:[#allocation10_spill] sm:$0xff] }
 0x160   :  { %7347 = vrsqrt.f32 %v1048_v42  ;;  %v11093_v42 = vld [vmem:[#allocation9_spill] sm:$0xff] }
 0x16d   :  { %v7348_v6 = vpop.eup %7347 }
 0x16e   :  { %v1050_v2 = vmul.f32 %v7348_v6, %v712_v43  ;;  %v11102_v6 = vld [vmem:[#allocation19_spill] sm:$0xff]  ;;  %v11112_v43 = vsub.f32 %v7947_v63, %v8091_v33  ;;  %v11116_v63 = vsub.f32 %v7629_v34, %v8091_v33  ;;  %v11119_v34 = vsub.f32 %v7655_v50, %v8091_v33 }
 0x170   :  { %v8215_v14 = vrot.slane %v1050_v2, %v8099_v40  ;;  %v11107_v2 = vld [vmem:[#allocation24_spill] sm:$0xff] }
 0x172   :  { %v1134_v56 = vmul.f32 %v8215_v14, %v11110_v45  ;;  %v1150_v30 = vmul.f32 %v8215_v14, %v11111_v1  ;;  %v1166_v40 = vmul.f32 %v8215_v14, %v11112_v43  ;;  %v1182_v49 = vmul.f32 %v8215_v14, %v11113_v52 }
 0x173   :  { %v8256_v45 = vmul.f32 %v8215_v14, %v11114_v53  ;;  %v8262_v1 = vmul.f32 %v8215_v14, %v11115_v4  ;;  %v8268_v43 = vmul.f32 %v8215_v14, %v11116_v63  ;;  %v8274_v35 = vmul.f32 %v8215_v14, %v11117_v51 }
 0x174   :  { %v1204_v52 = vadd.f32 %v8226_v37, %v1134_v56  ;;  %v1220_v53 = vadd.f32 %v8226_v37, %v1150_v30  ;;  %v1236_v38 = vadd.f32 %v8226_v37, %v1166_v40  ;;  %v1252_v4 = vadd.f32 %v8226_v37, %v1182_v49 }
 0x175   :  { %11118 = vst [vmem:[#allocation7_spill] sm:$0xff] %v8274_v35  ;;  %v8284_v63 = vmul.f32 %v8215_v14, %v11119_v34  ;;  %v8290_v51 = vmul.f32 %v8215_v14, %v11121_v36  ;;  %v11122_v56 = vsub.f32 %v7647_v44, %v8091_v33  ;;  %v11123_v49 = vsub.f32 %v7662_v57, %v8091_v33 }
 0x176   :  { %v1268_v40 = vmax.f32 %v1204_v52, 0.0  ;;  %v1284_v34 = vmax.f32 %v1220_v53, 0.0  ;;  %v1316_v35 = vmax.f32 %v1252_v4, 0.0  ;;  %v8308_v36 = vmul.f32 %v8215_v14, %v11125_v62 }
 0x177   :  { %11120 = vst [vmem:[#allocation6_spill] sm:$0xff] %v8284_v63  ;;  %v8296_v30 = vmul.f32 %v8215_v14, %v11122_v56  ;;  %v8302_v50 = vmul.f32 %v8215_v14, %v11123_v49  ;;  %v1300_v63 = vmax.f32 %v1236_v38, 0.0  ;;  %v11127_v44 = vsub.f32 %v7695_v22, %v8091_v33 }
 0x178   :  { %11126 = vst [vmem:[#allocation10_spill] sm:$0xff] %v8308_v36  ;;  %v11129_v57 = vsub.f32 %v7676_v5, %v8091_v33  ;;  %v11131_v53 = vsub.f32 %v7690_v17, %v8091_v33  ;;  %v1332_v38 = vmax.f32 %v1268_v40, %v1284_v34  ;;  %v11133_v22 = vsub.f32 %v7711_v39, %v8091_v33  ;;  %v11188_v36 = vld [vmem:[#allocation36_spill] sm:$0xff] }
 0x179   :  { %11124 = vst [vmem:[#allocation8_spill] sm:$0xff] %v8302_v50  ;;  %v8314_v56 = vmul.f32 %v8215_v14, %v11127_v44  ;;  %v1348_v4 = vmax.f32 %v1300_v63, %v1316_v35  ;;  %v11134_v62 = vsub.f32 %v7704_v29, %v8091_v33  ;;  %v11135_v44 = vsub.f32 %v7718_v47, %v8091_v33  ;;  %v11190_v50 = vld [vmem:[#allocation38_spill] sm:$0xff] }
 0x17a   :  { %v8320_v52 = vmul.f32 %v8215_v14, %v11129_v57  ;;  %v8326_v10 = vmul.f32 %v8215_v14, %v11131_v53  ;;  %v1133_v49 = vmul.f32 %v8215_v14, %v11133_v22  ;;  %v11136_v57 = vsub.f32 %v7739_v3, %v8091_v33 }
 0x17b   :  { %11128 = vst [vmem:[#allocation12_spill] sm:$0xff] %v8314_v56  ;;  %v1135_v5 = vmul.f32 %v8215_v14, %v11134_v62  ;;  %v1136_v17 = vmul.f32 %v8215_v14, %v11135_v44  ;;  %v11137_v39 = vsub.f32 %v7751_v18, %v8091_v33  ;;  %v11138_v29 = vsub.f32 %v7732_v61, %v8091_v33  ;;  %v11186_v56 = vld [vmem:[#allocation37_spill] sm:$0xff] }
 0x17c   :  { %11130 = vst [vmem:[#allocation9_spill] sm:$0xff] %v8320_v52  ;;  %11132 = vst [vmem:[#allocation11_spill] sm:$0xff] %v8326_v10  ;;  %v1137_v35 = vmul.f32 %v8215_v14, %v11136_v57  ;;  %v1364_v34 = vmax.f32 %v1332_v38, %v1348_v4  ;;  %v11139_v47 = vsub.f32 %v7746_v12, %v8091_v33  ;;  %v11182_v10 = vld [vmem:[#allocation32_spill] sm:$0xff]  ;;  %v11184_v52 = vld [vmem:[#allocation34_spill] sm:$0xff] }
 0x17d   :  { %v1138_v63 = vmul.f32 %v8215_v14, %v11137_v39  ;;  %v1139_v40 = vmul.f32 %v8215_v14, %v11138_v29  ;;  %v11140_v3 = vsub.f32 %v7767_v32, %v8091_v33  ;;  %v11141_v18 = vsub.f32 %v7779_v54, %v8091_v33 }
 0x17e   :  { %v1140_v53 = vmul.f32 %v8215_v14, %v11139_v47  ;;  %v11142_v61 = vsub.f32 %v7760_v26, %v8091_v33  ;;  %v11143_v12 = vsub.f32 %v7774_v46, %v8091_v33  ;;  %v11144_v32 = vsub.f32 %v7795_v7, %v8091_v33  ;;  %1380 = vst.msk [vmem:[#allocation2 + $0xa1] sm:$0xff] %vm53_vm1, %v1364_v34 }
 0x17f   :  { %v1141_v22 = vmul.f32 %v8215_v14, %v11140_v3  ;;  %v1142_v62 = vmul.f32 %v8215_v14, %v11141_v18  ;;  %v11145_v54 = vsub.f32 %v7807_v24, %v8091_v33  ;;  %v11146_v26 = vsub.f32 %v7788_v0, %v8091_v33 }
 0x180   :  { %v1143_v38 = vmul.f32 %v8215_v14, %v11142_v61  ;;  %v1144_v4 = vmul.f32 %v8215_v14, %v11143_v12  ;;  %v1145_v44 = vmul.f32 %v8215_v14, %v11144_v32  ;;  %v11147_v46 = vsub.f32 %v7802_v16, %v8091_v33 }
 0x181   :  { %v1146_v57 = vmul.f32 %v8215_v14, %v11145_v54  ;;  %v1147_v39 = vmul.f32 %v8215_v14, %v11146_v26  ;;  %v11148_v7 = vsub.f32 %v11088_v8, %v8091_v33  ;;  %v11149_v24 = vsub.f32 %v11089_v13, %v8091_v33 }
 0x182   :  { %v1148_v29 = vmul.f32 %v8215_v14, %v11147_v46  ;;  %v11150_v0 = vsub.f32 %v11090_v28, %v8091_v33  ;;  %v11151_v16 = vsub.f32 %v11091_v21, %v8091_v33  ;;  %v11152_v8 = vsub.f32 %v11092_v15, %v8091_v33 }
 0x183   :  { %v1149_v47 = vmul.f32 %v8215_v14, %v11148_v7  ;;  %v1151_v34 = vmul.f32 %v8215_v14, %v11149_v24  ;;  %v11153_v13 = vsub.f32 %v11093_v42, %v8091_v33  ;;  %v11154_v28 = vsub.f32 %v11094_v27, %v8091_v33 }
 0x184   :  { %v1152_v3 = vmul.f32 %v8215_v14, %v11150_v0  ;;  %v1153_v18 = vmul.f32 %v8215_v14, %v11151_v16  ;;  %v1154_v61 = vmul.f32 %v8215_v14, %v11152_v8  ;;  %v11155_v21 = vsub.f32 %v11095_v23, %v8091_v33 }
 0x185   :  { %v1155_v12 = vmul.f32 %v8215_v14, %v11153_v13  ;;  %v1156_v32 = vmul.f32 %v8215_v14, %v11154_v28  ;;  %v11156_v15 = vsub.f32 %v11096_v59, %v8091_v33  ;;  %v11157_v42 = vsub.f32 %v11097_v48, %v8091_v33 }
 0x186   :  { %v1157_v54 = vmul.f32 %v8215_v14, %v11155_v21  ;;  %v11158_v27 = vsub.f32 %v11098_v25, %v8091_v33  ;;  %v11159_v23 = vsub.f32 %v11099_v55, %v8091_v33  ;;  %v11160_v59 = vsub.f32 %v11100_v60, %v8091_v33 }
 0x187   :  { %v1158_v26 = vmul.f32 %v8215_v14, %v11156_v15  ;;  %v1159_v46 = vmul.f32 %v8215_v14, %v11157_v42  ;;  %v11161_v48 = vsub.f32 %v11101_v11, %v8091_v33  ;;  %v11162_v25 = vsub.f32 %v11102_v6, %v8091_v33  ;;  %v11166_v15 = vld [vmem:[#allocation25_spill] sm:$0xff] }
 0x188   :  { %v1160_v7 = vmul.f32 %v8215_v14, %v11158_v27  ;;  %v1161_v24 = vmul.f32 %v8215_v14, %v11159_v23  ;;  %v1162_v0 = vmul.f32 %v8215_v14, %v11160_v59  ;;  %v11163_v55 = vsub.f32 %v11103_v41, %v8091_v33  ;;  %v11170_v59 = vld [vmem:[#allocation26_spill] sm:$0xff] }
 0x189   :  { %v1163_v16 = vmul.f32 %v8215_v14, %v11161_v48  ;;  %v1164_v8 = vmul.f32 %v8215_v14, %v11162_v25  ;;  %v11164_v60 = vsub.f32 %v11104_v20, %v8091_v33  ;;  %v11165_v11 = vsub.f32 %v11105_v19, %v8091_v33  ;;  %v11172_v25 = vld [vmem:[#allocation29_spill] sm:$0xff] }
 0x18a   :  { %v1165_v13 = vmul.f32 %v8215_v14, %v11163_v55  ;;  %v11167_v6 = vsub.f32 %v11166_v15, %v8091_v33  ;;  %v11168_v41 = vsub.f32 %v11106_v9, %v8091_v33  ;;  %v11169_v20 = vsub.f32 %v11107_v2, %v8091_v33  ;;  %v11175_v15 = vld [vmem:[#allocation28_spill] sm:$0xff] }
 0x18b   :  { %v1167_v28 = vmul.f32 %v8215_v14, %v11164_v60  ;;  %v1168_v21 = vmul.f32 %v8215_v14, %v11165_v11  ;;  %v11171_v19 = vsub.f32 %v11170_v59, %v8091_v33  ;;  %v11173_v55 = vsub.f32 %v11172_v25, %v8091_v33 }
 0x18c   :  { %v1169_v42 = vmul.f32 %v8215_v14, %v11167_v6  ;;  %v1170_v27 = vmul.f32 %v8215_v14, %v11168_v41  ;;  %v1171_v23 = vmul.f32 %v8215_v14, %v11169_v20  ;;  %v11174_v9 = vsub.f32 %v11108_v31, %v8091_v33  ;;  %v11177_v41 = vld [vmem:[#allocation30_spill] sm:$0xff] }
 0x18d   :  { %v1172_v48 = vmul.f32 %v8215_v14, %v11171_v19  ;;  %v1173_v60 = vmul.f32 %v8215_v14, %v11173_v55  ;;  %v11176_v2 = vsub.f32 %v11175_v15, %v8091_v33  ;;  %v11178_v20 = vsub.f32 %v11177_v41, %v8091_v33  ;;  %v11179_v19 = vld [vmem:[#allocation33_spill] sm:$0xff] }
 0x18e   :  { %v1174_v11 = vmul.f32 %v8215_v14, %v11174_v9  ;;  %v11180_v25 = vsub.f32 %v11179_v19, %v8091_v33  ;;  %v11181_v31 = vsub.f32 %v11109_v58, %v8091_v33  ;;  %v11183_v15 = vsub.f32 %v11182_v10, %v8091_v33 }
 0x18f   :  { %v1175_v6 = vmul.f32 %v8215_v14, %v11176_v2  ;;  %v1176_v59 = vmul.f32 %v8215_v14, %v11178_v20  ;;  %v11185_v41 = vsub.f32 %v11184_v52, %v8091_v33  ;;  %v11187_v19 = vsub.f32 %v11186_v56, %v8091_v33 }
 0x190   :  { %v1177_v55 = vmul.f32 %v8215_v14, %v11180_v25  ;;  %v1178_v9 = vmul.f32 %v8215_v14, %v11181_v31  ;;  %v1179_v2 = vmul.f32 %v8215_v14, %v11183_v15  ;;  %v11189_v58 = vsub.f32 %v11188_v36, %v8091_v33  ;;  %v11192_v36 = vld [vmem:[#allocation7_spill] sm:$0xff] }
 0x191   :  { %v1180_v20 = vmul.f32 %v8215_v14, %v11185_v41  ;;  %v1181_v25 = vmul.f32 %v8215_v14, %v11187_v19  ;;  %v11191_v10 = vsub.f32 %v11190_v50, %v8091_v33  ;;  %v8523_v52 = vadd.f32 %v8226_v37, %v8256_v45  ;;  %v11198_v50 = vld [vmem:[#allocation10_spill] sm:$0xff] }
 0x192   :  { %v1183_v31 = vmul.f32 %v8215_v14, %v11189_v58  ;;  %v8527_v41 = vadd.f32 %v8226_v37, %v8262_v1  ;;  %v8531_v56 = vadd.f32 %v8226_v37, %v8268_v43  ;;  %v8535_v19 = vadd.f32 %v8226_v37, %v11192_v36  ;;  %v11193_v58 = vld [vmem:[#allocation6_spill] sm:$0xff]  ;;  %v11197_v1 = vld [vmem:[#allocation8_spill] sm:$0xff] }
 0x193   :  { %v1184_v15 = vmul.f32 %v8215_v14, %v11191_v10  ;;  %v8539_v33 = vadd.f32 %v8226_v37, %v11193_v58  ;;  %v8543_v14 = vadd.f32 %v8226_v37, %v8290_v51  ;;  %v8547_v45 = vadd.f32 %v8226_v37, %v8296_v30  ;;  %v11199_v36 = vld [vmem:[#allocation12_spill] sm:$0xff] }
 0x194   :  { %v8551_v43 = vadd.f32 %v8226_v37, %v11197_v1  ;;  %v8555_v10 = vadd.f32 %v8226_v37, %v11198_v50  ;;  %v8559_v58 = vadd.f32 %v8226_v37, %v11199_v36  ;;  %v8573_v1 = vadd.f32 %v8226_v37, %v1135_v5 }
 0x195   :  { %11194 = vst [vmem:[#allocation14_spill] sm:$0xff] %v8539_v33  ;;  %11195 = vst [vmem:[#allocation16_spill] sm:$0xff] %v8543_v14  ;;  %v11201_v33 = vld [vmem:[#allocation9_spill] sm:$0xff]  ;;  %v11202_v14 = vld [vmem:[#allocation11_spill] sm:$0xff]  ;;  %v8576_v50 = vadd.f32 %v8226_v37, %v1136_v17  ;;  %v8579_v36 = vadd.f32 %v8226_v37, %v1137_v35  ;;  %v8594_v5 = vadd.f32 %v8226_v37, %v1142_v62 }
 0x196   :  { %11196 = vst [vmem:[#allocation13_spill] sm:$0xff] %v8547_v45  ;;  %11200 = vst [vmem:[#allocation15_spill] sm:$0xff] %v8559_v58  ;;  %v8563_v51 = vadd.f32 %v8226_v37, %v11201_v33  ;;  %v8567_v30 = vadd.f32 %v8226_v37, %v11202_v14  ;;  %v8570_v45 = vadd.f32 %v8226_v37, %v1133_v49 }
 0x197   :  { %v8582_v58 = vadd.f32 %v8226_v37, %v1138_v63  ;;  %v8585_v33 = vadd.f32 %v8226_v37, %v1139_v40  ;;  %v8588_v14 = vadd.f32 %v8226_v37, %v1140_v53  ;;  %v8591_v49 = vadd.f32 %v8226_v37, %v1141_v22 }
 0x198   :  { %v8597_v17 = vadd.f32 %v8226_v37, %v1143_v38  ;;  %v8600_v35 = vadd.f32 %v8226_v37, %v1144_v4  ;;  %v8603_v63 = vadd.f32 %v8226_v37, %v1145_v44  ;;  %v8606_v40 = vadd.f32 %v8226_v37, %v1146_v57 }
 0x199   :  { %v8609_v53 = vadd.f32 %v8226_v37, %v1147_v39  ;;  %v8612_v22 = vadd.f32 %v8226_v37, %v1148_v29  ;;  %v8615_v62 = vadd.f32 %v8226_v37, %v1149_v47  ;;  %v8618_v38 = vadd.f32 %v8226_v37, %v1151_v34 }
 0x19a   :  { %v8621_v4 = vadd.f32 %v8226_v37, %v1152_v3  ;;  %v8624_v44 = vadd.f32 %v8226_v37, %v1153_v18  ;;  %v8627_v57 = vadd.f32 %v8226_v37, %v1154_v61  ;;  %v8630_v39 = vadd.f32 %v8226_v37, %v1155_v12 }
 0x19b   :  { %v8633_v29 = vadd.f32 %v8226_v37, %v1156_v32  ;;  %v8636_v47 = vadd.f32 %v8226_v37, %v1157_v54  ;;  %v8639_v34 = vadd.f32 %v8226_v37, %v1158_v26  ;;  %v8642_v3 = vadd.f32 %v8226_v37, %v1159_v46 }
 0x19c   :  { %v8645_v18 = vadd.f32 %v8226_v37, %v1160_v7  ;;  %v8648_v61 = vadd.f32 %v8226_v37, %v1161_v24  ;;  %v8651_v12 = vadd.f32 %v8226_v37, %v1162_v0  ;;  %v8654_v32 = vadd.f32 %v8226_v37, %v1163_v16 }
 0x19d   :  { %v8657_v54 = vadd.f32 %v8226_v37, %v1164_v8  ;;  %v8660_v26 = vadd.f32 %v8226_v37, %v1165_v13  ;;  %v8663_v46 = vadd.f32 %v8226_v37, %v1167_v28  ;;  %v8666_v7 = vadd.f32 %v8226_v37, %v1168_v21 }
 0x19e   :  { %v8669_v24 = vadd.f32 %v8226_v37, %v1169_v42  ;;  %v8672_v0 = vadd.f32 %v8226_v37, %v1170_v27  ;;  %v8675_v16 = vadd.f32 %v8226_v37, %v1171_v23  ;;  %v8678_v8 = vadd.f32 %v8226_v37, %v1172_v48 }
 0x19f   :  { %v8681_v13 = vadd.f32 %v8226_v37, %v1173_v60  ;;  %v8684_v28 = vadd.f32 %v8226_v37, %v1174_v11  ;;  %v8687_v21 = vadd.f32 %v8226_v37, %v1175_v6  ;;  %v8690_v42 = vadd.f32 %v8226_v37, %v1176_v59 }
 0x1a0   :  { %v8693_v27 = vadd.f32 %v8226_v37, %v1177_v55  ;;  %v8696_v23 = vadd.f32 %v8226_v37, %v1178_v9  ;;  %v8699_v48 = vadd.f32 %v8226_v37, %v1179_v2  ;;  %v8702_v60 = vadd.f32 %v8226_v37, %v1180_v20 }
 0x1a1   :  { %v8705_v11 = vadd.f32 %v8226_v37, %v1181_v25  ;;  %v8708_v6 = vadd.f32 %v8226_v37, %v1183_v31  ;;  %v8711_v59 = vadd.f32 %v8226_v37, %v1184_v15  ;;  %v1255_v55 = vmax.f32 %v8523_v52, 0.0  ;;  %v11212_v25 = vld [vmem:[#allocation13_spill] sm:$0xff]  ;;  %v11213_v37 = vld [vmem:[#allocation15_spill] sm:$0xff] }
 0x1a2   :  { %11203 = vst [vmem:[#allocation18_spill] sm:$0xff] %v8693_v27  ;;  %11204 = vst [vmem:[#allocation20_spill] sm:$0xff] %v8696_v23  ;;  %v1256_v9 = vmax.f32 %v8527_v41, 0.0  ;;  %v1257_v23 = vmax.f32 %v8531_v56, 0.0  ;;  %v1258_v2 = vmax.f32 %v8535_v19, 0.0  ;;  %v1262_v31 = vmax.f32 %v8551_v43, 0.0 }
 0x1a3   :  { %11205 = vst [vmem:[#allocation17_spill] sm:$0xff] %v8699_v48  ;;  %11206 = vst [vmem:[#allocation19_spill] sm:$0xff] %v8702_v60  ;;  %v11210_v48 = vld [vmem:[#allocation14_spill] sm:$0xff]  ;;  %v11211_v60 = vld [vmem:[#allocation16_spill] sm:$0xff]  ;;  %v1264_v15 = vmax.f32 %v11213_v37, 0.0  ;;  %v1265_v52 = vmax.f32 %v8563_v51, 0.0 }
 0x1a4   :  { %11207 = vst [vmem:[#allocation22_spill] sm:$0xff] %v8705_v11  ;;  %11208 = vst [vmem:[#allocation21_spill] sm:$0xff] %v8708_v6  ;;  %v1259_v20 = vmax.f32 %v11210_v48, 0.0  ;;  %v1260_v27 = vmax.f32 %v11211_v60, 0.0  ;;  %v1261_v11 = vmax.f32 %v11212_v25, 0.0  ;;  %v1263_v6 = vmax.f32 %v8555_v10, 0.0 }
 0x1a5   :  { %11209 = vst [vmem:[#allocation23_spill] sm:$0xff] %v8711_v59  ;;  %v1266_v41 = vmax.f32 %v8567_v30, 0.0  ;;  %v1267_v56 = vmax.f32 %v8570_v45, 0.0  ;;  %v1269_v19 = vmax.f32 %v8573_v1, 0.0  ;;  %v1270_v48 = vmax.f32 %v8576_v50, 0.0 }
 0x1a6   :  { %v1271_v60 = vmax.f32 %v8579_v36, 0.0  ;;  %v1272_v25 = vmax.f32 %v8582_v58, 0.0  ;;  %v1273_v43 = vmax.f32 %v8585_v33, 0.0  ;;  %v1274_v10 = vmax.f32 %v8588_v14, 0.0 }
 0x1a7   :  { %v1275_v37 = vmax.f32 %v8591_v49, 0.0  ;;  %v1276_v51 = vmax.f32 %v8594_v5, 0.0  ;;  %v1277_v30 = vmax.f32 %v8597_v17, 0.0  ;;  %v1278_v45 = vmax.f32 %v8600_v35, 0.0 }
 0x1a8   :  { %v1279_v1 = vmax.f32 %v8603_v63, 0.0  ;;  %v1280_v50 = vmax.f32 %v8606_v40, 0.0  ;;  %v1281_v36 = vmax.f32 %v8609_v53, 0.0  ;;  %v1282_v58 = vmax.f32 %v8612_v22, 0.0 }
 0x1a9   :  { %v1283_v33 = vmax.f32 %v8615_v62, 0.0  ;;  %v1285_v14 = vmax.f32 %v8618_v38, 0.0  ;;  %v1286_v49 = vmax.f32 %v8621_v4, 0.0  ;;  %v1287_v5 = vmax.f32 %v8624_v44, 0.0  ;;  %v11214_v59 = vld [vmem:[#allocation18_spill] sm:$0xff] }
 0x1aa   :  { %v1288_v17 = vmax.f32 %v8627_v57, 0.0  ;;  %v1289_v35 = vmax.f32 %v8630_v39, 0.0  ;;  %v1290_v63 = vmax.f32 %v8633_v29, 0.0  ;;  %v1291_v40 = vmax.f32 %v8636_v47, 0.0 }
 0x1ab   :  { %v1292_v53 = vmax.f32 %v8639_v34, 0.0  ;;  %v1293_v22 = vmax.f32 %v8642_v3, 0.0  ;;  %v1294_v62 = vmax.f32 %v8645_v18, 0.0  ;;  %v1295_v38 = vmax.f32 %v8648_v61, 0.0 }
 0x1ac   :  { %v1296_v4 = vmax.f32 %v8651_v12, 0.0  ;;  %v1297_v44 = vmax.f32 %v8654_v32, 0.0  ;;  %v1298_v57 = vmax.f32 %v8657_v54, 0.0  ;;  %v1299_v39 = vmax.f32 %v8660_v26, 0.0 }
 0x1ad   :  { %v1301_v29 = vmax.f32 %v8663_v46, 0.0  ;;  %v1302_v47 = vmax.f32 %v8666_v7, 0.0  ;;  %v1303_v34 = vmax.f32 %v8669_v24, 0.0  ;;  %v1304_v3 = vmax.f32 %v8672_v0, 0.0  ;;  %v11215_v7 = vld [vmem:[#allocation20_spill] sm:$0xff]  ;;  %v11216_v0 = vld [vmem:[#allocation17_spill] sm:$0xff] }
 0x1ae   :  { %v1305_v18 = vmax.f32 %v8675_v16, 0.0  ;;  %v1306_v61 = vmax.f32 %v8678_v8, 0.0  ;;  %v1307_v12 = vmax.f32 %v8681_v13, 0.0  ;;  %v1308_v32 = vmax.f32 %v8684_v28, 0.0  ;;  %v11217_v8 = vld [vmem:[#allocation19_spill] sm:$0xff]  ;;  %v11218_v28 = vld [vmem:[#allocation22_spill] sm:$0xff] }
 0x1af   :  { %v1309_v54 = vmax.f32 %v8687_v21, 0.0  ;;  %v1310_v26 = vmax.f32 %v8690_v42, 0.0  ;;  %v1311_v46 = vmax.f32 %v11214_v59, 0.0  ;;  %v1312_v24 = vmax.f32 %v11215_v7, 0.0  ;;  %v11219_v42 = vld [vmem:[#allocation21_spill] sm:$0xff]  ;;  %v11220_v7 = vld [vmem:[#allocation23_spill] sm:$0xff] }
 0x1b0   :  { %v1313_v16 = vmax.f32 %v11216_v0, 0.0  ;;  %v1314_v13 = vmax.f32 %v11217_v8, 0.0  ;;  %v1315_v21 = vmax.f32 %v11218_v28, 0.0  ;;  %v1317_v59 = vmax.f32 %v11219_v42, 0.0 }
 0x1b1   :  { %v1318_v0 = vmax.f32 %v11220_v7, 0.0  ;;  %v1319_v8 = vmax.f32 %v1255_v55, %v1271_v60  ;;  %v1320_v28 = vmax.f32 %v1256_v9, %v1272_v25  ;;  %v1321_v42 = vmax.f32 %v1257_v23, %v1273_v43 }
 0x1b2   :  { %v1322_v7 = vmax.f32 %v1258_v2, %v1274_v10  ;;  %v1323_v55 = vmax.f32 %v1259_v20, %v1275_v37  ;;  %v1324_v60 = vmax.f32 %v1260_v27, %v1276_v51  ;;  %v1325_v9 = vmax.f32 %v1261_v11, %v1277_v30 }
 0x1b3   :  { %v1326_v25 = vmax.f32 %v1262_v31, %v1278_v45  ;;  %v1327_v23 = vmax.f32 %v1263_v6, %v1279_v1  ;;  %v1328_v43 = vmax.f32 %v1264_v15, %v1280_v50  ;;  %v1329_v2 = vmax.f32 %v1265_v52, %v1281_v36 }
 0x1b4   :  { %v1330_v10 = vmax.f32 %v1266_v41, %v1282_v58  ;;  %v1331_v20 = vmax.f32 %v1267_v56, %v1283_v33  ;;  %v1333_v37 = vmax.f32 %v1269_v19, %v1285_v14  ;;  %v1334_v27 = vmax.f32 %v1270_v48, %v1286_v49 }
 0x1b5   :  { %v1335_v51 = vmax.f32 %v1287_v5, %v1303_v34  ;;  %v1336_v11 = vmax.f32 %v1288_v17, %v1304_v3  ;;  %v1337_v30 = vmax.f32 %v1289_v35, %v1305_v18  ;;  %v1338_v31 = vmax.f32 %v1290_v63, %v1306_v61 }
 0x1b6   :  { %v1339_v45 = vmax.f32 %v1291_v40, %v1307_v12  ;;  %v1340_v1 = vmax.f32 %v1292_v53, %v1308_v32  ;;  %v1341_v6 = vmax.f32 %v1293_v22, %v1309_v54  ;;  %v1342_v15 = vmax.f32 %v1294_v62, %v1310_v26  ;;  %v7297_v32 = vld [vmem:[%s10977_s4 + $0x8] sm:$0xff]   ;;  %v7296_v54 = vld [vmem:[%s10977_s4 + $0x20] sm:$0xff]  }
 0x1b7   :  { %v1343_v50 = vmax.f32 %v1295_v38, %v1311_v46  ;;  %v1344_v36 = vmax.f32 %v1296_v4, %v1312_v24  ;;  %v1345_v52 = vmax.f32 %v1297_v44, %v1313_v16  ;;  %v1346_v41 = vmax.f32 %v1298_v57, %v1314_v13  ;;  %v1425_v44 = vld [vmem:[#allocation2 + $0x1] sm:$0xff] }
 0x1b8   :  { %v1347_v58 = vmax.f32 %v1299_v39, %v1315_v21  ;;  %v1349_v33 = vmax.f32 %v1301_v29, %v1317_v59  ;;  %v1350_v56 = vmax.f32 %v1302_v47, %v1318_v0  ;;  %v1351_v14 = vmax.f32 %v1319_v8, %v1335_v51  ;;  %v7295_v57 = vld [vmem:[%s10977_s4 + $0x28] sm:$0xff]   ;;  %v7298_v59 = vld [vmem:[%s10977_s4] sm:$0xff]  }
 0x1b9   :  { %v1352_v19 = vmax.f32 %v1320_v28, %v1336_v11  ;;  %v1353_v48 = vmax.f32 %v1321_v42, %v1337_v30  ;;  %v1354_v49 = vmax.f32 %v1322_v7, %v1338_v31  ;;  %v1355_v5 = vmax.f32 %v1323_v55, %v1339_v45  ;;  %v1841_v16 = vld [vmem:[#allocation2 + $0x2] sm:$0xff] }
 0x1ba   :  { %v1356_v34 = vmax.f32 %v1324_v60, %v1340_v1  ;;  %v1357_v17 = vmax.f32 %v1325_v9, %v1341_v6  ;;  %v1358_v35 = vmax.f32 %v1326_v25, %v1342_v15  ;;  %v1359_v63 = vmax.f32 %v1327_v23, %v1343_v50  ;;  %1367 = vst.msk [vmem:[#allocation2 + $0xb] sm:$0xff] %vm53_vm1, %v1351_v14  ;;  %v7299_v51 = vld [vmem:[%s10977_s4 + $0x48] sm:$0xff]  }
 0x1bb   :  { %v1360_v40 = vmax.f32 %v1328_v43, %v1344_v36  ;;  %v1361_v53 = vmax.f32 %v1329_v2, %v1345_v52  ;;  %1368 = vst.msk [vmem:[#allocation2 + $0x15] sm:$0xff] %vm53_vm1, %v1352_v19  ;;  %1369 = vst.msk [vmem:[#allocation2 + $0x1f] sm:$0xff] %vm53_vm1, %v1353_v48  ;;  %v1362_v22 = vmax.f32 %v1330_v10, %v1346_v41  ;;  %v11221_v24 = vmov 0.0   ;;  %v8859_v1 = vld [vmem:[#allocation2 + $0xa2] sm:$0xff] }
 0x1bc   :  { %v1363_v62 = vmax.f32 %v1331_v20, %v1347_v58  ;;  %v1365_v38 = vmax.f32 %v1333_v37, %v1349_v33  ;;  %v1366_v4 = vmax.f32 %v1334_v27, %v1350_v56  ;;  %1370 = vst.msk [vmem:[#allocation2 + $0x29] sm:$0xff] %vm53_vm1, %v1354_v49  ;;  %1371 = vst.msk [vmem:[#allocation2 + $0x33] sm:$0xff] %vm53_vm1, %v1355_v5  ;;  %v8861_v6 = vld [vmem:[#allocation2 + $0xc2] sm:$0xff] }
 0x1bd   :  { %1372 = vst.msk [vmem:[#allocation2 + $0x3d] sm:$0xff] %vm53_vm1, %v1356_v34  ;;  %1373 = vst.msk [vmem:[#allocation2 + $0x47] sm:$0xff] %vm53_vm1, %v1357_v17  ;;  %v7300_v33 = vld [vmem:[%s10977_s4 + $0x40] sm:$0xff]  }
 0x1be   :  { %1374 = vst.msk [vmem:[#allocation2 + $0x51] sm:$0xff] %vm53_vm1, %v1358_v35  ;;  %1375 = vst.msk [vmem:[#allocation2 + $0x6f] sm:$0xff] %vm53_vm1, %v1359_v63 }
 0x1bf   :  { %1376 = vst.msk [vmem:[#allocation2 + $0x79] sm:$0xff] %vm53_vm1, %v1360_v40  ;;  %1377 = vst.msk [vmem:[#allocation2 + $0x83] sm:$0xff] %vm53_vm1, %v1361_v53 }
 0x1c0   :  { %1378 = vst.msk [vmem:[#allocation2 + $0x8d] sm:$0xff] %vm53_vm1, %v1362_v22  ;;  %1379 = vst.msk [vmem:[#allocation2 + $0x97] sm:$0xff] %vm53_vm1, %v1363_v62  ;;  %v1436_v22 = vld [vmem:[#allocation2 + $0x59] sm:$0xff] }
 0x1c1   :  { %1381 = vst.msk [vmem:[#allocation2 + $0xab] sm:$0xff] %vm53_vm1, %v1365_v38  ;;  %1382 = vst.msk [vmem:[#allocation2 + $0xb5] sm:$0xff] %vm53_vm1, %v1366_v4  ;;  %v1426_v39 = vld [vmem:[#allocation2 + $0x9] sm:$0xff] }
 0x1c2   :  { %v1427_v29 = vld [vmem:[#allocation2 + $0x11] sm:$0xff]  ;;  %v1428_v47 = vld [vmem:[#allocation2 + $0x19] sm:$0xff]  ;;  %v1450_v3 = vpack.c.bf16 %v1426_v39, %v1425_v44  ;;  %v1429_v0 = vld [vmem:[#allocation2 + $0x21] sm:$0xff]  ;;  %83 = vst.msk [vmem:[#allocation4] sm:$0xff] %vm82_vm3, %v11221_v24 }
 0x1c3   :  { %v1451_v18 = vpack.c.bf16 %v1428_v47, %v1427_v29  ;;  %v8791_v61 = vld [vmem:[#allocation2 + $0xa] sm:$0xff]  ;;  %v8793_v12 = vld [vmem:[#allocation2 + $0x12] sm:$0xff]  ;;  %v8803_v26 = vld [vmem:[#allocation2 + $0x1a] sm:$0xff]  ;;  %84 = vst.msk [vmem:[#allocation4 + $0x8] sm:$0xff] %vm82_vm3, %v11221_v24 }
 0x1c4   :  { %6479 = vmatmul.mubr.msk.bf16.vlgmr.msra.gmra.mxu0 %vm53_vm1, %v1450_v3  ;;  %v2120_v46 = vpack.c.bf16 %v8793_v12, %v8791_v61  ;;  %v8809_v13 = vld [vmem:[#allocation2 + $0x22] sm:$0xff]  ;;  %v8811_v21 = vld [vmem:[#allocation2 + $0x2a] sm:$0xff]  ;;  %v8819_v8 = vld [vmem:[#allocation2 + $0x32] sm:$0xff]  ;;  %v1866_v20 = vpack.c.bf16 %v8791_v61, %v1841_v16  ;;  %v1867_v34 = vpack.c.bf16 %v8803_v26, %v8793_v12  ;;  %85 = vst.msk [vmem:[#allocation4 + $0x10] sm:$0xff] %vm82_vm3, %v11221_v24 }
 0x1c5   :  { %6483 = vmatmul.mubr.msk.bf16.vlgmr.msra.gmra.mxu1 %vm53_vm1, %v1451_v18  ;;  %6587 = vmatpush3.bf16.msra.mxu0 %v7295_v57  ;;  %v8821_v28 = vld [vmem:[#allocation2 + $0x3a] sm:$0xff]  ;;  %v2121_v42 = vpack.c.bf16 %v8809_v13, %v8803_v26  ;;  %v1430_v7 = vld [vmem:[#allocation2 + $0x29] sm:$0xff]  ;;  %v2122_v9 = vpack.c.bf16 %v8819_v8, %v8811_v21  ;;  %v8831_v25 = vld [vmem:[#allocation2 + $0x52] sm:$0xff]  ;;  %v1868_v40 = vpack.c.bf16 %v8811_v21, %v8809_v13 }
 0x1c6   :  { %6486 = vmatprep.mubr.msk.bf16.mxu1 %vm7358_vm2, %v11221_v24  ;;  %6588 = vmatprep.subr.bf16.mxu0 %v11221_v24  ;;  %v8825_v55 = vld [vmem:[#allocation2 + $0x42] sm:$0xff]  ;;  %v8827_v60 = vld [vmem:[#allocation2 + $0x4a] sm:$0xff]  ;;  %v1452_v10 = vpack.c.bf16 %v1430_v7, %v1429_v0  ;;  %v8841_v37 = vld [vmem:[#allocation2 + $0x72] sm:$0xff]  ;;  %86 = vst.msk [vmem:[#allocation4 + $0x18] sm:$0xff] %vm82_vm3, %v11221_v24 }
 0x1c7   :  { %6590 = vmatprep.mubr.msk.bf16.mxu0 %vm7358_vm2, %v11221_v24  ;;  %6531 = vmatpush3.bf16.msra.mxu1 %v7297_v32  ;;  %v2123_v23 = vpack.c.bf16 %v8825_v55, %v8821_v28  ;;  %v8836_v43 = vld [vmem:[#allocation2 + $0x6a] sm:$0xff]  ;;  %v8843_v27 = vld [vmem:[#allocation2 + $0x7a] sm:$0xff]  ;;  %v8849_v11 = vld [vmem:[#allocation2 + $0x82] sm:$0xff]  ;;  %87 = vst.msk [vmem:[#allocation4 + $0x20] sm:$0xff] %vm82_vm3, %v11221_v24 }
 0x1c8   :  { %6532 = vmatprep.subr.bf16.mxu1 %v11221_v24  ;;  %v8851_v30 = vld [vmem:[#allocation2 + $0x8a] sm:$0xff]  ;;  %v8857_v45 = vld [vmem:[#allocation2 + $0x92] sm:$0xff]  ;;  %v8869_v50 = vld [vmem:[#allocation2 + $0x9a] sm:$0xff]  ;;  %88 = vst.msk [vmem:[#allocation4 + $0x28] sm:$0xff] %vm82_vm3, %v11221_v24 }
 0x1c9   :  { %6589 = vmatpush3.bf16.msra.mxu0 %v7296_v54  ;;  %v8871_v36 = vld [vmem:[#allocation2 + $0xaa] sm:$0xff]  ;;  %v8875_v41 = vld [vmem:[#allocation2 + $0xb2] sm:$0xff]  ;;  %v8877_v58 = vld [vmem:[#allocation2 + $0xba] sm:$0xff]  ;;  %v1873_v54 = vpack.c.bf16 %v8843_v27, %v8841_v37  ;;  %89 = vst.msk [vmem:[#allocation4 + $0x30] sm:$0xff] %vm82_vm3, %v11221_v24 }
 0x1ca   :  { %6698 = vmatprep.subr.bf16.mxu0 %v11221_v24  ;;  %v1431_v56 = vld [vmem:[#allocation2 + $0x31] sm:$0xff]  ;;  %v1432_v14 = vld [vmem:[#allocation2 + $0x39] sm:$0xff]  ;;  %v1433_v17 = vld [vmem:[#allocation2 + $0x41] sm:$0xff]  ;;  %90 = vst.msk [vmem:[#allocation4 + $0x38] sm:$0xff] %vm82_vm3, %v11221_v24 }
 0x1cb   :  { %6533 = vmatpush3.bf16.msra.mxu1 %v7298_v59  ;;  %v1453_v5 = vpack.c.bf16 %v1432_v14, %v1431_v56  ;;  %v1434_v35 = vld [vmem:[#allocation2 + $0x49] sm:$0xff]  ;;  %v1435_v53 = vld [vmem:[#allocation2 + $0x51] sm:$0xff]  ;;  %v8907_v62 = vld [vmem:[#allocation2 + $0x1c] sm:$0xff]  ;;  %91 = vst.msk [vmem:[#allocation4 + $0x40] sm:$0xff] %vm82_vm3, %v11221_v24 }
 0x1cc   :  { %6591 = vmatmul.mubr.msk.bf16.vlgmr.msra.gmra.mxu0 %vm53_vm1, %v1866_v20  ;;  %6642 = vmatprep.subr.bf16.mxu1 %v11221_v24  ;;  %v1454_v63 = vpack.c.bf16 %v1434_v35, %v1433_v17  ;;  %v8909_v38 = vld [vmem:[#allocation2 + $0x24] sm:$0xff]  ;;  %v8911_v4 = vld [vmem:[#allocation2 + $0x2c] sm:$0xff]  ;;  %v8913_v44 = vld [vmem:[#allocation2 + $0x34] sm:$0xff]  ;;  %v1455_v14 = vpack.c.bf16 %v1436_v22, %v1435_v53  ;;  %92 = vst.msk [vmem:[#allocation4 + $0x48] sm:$0xff] %vm82_vm3, %v11221_v24 }
 0x1cd   :  { %6487 = vmatmul.mubr.msk.bf16.gmra.mxu1 %vm53_vm1, %v1452_v10  ;;  %6594 = vmatprep.mubr.msk.bf16.mxu0 %vm7358_vm2, %v11221_v24  ;;  %v8915_v57 = vld [vmem:[#allocation2 + $0x3c] sm:$0xff]  ;;  %v8917_v39 = vld [vmem:[#allocation2 + $0x44] sm:$0xff]  ;;  %v8921_v47 = vld [vmem:[#allocation2 + $0x4c] sm:$0xff]  ;;  %93 = vst.msk [vmem:[#allocation4 + $0x50] sm:$0xff] %vm82_vm3, %v11221_v24 }
 0x1ce   :  { %6490 = vmatprep.mubr.msk.bf16.mxu1 %vm7358_vm2, %v11221_v24  ;;  %6699 = vmatpush3.bf16.msra.mxu0 %v7299_v51  ;;  %v8923_v3 = vld [vmem:[#allocation2 + $0x54] sm:$0xff]  ;;  %v8925_v18 = vld [vmem:[#allocation2 + $0x6c] sm:$0xff]  ;;  %v8933_v59 = vld [vmem:[#allocation2 + $0x7c] sm:$0xff] }
 0x1cf   :  { %6700 = vmatprep.subr.bf16.mxu0 %v11221_v24  ;;  %v8931_v16 = vld [vmem:[#allocation2 + $0x74] sm:$0xff]  ;;  %v8935_v0 = vld [vmem:[#allocation2 + $0x84] sm:$0xff]  ;;  %v8939_v10 = vld [vmem:[#allocation2 + $0x8c] sm:$0xff] }
 0x1d0   :  { %v8941_v20 = vld [vmem:[#allocation2 + $0x94] sm:$0xff]  ;;  %v8943_v51 = vld [vmem:[#allocation2 + $0x9c] sm:$0xff]  ;;  %v8953_v17 = vld [vmem:[#allocation2 + $0xac] sm:$0xff] }
 0x1d1   :  { %v8955_v35 = vld [vmem:[#allocation2 + $0xb4] sm:$0xff]  ;;  %v1437_v53 = vld [vmem:[#allocation2 + $0x61] sm:$0xff]  ;;  %v1438_v22 = vld [vmem:[#allocation2 + $0x69] sm:$0xff] }
 0x1d2   :  { %6701 = vmatpush3.bf16.msra.mxu0 %v7300_v33  ;;  %v1456_v56 = vpack.c.bf16 %v1438_v22, %v1437_v53  ;;  %v8977_v33 = vld [vmem:[#allocation2 + $0x5a] sm:$0xff]  ;;  %v8987_v22 = vld [vmem:[#allocation2 + $0x62] sm:$0xff] }
 0x1d3   :  { %6810 = vmatprep.subr.bf16.mxu0 %v11221_v24  ;;  %v1871_v53 = vpack.c.bf16 %v8977_v33, %v8831_v25  ;;  %v2350_v32 = vld [vmem:[#allocation2 + $0x13] sm:$0xff] }
 0x1d4   :  { %6595 = vmatmul.mubr.msk.bf16.gmra.mxu0 %vm53_vm1, %v1867_v34  ;;  %v8951_v34 = vld [vmem:[#allocation2 + $0xa4] sm:$0xff] }
 0x1d5   :  { %6491 = vmatmul.mubr.msk.bf16.gmra.mxu1 %vm53_vm1, %v1453_v5  ;;  %6598 = vmatprep.mubr.msk.bf16.mxu0 %vm7358_vm2, %v11221_v24  ;;  %v1869_v5 = vpack.c.bf16 %v8821_v28, %v8819_v8  ;;  %v2884_v28 = vpack.c.bf16 %v8915_v57, %v8913_v44 }
 0x1d6   :  { %6494 = vmatprep.mubr.msk.bf16.mxu1 %vm7358_vm2, %v11221_v24 }
 0x1dc   :  { %6599 = vmatmul.mubr.msk.bf16.gmra.mxu0 %vm53_vm1, %v1868_v40 }
 0x1dd   :  { %6495 = vmatmul.mubr.msk.bf16.gmra.mxu1 %vm53_vm1, %v1454_v63  ;;  %6602 = vmatprep.mubr.msk.bf16.mxu0 %vm7358_vm2, %v11221_v24  ;;  %v1870_v63 = vpack.c.bf16 %v8827_v60, %v8825_v55 }
 0x1de   :  { %6498 = vmatprep.mubr.msk.bf16.mxu1 %vm7358_vm2, %v11221_v24 }
 0x1e4   :  { %6603 = vmatmul.mubr.msk.bf16.gmra.mxu0 %vm53_vm1, %v1869_v5  ;;  %v1440_v5 = vld [vmem:[#allocation2 + $0x79] sm:$0xff] }
 0x1e5   :  { %6499 = vmatmul.mubr.msk.bf16.gmra.mxu1 %vm53_vm1, %v1455_v14  ;;  %6606 = vmatprep.mubr.msk.bf16.mxu0 %vm7358_vm2, %v11221_v24  ;;  %v1439_v14 = vld [vmem:[#allocation2 + $0x71] sm:$0xff] }
 0x1e6   :  { %6502 = vmatprep.mubr.msk.bf16.mxu1 %vm7358_vm2, %v11221_v24  ;;  %v1457_v40 = vpack.c.bf16 %v1440_v5, %v1439_v14  ;;  %v1872_v14 = vpack.c.bf16 %v8836_v43, %v8987_v22  ;;  %v1444_v5 = vld [vmem:[#allocation2 + $0x99] sm:$0xff] }
 0x1ec   :  { %6607 = vmatmul.mubr.msk.bf16.gmra.mxu0 %vm53_vm1, %v1870_v63  ;;  %v1442_v63 = vld [vmem:[#allocation2 + $0x89] sm:$0xff] }
 0x1ed   :  { %6503 = vmatmul.mubr.msk.bf16.gmra.mxu1 %vm53_vm1, %v1456_v56  ;;  %6610 = vmatprep.mubr.msk.bf16.mxu0 %vm7358_vm2, %v11221_v24  ;;  %v1441_v56 = vld [vmem:[#allocation2 + $0x81] sm:$0xff] }
 0x1ee   :  { %6506 = vmatprep.mubr.msk.bf16.mxu1 %vm7358_vm2, %v11221_v24  ;;  %v1458_v7 = vpack.c.bf16 %v1442_v63, %v1441_v56  ;;  %v1446_v56 = vld [vmem:[#allocation2 + $0xa9] sm:$0xff] }
 0x1f4   :  { %6611 = vmatmul.mubr.msk.bf16.gmra.mxu0 %vm53_vm1, %v1871_v53 }
 0x1f5   :  { %6507 = vmatmul.mubr.msk.bf16.gmra.mxu1 %vm53_vm1, %v1457_v40  ;;  %6614 = vmatprep.mubr.msk.bf16.mxu0 %vm7358_vm2, %v11221_v24  ;;  %v1443_v40 = vld [vmem:[#allocation2 + $0x91] sm:$0xff] }
 0x1f6   :  { %6510 = vmatprep.mubr.msk.bf16.mxu1 %vm7358_vm2, %v11221_v24  ;;  %v1459_v53 = vpack.c.bf16 %v1444_v5, %v1443_v40  ;;  %v1448_v40 = vld [vmem:[#allocation2 + $0xb9] sm:$0xff] }
 0x1fc   :  { %6615 = vmatmul.mubr.msk.bf16.gmra.mxu0 %vm53_vm1, %v1872_v14  ;;  %v1874_v14 = vpack.c.bf16 %v8851_v30, %v8849_v11 }
 0x1fd   :  { %6511 = vmatmul.mubr.msk.bf16.gmra.mxu1 %vm53_vm1, %v1458_v7  ;;  %6618 = vmatprep.mubr.msk.bf16.mxu0 %vm7358_vm2, %v11221_v24  ;;  %v1445_v7 = vld [vmem:[#allocation2 + $0xa1] sm:$0xff] }
 0x1fe   :  { %6514 = vmatprep.mubr.msk.bf16.mxu1 %vm7358_vm2, %v11221_v24  ;;  %v1460_v63 = vpack.c.bf16 %v1446_v56, %v1445_v7  ;;  %v1449_v7 = vld [vmem:[#allocation2 + $0xc1] sm:$0xff] }
 0x1ff   :  { %v1462_v56 = vpack.c.bf16 %v1449_v7, %v1449_v7  ;;  %v7302_v7 = vld [vmem:[%s10977_s4 + $0x30] sm:$0xff]  }
 0x204   :  { %6619 = vmatmul.mubr.msk.bf16.gmra.mxu0 %vm53_vm1, %v1873_v54  ;;  %v1447_v54 = vld [vmem:[#allocation2 + $0xb1] sm:$0xff] }
 0x205   :  { %6515 = vmatmul.mubr.msk.bf16.gmra.mxu1 %vm53_vm1, %v1459_v53  ;;  %6622 = vmatprep.mubr.msk.bf16.mxu0 %vm7358_vm2, %v11221_v24  ;;  %v1461_v5 = vpack.c.bf16 %v1448_v40, %v1447_v54  ;;  %v1875_v53 = vpack.c.bf16 %v8869_v50, %v8857_v45  ;;  %v1384_v54 = vld [vmem:[#allocation2 + $0x8] sm:$0xff] }
 0x206   :  { %6518 = vmatprep.mubr.msk.bf16.mxu1 %vm7358_vm2, %v11221_v24 }
 0x20c   :  { %6623 = vmatmul.mubr.msk.bf16.gmra.mxu0 %vm53_vm1, %v1874_v14  ;;  %v1383_v14 = vld [vmem:[#allocation2] sm:$0xff] }
 0x20d   :  { %6519 = vmatmul.mubr.msk.bf16.gmra.mxu1 %vm53_vm1, %v1460_v63  ;;  %6626 = vmatprep.mubr.msk.bf16.mxu0 %vm7358_vm2, %v11221_v24  ;;  %v1876_v63 = vpack.c.bf16 %v8871_v36, %v8859_v1  ;;  %v1408_v40 = vpack.c.bf16 %v1384_v54, %v1383_v14  ;;  %v1878_v14 = vpack.c.bf16 %v8861_v6, %v8861_v6 }
 0x20e   :  { %6522 = vmatprep.mubr.msk.bf16.mxu1 %vm7358_vm2, %v11221_v24 }
 0x214   :  { %6627 = vmatmul.mubr.msk.bf16.gmra.mxu0 %vm53_vm1, %v1875_v53  ;;  %v7301_v53 = vld [vmem:[%s10977_s4 + $0x38] sm:$0xff]  }
 0x215   :  { %6523 = vmatmul.mubr.msk.bf16.gmra.mxu1 %vm53_vm1, %v1461_v5  ;;  %6630 = vmatprep.mubr.msk.bf16.mxu0 %vm7358_vm2, %v11221_v24  ;;  %v1877_v5 = vpack.c.bf16 %v8877_v58, %v8875_v41 }
 0x216   :  { %6526 = vmatprep.mubr.msk.bf16.mxu1 %vm7358_vm2, %v11221_v24 }
 0x21c   :  { %6631 = vmatmul.mubr.msk.bf16.gmra.mxu0 %vm53_vm1, %v1876_v63  ;;  %v1386_v63 = vld [vmem:[#allocation2 + $0x18] sm:$0xff] }
 0x21d   :  { %6527 = vmatmul.mubr.msk.bf16.gmra.mxu1 %vm53_vm1, %v1462_v56  ;;  %6634 = vmatprep.mubr.msk.bf16.mxu0 %vm7358_vm2, %v11221_v24  ;;  %v1385_v56 = vld [vmem:[#allocation2 + $0x10] sm:$0xff] }
 0x21e   :  { %6534 = vmatprep.mubr.msk.bf16.mxu1 %vm7358_vm2, %v11221_v24  ;;  %v1409_v54 = vpack.c.bf16 %v1386_v63, %v1385_v56  ;;  %v1389_v56 = vld [vmem:[#allocation2 + $0x30] sm:$0xff]  ;;  %v1390_v63 = vld [vmem:[#allocation2 + $0x38] sm:$0xff] }
 0x224   :  { %6635 = vmatmul.mubr.msk.bf16.gmra.mxu0 %vm53_vm1, %v1877_v5  ;;  %v1388_v5 = vld [vmem:[#allocation2 + $0x28] sm:$0xff] }
 0x225   :  { %6535 = vmatmul.mubr.msk.bf16.vlgmr.msra.gmra.mxu1 %vm53_vm1, %v1408_v40  ;;  %6638 = vmatprep.mubr.msk.bf16.mxu0 %vm7358_vm2, %v11221_v24  ;;  %v1387_v40 = vld [vmem:[#allocation2 + $0x20] sm:$0xff] }
 0x226   :  { %6538 = vmatprep.mubr.msk.bf16.mxu1 %vm7358_vm2, %v11221_v24  ;;  %6643 = vmatpush3.bf16.msra.mxu1 %v7301_v53  ;;  %v2349_v53 = vld [vmem:[#allocation2 + $0xb] sm:$0xff]  ;;  %v1410_v29 = vpack.c.bf16 %v1388_v5, %v1387_v40 }
 0x227   :  { %6644 = vmatprep.subr.bf16.mxu1 %v11221_v24  ;;  %v2374_v49 = vpack.c.bf16 %v2350_v32, %v2349_v53  ;;  %v7304_v32 = vld [vmem:[%s10977_s4 + $0x60] sm:$0xff]   ;;  %v1392_v5 = vld [vmem:[#allocation2 + $0x48] sm:$0xff] }
 0x228   :  { %v2353_v53 = vld [vmem:[#allocation2 + $0x2b] sm:$0xff] }
 0x22a   :  { %6645 = vmatpush3.bf16.msra.mxu1 %v7302_v7  ;;  %v7303_v7 = vld [vmem:[%s10977_s4 + $0x68] sm:$0xff]  }
 0x22b   :  { %6754 = vmatprep.subr.bf16.mxu1 %v11221_v24 }
 0x22c   :  { %6639 = vmatmul.mubr.msk.bf16.gmra.mxu0 %vm53_vm1, %v1878_v14  ;;  %v2351_v14 = vld [vmem:[#allocation2 + $0x1b] sm:$0xff] }
 0x22d   :  { %6539 = vmatmul.mubr.msk.bf16.gmra.mxu1 %vm53_vm1, %v1409_v54  ;;  %6702 = vmatprep.mubr.msk.bf16.mxu0 %vm7358_vm2, %v11221_v24  ;;  %v2352_v54 = vld [vmem:[#allocation2 + $0x23] sm:$0xff] }
 0x22e   :  { %6542 = vmatprep.mubr.msk.bf16.mxu1 %vm7358_vm2, %v11221_v24  ;;  %v2375_v40 = vpack.c.bf16 %v2352_v54, %v2351_v14  ;;  %v2355_v14 = vld [vmem:[#allocation2 + $0x3b] sm:$0xff]  ;;  %v2356_v54 = vld [vmem:[#allocation2 + $0x43] sm:$0xff] }
 0x234   :  { %6703 = vmatmul.mubr.msk.bf16.vlgmr.msra.gmra.mxu0 %vm53_vm1, %v2374_v49  ;;  %v1391_v49 = vld [vmem:[#allocation2 + $0x40] sm:$0xff] }
 0x235   :  { %6543 = vmatmul.mubr.msk.bf16.gmra.mxu1 %vm53_vm1, %v1410_v29  ;;  %6706 = vmatprep.mubr.msk.bf16.mxu0 %vm7358_vm2, %v11221_v24  ;;  %v1411_v29 = vpack.c.bf16 %v1390_v63, %v1389_v56  ;;  %v1412_v48 = vpack.c.bf16 %v1392_v5, %v1391_v49  ;;  %v1394_v63 = vld [vmem:[#allocation2 + $0x58] sm:$0xff]  ;;  %v1396_v49 = vld [vmem:[#allocation2 + $0x68] sm:$0xff] }
 0x236   :  { %6546 = vmatprep.mubr.msk.bf16.mxu1 %vm7358_vm2, %v11221_v24  ;;  %6811 = vmatpush3.bf16.msra.mxu0 %v7303_v7  ;;  %v2354_v7 = vld [vmem:[#allocation2 + $0x33] sm:$0xff]  ;;  %v2357_v5 = vld [vmem:[#allocation2 + $0x4b] sm:$0xff] }
 0x237   :  { %6812 = vmatprep.subr.bf16.mxu0 %v11221_v24  ;;  %v2376_v56 = vpack.c.bf16 %v2354_v7, %v2353_v53  ;;  %v2358_v53 = vld [vmem:[#allocation2 + $0x53] sm:$0xff] }
 0x23a   :  { %6813 = vmatpush3.bf16.msra.mxu0 %v7304_v32  ;;  %v1393_v32 = vld [vmem:[#allocation2 + $0x50] sm:$0xff] }
 0x23b   :  { %6922 = vmatprep.subr.bf16.mxu0 %v11221_v24 }
 0x23c   :  { %6707 = vmatmul.mubr.msk.bf16.gmra.mxu0 %vm53_vm1, %v2375_v40  ;;  %v2377_v40 = vpack.c.bf16 %v2356_v54, %v2355_v14  ;;  %v1397_v14 = vld [vmem:[#allocation2 + $0x70] sm:$0xff]  ;;  %v1398_v54 = vld [vmem:[#allocation2 + $0x78] sm:$0xff] }
 0x23d   :  { %6547 = vmatmul.mubr.msk.bf16.gmra.mxu1 %vm53_vm1, %v1411_v29  ;;  %6710 = vmatprep.mubr.msk.bf16.mxu0 %vm7358_vm2, %v11221_v24  ;;  %v1413_v29 = vpack.c.bf16 %v1394_v63, %v1393_v32  ;;  %v2359_v32 = vld [vmem:[#allocation2 + $0x5b] sm:$0xff]  ;;  %v2360_v63 = vld [vmem:[#allocation2 + $0x63] sm:$0xff] }
 0x23e   :  { %6550 = vmatprep.mubr.msk.bf16.mxu1 %vm7358_vm2, %v11221_v24 }
 0x244   :  { %6711 = vmatmul.mubr.msk.bf16.gmra.mxu0 %vm53_vm1, %v2376_v56  ;;  %v2378_v56 = vpack.c.bf16 %v2358_v53, %v2357_v5  ;;  %v2361_v5 = vld [vmem:[#allocation2 + $0x6b] sm:$0xff]  ;;  %v2362_v53 = vld [vmem:[#allocation2 + $0x73] sm:$0xff] }
 0x245   :  { %6551 = vmatmul.mubr.msk.bf16.gmra.mxu1 %vm53_vm1, %v1412_v48  ;;  %6714 = vmatprep.mubr.msk.bf16.mxu0 %vm7358_vm2, %v11221_v24  ;;  %v1395_v48 = vld [vmem:[#allocation2 + $0x60] sm:$0xff] }
 0x246   :  { %6554 = vmatprep.mubr.msk.bf16.mxu1 %vm7358_vm2, %v11221_v24  ;;  %v1414_v7 = vpack.c.bf16 %v1396_v49, %v1395_v48  ;;  %v1399_v48 = vld [vmem:[#allocation2 + $0x80] sm:$0xff]  ;;  %v1400_v49 = vld [vmem:[#allocation2 + $0x88] sm:$0xff] }
 0x24c   :  { %6715 = vmatmul.mubr.msk.bf16.gmra.mxu0 %vm53_vm1, %v2377_v40  ;;  %v1415_v40 = vpack.c.bf16 %v1398_v54, %v1397_v14  ;;  %v2363_v14 = vld [vmem:[#allocation2 + $0x7b] sm:$0xff]  ;;  %v2364_v54 = vld [vmem:[#allocation2 + $0x83] sm:$0xff] }
 0x24d   :  { %6555 = vmatmul.mubr.msk.bf16.gmra.mxu1 %vm53_vm1, %v1413_v29  ;;  %6718 = vmatprep.mubr.msk.bf16.mxu0 %vm7358_vm2, %v11221_v24  ;;  %v2379_v29 = vpack.c.bf16 %v2360_v63, %v2359_v32  ;;  %v1401_v32 = vld [vmem:[#allocation2 + $0x90] sm:$0xff]  ;;  %v1402_v63 = vld [vmem:[#allocation2 + $0x98] sm:$0xff] }
 0x24e   :  { %6558 = vmatprep.mubr.msk.bf16.mxu1 %vm7358_vm2, %v11221_v24 }
 0x254   :  { %6719 = vmatmul.mubr.msk.bf16.gmra.mxu0 %vm53_vm1, %v2378_v56  ;;  %v2380_v56 = vpack.c.bf16 %v2362_v53, %v2361_v5  ;;  %v2365_v5 = vld [vmem:[#allocation2 + $0x8b] sm:$0xff]  ;;  %v2366_v53 = vld [vmem:[#allocation2 + $0x93] sm:$0xff] }
 0x255   :  { %6559 = vmatmul.mubr.msk.bf16.gmra.mxu1 %vm53_vm1, %v1414_v7  ;;  %6722 = vmatprep.mubr.msk.bf16.mxu0 %vm7358_vm2, %v11221_v24  ;;  %v1416_v7 = vpack.c.bf16 %v1400_v49, %v1399_v48  ;;  %v1403_v48 = vld [vmem:[#allocation2 + $0xa0] sm:$0xff]  ;;  %v1404_v49 = vld [vmem:[#allocation2 + $0xa8] sm:$0xff] }
 0x256   :  { %6562 = vmatprep.mubr.msk.bf16.mxu1 %vm7358_vm2, %v11221_v24 }
 0x25c   :  { %6723 = vmatmul.mubr.msk.bf16.gmra.mxu0 %vm53_vm1, %v2379_v29  ;;  %v1417_v29 = vpack.c.bf16 %v1402_v63, %v1401_v32  ;;  %v2368_v32 = vld [vmem:[#allocation2 + $0xa3] sm:$0xff]  ;;  %v1405_v63 = vld [vmem:[#allocation2 + $0xb0] sm:$0xff] }
 0x25d   :  { %6563 = vmatmul.mubr.msk.bf16.gmra.mxu1 %vm53_vm1, %v1415_v40  ;;  %6726 = vmatprep.mubr.msk.bf16.mxu0 %vm7358_vm2, %v11221_v24  ;;  %v2381_v40 = vpack.c.bf16 %v2364_v54, %v2363_v14  ;;  %v1406_v14 = vld [vmem:[#allocation2 + $0xb8] sm:$0xff] }
 0x25e   :  { %6566 = vmatprep.mubr.msk.bf16.mxu1 %vm7358_vm2, %v11221_v24  ;;  %v2367_v54 = vld [vmem:[#allocation2 + $0x9b] sm:$0xff] }
 0x264   :  { %6727 = vmatmul.mubr.msk.bf16.gmra.mxu0 %vm53_vm1, %v2380_v56  ;;  %v2382_v56 = vpack.c.bf16 %v2366_v53, %v2365_v5  ;;  %v2370_v5 = vld [vmem:[#allocation2 + $0xb3] sm:$0xff] }
 0x265   :  { %6567 = vmatmul.mubr.msk.bf16.gmra.mxu1 %vm53_vm1, %v1416_v7  ;;  %6730 = vmatprep.mubr.msk.bf16.mxu0 %vm7358_vm2, %v11221_v24  ;;  %v1418_v7 = vpack.c.bf16 %v1404_v49, %v1403_v48  ;;  %v1407_v48 = vld [vmem:[#allocation2 + $0xc0] sm:$0xff]  ;;  %v2369_v49 = vld [vmem:[#allocation2 + $0xab] sm:$0xff] }
 0x266   :  { %6570 = vmatprep.mubr.msk.bf16.mxu1 %vm7358_vm2, %v11221_v24  ;;  %v1420_v53 = vpack.c.bf16 %v1407_v48, %v1407_v48 }
 0x26c   :  { %6731 = vmatmul.mubr.msk.bf16.gmra.mxu0 %vm53_vm1, %v2381_v40  ;;  %v2383_v40 = vpack.c.bf16 %v2368_v32, %v2367_v54  ;;  %v2372_v54 = vld [vmem:[#allocation2 + $0xc3] sm:$0xff] }
 0x26d   :  { %6571 = vmatmul.mubr.msk.bf16.gmra.mxu1 %vm53_vm1, %v1417_v29  ;;  %6734 = vmatprep.mubr.msk.bf16.mxu0 %vm7358_vm2, %v11221_v24  ;;  %v1419_v29 = vpack.c.bf16 %v1406_v14, %v1405_v63  ;;  %v2371_v14 = vld [vmem:[#allocation2 + $0xbb] sm:$0xff] }
 0x26e   :  { %6574 = vmatprep.mubr.msk.bf16.mxu1 %vm7358_vm2, %v11221_v24 }
 0x274   :  { %6735 = vmatmul.mubr.msk.bf16.gmra.mxu0 %vm53_vm1, %v2382_v56 }
 0x275   :  { %6575 = vmatmul.mubr.msk.bf16.gmra.mxu1 %vm53_vm1, %v1418_v7  ;;  %6738 = vmatprep.mubr.msk.bf16.mxu0 %vm7358_vm2, %v11221_v24  ;;  %v2384_v7 = vpack.c.bf16 %v2370_v5, %v2369_v49  ;;  %v2385_v5 = vpack.c.bf16 %v2372_v54, %v2371_v14  ;;  %v7306_v54 = vld [vmem:[%s10977_s4 + $0x50] sm:$0xff]  }
 0x276   :  { %6578 = vmatprep.mubr.msk.bf16.mxu1 %vm7358_vm2, %v11221_v24 }
 0x27c   :  { %6739 = vmatmul.mubr.msk.bf16.gmra.mxu0 %vm53_vm1, %v2383_v40 }
 0x27d   :  { %6579 = vmatmul.mubr.msk.bf16.gmra.mxu1 %vm53_vm1, %v1419_v29  ;;  %6742 = vmatprep.mubr.msk.bf16.mxu0 %vm7358_vm2, %v11221_v24 }
 0x27e   :  { %6582 = vmatprep.mubr.msk.bf16.mxu1 %vm7358_vm2, %v11221_v24 }
 0x284   :  { %v9121_v56 = vpop.f32.mrf.mxu0  ;;  %6743 = vmatmul.mubr.msk.bf16.gmra.mxu0 %vm53_vm1, %v2384_v7 }
 0x285   :  { %v9123_v19 = vpop.f32.mrf.mxu1  ;;  %6583 = vmatmul.mubr.msk.bf16.gmra.mxu1 %vm53_vm1, %v1420_v53  ;;  %6746 = vmatprep.mubr.msk.bf16.mxu0 %vm7358_vm2, %v11221_v24  ;;  %v7305_v53 = vld [vmem:[%s10977_s4 + $0x58] sm:$0xff]  }
 0x286   :  { %6646 = vmatprep.mubr.msk.bf16.mxu1 %vm7358_vm2, %v11221_v24  ;;  %v6480_v32 = vpop.f32.mrf.mxu0 }
 0x287   :  { %v6484_v63 = vpop.f32.mrf.mxu1  ;;  %v2373_v32 = vld [vmem:[#allocation2 + $0xcb] sm:$0xff] }
 0x288   :  { %v9131_v29 = vpop.f32.mrf.mxu0 }
 0x289   :  { %v9133_v40 = vpop.f32.mrf.mxu1 }
 0x28a   :  { %v6481_v48 = vpop.f32.mrf.mxu0 }
 0x28b   :  { %v6485_v49 = vpop.f32.mrf.mxu1 }
 0x28c   :  { %v9140_v52 = vpop.f32.mrf.mxu0  ;;  %6747 = vmatmul.mubr.msk.bf16.gmra.mxu0 %vm53_vm1, %v2385_v5 }
 0x28d   :  { %v9138_v7 = vpop.f32.mrf.mxu1  ;;  %6647 = vmatmul.mubr.msk.bf16.vlgmr.msra.gmra.mxu1 %vm53_vm1, %v2120_v46  ;;  %6750 = vmatprep.mubr.msk.bf16.mxu0 %vm7358_vm2, %v11221_v24  ;;  %v2386_v46 = vpack.c.bf16 %v2373_v32, %v2373_v32 }
 0x28e   :  { %6650 = vmatprep.mubr.msk.bf16.mxu1 %vm7358_vm2, %v11221_v24  ;;  %v6592_v14 = vpop.f32.mrf.mxu0  ;;  %6755 = vmatpush3.bf16.msra.mxu1 %v7305_v53 }
 0x28f   :  { %v6488_v63 = vpop.f32.mrf.mxu1  ;;  %6756 = vmatprep.subr.bf16.mxu1 %v11221_v24  ;;  %v9173_v14 = vld [vmem:[#allocation2 + $0x14] sm:$0xff] }
 0x290   :  { %v9157_v12 = vpop.f32.mrf.mxu0  ;;  %v2882_v13 = vpack.c.bf16 %v8907_v62, %v9173_v14 }
 0x291   :  { %v9155_v61 = vpop.f32.mrf.mxu1 }
 0x292   :  { %v6593_v49 = vpop.f32.mrf.mxu0  ;;  %6757 = vmatpush3.bf16.msra.mxu1 %v7306_v54 }
 0x293   :  { %v6489_v48 = vpop.f32.mrf.mxu1  ;;  %6866 = vmatprep.subr.bf16.mxu1 %v11221_v24 }
 0x294   :  { %v9162_v63 = vpop.f32.mrf.mxu0  ;;  %6751 = vmatmul.mubr.msk.bf16.gmra.mxu0 %vm53_vm1, %v2386_v46 }
 0x295   :  { %v9160_v5 = vpop.f32.mrf.mxu1  ;;  %6651 = vmatmul.mubr.msk.bf16.gmra.mxu1 %vm53_vm1, %v2121_v42  ;;  %6814 = vmatprep.mubr.msk.bf16.mxu0 %vm7358_vm2, %v11221_v24  ;;  %v7307_v42 = vld [vmem:[%s10977_s4 + $0x88] sm:$0xff]  }
 0x296   :  { %6654 = vmatprep.mubr.msk.bf16.mxu1 %vm7358_vm2, %v11221_v24  ;;  %v6596_v32 = vpop.f32.mrf.mxu0 }
 0x297   :  { %v6492_v53 = vpop.f32.mrf.mxu1 }
 0x298   :  { %v9177_v48 = vpop.f32.mrf.mxu0 }
 0x299   :  { %v9175_v54 = vpop.f32.mrf.mxu1 }
 0x29a   :  { %v6597_v26 = vpop.f32.mrf.mxu0 }
 0x29b   :  { %v6493_v49 = vpop.f32.mrf.mxu1 }
 0x29c   :  { %v9186_v15 = vpop.f32.mrf.mxu0  ;;  %6815 = vmatmul.mubr.msk.bf16.vlgmr.msra.gmra.mxu0 %vm53_vm1, %v2882_v13  ;;  %v7308_v49 = vld [vmem:[%s10977_s4 + $0x80] sm:$0xff]   ;;  %v2883_v13 = vpack.c.bf16 %v8911_v4, %v8909_v38 }
 0x29d   :  { %v9184_v46 = vpop.f32.mrf.mxu1  ;;  %6655 = vmatmul.mubr.msk.bf16.gmra.mxu1 %vm53_vm1, %v2122_v9  ;;  %6818 = vmatprep.mubr.msk.bf16.mxu0 %vm7358_vm2, %v11221_v24 }
 0x29e   :  { %6658 = vmatprep.mubr.msk.bf16.mxu1 %vm7358_vm2, %v11221_v24  ;;  %v6600_v32 = vpop.f32.mrf.mxu0  ;;  %6923 = vmatpush3.bf16.msra.mxu0 %v7307_v42 }
 0x29f   :  { %v6496_v53 = vpop.f32.mrf.mxu1  ;;  %6924 = vmatprep.subr.bf16.mxu0 %v11221_v24 }
 0x2a0   :  { %v9203_v8 = vpop.f32.mrf.mxu0 }
 0x2a1   :  { %v9201_v21 = vpop.f32.mrf.mxu1 }
 0x2a2   :  { %v6601_v26 = vpop.f32.mrf.mxu0  ;;  %6925 = vmatpush3.bf16.msra.mxu0 %v7308_v49 }
 0x2a3   :  { %v6497_v9 = vpop.f32.mrf.mxu1  ;;  %7006 = vmatprep.subr.bf16.mxu0 %v11221_v24 }
 0x2a4   :  { %v9210_v42 = vpop.f32.mrf.mxu0  ;;  %6819 = vmatmul.mubr.msk.bf16.gmra.mxu0 %vm53_vm1, %v2883_v13  ;;  %v11224_v13 = vpack.c.bf16 %v8831_v25, %v8827_v60 }
 0x2a5   :  { %v9208_v53 = vpop.f32.mrf.mxu1  ;;  %6659 = vmatmul.mubr.msk.bf16.gmra.mxu1 %vm53_vm1, %v2123_v23  ;;  %6822 = vmatprep.mubr.msk.bf16.mxu0 %vm7358_vm2, %v11221_v24 }
 0x2a6   :  { %6662 = vmatprep.mubr.msk.bf16.mxu1 %vm7358_vm2, %v11221_v24  ;;  %v6604_v49 = vpop.f32.mrf.mxu0 }
 0x2a7   :  { %v6500_v32 = vpop.f32.mrf.mxu1 }
 0x2a8   :  { %v9223_v26 = vpop.f32.mrf.mxu0 }
 0x2a9   :  { %v9221_v9 = vpop.f32.mrf.mxu1 }
 0x2aa   :  { %11222 = vst [vmem:[#allocation27_spill] sm:$0xff] %v9221_v9  ;;  %v6605_v2 = vpop.f32.mrf.mxu0 }
 0x2ab   :  { %v6501_v31 = vpop.f32.mrf.mxu1 }
 0x2ac   :  { %v9229_v23 = vpop.f32.mrf.mxu0  ;;  %6823 = vmatmul.mubr.msk.bf16.gmra.mxu0 %vm53_vm1, %v2884_v28  ;;  %v2885_v28 = vpack.c.bf16 %v8921_v47, %v8917_v39 }
 0x2ad   :  { %v9227_v55 = vpop.f32.mrf.mxu1  ;;  %6663 = vmatmul.mubr.msk.bf16.gmra.mxu1 %vm53_vm1, %v11224_v13  ;;  %6826 = vmatprep.mubr.msk.bf16.mxu0 %vm7358_vm2, %v11221_v24 }
 0x2ae   :  { %11223 = vst [vmem:[#allocation24_spill] sm:$0xff] %v9227_v55  ;;  %6666 = vmatprep.mubr.msk.bf16.mxu1 %vm7358_vm2, %v11221_v24  ;;  %v6608_v31 = vpop.f32.mrf.mxu0  ;;  %v2125_v55 = vpack.c.bf16 %v8987_v22, %v8977_v33 }
 0x2af   :  { %v6504_v2 = vpop.f32.mrf.mxu1 }
 0x2b0   :  { %v9242_v49 = vpop.f32.mrf.mxu0  ;;  %v9258_v2 = vld [vmem:[#allocation2 + $0x5c] sm:$0xff] }
 0x2b1   :  { %v9240_v32 = vpop.f32.mrf.mxu1 }
 0x2b2   :  { %11225 = vst [vmem:[#allocation31_spill] sm:$0xff] %v9240_v32  ;;  %v6609_v25 = vpop.f32.mrf.mxu0 }
 0x2b3   :  { %v6505_v60 = vpop.f32.mrf.mxu1 }
 0x2b4   :  { %v9250_v9 = vpop.f32.mrf.mxu0  ;;  %6827 = vmatmul.mubr.msk.bf16.gmra.mxu0 %vm53_vm1, %v2885_v28 }
 0x2b5   :  { %v9248_v13 = vpop.f32.mrf.mxu1  ;;  %11227 = vst [vmem:[#allocation25_spill] sm:$0xff] %v9250_v9  ;;  %6667 = vmatmul.mubr.msk.bf16.gmra.mxu1 %vm53_vm1, %v2125_v55  ;;  %6830 = vmatprep.mubr.msk.bf16.mxu0 %vm7358_vm2, %v11221_v24  ;;  %v2886_v55 = vpack.c.bf16 %v9258_v2, %v8923_v3  ;;  %v11231_v9 = vpack.c.bf16 %v8841_v37, %v8836_v43 }
 0x2b6   :  { %11226 = vst [vmem:[#allocation35_spill] sm:$0xff] %v9248_v13  ;;  %6670 = vmatprep.mubr.msk.bf16.mxu1 %vm7358_vm2, %v11221_v24  ;;  %v6612_v22 = vpop.f32.mrf.mxu0 }
 0x2b7   :  { %v6508_v33 = vpop.f32.mrf.mxu1  ;;  %v9279_v22 = vld [vmem:[#allocation2 + $0x64] sm:$0xff] }
 0x2b8   :  { %v9262_v60 = vpop.f32.mrf.mxu0  ;;  %v2887_v37 = vpack.c.bf16 %v8925_v18, %v9279_v22 }
 0x2b9   :  { %v9260_v31 = vpop.f32.mrf.mxu1 }
 0x2ba   :  { %11228 = vst [vmem:[#allocation26_spill] sm:$0xff] %v9260_v31  ;;  %v6613_v13 = vpop.f32.mrf.mxu0 }
 0x2bb   :  { %v6509_v25 = vpop.f32.mrf.mxu1 }
 0x2bc   :  { %v9268_v32 = vpop.f32.mrf.mxu0  ;;  %6831 = vmatmul.mubr.msk.bf16.gmra.mxu0 %vm53_vm1, %v2886_v55 }
 0x2bd   :  { %v9266_v28 = vpop.f32.mrf.mxu1  ;;  %11230 = vst [vmem:[#allocation28_spill] sm:$0xff] %v9268_v32  ;;  %6671 = vmatmul.mubr.msk.bf16.gmra.mxu1 %vm53_vm1, %v11231_v9  ;;  %6834 = vmatprep.mubr.msk.bf16.mxu0 %vm7358_vm2, %v11221_v24  ;;  %v11236_v32 = vpack.c.bf16 %v8849_v11, %v8843_v27  ;;  %v2888_v27 = vpack.c.bf16 %v8933_v59, %v8931_v16 }
 0x2be   :  { %11229 = vst [vmem:[#allocation29_spill] sm:$0xff] %v9266_v28  ;;  %6674 = vmatprep.mubr.msk.bf16.mxu1 %vm7358_vm2, %v11221_v24  ;;  %v6616_v33 = vpop.f32.mrf.mxu0 }
 0x2bf   :  { %v6512_v13 = vpop.f32.mrf.mxu1 }
 0x2c0   :  { %v9283_v28 = vpop.f32.mrf.mxu0 }
 0x2c1   :  { %v9281_v25 = vpop.f32.mrf.mxu1  ;;  %11233 = vst [vmem:[#allocation33_spill] sm:$0xff] %v9283_v28 }
 0x2c2   :  { %11232 = vst [vmem:[#allocation30_spill] sm:$0xff] %v9281_v25  ;;  %v6617_v43 = vpop.f32.mrf.mxu0 }
 0x2c3   :  { %v6513_v31 = vpop.f32.mrf.mxu1 }
 0x2c4   :  { %v9289_v55 = vpop.f32.mrf.mxu0  ;;  %6835 = vmatmul.mubr.msk.bf16.gmra.mxu0 %vm53_vm1, %v2887_v37  ;;  %v11241_v37 = vpack.c.bf16 %v8857_v45, %v8851_v30  ;;  %v2889_v30 = vpack.c.bf16 %v8939_v10, %v8935_v0 }
 0x2c5   :  { %v9287_v9 = vpop.f32.mrf.mxu1  ;;  %11235 = vst [vmem:[#allocation34_spill] sm:$0xff] %v9289_v55  ;;  %6675 = vmatmul.mubr.msk.bf16.gmra.mxu1 %vm53_vm1, %v11236_v32  ;;  %6838 = vmatprep.mubr.msk.bf16.mxu0 %vm7358_vm2, %v11221_v24  ;;  %v11263_v55 = vpack.c.bf16 %v8913_v44, %v8911_v4 }
 0x2c6   :  { %11234 = vst [vmem:[#allocation32_spill] sm:$0xff] %v9287_v9  ;;  %6678 = vmatprep.mubr.msk.bf16.mxu1 %vm7358_vm2, %v11221_v24  ;;  %v6620_v13 = vpop.f32.mrf.mxu0 }
 0x2c7   :  { %v6516_v31 = vpop.f32.mrf.mxu1 }
 0x2c8   :  { %v9302_v43 = vpop.f32.mrf.mxu0 }
 0x2c9   :  { %v9300_v33 = vpop.f32.mrf.mxu1  ;;  %11238 = vst [vmem:[#allocation36_spill] sm:$0xff] %v9302_v43 }
 0x2ca   :  { %11237 = vst [vmem:[#allocation37_spill] sm:$0xff] %v9300_v33  ;;  %v6621_v25 = vpop.f32.mrf.mxu0 }
 0x2cb   :  { %v6517_v9 = vpop.f32.mrf.mxu1 }
 0x2cc   :  { %v9308_v32 = vpop.f32.mrf.mxu0  ;;  %6839 = vmatmul.mubr.msk.bf16.gmra.mxu0 %vm53_vm1, %v2888_v27 }
 0x2cd   :  { %v9306_v11 = vpop.f32.mrf.mxu1  ;;  %11240 = vst [vmem:[#allocation7_spill] sm:$0xff] %v9308_v32  ;;  %6679 = vmatmul.mubr.msk.bf16.gmra.mxu1 %vm53_vm1, %v11241_v37  ;;  %6842 = vmatprep.mubr.msk.bf16.mxu0 %vm7358_vm2, %v11221_v24  ;;  %v11246_v37 = vpack.c.bf16 %v8859_v1, %v8869_v50  ;;  %v2890_v1 = vpack.c.bf16 %v8943_v51, %v8941_v20 }
 0x2ce   :  { %11239 = vst [vmem:[#allocation38_spill] sm:$0xff] %v9306_v11  ;;  %6682 = vmatprep.mubr.msk.bf16.mxu1 %vm7358_vm2, %v11221_v24  ;;  %v6624_v9 = vpop.f32.mrf.mxu0 }
 0x2cf   :  { %v6520_v25 = vpop.f32.mrf.mxu1 }
 0x2d0   :  { %v9321_v13 = vpop.f32.mrf.mxu0 }
 0x2d1   :  { %v9319_v31 = vpop.f32.mrf.mxu1  ;;  %11243 = vst [vmem:[#allocation8_spill] sm:$0xff] %v9321_v13  ;;  %v7309_v13 = vld [vmem:[%s10977_s4 + $0x78] sm:$0xff]  }
 0x2d2   :  { %11242 = vst [vmem:[#allocation6_spill] sm:$0xff] %v9319_v31  ;;  %v6625_v33 = vpop.f32.mrf.mxu0 }
 0x2d3   :  { %v6521_v11 = vpop.f32.mrf.mxu1 }
 0x2d4   :  { %v9327_v27 = vpop.f32.mrf.mxu0  ;;  %6843 = vmatmul.mubr.msk.bf16.gmra.mxu0 %vm53_vm1, %v2889_v30 }
 0x2d5   :  { %v9325_v45 = vpop.f32.mrf.mxu1  ;;  %11245 = vst [vmem:[#allocation12_spill] sm:$0xff] %v9327_v27  ;;  %6683 = vmatmul.mubr.msk.bf16.gmra.mxu1 %vm53_vm1, %v11246_v37  ;;  %6846 = vmatprep.mubr.msk.bf16.mxu0 %vm7358_vm2, %v11221_v24  ;;  %v11251_v37 = vpack.c.bf16 %v8875_v41, %v8871_v36  ;;  %v2891_v36 = vpack.c.bf16 %v8953_v17, %v8951_v34 }
 0x2d6   :  { %11244 = vst [vmem:[#allocation10_spill] sm:$0xff] %v9325_v45  ;;  %6686 = vmatprep.mubr.msk.bf16.mxu1 %vm7358_vm2, %v11221_v24  ;;  %v6628_v11 = vpop.f32.mrf.mxu0 }
 0x2d7   :  { %v6524_v33 = vpop.f32.mrf.mxu1 }
 0x2d8   :  { %v9340_v9 = vpop.f32.mrf.mxu0 }
 0x2d9   :  { %v9338_v25 = vpop.f32.mrf.mxu1  ;;  %11248 = vst [vmem:[#allocation11_spill] sm:$0xff] %v9340_v9 }
 0x2da   :  { %11247 = vst [vmem:[#allocation9_spill] sm:$0xff] %v9338_v25  ;;  %v6629_v31 = vpop.f32.mrf.mxu0 }
 0x2db   :  { %v6525_v45 = vpop.f32.mrf.mxu1 }
 0x2dc   :  { %v9346_v30 = vpop.f32.mrf.mxu0  ;;  %6847 = vmatmul.mubr.msk.bf16.gmra.mxu0 %vm53_vm1, %v2890_v1  ;;  %v11254_v1 = vpack.c.bf16 %v8861_v6, %v8877_v58 }
 0x2dd   :  { %v9344_v50 = vpop.f32.mrf.mxu1  ;;  %11250 = vst [vmem:[#allocation16_spill] sm:$0xff] %v9346_v30  ;;  %6687 = vmatmul.mubr.msk.bf16.gmra.mxu1 %vm53_vm1, %v11251_v37  ;;  %6850 = vmatprep.mubr.msk.bf16.mxu0 %vm7358_vm2, %v11221_v24 }
 0x2de   :  { %11249 = vst [vmem:[#allocation14_spill] sm:$0xff] %v9344_v50  ;;  %6690 = vmatprep.mubr.msk.bf16.mxu1 %vm7358_vm2, %v11221_v24  ;;  %v6632_v45 = vpop.f32.mrf.mxu0 }
 0x2df   :  { %v6528_v31 = vpop.f32.mrf.mxu1  ;;  %v9374_v45 = vld [vmem:[#allocation2 + $0xbc] sm:$0xff] }
 0x2e0   :  { %v9357_v11 = vpop.f32.mrf.mxu0 }
 0x2e1   :  { %v1651_v33 = vpop.f32.mrf.mxu1  ;;  %11252 = vst [vmem:[#allocation13_spill] sm:$0xff] %v9357_v11 }
 0x2e2   :  { %v6633_v25 = vpop.f32.mrf.mxu0 }
 0x2e3   :  { %v6529_v50 = vpop.f32.mrf.mxu1  ;;  %v2119_v25 = vld [vmem:[#allocation2 + $0xca] sm:$0xff] }
 0x2e4   :  { %v9363_v37 = vpop.f32.mrf.mxu0  ;;  %6851 = vmatmul.mubr.msk.bf16.gmra.mxu0 %vm53_vm1, %v2891_v36  ;;  %v2132_v6 = vpack.c.bf16 %v2119_v25, %v2119_v25  ;;  %v2892_v36 = vpack.c.bf16 %v9374_v45, %v8955_v35  ;;  %v9392_v25 = vld [vmem:[#allocation2 + $0xcc] sm:$0xff] }
 0x2e5   :  { %v9361_v41 = vpop.f32.mrf.mxu1  ;;  %11253 = vst [vmem:[#allocation15_spill] sm:$0xff] %v9363_v37  ;;  %6691 = vmatmul.mubr.msk.bf16.gmra.mxu1 %vm53_vm1, %v11254_v1  ;;  %6854 = vmatprep.mubr.msk.bf16.mxu0 %vm7358_vm2, %v11221_v24 }
 0x2e6   :  { %6694 = vmatprep.mubr.msk.bf16.mxu1 %vm7358_vm2, %v11221_v24  ;;  %v6636_v31 = vpop.f32.mrf.mxu0 }
 0x2e7   :  { %v6536_v50 = vpop.f32.mrf.mxu1 }
 0x2e8   :  { %v9378_v37 = vpop.f32.mrf.mxu0 }
 0x2e9   :  { %v9376_v33 = vpop.f32.mrf.mxu1  ;;  %11255 = vst [vmem:[#allocation18_spill] sm:$0xff] %v9378_v37 }
 0x2ea   :  { %v6637_v1 = vpop.f32.mrf.mxu0 }
 0x2eb   :  { %v6537_v58 = vpop.f32.mrf.mxu1  ;;  %v9394_v1 = vld [vmem:[#allocation2 + $0xc4] sm:$0xff] }
 0x2ec   :  { %v9384_v30 = vpop.f32.mrf.mxu0  ;;  %6855 = vmatmul.mubr.msk.bf16.gmra.mxu0 %vm53_vm1, %v2892_v36  ;;  %v2603_v58 = vld [vmem:[#allocation2 + $0xc] sm:$0xff] }
 0x2ed   :  { %v9382_v11 = vpop.f32.mrf.mxu1  ;;  %11256 = vst [vmem:[#allocation20_spill] sm:$0xff] %v9384_v30  ;;  %6695 = vmatmul.mubr.msk.bf16.gmra.mxu1 %vm53_vm1, %v2132_v6  ;;  %6858 = vmatprep.mubr.msk.bf16.mxu0 %vm7358_vm2, %v11221_v24  ;;  %v2893_v6 = vpack.c.bf16 %v9392_v25, %v9394_v1  ;;  %v2628_v27 = vpack.c.bf16 %v9173_v14, %v2603_v58 }
 0x2ee   :  { %6758 = vmatprep.mubr.msk.bf16.mxu1 %vm7358_vm2, %v11221_v24  ;;  %v6640_v31 = vpop.f32.mrf.mxu0 }
 0x2ef   :  { %v6540_v50 = vpop.f32.mrf.mxu1  ;;  %v7310_v31 = vld [vmem:[%s10977_s4 + $0x70] sm:$0xff]  }
 0x2f0   :  { %v2067_v30 = vpop.f32.mrf.mxu0 }
 0x2f1   :  { %v9396_v37 = vpop.f32.mrf.mxu1 }
 0x2f2   :  { %v6641_v9 = vpop.f32.mrf.mxu0 }
 0x2f3   :  { %v6541_v36 = vpop.f32.mrf.mxu1  ;;  %v2881_v9 = vld [vmem:[#allocation2 + $0xd4] sm:$0xff] }
 0x2f4   :  { %v9406_v50 = vpop.f32.mrf.mxu0  ;;  %6859 = vmatmul.mubr.msk.bf16.gmra.mxu0 %vm53_vm1, %v2893_v6  ;;  %v2894_v6 = vpack.c.bf16 %v2881_v9, %v2881_v9 }
 0x2f5   :  { %v9404_v32 = vpop.f32.mrf.mxu1  ;;  %11257 = vst [vmem:[#allocation17_spill] sm:$0xff] %v9406_v50  ;;  %6759 = vmatmul.mubr.msk.bf16.vlgmr.msra.gmra.mxu1 %vm53_vm1, %v2628_v27  ;;  %6862 = vmatprep.mubr.msk.bf16.mxu0 %vm7358_vm2, %v11221_v24 }
 0x2f6   :  { %6762 = vmatprep.mubr.msk.bf16.mxu1 %vm7358_vm2, %v11221_v24  ;;  %v6704_v30 = vpop.f32.mrf.mxu0  ;;  %6867 = vmatpush3.bf16.msra.mxu1 %v7309_v13  ;;  %v11260_v13 = vpack.c.bf16 %v8909_v38, %v8907_v62 }
 0x2f7   :  { %v6544_v14 = vpop.f32.mrf.mxu1  ;;  %6868 = vmatprep.subr.bf16.mxu1 %v11221_v24  ;;  %v3365_v30 = vld [vmem:[#allocation2 + $0x16] sm:$0xff] }
 0x2f8   :  { %v9420_v27 = vpop.f32.mrf.mxu0 }
 0x2f9   :  { %v9418_v58 = vpop.f32.mrf.mxu1  ;;  %11258 = vst [vmem:[#allocation19_spill] sm:$0xff] %v9420_v27 }
 0x2fa   :  { %v6705_v50 = vpop.f32.mrf.mxu0  ;;  %6869 = vmatpush3.bf16.msra.mxu1 %v7310_v31  ;;  %v3366_v31 = vld [vmem:[#allocation2 + $0x1e] sm:$0xff] }
 0x2fb   :  { %v6545_v36 = vpop.f32.mrf.mxu1  ;;  %6978 = vmatprep.subr.bf16.mxu1 %v11221_v24  ;;  %v3390_v38 = vpack.c.bf16 %v3366_v31, %v3365_v30  ;;  %v3368_v30 = vld [vmem:[#allocation2 + $0x2e] sm:$0xff] }
 0x2fc   :  { %v9425_v14 = vpop.f32.mrf.mxu0  ;;  %6863 = vmatmul.mubr.msk.bf16.gmra.mxu0 %vm53_vm1, %v2894_v6 }
 0x2fd   :  { %v9423_v43 = vpop.f32.mrf.mxu1  ;;  %11259 = vst [vmem:[#allocation22_spill] sm:$0xff] %v9425_v14  ;;  %6763 = vmatmul.mubr.msk.bf16.gmra.mxu1 %vm53_vm1, %v11260_v13  ;;  %6926 = vmatprep.mubr.msk.bf16.mxu0 %vm7358_vm2, %v11221_v24 }
 0x2fe   :  { %6766 = vmatprep.mubr.msk.bf16.mxu1 %vm7358_vm2, %v11221_v24  ;;  %v6708_v9 = vpop.f32.mrf.mxu0 }
 0x2ff   :  { %v6548_v50 = vpop.f32.mrf.mxu1  ;;  %v3367_v9 = vld [vmem:[#allocation2 + $0x26] sm:$0xff] }
 0x300   :  { %v9438_v14 = vpop.f32.mrf.mxu0  ;;  %v3391_v44 = vpack.c.bf16 %v3368_v30, %v3367_v9  ;;  %v3370_v9 = vld [vmem:[#allocation2 + $0x3e] sm:$0xff] }
 0x301   :  { %v9436_v36 = vpop.f32.mrf.mxu1  ;;  %11261 = vst [vmem:[#allocation21_spill] sm:$0xff] %v9438_v14  ;;  %v11266_v14 = vpack.c.bf16 %v8917_v39, %v8915_v57 }
 0x302   :  { %v6709_v62 = vpop.f32.mrf.mxu0 }
 0x303   :  { %v6549_v27 = vpop.f32.mrf.mxu1 }
 0x304   :  { %v9442_v6 = vpop.f32.mrf.mxu0  ;;  %6927 = vmatmul.mubr.msk.bf16.vlgmr.msra.gmra.mxu0 %vm53_vm1, %v3390_v38 }
 0x305   :  { %v9440_v13 = vpop.f32.mrf.mxu1  ;;  %11262 = vst [vmem:[#allocation23_spill] sm:$0xff] %v9442_v6  ;;  %6767 = vmatmul.mubr.msk.bf16.gmra.mxu1 %vm53_vm1, %v11263_v55  ;;  %6930 = vmatprep.mubr.msk.bf16.mxu0 %vm7358_vm2, %v11221_v24 }
 0x306   :  { %6770 = vmatprep.mubr.msk.bf16.mxu1 %vm7358_vm2, %v11221_v24  ;;  %v6712_v50 = vpop.f32.mrf.mxu0 }
 0x307   :  { %v6552_v27 = vpop.f32.mrf.mxu1  ;;  %v3369_v50 = vld [vmem:[#allocation2 + $0x36] sm:$0xff] }
 0x308   :  { %v9455_v62 = vpop.f32.mrf.mxu0  ;;  %v3392_v39 = vpack.c.bf16 %v3370_v9, %v3369_v50  ;;  %v3623_v9 = vld [vmem:[%s10980_s12 + $0x10] sm:$0xff] }
 0x309   :  { %v9453_v31 = vpop.f32.mrf.mxu1  ;;  %11264 = vst [vmem:[#allocation40_spill] sm:$0xff] %v9455_v62 }
 0x30a   :  { %v6713_v4 = vpop.f32.mrf.mxu0 }
 0x30b   :  { %v6553_v6 = vpop.f32.mrf.mxu1 }
 0x30c   :  { %v9459_v38 = vpop.f32.mrf.mxu0  ;;  %6931 = vmatmul.mubr.msk.bf16.gmra.mxu0 %vm53_vm1, %v3391_v44  ;;  %v3621_v44 = vld [vmem:[%s10980_s12] sm:$0xff] }
 0x30d   :  { %v9457_v55 = vpop.f32.mrf.mxu1  ;;  %11265 = vst [vmem:[#allocation41_spill] sm:$0xff] %v9459_v38  ;;  %6771 = vmatmul.mubr.msk.bf16.gmra.mxu1 %vm53_vm1, %v11266_v14  ;;  %6934 = vmatprep.mubr.msk.bf16.mxu0 %vm7358_vm2, %v11221_v24  ;;  %v7359_v14 = vmov 0  }
 0x30e   :  { %6774 = vmatprep.mubr.msk.bf16.mxu1 %vm7358_vm2, %v11221_v24  ;;  %v6716_v27 = vpop.f32.mrf.mxu0  ;;  %7258 = vset.pattern.permute.xlu0 %v7359_v14 }
 0x30f   :  { %v6556_v6 = vpop.f32.mrf.mxu1  ;;  %7259 = vset.pattern.permute.xlu1 %v7359_v14  ;;  %v11269_v27 = vpack.c.bf16 %v8923_v3, %v8921_v47  ;;  %3648 = vperm.xlu0 %7258, %v3621_v44   ;;  %v3372_v14 = vld [vmem:[#allocation2 + $0x4e] sm:$0xff] }
 0x310   :  { %v9472_v4 = vpop.f32.mrf.mxu0  ;;  %3658 = vperm.xlu1 %7259, %v3623_v9   ;;  %v3622_v47 = vld [vmem:[%s10980_s12 + $0x8] sm:$0xff]  ;;  %v3625_v9 = vld [vmem:[%s10980_s12 + $0x20] sm:$0xff] }
 0x311   :  { %v9470_v30 = vpop.f32.mrf.mxu1  ;;  %11267 = vst [vmem:[#allocation42_spill] sm:$0xff] %v9472_v4 }
 0x312   :  { %v6717_v57 = vpop.f32.mrf.mxu0 }
 0x313   :  { %v6557_v38 = vpop.f32.mrf.mxu1  ;;  %v3371_v57 = vld [vmem:[#allocation2 + $0x46] sm:$0xff]  ;;  %3653 = vperm.xlu0 %7258, %v3622_v47   ;;  %v3627_v47 = vld [vmem:[%s10980_s12 + $0x30] sm:$0xff] }
 0x314   :  { %v9479_v6 = vpop.f32.mrf.mxu0  ;;  %6935 = vmatmul.mubr.msk.bf16.gmra.mxu0 %vm53_vm1, %v3392_v39 }
 0x315   :  { %v9477_v62 = vpop.f32.mrf.mxu1  ;;  %11268 = vst [vmem:[#allocation43_spill] sm:$0xff] %v9479_v6  ;;  %6775 = vmatmul.mubr.msk.bf16.gmra.mxu1 %vm53_vm1, %v11269_v27  ;;  %6938 = vmatprep.mubr.msk.bf16.mxu0 %vm7358_vm2, %v11221_v24  ;;  %v2633_v27 = vpack.c.bf16 %v9279_v22, %v9258_v2  ;;  %v3624_v6 = vld [vmem:[%s10980_s12 + $0x18] sm:$0xff] }
 0x316   :  { %6778 = vmatprep.mubr.msk.bf16.mxu1 %vm7358_vm2, %v11221_v24  ;;  %v6720_v50 = vpop.f32.mrf.mxu0  ;;  %3663 = vperm.xlu1 %7259, %v3624_v6   ;;  %v3626_v6 = vld [vmem:[%s10980_s12 + $0x28] sm:$0xff] }
 0x317   :  { %v6560_v38 = vpop.f32.mrf.mxu1  ;;  %v3393_v50 = vpack.c.bf16 %v3372_v14, %v3371_v57  ;;  %3668 = vperm.xlu0 %7258, %v3625_v9   ;;  %v3373_v57 = vld [vmem:[#allocation2 + $0x56] sm:$0xff]  ;;  %v3374_v14 = vld [vmem:[#allocation2 + $0x5e] sm:$0xff] }
 0x318   :  { %v9498_v39 = vpop.f32.mrf.mxu0  ;;  %v3628_v9 = vld [vmem:[%s10980_s12 + $0x38] sm:$0xff] }
 0x319   :  { %v9496_v3 = vpop.f32.mrf.mxu1 }
 0x31a   :  { %v6721_v44 = vpop.f32.mrf.mxu0  ;;  %3673 = vperm.xlu1 %7259, %v3626_v6  }
 0x31b   :  { %v6561_v38 = vpop.f32.mrf.mxu1  ;;  %3678 = vperm.xlu0 %7258, %v3627_v47   ;;  %v3630_v47 = vld [vmem:[%s10980_s12 + $0x48] sm:$0xff] }
 0x31c   :  { %v9510_v28 = vpop.f32.mrf.mxu0  ;;  %6939 = vmatmul.mubr.msk.bf16.gmra.mxu0 %vm53_vm1, %v3393_v50 }
 0x31d   :  { %v9508_v4 = vpop.f32.mrf.mxu1  ;;  %11270 = vst [vmem:[#allocation44_spill] sm:$0xff] %v9510_v28  ;;  %6779 = vmatmul.mubr.msk.bf16.gmra.mxu1 %vm53_vm1, %v2633_v27  ;;  %6942 = vmatprep.mubr.msk.bf16.mxu0 %vm7358_vm2, %v11221_v24 }
 0x31e   :  { %6782 = vmatprep.mubr.msk.bf16.mxu1 %vm7358_vm2, %v11221_v24  ;;  %v6724_v22 = vpop.f32.mrf.mxu0  ;;  %3683 = vperm.xlu1 %7259, %v3628_v9  }
 0x31f   :  { %v6564_v2 = vpop.f32.mrf.mxu1  ;;  %v3629_v22 = vld [vmem:[%s10980_s12 + $0x40] sm:$0xff] }
 0x320   :  { %v9526_v38 = vpop.f32.mrf.mxu0  ;;  %v3394_v2 = vpack.c.bf16 %v3374_v14, %v3373_v57  ;;  %3688 = vperm.xlu0 %7258, %v3629_v22   ;;  %v3632_v22 = vld [vmem:[%s10980_s12 + $0x58] sm:$0xff] }
 0x321   :  { %v9524_v27 = vpop.f32.mrf.mxu1  ;;  %11271 = vst [vmem:[#allocation45_spill] sm:$0xff] %v9526_v38  ;;  %v11273_v38 = vpack.c.bf16 %v8931_v16, %v8925_v18  ;;  %v3631_v18 = vld [vmem:[%s10980_s12 + $0x50] sm:$0xff] }
 0x322   :  { %v6725_v50 = vpop.f32.mrf.mxu0  ;;  %3693 = vperm.xlu1 %7259, %v3630_v47  }
 0x323   :  { %v6565_v44 = vpop.f32.mrf.mxu1  ;;  %v3376_v50 = vld [vmem:[#allocation2 + $0x6e] sm:$0xff] }
 0x324   :  { %v9536_v28 = vpop.f32.mrf.mxu0  ;;  %6943 = vmatmul.mubr.msk.bf16.gmra.mxu0 %vm53_vm1, %v3394_v2  ;;  %v3375_v44 = vld [vmem:[#allocation2 + $0x66] sm:$0xff]  ;;  %3698 = vperm.xlu0 %7258, %v3631_v18  }
 0x325   :  { %v9534_v6 = vpop.f32.mrf.mxu1  ;;  %11272 = vst [vmem:[#allocation46_spill] sm:$0xff] %v9536_v28  ;;  %6783 = vmatmul.mubr.msk.bf16.gmra.mxu1 %vm53_vm1, %v11273_v38  ;;  %6946 = vmatprep.mubr.msk.bf16.mxu0 %vm7358_vm2, %v11221_v24  ;;  %v3634_v18 = vld [vmem:[%s10980_s12 + $0x68] sm:$0xff] }
 0x326   :  { %6786 = vmatprep.mubr.msk.bf16.mxu1 %vm7358_vm2, %v11221_v24  ;;  %v6728_v14 = vpop.f32.mrf.mxu0  ;;  %3703 = vperm.xlu1 %7259, %v3632_v22  }
 0x327   :  { %v6568_v57 = vpop.f32.mrf.mxu1  ;;  %v3633_v14 = vld [vmem:[%s10980_s12 + $0x60] sm:$0xff] }
 0x328   :  { %v9555_v38 = vpop.f32.mrf.mxu0  ;;  %v3395_v57 = vpack.c.bf16 %v3376_v50, %v3375_v44  ;;  %3708 = vperm.xlu0 %7258, %v3633_v14   ;;  %v3636_v14 = vld [vmem:[%s10980_s12 + $0x78] sm:$0xff] }
 0x329   :  { %v9553_v16 = vpop.f32.mrf.mxu1  ;;  %11274 = vst [vmem:[#allocation47_spill] sm:$0xff] %v9555_v38  ;;  %v11276_v38 = vpack.c.bf16 %v8935_v0, %v8933_v59  ;;  %v3635_v59 = vld [vmem:[%s10980_s12 + $0x70] sm:$0xff] }
 0x32a   :  { %v6729_v9 = vpop.f32.mrf.mxu0  ;;  %3713 = vperm.xlu1 %7259, %v3634_v18  }
 0x32b   :  { %v6569_v2 = vpop.f32.mrf.mxu1  ;;  %v3378_v9 = vld [vmem:[#allocation2 + $0x7e] sm:$0xff] }
 0x32c   :  { %v9565_v28 = vpop.f32.mrf.mxu0  ;;  %6947 = vmatmul.mubr.msk.bf16.gmra.mxu0 %vm53_vm1, %v3395_v57  ;;  %v3377_v2 = vld [vmem:[#allocation2 + $0x76] sm:$0xff]  ;;  %3718 = vperm.xlu0 %7258, %v3635_v59   ;;  %v3638_v59 = vld [vmem:[%s10980_s12 + $0x88] sm:$0xff] }
 0x32d   :  { %v9563_v47 = vpop.f32.mrf.mxu1  ;;  %11275 = vst [vmem:[#allocation48_spill] sm:$0xff] %v9565_v28  ;;  %6787 = vmatmul.mubr.msk.bf16.gmra.mxu1 %vm53_vm1, %v11276_v38  ;;  %6950 = vmatprep.mubr.msk.bf16.mxu0 %vm7358_vm2, %v11221_v24 }
 0x32e   :  { %6790 = vmatprep.mubr.msk.bf16.mxu1 %vm7358_vm2, %v11221_v24  ;;  %v6732_v50 = vpop.f32.mrf.mxu0  ;;  %3723 = vperm.xlu1 %7259, %v3636_v14  }
 0x32f   :  { %v6572_v44 = vpop.f32.mrf.mxu1  ;;  %v3637_v50 = vld [vmem:[%s10980_s12 + $0x80] sm:$0xff] }
 0x330   :  { %v9584_v38 = vpop.f32.mrf.mxu0  ;;  %v3396_v44 = vpack.c.bf16 %v3378_v9, %v3377_v2  ;;  %3728 = vperm.xlu0 %7258, %v3637_v50   ;;  %v3640_v50 = vld [vmem:[%s10980_s12 + $0x98] sm:$0xff] }
 0x331   :  { %v9582_v0 = vpop.f32.mrf.mxu1  ;;  %11277 = vst [vmem:[#allocation49_spill] sm:$0xff] %v9584_v38  ;;  %v11279_v38 = vpack.c.bf16 %v8941_v20, %v8939_v10  ;;  %v3639_v10 = vld [vmem:[%s10980_s12 + $0x90] sm:$0xff] }
 0x332   :  { %v6733_v22 = vpop.f32.mrf.mxu0  ;;  %3733 = vperm.xlu1 %7259, %v3638_v59  }
 0x333   :  { %v6573_v57 = vpop.f32.mrf.mxu1  ;;  %v3380_v22 = vld [vmem:[#allocation2 + $0x8e] sm:$0xff] }
 0x334   :  { %v9594_v28 = vpop.f32.mrf.mxu0  ;;  %6951 = vmatmul.mubr.msk.bf16.gmra.mxu0 %vm53_vm1, %v3396_v44  ;;  %v3379_v57 = vld [vmem:[#allocation2 + $0x86] sm:$0xff]  ;;  %3738 = vperm.xlu0 %7258, %v3639_v10  }
 0x335   :  { %v9592_v18 = vpop.f32.mrf.mxu1  ;;  %11278 = vst [vmem:[#allocation50_spill] sm:$0xff] %v9594_v28  ;;  %6791 = vmatmul.mubr.msk.bf16.gmra.mxu1 %vm53_vm1, %v11279_v38  ;;  %6954 = vmatprep.mubr.msk.bf16.mxu0 %vm7358_vm2, %v11221_v24  ;;  %v3642_v10 = vld [vmem:[%s10980_s12 + $0xa8] sm:$0xff] }
 0x336   :  { %6794 = vmatprep.mubr.msk.bf16.mxu1 %vm7358_vm2, %v11221_v24  ;;  %v6736_v9 = vpop.f32.mrf.mxu0  ;;  %3743 = vperm.xlu1 %7259, %v3640_v50  }
 0x337   :  { %v6576_v2 = vpop.f32.mrf.mxu1  ;;  %v3641_v9 = vld [vmem:[%s10980_s12 + $0xa0] sm:$0xff] }
 0x338   :  { %v9613_v38 = vpop.f32.mrf.mxu0  ;;  %v3397_v2 = vpack.c.bf16 %v3380_v22, %v3379_v57  ;;  %3748 = vperm.xlu0 %7258, %v3641_v9   ;;  %v3644_v9 = vld [vmem:[%s10980_s12 + $0xb8] sm:$0xff] }
 0x339   :  { %v9611_v20 = vpop.f32.mrf.mxu1  ;;  %11280 = vst [vmem:[#allocation51_spill] sm:$0xff] %v9613_v38  ;;  %v11282_v38 = vpack.c.bf16 %v8951_v34, %v8943_v51  ;;  %v3643_v51 = vld [vmem:[%s10980_s12 + $0xb0] sm:$0xff] }
 0x33a   :  { %v6737_v14 = vpop.f32.mrf.mxu0  ;;  %3753 = vperm.xlu1 %7259, %v3642_v10  }
 0x33b   :  { %v6577_v44 = vpop.f32.mrf.mxu1  ;;  %v3382_v14 = vld [vmem:[#allocation2 + $0x9e] sm:$0xff] }
 0x33c   :  { %v9623_v28 = vpop.f32.mrf.mxu0  ;;  %6955 = vmatmul.mubr.msk.bf16.gmra.mxu0 %vm53_vm1, %v3397_v2  ;;  %v3381_v44 = vld [vmem:[#allocation2 + $0x96] sm:$0xff]  ;;  %3758 = vperm.xlu0 %7258, %v3643_v51   ;;  %v3383_v51 = vld [vmem:[#allocation2 + $0xa6] sm:$0xff] }
 0x33d   :  { %v9621_v59 = vpop.f32.mrf.mxu1  ;;  %11281 = vst [vmem:[#allocation52_spill] sm:$0xff] %v9623_v28  ;;  %6795 = vmatmul.mubr.msk.bf16.gmra.mxu1 %vm53_vm1, %v11282_v38  ;;  %6958 = vmatprep.mubr.msk.bf16.mxu0 %vm7358_vm2, %v11221_v24 }
 0x33e   :  { %6798 = vmatprep.mubr.msk.bf16.mxu1 %vm7358_vm2, %v11221_v24  ;;  %v6740_v22 = vpop.f32.mrf.mxu0  ;;  %3763 = vperm.xlu1 %7259, %v3644_v9  }
 0x33f   :  { %v6580_v57 = vpop.f32.mrf.mxu1  ;;  %v3645_v22 = vld [vmem:[%s10980_s12 + $0xc0] sm:$0xff] }
 0x340   :  { %v9642_v38 = vpop.f32.mrf.mxu0  ;;  %v3398_v57 = vpack.c.bf16 %v3382_v14, %v3381_v44  ;;  %3768 = vperm.xlu0 %7258, %v3645_v22   ;;  %v2639_v22 = vpack.c.bf16 %v9394_v1, %v9374_v45  ;;  %v1748_v1 = vadd.f32 %v9382_v11, %v9123_v19 }
 0x341   :  { %v9640_v34 = vpop.f32.mrf.mxu1  ;;  %11283 = vst [vmem:[#allocation53_spill] sm:$0xff] %v9642_v38  ;;  %v11285_v38 = vpack.c.bf16 %v8955_v35, %v8953_v17  ;;  %v5594_v17 = vld [vmem:[%s10981_s13] sm:$0xff]  ;;  %v5595_v35 = vld [vmem:[%s10981_s13 + $0x8] sm:$0xff] }
 0x342   :  { %v6741_v50 = vpop.f32.mrf.mxu0  ;;  %5605 = vperm.xlu1 %7259, %v5594_v17   ;;  %v5597_v17 = vld [vmem:[%s10981_s13 + $0x18] sm:$0xff] }
 0x343   :  { %v6581_v2 = vpop.f32.mrf.mxu1  ;;  %v3384_v50 = vld [vmem:[#allocation2 + $0xae] sm:$0xff] }
 0x344   :  { %v9652_v28 = vpop.f32.mrf.mxu0  ;;  %6959 = vmatmul.mubr.msk.bf16.gmra.mxu0 %vm53_vm1, %v3398_v57  ;;  %v1740_v2 = vadd.f32 %v9361_v41, %v9121_v56  ;;  %5610 = vperm.xlu0 %7258, %v5595_v35   ;;  %v1743_v56 = vadd.f32 %v9376_v33, %v9131_v29  ;;  %v3386_v33 = vld [vmem:[#allocation2 + $0xbe] sm:$0xff]  ;;  %v5599_v35 = vld [vmem:[%s10981_s13 + $0x28] sm:$0xff] }
 0x345   :  { %v9650_v10 = vpop.f32.mrf.mxu1  ;;  %11284 = vst [vmem:[#allocation54_spill] sm:$0xff] %v9652_v28  ;;  %6799 = vmatmul.mubr.msk.bf16.gmra.mxu1 %vm53_vm1, %v11285_v38  ;;  %6962 = vmatprep.mubr.msk.bf16.mxu0 %vm7358_vm2, %v11221_v24  ;;  %v5596_v28 = vld [vmem:[%s10981_s13 + $0x10] sm:$0xff] }
 0x346   :  { %6802 = vmatprep.mubr.msk.bf16.mxu1 %vm7358_vm2, %v11221_v24  ;;  %v6744_v14 = vpop.f32.mrf.mxu0  ;;  %v2070_v41 = vadd.f32 %v9140_v52, %v1740_v2  ;;  %5615 = vperm.xlu1 %7259, %v5596_v28   ;;  %v3385_v2 = vld [vmem:[#allocation2 + $0xb6] sm:$0xff]  ;;  %v2640_v28 = vpack.c.bf16 %v9392_v25, %v9392_v25 }
 0x347   :  { %v6584_v44 = vpop.f32.mrf.mxu1  ;;  %v3399_v14 = vpack.c.bf16 %v3384_v50, %v3383_v51  ;;  %v2071_v51 = vadd.f32 %v9157_v12, %v1743_v56  ;;  %v5598_v50 = vld [vmem:[%s10981_s13 + $0x20] sm:$0xff]  ;;  %v3400_v12 = vpack.c.bf16 %v3386_v33, %v3385_v2  ;;  %v1751_v56 = vadd.f32 %v9396_v37, %v9133_v40  ;;  %v5601_v25 = vld [vmem:[%s10981_s13 + $0x38] sm:$0xff] }
 0x348   :  { %v9671_v57 = vpop.f32.mrf.mxu0  ;;  %5620 = vperm.xlu0 %7258, %v5597_v17   ;;  %v5600_v17 = vld [vmem:[%s10981_s13 + $0x30] sm:$0xff]  ;;  %v3387_v40 = vld [vmem:[#allocation2 + $0xc6] sm:$0xff] }
 0x349   :  { %v1838_v38 = vpop.f32.mrf.mxu1  ;;  %v3111_v2 = vld [vmem:[#allocation2 + $0x15] sm:$0xff] }
 0x34a   :  { %v6745_v44 = vpop.f32.mrf.mxu0  ;;  %5625 = vperm.xlu1 %7259, %v5598_v50   ;;  %v3112_v50 = vld [vmem:[#allocation2 + $0x1d] sm:$0xff] }
 0x34b   :  { %v6585_v9 = vpop.f32.mrf.mxu1 }
 0x34c   :  { %v9684_v9 = vpop.f32.mrf.mxu0  ;;  %6963 = vmatmul.mubr.msk.bf16.gmra.mxu0 %vm53_vm1, %v3399_v14  ;;  %5630 = vperm.xlu0 %7258, %v5599_v35   ;;  %v5602_v35 = vld [vmem:[%s10981_s13 + $0x40] sm:$0xff] }
 0x34d   :  { %v2222_v38 = vpop.f32.mrf.mxu1  ;;  %6803 = vmatmul.mubr.msk.bf16.gmra.mxu1 %vm53_vm1, %v2639_v22  ;;  %6966 = vmatprep.mubr.msk.bf16.mxu0 %vm7358_vm2, %v11221_v24 }
 0x34e   :  { %v9688_v45 = vadd.f32 %v2222_v38, %v2070_v41  ;;  %6806 = vmatprep.mubr.msk.bf16.mxu1 %vm7358_vm2, %v11221_v24  ;;  %v6748_v29 = vpop.f32.mrf.mxu0  ;;  %v2072_v41 = vadd.f32 %v9162_v63, %v1748_v1  ;;  %v3388_v63 = vld [vmem:[#allocation2 + $0xce] sm:$0xff]  ;;  %5635 = vperm.xlu1 %7259, %v5600_v17   ;;  %v1756_v1 = vadd.f32 %v9404_v32, %v9138_v7 }
 0x34f   :  { %v6648_v52 = vpop.f32.mrf.mxu1  ;;  %v3136_v17 = vpack.c.bf16 %v3112_v50, %v3111_v2  ;;  %v1759_v7 = vadd.f32 %v9418_v58, %v9155_v61 }
 0x350   :  { %v9703_v22 = vpop.f32.mrf.mxu0  ;;  %5640 = vperm.xlu0 %7258, %v5601_v25  }
 0x351   :  { %v2225_v44 = vpop.f32.mrf.mxu1  ;;  %v2075_v58 = vadd.f32 %v9203_v8, %v1759_v7 }
 0x352   :  { %v9707_v14 = vadd.f32 %v2225_v44, %v2071_v51  ;;  %v6749_v11 = vpop.f32.mrf.mxu0  ;;  %v2073_v51 = vadd.f32 %v9177_v48, %v1751_v56  ;;  %5645 = vperm.xlu1 %7259, %v5602_v35   ;;  %v2074_v48 = vadd.f32 %v9186_v15, %v1756_v1  ;;  %v1764_v15 = vadd.f32 %v9423_v43, %v9160_v5 }
 0x353   :  { %v6649_v19 = vpop.f32.mrf.mxu1 }
 0x354   :  { %v9718_v52 = vpop.f32.mrf.mxu0  ;;  %6967 = vmatmul.mubr.msk.bf16.gmra.mxu0 %vm53_vm1, %v3400_v12  ;;  %v3401_v19 = vpack.c.bf16 %v3388_v63, %v3387_v40  ;;  %v3113_v63 = vld [vmem:[#allocation2 + $0x25] sm:$0xff] }
 0x355   :  { %v2230_v38 = vpop.f32.mrf.mxu1  ;;  %6807 = vmatmul.mubr.msk.bf16.gmra.mxu1 %vm53_vm1, %v2640_v28  ;;  %6970 = vmatprep.mubr.msk.bf16.mxu0 %vm7358_vm2, %v11221_v24 }
 0x356   :  { %v9722_v29 = vadd.f32 %v2230_v38, %v2072_v41  ;;  %6870 = vmatprep.mubr.msk.bf16.mxu1 %vm7358_vm2, %v11221_v24  ;;  %v6752_v33 = vpop.f32.mrf.mxu0  ;;  %v3389_v38 = vld [vmem:[#allocation2 + $0xd6] sm:$0xff] }
 0x357   :  { %v6652_v37 = vpop.f32.mrf.mxu1 }
 0x358   :  { %v2575_v28 = vpop.f32.mrf.mxu0  ;;  %v3114_v37 = vld [vmem:[#allocation2 + $0x2d] sm:$0xff] }
 0x359   :  { %v2233_v44 = vpop.f32.mrf.mxu1  ;;  %v1767_v28 = vadd.f32 %v9436_v36, %v9175_v54  ;;  %v1772_v54 = vadd.f32 %v9440_v13, %v9184_v46  ;;  %v3115_v36 = vld [vmem:[#allocation2 + $0x35] sm:$0xff] }
 0x35a   :  { %v9734_v11 = vadd.f32 %v2233_v44, %v2073_v51  ;;  %v6753_v41 = vpop.f32.mrf.mxu0  ;;  %v3402_v51 = vpack.c.bf16 %v3389_v38, %v3389_v38  ;;  %v3137_v44 = vpack.c.bf16 %v3114_v37, %v3113_v63 }
 0x35b   :  { %v6653_v12 = vpop.f32.mrf.mxu1 }
 0x35c   :  { %v9739_v56 = vpop.f32.mrf.mxu0  ;;  %6971 = vmatmul.mubr.msk.bf16.gmra.mxu0 %vm53_vm1, %v3401_v19  ;;  %v2076_v19 = vadd.f32 %v9210_v42, %v1764_v15  ;;  %v2077_v42 = vadd.f32 %v9223_v26, %v1767_v28  ;;  %v1775_v15 = vadd.f32 %v9453_v31, %v9201_v21  ;;  %v3117_v21 = vld [vmem:[#allocation2 + $0x45] sm:$0xff]  ;;  %v3118_v31 = vld [vmem:[#allocation2 + $0x4d] sm:$0xff] }
 0x35d   :  { %v2238_v32 = vpop.f32.mrf.mxu1  ;;  %6871 = vmatmul.mubr.msk.bf16.vlgmr.msra.gmra.mxu1 %vm53_vm1, %v3136_v17  ;;  %6974 = vmatprep.mubr.msk.bf16.mxu0 %vm7358_vm2, %v11221_v24  ;;  %v3116_v17 = vld [vmem:[#allocation2 + $0x3d] sm:$0xff] }
 0x35e   :  { %v9743_v25 = vadd.f32 %v2238_v32, %v2074_v48  ;;  %6874 = vmatprep.mubr.msk.bf16.mxu1 %vm7358_vm2, %v11221_v24  ;;  %v6816_v61 = vpop.f32.mrf.mxu0 }
 0x35f   :  { %v6656_v40 = vpop.f32.mrf.mxu1  ;;  %v3138_v61 = vpack.c.bf16 %v3116_v17, %v3115_v36  ;;  %v11288_v17 = vld [vmem:[#allocation24_spill] sm:$0xff] }
 0x360   :  { %v9752_v1 = vpop.f32.mrf.mxu0 }
 0x361   :  { %v2241_v33 = vpop.f32.mrf.mxu1 }
 0x362   :  { %v9754_v2 = vadd.f32 %v2241_v33, %v2075_v58  ;;  %v6817_v35 = vpop.f32.mrf.mxu0  ;;  %v2078_v58 = vadd.f32 %v9229_v23, %v1772_v54  ;;  %v1780_v33 = vadd.f32 %v9457_v55, %v9208_v53 }
 0x363   :  { %v6657_v50 = vpop.f32.mrf.mxu1 }
 0x364   :  { %v9759_v5 = vpop.f32.mrf.mxu0  ;;  %6975 = vmatmul.mubr.msk.bf16.gmra.mxu0 %vm53_vm1, %v3402_v51  ;;  %v2079_v51 = vadd.f32 %v9242_v49, %v1775_v15 }
 0x365   :  { %v2246_v12 = vpop.f32.mrf.mxu1  ;;  %6875 = vmatmul.mubr.msk.bf16.gmra.mxu1 %vm53_vm1, %v3137_v44  ;;  %7014 = vmatprep.mubr.msk.bf16.mxu0 %vm7358_vm2, %v11221_v24 }
 0x366   :  { %v9763_v8 = vadd.f32 %v2246_v12, %v2076_v19  ;;  %6878 = vmatprep.mubr.msk.bf16.mxu1 %vm7358_vm2, %v11221_v24  ;;  %v6820_v41 = vpop.f32.mrf.mxu0  ;;  %v3139_v19 = vpack.c.bf16 %v3118_v31, %v3117_v21  ;;  %v11286_v12 = vld [vmem:[#allocation27_spill] sm:$0xff]  ;;  %v11290_v21 = vld [vmem:[#allocation28_spill] sm:$0xff] }
 0x367   :  { %v6660_v43 = vpop.f32.mrf.mxu1  ;;  %v11287_v41 = vld [vmem:[#allocation25_spill] sm:$0xff] }
 0x368   :  { %v9772_v48 = vpop.f32.mrf.mxu0  ;;  %v1783_v43 = vadd.f32 %v9470_v30, %v11286_v12  ;;  %v2080_v54 = vadd.f32 %v11287_v41, %v1780_v33  ;;  %v3119_v30 = vld [vmem:[#allocation2 + $0x55] sm:$0xff]  ;;  %v11289_v33 = vld [vmem:[#allocation31_spill] sm:$0xff] }
 0x369   :  { %v2249_v7 = vpop.f32.mrf.mxu1 }
 0x36a   :  { %v9774_v32 = vadd.f32 %v2249_v7, %v2077_v42  ;;  %v6821_v40 = vpop.f32.mrf.mxu0  ;;  %v1788_v7 = vadd.f32 %v9477_v62, %v11288_v17 }
 0x36b   :  { %v6661_v38 = vpop.f32.mrf.mxu1  ;;  %v3120_v40 = vld [vmem:[#allocation2 + $0x5d] sm:$0xff] }
 0x36c   :  { %v9779_v37 = vpop.f32.mrf.mxu0  ;;  %v2081_v38 = vadd.f32 %v9262_v60, %v1783_v43  ;;  %v2082_v31 = vadd.f32 %v11290_v21, %v1788_v7  ;;  %v11292_v43 = vld [vmem:[#allocation33_spill] sm:$0xff] }
 0x36d   :  { %v2254_v63 = vpop.f32.mrf.mxu1  ;;  %6879 = vmatmul.mubr.msk.bf16.gmra.mxu1 %vm53_vm1, %v3138_v61  ;;  %v11295_v21 = vld [vmem:[#allocation29_spill] sm:$0xff] }
 0x36e   :  { %v9782_v46 = vadd.f32 %v2254_v63, %v2078_v58  ;;  %6882 = vmatprep.mubr.msk.bf16.mxu1 %vm7358_vm2, %v11221_v24  ;;  %v6824_v13 = vpop.f32.mrf.mxu0 }
 0x36f   :  { %v6664_v26 = vpop.f32.mrf.mxu1  ;;  %v3140_v13 = vpack.c.bf16 %v3120_v40, %v3119_v30  ;;  %v11293_v30 = vld [vmem:[#allocation26_spill] sm:$0xff] }
 0x370   :  { %v9789_v50 = vpop.f32.mrf.mxu0  ;;  %v1799_v40 = vadd.f32 %v9524_v27, %v11293_v30  ;;  %v3123_v27 = vld [vmem:[#allocation2 + $0x75] sm:$0xff] }
 0x371   :  { %v2257_v23 = vpop.f32.mrf.mxu1 }
 0x372   :  { %v9791_v35 = vadd.f32 %v2257_v23, %v2079_v51  ;;  %v6825_v28 = vpop.f32.mrf.mxu0  ;;  %v1791_v51 = vadd.f32 %v9496_v3, %v11289_v33  ;;  %v3121_v3 = vld [vmem:[#allocation2 + $0x65] sm:$0xff] }
 0x373   :  { %v6665_v44 = vpop.f32.mrf.mxu1 }
 0x374   :  { %v9796_v36 = vpop.f32.mrf.mxu0  ;;  %v2083_v41 = vadd.f32 %v11292_v43, %v1791_v51 }
 0x375   :  { %v2262_v42 = vpop.f32.mrf.mxu1  ;;  %6883 = vmatmul.mubr.msk.bf16.gmra.mxu1 %vm53_vm1, %v3139_v19  ;;  %v11291_v19 = vld [vmem:[#allocation35_spill] sm:$0xff] }
 0x376   :  { %v9799_v53 = vadd.f32 %v2262_v42, %v2080_v54  ;;  %6886 = vmatprep.mubr.msk.bf16.mxu1 %vm7358_vm2, %v11221_v24  ;;  %v6828_v55 = vpop.f32.mrf.mxu0  ;;  %v1796_v12 = vadd.f32 %v9508_v4, %v11291_v19  ;;  %v3122_v54 = vld [vmem:[#allocation2 + $0x6d] sm:$0xff] }
 0x377   :  { %v6668_v49 = vpop.f32.mrf.mxu1 }
 0x378   :  { %v9806_v15 = vpop.f32.mrf.mxu0 }
 0x379   :  { %v2265_v61 = vpop.f32.mrf.mxu1 }
 0x37a   :  { %v9808_v58 = vadd.f32 %v2265_v61, %v2081_v38  ;;  %v6829_v26 = vpop.f32.mrf.mxu0  ;;  %v3141_v38 = vpack.c.bf16 %v3122_v54, %v3121_v3  ;;  %v11294_v61 = vld [vmem:[#allocation34_spill] sm:$0xff] }
 0x37b   :  { %v6669_v63 = vpop.f32.mrf.mxu1 }
 0x37c   :  { %v9813_v44 = vpop.f32.mrf.mxu0  ;;  %v2084_v63 = vadd.f32 %v11294_v61, %v1796_v12 }
 0x37d   :  { %v2270_v23 = vpop.f32.mrf.mxu1  ;;  %6887 = vmatmul.mubr.msk.bf16.gmra.mxu1 %vm53_vm1, %v3140_v13 }
 0x37e   :  { %v9816_v60 = vadd.f32 %v2270_v23, %v2082_v31  ;;  %6890 = vmatprep.mubr.msk.bf16.mxu1 %vm7358_vm2, %v11221_v24  ;;  %v6832_v28 = vpop.f32.mrf.mxu0  ;;  %v1804_v31 = vadd.f32 %v9534_v6, %v11295_v21  ;;  %v11296_v23 = vld [vmem:[#allocation36_spill] sm:$0xff] }
 0x37f   :  { %v6672_v62 = vpop.f32.mrf.mxu1  ;;  %v3124_v28 = vld [vmem:[#allocation2 + $0x7d] sm:$0xff] }
 0x380   :  { %v9823_v49 = vpop.f32.mrf.mxu0  ;;  %v2085_v62 = vadd.f32 %v11296_v23, %v1799_v40  ;;  %v3142_v54 = vpack.c.bf16 %v3124_v28, %v3123_v27  ;;  %v3126_v23 = vld [vmem:[#allocation2 + $0x8d] sm:$0xff] }
 0x381   :  { %v2273_v42 = vpop.f32.mrf.mxu1 }
 0x382   :  { %v9825_v55 = vadd.f32 %v2273_v42, %v2083_v41  ;;  %v6833_v7 = vpop.f32.mrf.mxu0  ;;  %v11298_v42 = vld [vmem:[#allocation30_spill] sm:$0xff] }
 0x383   :  { %v6673_v17 = vpop.f32.mrf.mxu1  ;;  %v11299_v7 = vld [vmem:[#allocation7_spill] sm:$0xff] }
 0x384   :  { %v9830_v13 = vpop.f32.mrf.mxu0  ;;  %v1807_v17 = vadd.f32 %v9553_v16, %v11298_v42  ;;  %v3125_v16 = vld [vmem:[#allocation2 + $0x85] sm:$0xff]  ;;  %v11305_v42 = vld [vmem:[#allocation12_spill] sm:$0xff] }
 0x385   :  { %v2278_v26 = vpop.f32.mrf.mxu1  ;;  %6891 = vmatmul.mubr.msk.bf16.gmra.mxu1 %vm53_vm1, %v3141_v38  ;;  %v2086_v38 = vadd.f32 %v11299_v7, %v1804_v31 }
 0x386   :  { %v9833_v4 = vadd.f32 %v2278_v26, %v2084_v63  ;;  %6894 = vmatprep.mubr.msk.bf16.mxu1 %vm7358_vm2, %v11221_v24  ;;  %v6836_v51 = vpop.f32.mrf.mxu0  ;;  %v11301_v26 = vld [vmem:[#allocation32_spill] sm:$0xff] }
 0x387   :  { %v6676_v33 = vpop.f32.mrf.mxu1  ;;  %v11302_v51 = vld [vmem:[#allocation8_spill] sm:$0xff] }
 0x388   :  { %v9840_v12 = vpop.f32.mrf.mxu0  ;;  %v1812_v33 = vadd.f32 %v9563_v47, %v11301_v26  ;;  %v2087_v21 = vadd.f32 %v11302_v51, %v1807_v17  ;;  %v11308_v51 = vld [vmem:[#allocation11_spill] sm:$0xff] }
 0x389   :  { %v2281_v19 = vpop.f32.mrf.mxu1  ;;  %11297 = vst [vmem:[#allocation27_spill] sm:$0xff] %v9840_v12 }
 0x38a   :  { %v9842_v43 = vadd.f32 %v2281_v19, %v2085_v62  ;;  %v6837_v3 = vpop.f32.mrf.mxu0  ;;  %v2088_v7 = vadd.f32 %v11305_v42, %v1812_v33 }
 0x38b   :  { %v6677_v41 = vpop.f32.mrf.mxu1  ;;  %v11304_v3 = vld [vmem:[#allocation37_spill] sm:$0xff] }
 0x38c   :  { %v9847_v61 = vpop.f32.mrf.mxu0  ;;  %v3143_v41 = vpack.c.bf16 %v3126_v23, %v3125_v16  ;;  %v3128_v16 = vld [vmem:[#allocation2 + $0x9d] sm:$0xff] }
 0x38d   :  { %v2286_v30 = vpop.f32.mrf.mxu1  ;;  %11300 = vst [vmem:[#allocation25_spill] sm:$0xff] %v9847_v61  ;;  %6895 = vmatmul.mubr.msk.bf16.gmra.mxu1 %vm53_vm1, %v3142_v54  ;;  %v1815_v54 = vadd.f32 %v9582_v0, %v11304_v3  ;;  %v3127_v0 = vld [vmem:[#allocation2 + $0x95] sm:$0xff]  ;;  %v11310_v3 = vld [vmem:[#allocation6_spill] sm:$0xff] }
 0x38e   :  { %v9850_v6 = vadd.f32 %v2286_v30, %v2086_v38  ;;  %6898 = vmatprep.mubr.msk.bf16.mxu1 %vm7358_vm2, %v11221_v24  ;;  %v6840_v63 = vpop.f32.mrf.mxu0  ;;  %v1823_v42 = vadd.f32 %v9611_v20, %v11310_v3 }
 0x38f   :  { %v6680_v40 = vpop.f32.mrf.mxu1  ;;  %v11307_v63 = vld [vmem:[#allocation38_spill] sm:$0xff] }
 0x390   :  { %v9857_v62 = vpop.f32.mrf.mxu0  ;;  %v1820_v26 = vadd.f32 %v9592_v18, %v11307_v63  ;;  %v11313_v63 = vld [vmem:[#allocation10_spill] sm:$0xff] }
 0x391   :  { %v2289_v31 = vpop.f32.mrf.mxu1  ;;  %11303 = vst [vmem:[#allocation24_spill] sm:$0xff] %v9857_v62 }
 0x392   :  { %v9859_v27 = vadd.f32 %v2289_v31, %v2087_v21  ;;  %v6841_v19 = vpop.f32.mrf.mxu0  ;;  %v2089_v21 = vadd.f32 %v11308_v51, %v1815_v54  ;;  %v11314_v51 = vld [vmem:[#allocation13_spill] sm:$0xff] }
 0x393   :  { %v6681_v28 = vpop.f32.mrf.mxu1 }
 0x394   :  { %v9864_v30 = vpop.f32.mrf.mxu0 }
 0x395   :  { %v2294_v38 = vpop.f32.mrf.mxu1  ;;  %11306 = vst [vmem:[#allocation31_spill] sm:$0xff] %v9864_v30  ;;  %6899 = vmatmul.mubr.msk.bf16.gmra.mxu1 %vm53_vm1, %v3143_v41  ;;  %v3144_v41 = vpack.c.bf16 %v3128_v16, %v3127_v0  ;;  %v3129_v0 = vld [vmem:[#allocation2 + $0xa5] sm:$0xff]  ;;  %v3130_v16 = vld [vmem:[#allocation2 + $0xad] sm:$0xff] }
 0x396   :  { %v9867_v47 = vadd.f32 %v2294_v38, %v2088_v7  ;;  %6902 = vmatprep.mubr.msk.bf16.mxu1 %vm7358_vm2, %v11221_v24  ;;  %v6844_v40 = vpop.f32.mrf.mxu0  ;;  %v11311_v7 = vld [vmem:[#allocation16_spill] sm:$0xff] }
 0x397   :  { %v6684_v17 = vpop.f32.mrf.mxu1  ;;  %v2090_v38 = vadd.f32 %v11311_v7, %v1820_v26  ;;  %v1828_v26 = vadd.f32 %v9621_v59, %v11313_v63  ;;  %v3145_v7 = vpack.c.bf16 %v3130_v16, %v3129_v0  ;;  %v11320_v0 = vld [vmem:[#allocation18_spill] sm:$0xff] }
 0x398   :  { %v9874_v23 = vpop.f32.mrf.mxu0 }
 0x399   :  { %v2297_v33 = vpop.f32.mrf.mxu1  ;;  %11309 = vst [vmem:[#allocation28_spill] sm:$0xff] %v9874_v23 }
 0x39a   :  { %v9876_v31 = vadd.f32 %v2297_v33, %v2089_v21  ;;  %v6845_v19 = vpop.f32.mrf.mxu0  ;;  %v2091_v21 = vadd.f32 %v11314_v51, %v1823_v42  ;;  %v11319_v51 = vld [vmem:[#allocation14_spill] sm:$0xff] }
 0x39b   :  { %v6685_v28 = vpop.f32.mrf.mxu1 }
 0x39c   :  { %v9903_v20 = vpop.f32.mrf.mxu0 }
 0x39d   :  { %v2302_v18 = vpop.f32.mrf.mxu1  ;;  %11312 = vst [vmem:[#allocation35_spill] sm:$0xff] %v9903_v20  ;;  %6903 = vmatmul.mubr.msk.bf16.gmra.mxu1 %vm53_vm1, %v3144_v41 }
 0x39e   :  { %v9906_v54 = vadd.f32 %v2302_v18, %v2090_v38  ;;  %6906 = vmatprep.mubr.msk.bf16.mxu1 %vm7358_vm2, %v11221_v24  ;;  %v6848_v40 = vpop.f32.mrf.mxu0  ;;  %v11316_v38 = vld [vmem:[#allocation9_spill] sm:$0xff] }
 0x39f   :  { %v6688_v17 = vpop.f32.mrf.mxu1  ;;  %v1831_v18 = vadd.f32 %v9640_v34, %v11316_v38  ;;  %v3131_v34 = vld [vmem:[#allocation2 + $0xb5] sm:$0xff] }
 0x3a0   :  { %v9913_v28 = vpop.f32.mrf.mxu0  ;;  %v11317_v17 = vld [vmem:[#allocation15_spill] sm:$0xff] }
 0x3a1   :  { %v2305_v33 = vpop.f32.mrf.mxu1  ;;  %11315 = vst [vmem:[#allocation33_spill] sm:$0xff] %v9913_v28  ;;  %v2092_v40 = vadd.f32 %v11317_v17, %v1828_v26  ;;  %v2093_v16 = vadd.f32 %v11320_v0, %v1831_v18  ;;  %v11322_v17 = vld [vmem:[#allocation20_spill] sm:$0xff]  ;;  %v3133_v18 = vld [vmem:[#allocation2 + $0xc5] sm:$0xff] }
 0x3a2   :  { %v9915_v19 = vadd.f32 %v2305_v33, %v2091_v21  ;;  %v6849_v3 = vpop.f32.mrf.mxu0  ;;  %v1836_v21 = vadd.f32 %v9650_v10, %v11319_v51  ;;  %v3132_v33 = vld [vmem:[#allocation2 + $0xbd] sm:$0xff] }
 0x3a3   :  { %v6689_v41 = vpop.f32.mrf.mxu1  ;;  %v3146_v38 = vpack.c.bf16 %v3132_v33, %v3131_v34 }
 0x3a4   :  { %v9920_v23 = vpop.f32.mrf.mxu0 }
 0x3a5   :  { %v2310_v20 = vpop.f32.mrf.mxu1  ;;  %11318 = vst [vmem:[#allocation26_spill] sm:$0xff] %v9920_v23  ;;  %6907 = vmatmul.mubr.msk.bf16.gmra.mxu1 %vm53_vm1, %v3145_v7 }
 0x3a6   :  { %v9923_v59 = vadd.f32 %v2310_v20, %v2092_v40  ;;  %6910 = vmatprep.mubr.msk.bf16.mxu1 %vm7358_vm2, %v11221_v24  ;;  %v6852_v63 = vpop.f32.mrf.mxu0  ;;  %v2094_v40 = vadd.f32 %v11322_v17, %v1836_v21 }
 0x3a7   :  { %v6692_v42 = vpop.f32.mrf.mxu1  ;;  %v3134_v63 = vld [vmem:[#allocation2 + $0xcd] sm:$0xff] }
 0x3a8   :  { %v9930_v41 = vpop.f32.mrf.mxu0  ;;  %v3147_v34 = vpack.c.bf16 %v3134_v63, %v3133_v18  ;;  %v11327_v18 = vld [vmem:[#allocation19_spill] sm:$0xff] }
 0x3a9   :  { %v2313_v26 = vpop.f32.mrf.mxu1  ;;  %11321 = vst [vmem:[#allocation34_spill] sm:$0xff] %v9930_v41  ;;  %v2579_v63 = vadd.f32 %v11327_v18, %v9707_v14 }
 0x3aa   :  { %v9932_v3 = vadd.f32 %v2313_v26, %v2093_v16  ;;  %v6853_v20 = vpop.f32.mrf.mxu0 }
 0x3ab   :  { %v6693_v7 = vpop.f32.mrf.mxu1 }
 0x3ac   :  { %v9935_v42 = vpop.f32.mrf.mxu0  ;;  %v11325_v7 = vld [vmem:[#allocation17_spill] sm:$0xff] }
 0x3ad   :  { %v2318_v23 = vpop.f32.mrf.mxu1  ;;  %11323 = vst [vmem:[#allocation29_spill] sm:$0xff] %v9935_v42  ;;  %6911 = vmatmul.mubr.msk.bf16.gmra.mxu1 %vm53_vm1, %v3146_v38  ;;  %v2578_v20 = vadd.f32 %v11325_v7, %v9688_v45 }
 0x3ae   :  { %v9938_v10 = vadd.f32 %v2318_v23, %v2094_v40  ;;  %6914 = vmatprep.mubr.msk.bf16.mxu1 %vm7358_vm2, %v11221_v24  ;;  %v6856_v0 = vpop.f32.mrf.mxu0  ;;  %v3135_v40 = vld [vmem:[#allocation2 + $0xd5] sm:$0xff] }
 0x3af   :  { %v6696_v51 = vpop.f32.mrf.mxu1  ;;  %v3148_v45 = vpack.c.bf16 %v3135_v40, %v3135_v40  ;;  %v11331_v40 = vld [vmem:[#allocation21_spill] sm:$0xff] }
 0x3b0   :  { %v9942_v26 = vpop.f32.mrf.mxu0  ;;  %v2581_v18 = vadd.f32 %v11331_v40, %v9734_v11 }
 0x3b1   :  { %v2321_v16 = vpop.f32.mrf.mxu1  ;;  %11324 = vst [vmem:[#allocation36_spill] sm:$0xff] %v9942_v26 }
 0x3b2   :  { %v6857_v21 = vpop.f32.mrf.mxu0 }
 0x3b3   :  { %v6697_v33 = vpop.f32.mrf.mxu1 }
 0x3b4   :  { %v9946_v38 = vpop.f32.mrf.mxu0 }
 0x3b5   :  { %v2730_v17 = vpop.f32.mrf.mxu1  ;;  %11326 = vst [vmem:[#allocation30_spill] sm:$0xff] %v9946_v38  ;;  %6915 = vmatmul.mubr.msk.bf16.gmra.mxu1 %vm53_vm1, %v3147_v34  ;;  %v11329_v34 = vld [vmem:[#allocation22_spill] sm:$0xff] }
 0x3b6   :  { %v9949_v23 = vadd.f32 %v2730_v17, %v2578_v20  ;;  %6918 = vmatprep.mubr.msk.bf16.mxu1 %vm7358_vm2, %v11221_v24  ;;  %v6860_v0 = vpop.f32.mrf.mxu0  ;;  %v2580_v20 = vadd.f32 %v11329_v34, %v9722_v29  ;;  %v11332_v34 = vld [vmem:[#allocation23_spill] sm:$0xff] }
 0x3b7   :  { %v6760_v51 = vpop.f32.mrf.mxu1 }
 0x3b8   :  { %v9955_v33 = vpop.f32.mrf.mxu0 }
 0x3b9   :  { %v2733_v16 = vpop.f32.mrf.mxu1  ;;  %11328 = vst [vmem:[#allocation7_spill] sm:$0xff] %v9955_v33 }
 0x3ba   :  { %v9957_v21 = vadd.f32 %v2733_v16, %v2579_v63  ;;  %v6861_v38 = vpop.f32.mrf.mxu0 }
 0x3bb   :  { %v6761_v7 = vpop.f32.mrf.mxu1 }
 0x3bc   :  { %v9961_v26 = vpop.f32.mrf.mxu0 }
 0x3bd   :  { %v2738_v17 = vpop.f32.mrf.mxu1  ;;  %11330 = vst [vmem:[#allocation32_spill] sm:$0xff] %v9961_v26  ;;  %6919 = vmatmul.mubr.msk.bf16.gmra.mxu1 %vm53_vm1, %v3148_v45  ;;  %v2582_v26 = vadd.f32 %v11332_v34, %v9743_v25 }
 0x3be   :  { %v9964_v51 = vadd.f32 %v2738_v17, %v2580_v20  ;;  %6986 = vmatprep.mubr.msk.bf16.mxu1 %vm7358_vm2, %v11221_v24  ;;  %v6864_v0 = vpop.f32.mrf.mxu0 }
 0x3bf   :  { %v6764_v14 = vpop.f32.mrf.mxu1  ;;  %v11333_v0 = vld [vmem:[#allocation40_spill] sm:$0xff] }
 0x3c0   :  { %v3083_v38 = vpop.f32.mrf.mxu0  ;;  %v2583_v42 = vadd.f32 %v11333_v0, %v9754_v2 }
 0x3c1   :  { %v2741_v63 = vpop.f32.mrf.mxu1 }
 0x3c2   :  { %v9970_v16 = vadd.f32 %v2741_v63, %v2581_v18  ;;  %v6865_v7 = vpop.f32.mrf.mxu0 }
 0x3c3   :  { %v6765_v29 = vpop.f32.mrf.mxu1 }
 0x3c4   :  { %v9974_v20 = vpop.f32.mrf.mxu0  ;;  %v11334_v29 = vld [vmem:[#allocation41_spill] sm:$0xff] }
 0x3c5   :  { %v2746_v45 = vpop.f32.mrf.mxu1  ;;  %v2584_v25 = vadd.f32 %v11334_v29, %v9763_v8 }
 0x3c6   :  { %v9976_v17 = vadd.f32 %v2746_v45, %v2582_v26  ;;  %v6928_v14 = vpop.f32.mrf.mxu0 }
 0x3c7   :  { %v6768_v33 = vpop.f32.mrf.mxu1  ;;  %v11335_v14 = vld [vmem:[#allocation42_spill] sm:$0xff] }
 0x3c8   :  { %v9980_v40 = vpop.f32.mrf.mxu0  ;;  %v2585_v2 = vadd.f32 %v11335_v14, %v9774_v32  ;;  %v2587_v32 = vadd.f32 %v9498_v39, %v9791_v35 }
 0x3c9   :  { %v2749_v11 = vpop.f32.mrf.mxu1 }
 0x3ca   :  { %v9982_v18 = vadd.f32 %v2749_v11, %v2583_v42  ;;  %v6929_v38 = vpop.f32.mrf.mxu0 }
 0x3cb   :  { %v6769_v63 = vpop.f32.mrf.mxu1  ;;  %v11336_v38 = vld [vmem:[#allocation43_spill] sm:$0xff] }
 0x3cc   :  { %v9986_v34 = vpop.f32.mrf.mxu0  ;;  %v2586_v8 = vadd.f32 %v11336_v38, %v9782_v46 }
 0x3cd   :  { %v2754_v7 = vpop.f32.mrf.mxu1 }
 0x3ce   :  { %v9988_v26 = vadd.f32 %v2754_v7, %v2584_v25  ;;  %v6932_v45 = vpop.f32.mrf.mxu0 }
 0x3cf   :  { %v6772_v33 = vpop.f32.mrf.mxu1 }
 0x3d0   :  { %v9992_v41 = vpop.f32.mrf.mxu0 }
 0x3d1   :  { %v2757_v0 = vpop.f32.mrf.mxu1 }
 0x3d2   :  { %v9994_v42 = vadd.f32 %v2757_v0, %v2585_v2  ;;  %v6933_v63 = vpop.f32.mrf.mxu0 }
 0x3d3   :  { %v6773_v11 = vpop.f32.mrf.mxu1  ;;  %v11337_v63 = vld [vmem:[#allocation44_spill] sm:$0xff] }
 0x3d4   :  { %v9998_v28 = vpop.f32.mrf.mxu0  ;;  %v2588_v46 = vadd.f32 %v11337_v63, %v9799_v53 }
 0x3d5   :  { %v2762_v29 = vpop.f32.mrf.mxu1 }
 0x3d6   :  { %v10000_v25 = vadd.f32 %v2762_v29, %v2586_v8  ;;  %v6936_v33 = vpop.f32.mrf.mxu0 }
 0x3d7   :  { %v6776_v7 = vpop.f32.mrf.mxu1  ;;  %v11338_v33 = vld [vmem:[#allocation45_spill] sm:$0xff] }
 0x3d8   :  { %v10004_v14 = vpop.f32.mrf.mxu0  ;;  %v2589_v39 = vadd.f32 %v11338_v33, %v9808_v58 }
 0x3d9   :  { %v2765_v45 = vpop.f32.mrf.mxu1 }
 0x3da   :  { %v10006_v2 = vadd.f32 %v2765_v45, %v2587_v32  ;;  %v6937_v11 = vpop.f32.mrf.mxu0 }
 0x3db   :  { %v6777_v0 = vpop.f32.mrf.mxu1  ;;  %v11340_v11 = vld [vmem:[#allocation46_spill] sm:$0xff] }
 0x3dc   :  { %v10010_v30 = vpop.f32.mrf.mxu0  ;;  %v2590_v53 = vadd.f32 %v11340_v11, %v9816_v60 }
 0x3dd   :  { %v2770_v38 = vpop.f32.mrf.mxu1 }
 0x3de   :  { %v10012_v8 = vadd.f32 %v2770_v38, %v2588_v46  ;;  %v6940_v7 = vpop.f32.mrf.mxu0 }
 0x3df   :  { %v6780_v29 = vpop.f32.mrf.mxu1  ;;  %v11342_v7 = vld [vmem:[#allocation47_spill] sm:$0xff] }
 0x3e0   :  { %v10016_v62 = vpop.f32.mrf.mxu0  ;;  %v2591_v58 = vadd.f32 %v11342_v7, %v9825_v55 }
 0x3e1   :  { %v2773_v35 = vpop.f32.mrf.mxu1 }
 0x3e2   :  { %v10018_v32 = vadd.f32 %v2773_v35, %v2589_v39  ;;  %v6941_v0 = vpop.f32.mrf.mxu0 }
 0x3e3   :  { %v6781_v45 = vpop.f32.mrf.mxu1  ;;  %v11344_v0 = vld [vmem:[#allocation48_spill] sm:$0xff] }
 0x3e4   :  { %11339 = vst [vmem:[#allocation8_spill] sm:$0xff] %v10018_v32  ;;  %v10022_v61 = vpop.f32.mrf.mxu0  ;;  %v2592_v60 = vadd.f32 %v11344_v0, %v9833_v4 }
 0x3e5   :  { %v2778_v63 = vpop.f32.mrf.mxu1 }
 0x3e6   :  { %v10024_v46 = vadd.f32 %v2778_v63, %v2590_v53  ;;  %v6944_v29 = vpop.f32.mrf.mxu0 }
 0x3e7   :  { %v6784_v38 = vpop.f32.mrf.mxu1  ;;  %v11346_v29 = vld [vmem:[#allocation49_spill] sm:$0xff] }
 0x3e8   :  { %11341 = vst [vmem:[#allocation37_spill] sm:$0xff] %v10024_v46  ;;  %v10028_v12 = vpop.f32.mrf.mxu0  ;;  %v2593_v55 = vadd.f32 %v11346_v29, %v9842_v43 }
 0x3e9   :  { %v2781_v33 = vpop.f32.mrf.mxu1 }
 0x3ea   :  { %v10030_v39 = vadd.f32 %v2781_v33, %v2591_v58  ;;  %v6945_v45 = vpop.f32.mrf.mxu0 }
 0x3eb   :  { %v6785_v35 = vpop.f32.mrf.mxu1  ;;  %v11348_v45 = vld [vmem:[#allocation50_spill] sm:$0xff] }
 0x3ec   :  { %11343 = vst [vmem:[#allocation12_spill] sm:$0xff] %v10030_v39  ;;  %v10034_v32 = vpop.f32.mrf.mxu0  ;;  %v2594_v4 = vadd.f32 %v11348_v45, %v9850_v6 }
 0x3ed   :  { %v2786_v11 = vpop.f32.mrf.mxu1 }
 0x3ee   :  { %v10036_v53 = vadd.f32 %v2786_v11, %v2592_v60  ;;  %v6948_v38 = vpop.f32.mrf.mxu0 }
 0x3ef   :  { %v6788_v63 = vpop.f32.mrf.mxu1  ;;  %v11350_v38 = vld [vmem:[#allocation51_spill] sm:$0xff] }
 0x3f0   :  { %11345 = vst [vmem:[#allocation38_spill] sm:$0xff] %v10036_v53  ;;  %v10040_v46 = vpop.f32.mrf.mxu0  ;;  %v2595_v43 = vadd.f32 %v11350_v38, %v9859_v27 }
 0x3f1   :  { %v2789_v7 = vpop.f32.mrf.mxu1 }
 0x3f2   :  { %v10042_v58 = vadd.f32 %v2789_v7, %v2593_v55  ;;  %v6949_v35 = vpop.f32.mrf.mxu0 }
 0x3f3   :  { %v6789_v33 = vpop.f32.mrf.mxu1  ;;  %v11351_v35 = vld [vmem:[#allocation52_spill] sm:$0xff] }
 0x3f4   :  { %11347 = vst [vmem:[#allocation11_spill] sm:$0xff] %v10042_v58  ;;  %v10046_v39 = vpop.f32.mrf.mxu0  ;;  %v2596_v6 = vadd.f32 %v11351_v35, %v9867_v47  ;;  %v7311_v35 = vld [vmem:[%s10982_s7 + $0x38] sm:$0xff]  }
 0x3f5   :  { %v2794_v0 = vpop.f32.mrf.mxu1  ;;  %6979 = vmatpush3.bf16.msra.mxu1 %v7311_v35 }
 0x3f6   :  { %v10048_v60 = vadd.f32 %v2794_v0, %v2594_v4  ;;  %v6952_v63 = vpop.f32.mrf.mxu0  ;;  %6980 = vmatprep.subr.bf16.mxu1 %v11221_v24 }
 0x3f7   :  { %v6792_v11 = vpop.f32.mrf.mxu1  ;;  %v11352_v63 = vld [vmem:[#allocation53_spill] sm:$0xff] }
 0x3f8   :  { %11349 = vst [vmem:[#allocation6_spill] sm:$0xff] %v10048_v60  ;;  %v10052_v53 = vpop.f32.mrf.mxu0  ;;  %v2597_v27 = vadd.f32 %v11352_v63, %v9876_v31  ;;  %v2599_v63 = vadd.f32 %v9671_v57, %v9915_v19  ;;  %v2601_v57 = vadd.f32 %v9703_v22, %v9932_v3 }
 0x3f9   :  { %v2797_v29 = vpop.f32.mrf.mxu1 }
 0x3fa   :  { %v10054_v55 = vadd.f32 %v2797_v29, %v2595_v43  ;;  %v6953_v33 = vpop.f32.mrf.mxu0 }
 0x3fb   :  { %v6793_v7 = vpop.f32.mrf.mxu1  ;;  %v11353_v33 = vld [vmem:[#allocation54_spill] sm:$0xff] }
 0x3fc   :  { %v10058_v58 = vpop.f32.mrf.mxu0  ;;  %v2598_v47 = vadd.f32 %v11353_v33, %v9906_v54  ;;  %v2600_v33 = vadd.f32 %v9684_v9, %v9923_v59  ;;  %v2602_v9 = vadd.f32 %v9718_v52, %v9938_v10 }
 0x3fd   :  { %v2802_v45 = vpop.f32.mrf.mxu1 }
 0x3fe   :  { %v10060_v4 = vadd.f32 %v2802_v45, %v2596_v6  ;;  %v6956_v11 = vpop.f32.mrf.mxu0 }
 0x3ff   :  { %v6796_v0 = vpop.f32.mrf.mxu1 }
 0x400   :  { %v10064_v60 = vpop.f32.mrf.mxu0 }
 0x401   :  { %v2805_v38 = vpop.f32.mrf.mxu1 }
 0x402   :  { %v10066_v43 = vadd.f32 %v2805_v38, %v2597_v27  ;;  %v6957_v7 = vpop.f32.mrf.mxu0 }
 0x403   :  { %v6797_v29 = vpop.f32.mrf.mxu1 }
 0x404   :  { %v10073_v45 = vpop.f32.mrf.mxu0 }
 0x405   :  { %v2810_v6 = vpop.f32.mrf.mxu1 }
 0x406   :  { %v10075_v0 = vadd.f32 %v2810_v6, %v2598_v47  ;;  %v6960_v11 = vpop.f32.mrf.mxu0 }
 0x407   :  { %v6800_v31 = vpop.f32.mrf.mxu1 }
 0x408   :  { %11354 = vst [vmem:[#allocation16_spill] sm:$0xff] %v10075_v0  ;;  %v10080_v38 = vpop.f32.mrf.mxu0 }
 0x409   :  { %v2813_v27 = vpop.f32.mrf.mxu1 }
 0x40a   :  { %v10082_v54 = vadd.f32 %v2813_v27, %v2599_v63  ;;  %v6961_v7 = vpop.f32.mrf.mxu0 }
 0x40b   :  { %v6801_v29 = vpop.f32.mrf.mxu1 }
 0x40c   :  { %11355 = vst [vmem:[#allocation10_spill] sm:$0xff] %v10082_v54  ;;  %v10086_v6 = vpop.f32.mrf.mxu0 }
 0x40d   :  { %v2818_v47 = vpop.f32.mrf.mxu1 }
 0x40e   :  { %v10088_v35 = vadd.f32 %v2818_v47, %v2600_v33  ;;  %v6964_v11 = vpop.f32.mrf.mxu0 }
 0x40f   :  { %v6804_v31 = vpop.f32.mrf.mxu1 }
 0x410   :  { %11356 = vst [vmem:[#allocation13_spill] sm:$0xff] %v10088_v35  ;;  %v10092_v0 = vpop.f32.mrf.mxu0 }
 0x411   :  { %v2821_v19 = vpop.f32.mrf.mxu1  ;;  %11357 = vst [vmem:[#allocation9_spill] sm:$0xff] %v10092_v0 }
 0x412   :  { %v10094_v63 = vadd.f32 %v2821_v19, %v2601_v57  ;;  %v6965_v29 = vpop.f32.mrf.mxu0 }
 0x413   :  { %v6805_v27 = vpop.f32.mrf.mxu1 }
 0x414   :  { %11358 = vst [vmem:[#allocation15_spill] sm:$0xff] %v10094_v63  ;;  %v10098_v7 = vpop.f32.mrf.mxu0 }
 0x415   :  { %v2826_v59 = vpop.f32.mrf.mxu1  ;;  %11359 = vst [vmem:[#allocation14_spill] sm:$0xff] %v10098_v7 }
 0x416   :  { %v10100_v33 = vadd.f32 %v2826_v59, %v2602_v9  ;;  %v6968_v31 = vpop.f32.mrf.mxu0 }
 0x417   :  { %v6808_v47 = vpop.f32.mrf.mxu1 }
 0x418   :  { %11360 = vst [vmem:[#allocation18_spill] sm:$0xff] %v10100_v33  ;;  %v10102_v35 = vpop.f32.mrf.mxu0 }
 0x419   :  { %v2829_v11 = vpop.f32.mrf.mxu1  ;;  %11361 = vst [vmem:[#allocation20_spill] sm:$0xff] %v10102_v35 }
 0x41a   :  { %v6969_v3 = vpop.f32.mrf.mxu0 }
 0x41b   :  { %v6809_v22 = vpop.f32.mrf.mxu1  ;;  %v3649_v3 = vpop.permute.xlu0 %3648 }
 0x41c   :  { %v10104_v57 = vpop.f32.mrf.mxu0 }
 0x41d   :  { %v3238_v54 = vpop.f32.mrf.mxu1  ;;  %11362 = vst [vmem:[#allocation17_spill] sm:$0xff] %v10104_v57  ;;  %v3659_v57 = vpop.permute.xlu1 %3658 }
 0x41e   :  { %v6972_v27 = vpop.f32.mrf.mxu0 }
 0x41f   :  { %v6872_v19 = vpop.f32.mrf.mxu1 }
 0x420   :  { %v10106_v63 = vpop.f32.mrf.mxu0  ;;  %v3087_v19 = vadd.f32 %v9752_v1, %v9957_v21 }
 0x421   :  { %v3241_v29 = vpop.f32.mrf.mxu1  ;;  %11363 = vst [vmem:[#allocation19_spill] sm:$0xff] %v10106_v63  ;;  %v3654_v63 = vpop.permute.xlu0 %3653 }
 0x422   :  { %v6973_v10 = vpop.f32.mrf.mxu0 }
 0x423   :  { %v6873_v52 = vpop.f32.mrf.mxu1  ;;  %v3341_v10 = vadd.f32 %v3241_v29, %v3087_v19 }
 0x424   :  { %v10108_v9 = vpop.f32.mrf.mxu0  ;;  %v3086_v52 = vadd.f32 %v9739_v56, %v9949_v23  ;;  %v7314_v56 = vld [vmem:[%s10982_s7 + $0x28] sm:$0xff]   ;;  %v3089_v23 = vadd.f32 %v9772_v48, %v9970_v16 }
 0x425   :  { %v3246_v7 = vpop.f32.mrf.mxu1  ;;  %v3669_v19 = vpop.permute.xlu0 %3668 }
 0x426   :  { %v6976_v47 = vpop.f32.mrf.mxu0 }
 0x427   :  { %v6876_v59 = vpop.f32.mrf.mxu1 }
 0x428   :  { %v3591_v11 = vpop.f32.mrf.mxu0  ;;  %v3088_v59 = vadd.f32 %v9759_v5, %v9964_v51  ;;  %v7315_v5 = vld [vmem:[%s10982_s7 + $0x10] sm:$0xff]   ;;  %v3664_v51 = vpop.permute.xlu1 %3663 }
 0x429   :  { %v3249_v31 = vpop.f32.mrf.mxu1  ;;  %v3340_v11 = vadd.f32 %v3238_v54, %v3086_v52  ;;  %v10133_v54 = vadd.f32 %v9980_v40, %v3341_v10  ;;  %v7316_v40 = vld [vmem:[%s10982_s7 + $0x8] sm:$0xff]   ;;  %v3092_v10 = vadd.f32 %v9796_v36, %v9988_v26  ;;  %v3679_v36 = vpop.permute.xlu0 %3678 }
 0x42a   :  { %v6977_v22 = vpop.f32.mrf.mxu0  ;;  %v3342_v1 = vadd.f32 %v3246_v7, %v3088_v59  ;;  %v3090_v7 = vadd.f32 %v9779_v37, %v9976_v17  ;;  %v7317_v37 = vld [vmem:[%s10982_s7 + $0x20] sm:$0xff]   ;;  %v3091_v17 = vadd.f32 %v9789_v50, %v9982_v18 }
 0x42b   :  { %v6877_v33 = vpop.f32.mrf.mxu1  ;;  %v3343_v22 = vadd.f32 %v3249_v31, %v3089_v23  ;;  %v10138_v52 = vadd.f32 %v9974_v20, %v3340_v11  ;;  %v3772_v20 = vmul.f32 %v3654_v63, %v10133_v54 }
 0x42c   :  { %v7312_v33 = vld [vmem:[%s10982_s7 + $0x30] sm:$0xff]   ;;  %v10141_v59 = vadd.f32 %v9986_v34, %v3342_v1 }
 0x42d   :  { %v3254_v35 = vpop.f32.mrf.mxu1  ;;  %6981 = vmatpush3.bf16.msra.mxu1 %v7312_v33  ;;  %v3674_v33 = vpop.permute.xlu1 %3673  ;;  %v3771_v50 = vmul.f32 %v3649_v3, %v10138_v52  ;;  %v3094_v3 = vadd.f32 %v9813_v44, %v10000_v25 }
 0x42e   :  { %6982 = vmatprep.subr.bf16.mxu1 %v11221_v24  ;;  %v3344_v48 = vadd.f32 %v3254_v35, %v3090_v7  ;;  %v10155_v35 = vadd.f32 %v9992_v41, %v3343_v22  ;;  %v3773_v18 = vmul.f32 %v3659_v57, %v10141_v59  ;;  %v7318_v41 = vld [vmem:[%s10982_s7] sm:$0xff]  }
 0x42f   :  { %v6880_v0 = vpop.f32.mrf.mxu1  ;;  %v3851_v11 = vmul.f32 %v3771_v50, %v3771_v50 }
 0x430   :  { %v7313_v0 = vld [vmem:[%s10982_s7 + $0x18] sm:$0xff]   ;;  %v3774_v57 = vmul.f32 %v3664_v51, %v10155_v35  ;;  %v3853_v1 = vmul.f32 %v3773_v18, %v3773_v18  ;;  %v3095_v51 = vadd.f32 %v9823_v49, %v10006_v2 }
 0x431   :  { %v3257_v27 = vpop.f32.mrf.mxu1  ;;  %7007 = vmatpush3.bf16.msra.mxu0 %v7313_v0  ;;  %6983 = vmatpush3.bf16.msra.mxu1 %v7314_v56  ;;  %v10164_v0 = vadd.f32 %v9998_v28, %v3344_v48  ;;  %v3684_v44 = vpop.permute.xlu1 %3683  ;;  %v3876_v2 = vsel %vm82_vm3, %v3851_v11, 0.0 }
 0x432   :  { %7008 = vmatprep.subr.bf16.mxu0 %v11221_v24  ;;  %6984 = vmatprep.subr.bf16.mxu1 %v11221_v24  ;;  %v3345_v31 = vadd.f32 %v3257_v27, %v3091_v17  ;;  %v3854_v48 = vmul.f32 %v3774_v57, %v3774_v57  ;;  %v3879_v17 = vsel %vm82_vm3, %v3853_v1, 0.0 }
 0x433   :  { %v6881_v47 = vpop.f32.mrf.mxu1 }
 0x434   :  { %v3093_v47 = vadd.f32 %v9806_v15, %v9994_v42  ;;  %v3852_v15 = vmul.f32 %v3772_v20, %v3772_v20  ;;  %v10173_v28 = vadd.f32 %v10004_v14, %v3345_v31  ;;  %v3796_v14 = vsel %vm82_vm3, %v3771_v50, 0.0 }
 0x435   :  { %v3262_v21 = vpop.f32.mrf.mxu1  ;;  %7009 = vmatpush3.bf16.msra.mxu0 %v7315_v5  ;;  %6985 = vmatpush3.bf16.msra.mxu1 %v7317_v37  ;;  %v3797_v5 = vsel %vm82_vm3, %v3772_v20, 0.0 }
 0x436   :  { %7010 = vmatprep.subr.bf16.mxu0 %v11221_v24  ;;  %v3346_v27 = vadd.f32 %v3262_v21, %v3092_v10  ;;  %7034 = vmatprep.subr.bf16.mxu1 %v11221_v24  ;;  %v3775_v21 = vmul.f32 %v3669_v19, %v10164_v0  ;;  %v3877_v25 = vsel %vm82_vm3, %v3852_v15, 0.0  ;;  %v3096_v19 = vadd.f32 %v9830_v13, %v10012_v8 }
 0x437   :  { %v6884_v29 = vpop.f32.mrf.mxu1  ;;  %v3798_v37 = vadd.f32 %v3797_v5, %v3796_v14  ;;  %v3878_v10 = vadd.f32 %v3877_v25, %v3876_v2 }
 0x438   :  { %v10180_v23 = vadd.f32 %v10010_v30, %v3346_v27  ;;  %v3799_v30 = vsel %vm82_vm3, %v3773_v18, 0.0  ;;  %v3855_v20 = vmul.f32 %v3775_v21, %v3775_v21  ;;  %v11364_v18 = vld [vmem:[#allocation8_spill] sm:$0xff]  ;;  %v3881_v27 = vsel %vm82_vm3, %v3854_v48, 0.0 }
 0x439   :  { %v3265_v16 = vpop.f32.mrf.mxu1  ;;  %7011 = vmatpush3.bf16.msra.mxu0 %v7316_v40  ;;  %v3689_v40 = vpop.permute.xlu0 %3688  ;;  %v3803_v15 = vsel %vm82_vm3, %v3775_v21, 0.0 }
 0x43a   :  { %7012 = vmatprep.subr.bf16.mxu0 %v11221_v24  ;;  %v3347_v26 = vadd.f32 %v3265_v16, %v3093_v47  ;;  %v3776_v16 = vmul.f32 %v3674_v33, %v10173_v28  ;;  %v3777_v31 = vmul.f32 %v3679_v36, %v10180_v23  ;;  %v3800_v47 = vadd.f32 %v3799_v30, %v3798_v37  ;;  %v3694_v36 = vpop.permute.xlu1 %3693 }
 0x43b   :  { %v6885_v34 = vpop.f32.mrf.mxu1 }
 0x43c   :  { %v10188_v29 = vadd.f32 %v10016_v62, %v3347_v26  ;;  %v3801_v62 = vsel %vm82_vm3, %v3774_v57, 0.0  ;;  %v3856_v26 = vmul.f32 %v3776_v16, %v3776_v16  ;;  %v3857_v5 = vmul.f32 %v3777_v31, %v3777_v31 }
 0x43d   :  { %v3270_v63 = vpop.f32.mrf.mxu1  ;;  %7013 = vmatpush3.bf16.msra.mxu0 %v7318_v41  ;;  %v3802_v57 = vadd.f32 %v3801_v62, %v3800_v47  ;;  %v3699_v14 = vpop.permute.xlu0 %3698 }
 0x43e   :  { %v3348_v7 = vadd.f32 %v3270_v63, %v3094_v3  ;;  %7062 = vmatprep.subr.bf16.mxu0 %v11221_v24  ;;  %v3778_v33 = vmul.f32 %v3684_v44, %v10188_v29  ;;  %v11365_v63 = vld [vmem:[#allocation27_spill] sm:$0xff]  ;;  %v3883_v3 = vsel %vm82_vm3, %v3855_v20, 0.0  ;;  %v3885_v48 = vsel %vm82_vm3, %v3856_v26, 0.0 }
 0x43f   :  { %v6888_v42 = vpop.f32.mrf.mxu1  ;;  %v3097_v41 = vadd.f32 %v11365_v63, %v11364_v18  ;;  %v3804_v44 = vadd.f32 %v3803_v15, %v3802_v57  ;;  %v3887_v20 = vsel %vm82_vm3, %v3857_v5, 0.0  ;;  %v11368_v63 = vld [vmem:[#allocation12_spill] sm:$0xff] }
 0x440   :  { %v10199_v13 = vadd.f32 %v10022_v61, %v3348_v7  ;;  %v3880_v61 = vadd.f32 %v3879_v17, %v3878_v10  ;;  %v3858_v25 = vmul.f32 %v3778_v33, %v3778_v33  ;;  %v3704_v10 = vpop.permute.xlu1 %3703 }
 0x441   :  { %v3273_v56 = vpop.f32.mrf.mxu1 }
 0x442   :  { %v3349_v49 = vadd.f32 %v3273_v56, %v3095_v51  ;;  %v3805_v56 = vsel %vm82_vm3, %v3776_v16, 0.0  ;;  %v3779_v7 = vmul.f32 %v3689_v40, %v10199_v13  ;;  %v3882_v21 = vadd.f32 %v3881_v27, %v3880_v61  ;;  %v3709_v61 = vpop.permute.xlu0 %3708 }
 0x443   :  { %v6889_v22 = vpop.f32.mrf.mxu1  ;;  %v3806_v37 = vadd.f32 %v3805_v56, %v3804_v44  ;;  %v3889_v18 = vsel %vm82_vm3, %v3858_v25, 0.0  ;;  %v11370_v44 = vld [vmem:[#allocation38_spill] sm:$0xff]  ;;  %v11371_v25 = vld [vmem:[#allocation31_spill] sm:$0xff] }
 0x444   :  { %v10207_v42 = vadd.f32 %v10028_v12, %v3349_v49  ;;  %v11366_v22 = vld [vmem:[#allocation37_spill] sm:$0xff]  ;;  %v3807_v49 = vsel %vm82_vm3, %v3777_v31, 0.0  ;;  %v3884_v2 = vadd.f32 %v3883_v3, %v3882_v21  ;;  %v3859_v62 = vmul.f32 %v3779_v7, %v3779_v7 }
 0x445   :  { %v3278_v34 = vpop.f32.mrf.mxu1 }
 0x446   :  { %v3350_v8 = vadd.f32 %v3278_v34, %v3096_v19  ;;  %v11367_v19 = vld [vmem:[#allocation25_spill] sm:$0xff]  ;;  %v3809_v34 = vsel %vm82_vm3, %v3778_v33, 0.0  ;;  %v3886_v47 = vadd.f32 %v3885_v48, %v3884_v2  ;;  %v3714_v48 = vpop.permute.xlu1 %3713 }
 0x447   :  { %v6892_v50 = vpop.f32.mrf.mxu1  ;;  %v3098_v30 = vadd.f32 %v11367_v19, %v11366_v22 }
 0x448   :  { %v3604_v11 = vadd.f32 %v10034_v32, %v3350_v8  ;;  %v3780_v32 = vmul.f32 %v3694_v36, %v10207_v42  ;;  %v3808_v50 = vadd.f32 %v3807_v49, %v3806_v37  ;;  %v3888_v33 = vadd.f32 %v3887_v20, %v3886_v47  ;;  %v11373_v47 = vld [vmem:[#allocation28_spill] sm:$0xff] }
 0x449   :  { %v3281_v1 = vpop.f32.mrf.mxu1 }
 0x44a   :  { %v3351_v51 = vadd.f32 %v3281_v1, %v3097_v41  ;;  %v3781_v40 = vmul.f32 %v3699_v14, %v3604_v11  ;;  %v11369_v41 = vld [vmem:[#allocation24_spill] sm:$0xff]  ;;  %v3860_v15 = vmul.f32 %v3780_v32, %v3780_v32  ;;  %v3810_v57 = vadd.f32 %v3809_v34, %v3808_v50 }
 0x44b   :  { %v6893_v12 = vpop.f32.mrf.mxu1  ;;  %v3099_v27 = vadd.f32 %v11369_v41, %v11368_v63  ;;  %v3891_v1 = vsel %vm82_vm3, %v3859_v62, 0.0  ;;  %v3813_v56 = vsel %vm82_vm3, %v3780_v32, 0.0  ;;  %v3890_v14 = vadd.f32 %v3889_v18, %v3888_v33  ;;  %v3719_v41 = vpop.permute.xlu0 %3718 }
 0x44c   :  { %v3605_v16 = vadd.f32 %v10040_v46, %v3351_v51  ;;  %v3811_v46 = vsel %vm82_vm3, %v3779_v7, 0.0  ;;  %v3861_v3 = vmul.f32 %v3781_v40, %v3781_v40  ;;  %v3100_v12 = vadd.f32 %v11371_v25, %v11370_v44  ;;  %v3724_v44 = vpop.permute.xlu1 %3723 }
 0x44d   :  { %v3286_v17 = vpop.f32.mrf.mxu1  ;;  %v3812_v21 = vadd.f32 %v3811_v46, %v3810_v57  ;;  %v3815_v22 = vsel %vm82_vm3, %v3781_v40, 0.0  ;;  %v3892_v49 = vadd.f32 %v3891_v1, %v3890_v14  ;;  %v11372_v40 = vld [vmem:[#allocation11_spill] sm:$0xff] }
 0x44e   :  { %v3352_v8 = vadd.f32 %v3286_v17, %v3098_v30  ;;  %v3782_v26 = vmul.f32 %v3704_v10, %v3605_v16  ;;  %v3895_v16 = vsel %vm82_vm3, %v3861_v3, 0.0  ;;  %v3101_v50 = vadd.f32 %v11373_v47, %v11372_v40 }
 0x44f   :  { %v6896_v31 = vpop.f32.mrf.mxu1  ;;  %v3814_v32 = vadd.f32 %v3813_v56, %v3812_v21  ;;  %v11374_v56 = vld [vmem:[#allocation6_spill] sm:$0xff] }
 0x450   :  { %v10226_v36 = vadd.f32 %v10046_v39, %v3352_v8  ;;  %v3893_v39 = vsel %vm82_vm3, %v3860_v15, 0.0  ;;  %v3862_v19 = vmul.f32 %v3782_v26, %v3782_v26  ;;  %v3817_v37 = vsel %vm82_vm3, %v3782_v26, 0.0 }
 0x451   :  { %v3289_v11 = vpop.f32.mrf.mxu1  ;;  %v3894_v62 = vadd.f32 %v3893_v39, %v3892_v49  ;;  %v3816_v8 = vadd.f32 %v3815_v22, %v3814_v32 }
 0x452   :  { %v3783_v5 = vmul.f32 %v3709_v61, %v10226_v36  ;;  %v3353_v51 = vadd.f32 %v3289_v11, %v3099_v27 }
 0x453   :  { %v6897_v7 = vpop.f32.mrf.mxu1  ;;  %v3896_v27 = vadd.f32 %v3895_v16, %v3894_v62  ;;  %v3818_v46 = vadd.f32 %v3817_v37, %v3816_v8 }
 0x454   :  { %v10236_v30 = vadd.f32 %v10052_v53, %v3353_v51  ;;  %v3863_v17 = vmul.f32 %v3783_v5, %v3783_v5  ;;  %v3897_v53 = vsel %vm82_vm3, %v3862_v19, 0.0  ;;  %v3819_v18 = vsel %vm82_vm3, %v3783_v5, 0.0  ;;  %v11375_v5 = vld [vmem:[#allocation35_spill] sm:$0xff] }
 0x455   :  { %v3294_v2 = vpop.f32.mrf.mxu1  ;;  %v3898_v3 = vadd.f32 %v3897_v53, %v3896_v27  ;;  %v3820_v11 = vadd.f32 %v3819_v18, %v3818_v46  ;;  %v3102_v51 = vadd.f32 %v11375_v5, %v11374_v56  ;;  %v11377_v27 = vld [vmem:[#allocation26_spill] sm:$0xff]  ;;  %v3734_v46 = vpop.permute.xlu1 %3733 }
 0x456   :  { %v3784_v20 = vmul.f32 %v3714_v48, %v10236_v30  ;;  %v3354_v34 = vadd.f32 %v3294_v2, %v3100_v12  ;;  %v3899_v26 = vsel %vm82_vm3, %v3863_v17, 0.0 }
 0x457   :  { %v6900_v10 = vpop.f32.mrf.mxu1  ;;  %v3900_v25 = vadd.f32 %v3899_v26, %v3898_v3 }
 0x458   :  { %v3864_v31 = vmul.f32 %v3784_v20, %v3784_v20  ;;  %v10246_v63 = vadd.f32 %v10058_v58, %v3354_v34  ;;  %v3821_v61 = vsel %vm82_vm3, %v3784_v20, 0.0  ;;  %v3729_v34 = vpop.permute.xlu0 %3728 }
 0x459   :  { %v3297_v15 = vpop.f32.mrf.mxu1  ;;  %v3822_v12 = vadd.f32 %v3821_v61, %v3820_v11 }
 0x45a   :  { %v3785_v33 = vmul.f32 %v3719_v41, %v10246_v63  ;;  %v3355_v57 = vadd.f32 %v3297_v15, %v3101_v50  ;;  %v3901_v58 = vsel %vm82_vm3, %v3864_v31, 0.0 }
 0x45b   :  { %v6901_v1 = vpop.f32.mrf.mxu1  ;;  %v3902_v49 = vadd.f32 %v3901_v58, %v3900_v25 }
 0x45c   :  { %v3823_v14 = vsel %vm82_vm3, %v3785_v33, 0.0  ;;  %v3865_v21 = vmul.f32 %v3785_v33, %v3785_v33  ;;  %v10256_v7 = vadd.f32 %v10064_v60, %v3355_v57  ;;  %v11376_v60 = vld [vmem:[#allocation33_spill] sm:$0xff] }
 0x45d   :  { %v3302_v39 = vpop.f32.mrf.mxu1  ;;  %v3824_v32 = vadd.f32 %v3823_v14, %v3822_v12  ;;  %v3103_v20 = vadd.f32 %v11376_v60, %v10054_v55  ;;  %v3104_v55 = vadd.f32 %v11377_v27, %v10060_v4  ;;  %v3739_v4 = vpop.permute.xlu0 %3738 }
 0x45e   :  { %v3903_v22 = vsel %vm82_vm3, %v3865_v21, 0.0  ;;  %v3786_v19 = vmul.f32 %v3724_v44, %v10256_v7  ;;  %v3356_v48 = vadd.f32 %v3302_v39, %v3102_v51 }
 0x45f   :  { %v6904_v16 = vpop.f32.mrf.mxu1  ;;  %v3904_v62 = vadd.f32 %v3903_v22, %v3902_v49 }
 0x460   :  { %v3825_v2 = vsel %vm82_vm3, %v3786_v19, 0.0  ;;  %v3866_v37 = vmul.f32 %v3786_v19, %v3786_v19  ;;  %v10262_v17 = vadd.f32 %v10073_v45, %v3356_v48  ;;  %v11379_v48 = vld [vmem:[#allocation9_spill] sm:$0xff] }
 0x461   :  { %v3826_v8 = vadd.f32 %v3825_v2, %v3824_v32  ;;  %v3305_v10 = vpop.f32.mrf.mxu1  ;;  %v11381_v32 = vld [vmem:[#allocation29_spill] sm:$0xff] }
 0x462   :  { %v3905_v40 = vsel %vm82_vm3, %v3866_v37, 0.0  ;;  %v3787_v47 = vmul.f32 %v3729_v34, %v10262_v17  ;;  %v3357_v50 = vadd.f32 %v3305_v10, %v3103_v20 }
 0x463   :  { %v3906_v53 = vadd.f32 %v3905_v40, %v3904_v62  ;;  %v6905_v18 = vpop.f32.mrf.mxu1 }
 0x464   :  { %v3827_v31 = vsel %vm82_vm3, %v3787_v47, 0.0  ;;  %v3867_v41 = vmul.f32 %v3787_v47, %v3787_v47  ;;  %v10270_v45 = vadd.f32 %v10080_v38, %v3357_v50  ;;  %v11378_v38 = vld [vmem:[#allocation34_spill] sm:$0xff]  ;;  %v11384_v18 = vld [vmem:[#allocation36_spill] sm:$0xff] }
 0x465   :  { %v3828_v15 = vadd.f32 %v3827_v31, %v3826_v8  ;;  %v3310_v26 = vpop.f32.mrf.mxu1  ;;  %v3105_v51 = vadd.f32 %v11378_v38, %v10066_v43  ;;  %v3744_v43 = vpop.permute.xlu1 %3743  ;;  %v11382_v47 = vld [vmem:[#allocation14_spill] sm:$0xff] }
 0x466   :  { %v3907_v61 = vsel %vm82_vm3, %v3867_v41, 0.0  ;;  %v3788_v33 = vmul.f32 %v3734_v46, %v10270_v45  ;;  %v3358_v57 = vadd.f32 %v3310_v26, %v3104_v55  ;;  %v3749_v41 = vpop.permute.xlu0 %3748  ;;  %v11387_v38 = vld [vmem:[#allocation30_spill] sm:$0xff] }
 0x467   :  { %v3908_v3 = vadd.f32 %v3907_v61, %v3906_v53  ;;  %v6908_v11 = vpop.f32.mrf.mxu1  ;;  %v11383_v53 = vld [vmem:[#allocation10_spill] sm:$0xff] }
 0x468   :  { %v3829_v1 = vsel %vm82_vm3, %v3788_v33, 0.0  ;;  %v3868_v56 = vmul.f32 %v3788_v33, %v3788_v33  ;;  %v10278_v5 = vadd.f32 %v10086_v6, %v3358_v57  ;;  %v11380_v6 = vld [vmem:[#allocation16_spill] sm:$0xff]  ;;  %v3107_v31 = vadd.f32 %v11384_v18, %v11383_v53  ;;  %v11391_v53 = vld [vmem:[#allocation19_spill] sm:$0xff] }
 0x469   :  { %v3830_v58 = vadd.f32 %v3829_v1, %v3828_v15  ;;  %v3313_v14 = vpop.f32.mrf.mxu1  ;;  %v3106_v16 = vadd.f32 %v11381_v32, %v11380_v6  ;;  %v11385_v11 = vld [vmem:[#allocation20_spill] sm:$0xff]  ;;  %v11389_v32 = vld [vmem:[#allocation15_spill] sm:$0xff] }
 0x46a   :  { %v3909_v21 = vsel %vm82_vm3, %v3868_v56, 0.0  ;;  %v3789_v44 = vmul.f32 %v3739_v4, %v10278_v5  ;;  %v3359_v25 = vadd.f32 %v3313_v14, %v3105_v51  ;;  %v11386_v56 = vld [vmem:[#allocation13_spill] sm:$0xff]  ;;  %v3754_v4 = vpop.permute.xlu1 %3753 }
 0x46b   :  { %v3910_v12 = vadd.f32 %v3909_v21, %v3908_v3  ;;  %v6909_v39 = vpop.f32.mrf.mxu1  ;;  %v3108_v51 = vadd.f32 %v11387_v38, %v11386_v56 }
 0x46c   :  { %v3831_v22 = vsel %vm82_vm3, %v3789_v44, 0.0  ;;  %v3869_v19 = vmul.f32 %v3789_v44, %v3789_v44  ;;  %v10286_v49 = vadd.f32 %v11379_v48, %v3359_v25  ;;  %v11388_v48 = vld [vmem:[#allocation17_spill] sm:$0xff] }
 0x46d   :  { %v3832_v2 = vadd.f32 %v3831_v22, %v3830_v58  ;;  %v3318_v37 = vpop.f32.mrf.mxu1 }
 0x46e   :  { %v3911_v60 = vsel %vm82_vm3, %v3869_v19, 0.0  ;;  %v3790_v20 = vmul.f32 %v3744_v43, %v10286_v49  ;;  %v3360_v34 = vadd.f32 %v3318_v37, %v3106_v16  ;;  %v11390_v16 = vld [vmem:[#allocation7_spill] sm:$0xff] }
 0x46f   :  { %v3912_v62 = vadd.f32 %v3911_v60, %v3910_v12  ;;  %v6912_v8 = vpop.f32.mrf.mxu1  ;;  %v3109_v43 = vadd.f32 %v11390_v16, %v11389_v32 }
 0x470   :  { %v3833_v10 = vsel %vm82_vm3, %v3790_v20, 0.0  ;;  %v3870_v40 = vmul.f32 %v3790_v20, %v3790_v20  ;;  %v10294_v50 = vadd.f32 %v11382_v47, %v3360_v34 }
 0x471   :  { %v3834_v27 = vadd.f32 %v3833_v10, %v3832_v2  ;;  %v3321_v55 = vpop.f32.mrf.mxu1  ;;  %v3759_v2 = vpop.permute.xlu0 %3758 }
 0x472   :  { %v3913_v46 = vsel %vm82_vm3, %v3870_v40, 0.0  ;;  %v3791_v15 = vmul.f32 %v3749_v41, %v10294_v50  ;;  %v3361_v26 = vadd.f32 %v3321_v55, %v3107_v31  ;;  %v11392_v31 = vld [vmem:[#allocation18_spill] sm:$0xff]  ;;  %v11393_v41 = vld [vmem:[#allocation32_spill] sm:$0xff]  ;;  %v3764_v55 = vpop.permute.xlu1 %3763 }
 0x473   :  { %v3914_v61 = vadd.f32 %v3913_v46, %v3912_v62  ;;  %v6913_v33 = vpop.f32.mrf.mxu1 }
 0x474   :  { %v3835_v57 = vsel %vm82_vm3, %v3791_v15, 0.0  ;;  %v3871_v3 = vmul.f32 %v3791_v15, %v3791_v15  ;;  %v10302_v1 = vadd.f32 %v11385_v11, %v3361_v26 }
 0x475   :  { %v3836_v58 = vadd.f32 %v3835_v57, %v3834_v27  ;;  %v3326_v14 = vpop.f32.mrf.mxu1  ;;  %v3110_v27 = vadd.f32 %v11393_v41, %v11392_v31 }
 0x476   :  { %v3915_v21 = vsel %vm82_vm3, %v3871_v3, 0.0  ;;  %v3792_v44 = vmul.f32 %v3754_v4, %v10302_v1  ;;  %v3362_v25 = vadd.f32 %v3326_v14, %v3108_v51  ;;  %v3769_v51 = vpop.permute.xlu0 %3768 }
 0x477   :  { %v3916_v12 = vadd.f32 %v3915_v21, %v3914_v61  ;;  %v6916_v39 = vpop.f32.mrf.mxu1 }
 0x478   :  { %v3837_v22 = vsel %vm82_vm3, %v3792_v44, 0.0  ;;  %v3872_v19 = vmul.f32 %v3792_v44, %v3792_v44  ;;  %v10310_v6 = vadd.f32 %v11388_v48, %v3362_v25 }
 0x479   :  { %v3838_v37 = vadd.f32 %v3837_v22, %v3836_v58  ;;  %v3329_v60 = vpop.f32.mrf.mxu1 }
 0x47a   :  { %v3917_v20 = vsel %vm82_vm3, %v3872_v19, 0.0  ;;  %v3793_v34 = vmul.f32 %v3759_v2, %v10310_v6  ;;  %v3363_v62 = vadd.f32 %v3329_v60, %v3109_v43 }
 0x47b   :  { %v3918_v8 = vadd.f32 %v3917_v20, %v3916_v12  ;;  %v6917_v10 = vpop.f32.mrf.mxu1 }
 0x47c   :  { %v3839_v40 = vsel %vm82_vm3, %v3793_v34, 0.0  ;;  %v3873_v47 = vmul.f32 %v3793_v34, %v3793_v34  ;;  %v3617_v18 = vadd.f32 %v11391_v53, %v3363_v62 }
 0x47d   :  { %v3840_v46 = vadd.f32 %v3839_v40, %v3838_v37  ;;  %v3334_v15 = vpop.f32.mrf.mxu1 }
 0x47e   :  { %v3919_v26 = vsel %vm82_vm3, %v3873_v47, 0.0  ;;  %v3794_v61 = vmul.f32 %v3764_v55, %v3617_v18  ;;  %v3364_v33 = vadd.f32 %v3334_v15, %v3110_v27 }
 0x47f   :  { %v3920_v57 = vadd.f32 %v3919_v26, %v3918_v8  ;;  %v6920_v3 = vpop.f32.mrf.mxu1 }
 0x480   :  { %v3841_v11 = vsel %vm82_vm3, %v3794_v61, 0.0  ;;  %v3874_v56 = vmul.f32 %v3794_v61, %v3794_v61  ;;  %v3618_v38 = vadd.f32 %v10108_v9, %v3364_v33 }
 0x481   :  { %v3842_v4 = vadd.f32 %v3841_v11, %v3840_v46  ;;  %v3337_v58 = vpop.f32.mrf.mxu1 }
 0x482   :  { %v3921_v14 = vsel %vm82_vm3, %v3874_v56, 0.0  ;;  %v3795_v21 = vmul.f32 %v3769_v51, %v3618_v38 }
 0x483   :  { %v3922_v44 = vadd.f32 %v3921_v14, %v3920_v57  ;;  %v6921_v25 = vpop.f32.mrf.mxu1  ;;  %v3619_v57 = vld [vmem:[%s10983_s5] sm:$0x1]  ;;  %v11394_v14 = vld [vmem:[#allocation39_spill] sm:$0xff] }
 0x484   :  { %v3843_v12 = vsel %vm82_vm3, %v3795_v21, 0.0  ;;  %v3875_v39 = vmul.f32 %v3795_v21, %v3795_v21 }
 0x485   :  { %v3844_v22 = vadd.f32 %v3843_v12, %v3842_v4 }
 0x486   :  { %v3923_v19 = vsel %vm82_vm3, %v3875_v39, 0.0 }
 0x487   :  { %v3845_v48 = vrot.slane %v3844_v22, 4  ;;  %v3924_v32 = vadd.f32 %v3923_v19, %v3922_v44 }
 0x489   :  { %v3846_v16 = vadd.f32 %v3845_v48, %v3844_v22  ;;  %v3925_v43 = vrot.slane %v3924_v32, 4 }
 0x48b   :  { %v3847_v2 = vrot.slane %v3846_v16, 2  ;;  %v3926_v9 = vadd.f32 %v3925_v43, %v3924_v32 }
 0x48d   :  { %v3848_v37 = vadd.f32 %v3847_v2, %v3846_v16  ;;  %v3927_v60 = vrot.slane %v3926_v9, 2 }
 0x48f   :  { %v3849_v20 = vrot.slane %v3848_v37, 1  ;;  %v3928_v34 = vadd.f32 %v3927_v60, %v3926_v9 }
 0x491   :  { %v3850_v62 = vadd.f32 %v3849_v20, %v3848_v37  ;;  %v3929_v8 = vrot.slane %v3928_v34, 1 }
 0x493   :  { %v3930_v10 = vadd.f32 %v3929_v8, %v3928_v34  ;;  %v10326_v40 = vmul.f32 0.0078125, %v3850_v62 }
 0x495   :  { %v3932_v47 = vmul.f32 0.0078125, %v3930_v10  ;;  %v3933_v53 = vmul.f32 %v10326_v40, %v10326_v40  ;;  %v3952_v41 = vsub.f32 %v10246_v63, %v10326_v40  ;;  %v3953_v27 = vsub.f32 %v10256_v7, %v10326_v40 }
 0x496   :  { %v3954_v55 = vsub.f32 %v10262_v17, %v10326_v40  ;;  %v3955_v46 = vsub.f32 %v10270_v45, %v10326_v40  ;;  %v3956_v15 = vsub.f32 %v10278_v5, %v10326_v40  ;;  %v3957_v26 = vsub.f32 %v10286_v49, %v10326_v40 }
 0x497   :  { %v3934_v18 = vsub.f32 %v3932_v47, %v3933_v53  ;;  %v3958_v61 = vsub.f32 %v10294_v50, %v10326_v40  ;;  %v3959_v63 = vsub.f32 %v10302_v1, %v10326_v40  ;;  %v3960_v33 = vsub.f32 %v10310_v6, %v10326_v40 }
 0x498   :  { %v3938_v56 = vsub.f32 %v10138_v52, %v10326_v40  ;;  %v3939_v38 = vsub.f32 %v10133_v54, %v10326_v40  ;;  %v3940_v51 = vsub.f32 %v10141_v59, %v10326_v40  ;;  %v3941_v4 = vsub.f32 %v10155_v35, %v10326_v40  ;;  %v10373_v59 = vld [vmem:[%s10984_s6] ss:$0 sm:$0xff] }
 0x499   :  { %v3935_v31 = vadd.f32 1e-05, %v3934_v18  ;;  %v3942_v58 = vsub.f32 %v10164_v0, %v10326_v40  ;;  %v3943_v44 = vsub.f32 %v10173_v28, %v10326_v40  ;;  %v3944_v52 = vsub.f32 %v10180_v23, %v10326_v40 }
 0x49a   :  { %v3945_v54 = vsub.f32 %v10188_v29, %v10326_v40  ;;  %v3946_v35 = vsub.f32 %v10199_v13, %v10326_v40  ;;  %v3947_v0 = vsub.f32 %v10207_v42, %v10326_v40  ;;  %v3950_v28 = vsub.f32 %v10226_v36, %v10326_v40 }
 0x49b   :  { %7349 = vrsqrt.f32 %v3935_v31  ;;  %v3951_v23 = vsub.f32 %v10236_v30, %v10326_v40 }
 0x4a8   :  { %v7350_v3 = vpop.eup %7349 }
 0x4a9   :  { %v3937_v11 = vmul.f32 %v7350_v3, %v3619_v57 }
 0x4ab   :  { %v10362_v21 = vrot.slane %v3937_v11, %v11394_v14 }
 0x4ad   :  { %v3969_v25 = vmul.f32 %v10362_v21, %v3938_v56  ;;  %v3970_v29 = vmul.f32 %v10362_v21, %v3939_v38  ;;  %v3971_v12 = vmul.f32 %v10362_v21, %v3940_v51  ;;  %v3972_v39 = vmul.f32 %v10362_v21, %v3941_v4 }
 0x4ae   :  { %v3973_v22 = vmul.f32 %v10362_v21, %v3942_v58  ;;  %v3974_v43 = vmul.f32 %v10362_v21, %v3943_v44  ;;  %v3975_v2 = vmul.f32 %v10362_v21, %v3944_v52  ;;  %v3976_v9 = vmul.f32 %v10362_v21, %v3945_v54 }
 0x4af   :  { %v4000_v13 = vadd.f32 %v10373_v59, %v3969_v25  ;;  %v4001_v42 = vadd.f32 %v10373_v59, %v3970_v29  ;;  %v4002_v19 = vadd.f32 %v10373_v59, %v3971_v12  ;;  %v4003_v36 = vadd.f32 %v10373_v59, %v3972_v39 }
 0x4b0   :  { %v4004_v30 = vadd.f32 %v10373_v59, %v3973_v22  ;;  %v3977_v20 = vmul.f32 %v10362_v21, %v3946_v35  ;;  %v3978_v34 = vmul.f32 %v10362_v21, %v3947_v0  ;;  %v4005_v62 = vadd.f32 %v10373_v59, %v3974_v43 }
 0x4b1   :  { %v4025_v48 = vmax.f32 %v4000_v13, 0.0  ;;  %v4026_v32 = vmax.f32 %v4001_v42, 0.0  ;;  %v4027_v16 = vmax.f32 %v4002_v19, 0.0  ;;  %v4028_v37 = vmax.f32 %v4003_v36, 0.0 }
 0x4b2   :  { %v4029_v60 = vmax.f32 %v4004_v30, 0.0  ;;  %v4006_v8 = vadd.f32 %v10373_v59, %v3975_v2  ;;  %v4007_v10 = vadd.f32 %v10373_v59, %v3976_v9  ;;  %v3981_v47 = vmul.f32 %v10362_v21, %v3950_v28 }
 0x4b3   :  { %4050 = vst.msk [vmem:[#allocation3] sm:$0xff] %vm82_vm3, %v4025_v48  ;;  %4051 = vst.msk [vmem:[#allocation3 + $0x8] sm:$0xff] %vm82_vm3, %v4026_v32  ;;  %v4008_v53 = vadd.f32 %v10373_v59, %v3977_v20  ;;  %v4009_v18 = vadd.f32 %v10373_v59, %v3978_v34  ;;  %v3982_v31 = vmul.f32 %v10362_v21, %v3951_v23  ;;  %v4030_v3 = vmax.f32 %v4005_v62, 0.0 }
 0x4b4   :  { %4052 = vst.msk [vmem:[#allocation3 + $0x10] sm:$0xff] %vm82_vm3, %v4027_v16  ;;  %4053 = vst.msk [vmem:[#allocation3 + $0x18] sm:$0xff] %vm82_vm3, %v4028_v37  ;;  %v3983_v57 = vmul.f32 %v10362_v21, %v3952_v41  ;;  %v4031_v11 = vmax.f32 %v4006_v8, 0.0  ;;  %v4032_v56 = vmax.f32 %v4007_v10, 0.0  ;;  %v4012_v38 = vadd.f32 %v10373_v59, %v3981_v47 }
 0x4b5   :  { %4054 = vst.msk [vmem:[#allocation3 + $0x20] sm:$0xff] %vm82_vm3, %v4029_v60  ;;  %v4033_v51 = vmax.f32 %v4008_v53, 0.0  ;;  %v4034_v4 = vmax.f32 %v4009_v18, 0.0  ;;  %v4013_v58 = vadd.f32 %v10373_v59, %v3982_v31  ;;  %4055 = vst.msk [vmem:[#allocation3 + $0x28] sm:$0xff] %vm82_vm3, %v4030_v3  ;;  %v3984_v41 = vmul.f32 %v10362_v21, %v3953_v27 }
 0x4b6   :  { %v4014_v44 = vadd.f32 %v10373_v59, %v3983_v57  ;;  %4056 = vst.msk [vmem:[#allocation3 + $0x30] sm:$0xff] %vm82_vm3, %v4031_v11  ;;  %4057 = vst.msk [vmem:[#allocation3 + $0x38] sm:$0xff] %vm82_vm3, %v4032_v56  ;;  %v4037_v52 = vmax.f32 %v4012_v38, 0.0  ;;  %v3985_v54 = vmul.f32 %v10362_v21, %v3954_v55  ;;  %v3986_v35 = vmul.f32 %v10362_v21, %v3955_v46 }
 0x4b7   :  { %4058 = vst.msk [vmem:[#allocation3 + $0x40] sm:$0xff] %vm82_vm3, %v4033_v51  ;;  %4059 = vst.msk [vmem:[#allocation3 + $0x48] sm:$0xff] %vm82_vm3, %v4034_v4  ;;  %v4038_v0 = vmax.f32 %v4013_v58, 0.0  ;;  %v3987_v7 = vmul.f32 %v10362_v21, %v3956_v15  ;;  %v3988_v17 = vmul.f32 %v10362_v21, %v3957_v26  ;;  %v3989_v46 = vmul.f32 %v10362_v21, %v3958_v61 }
 0x4b8   :  { %v4039_v28 = vmax.f32 %v4014_v44, 0.0  ;;  %4062 = vst.msk [vmem:[#allocation3 + $0x60] sm:$0xff] %vm82_vm3, %v4037_v52  ;;  %v3990_v5 = vmul.f32 %v10362_v21, %v3959_v63  ;;  %v3991_v49 = vmul.f32 %v10362_v21, %v3960_v33  ;;  %v4015_v50 = vadd.f32 %v10373_v59, %v3984_v41 }
 0x4b9   :  { %4063 = vst.msk [vmem:[#allocation3 + $0x68] sm:$0xff] %vm82_vm3, %v4038_v0  ;;  %v4016_v61 = vadd.f32 %v10373_v59, %v3985_v54  ;;  %v10457_v1 = vadd.f32 %v10373_v59, %v3986_v35  ;;  %v10460_v21 = vadd.f32 %v10373_v59, %v3987_v7  ;;  %v10463_v12 = vadd.f32 %v10373_v59, %v3988_v17 }
 0x4ba   :  { %v4075_v27 = vld [vmem:[#allocation3] sm:$0x3]  ;;  %v4076_v45 = vld [vmem:[#allocation3 + $0xa] sm:$0x3]  ;;  %v4084_v55 = vld [vmem:[#allocation3 + $0x2] sm:$0x3]  ;;  %v10466_v19 = vadd.f32 %v10373_v59, %v3989_v46  ;;  %v10469_v36 = vadd.f32 %v10373_v59, %v3990_v5  ;;  %v10472_v2 = vadd.f32 %v10373_v59, %v3991_v49 }
 0x4bb   :  { %v4077_v15 = vmax.f32 %v4075_v27, %v4076_v45  ;;  %v4085_v26 = vld [vmem:[#allocation3 + $0xc] sm:$0x3]  ;;  %v4092_v23 = vld [vmem:[#allocation3 + $0x4] sm:$0x3]  ;;  %v4093_v25 = vld [vmem:[#allocation3 + $0xe] sm:$0x3] }
 0x4bc   :  { %4064 = vst.msk [vmem:[#allocation3 + $0x70] sm:$0xff] %vm82_vm3, %v4039_v28  ;;  %v4086_v63 = vmax.f32 %v4084_v55, %v4085_v26  ;;  %v4094_v29 = vmax.f32 %v4092_v23, %v4093_v25  ;;  %v4100_v6 = vld [vmem:[#allocation3 + $0x6] sm:$0x3]  ;;  %v4101_v40 = vld [vmem:[#allocation3 + $0x10] sm:$0x3]  ;;  %v4040_v62 = vmax.f32 %v4015_v50, 0.0 }
 0x4bd   :  { %v4108_v33 = vld [vmem:[#allocation3 + $0x14] sm:$0x3]  ;;  %v4079_v39 = vrot.slane %v4077_v15, 1  ;;  %v4102_v22 = vmax.f32 %v4100_v6, %v4101_v40  ;;  %v4109_v13 = vld [vmem:[#allocation3 + $0x1e] sm:$0x3]  ;;  %v4041_v38 = vmax.f32 %v4016_v61, 0.0 }
 0x4be   :  { %v4116_v42 = vld [vmem:[#allocation3 + $0x16] sm:$0x3]  ;;  %v4088_v30 = vrot.slane %v4086_v63, 1  ;;  %v4096_v48 = vrot.slane %v4094_v29, 1  ;;  %v4110_v32 = vmax.f32 %v4108_v33, %v4109_v13  ;;  %v4117_v16 = vld [vmem:[#allocation3 + $0x20] sm:$0x3] }
 0x4bf   :  { %v4124_v43 = vld [vmem:[#allocation3 + $0x18] sm:$0x3]  ;;  %v4081_v9 = vmax.f32 %v4077_v15, %v4079_v39  ;;  %v4104_v37 = vrot.slane %v4102_v22, 1  ;;  %v4118_v60 = vmax.f32 %v4116_v42, %v4117_v16  ;;  %v4125_v20 = vld [vmem:[#allocation3 + $0x22] sm:$0x3]  ;;  %4065 = vst.msk [vmem:[#allocation3 + $0x78] sm:$0xff] %vm82_vm3, %v4040_v62 }
 0x4c0   :  { %v4132_v34 = vld [vmem:[#allocation3 + $0x1a] sm:$0x3]  ;;  %v4090_v8 = vmax.f32 %v4086_v63, %v4088_v30  ;;  %v4098_v10 = vmax.f32 %v4094_v29, %v4096_v48  ;;  %v4112_v47 = vrot.slane %v4110_v32, 1  ;;  %v4126_v53 = vmax.f32 %v4124_v43, %v4125_v20  ;;  %v4133_v18 = vld [vmem:[#allocation3 + $0x24] sm:$0x3]  ;;  %4066 = vst.msk [vmem:[#allocation3 + $0x80] sm:$0xff] %vm82_vm3, %v4041_v38 }
 0x4c1   :  { %v4140_v31 = vld [vmem:[#allocation3 + $0x28] sm:$0x3]  ;;  %4083 = vst.msk [vmem:[#allocation4 + $0x7] sm:$0x1] %vm4082_vm4, %v4081_v9  ;;  %v4106_v57 = vmax.f32 %v4102_v22, %v4104_v37  ;;  %v4120_v3 = vrot.slane %v4118_v60, 1  ;;  %v4134_v11 = vmax.f32 %v4132_v34, %v4133_v18  ;;  %v4042_v41 = vmax.f32 %v10457_v1, 0.0 }
 0x4c2   :  { %v4141_v56 = vld [vmem:[#allocation3 + $0x32] sm:$0x3]  ;;  %v4148_v59 = vld [vmem:[#allocation3 + $0x2a] sm:$0x3]  ;;  %4091 = vst.msk [vmem:[#allocation4 + $0x8] sm:$0x1] %vm4082_vm4, %v4090_v8  ;;  %v4114_v51 = vmax.f32 %v4110_v32, %v4112_v47 }
 0x4c3   :  { %4099 = vst.msk [vmem:[#allocation4 + $0x9] sm:$0x1] %vm4082_vm4, %v4098_v10  ;;  %v4128_v4 = vrot.slane %v4126_v53, 1  ;;  %v4142_v58 = vmax.f32 %v4140_v31, %v4141_v56  ;;  %v4149_v44 = vld [vmem:[#allocation3 + $0x34] sm:$0x3]  ;;  %v4122_v54 = vmax.f32 %v4118_v60, %v4120_v3  ;;  %v4136_v35 = vrot.slane %v4134_v11, 1 }
 0x4c4   :  { %v4156_v52 = vld [vmem:[#allocation3 + $0x2c] sm:$0x3]  ;;  %4107 = vst.msk [vmem:[#allocation4 + $0xa] sm:$0x1] %vm4082_vm4, %v4106_v57  ;;  %v4150_v0 = vmax.f32 %v4148_v59, %v4149_v44  ;;  %v4157_v28 = vld [vmem:[#allocation3 + $0x36] sm:$0x3] }
 0x4c5   :  { %v4164_v7 = vld [vmem:[#allocation3 + $0x2e] sm:$0x3]  ;;  %v4043_v17 = vmax.f32 %v10460_v21, 0.0  ;;  %4115 = vst.msk [vmem:[#allocation4 + $0xd] sm:$0x1] %vm4082_vm4, %v4114_v51  ;;  %v4130_v27 = vmax.f32 %v4126_v53, %v4128_v4  ;;  %v4144_v45 = vrot.slane %v4142_v58, 1  ;;  %v4158_v55 = vmax.f32 %v4156_v52, %v4157_v28 }
 0x4c6   :  { %v4165_v46 = vld [vmem:[#allocation3 + $0x38] sm:$0x3]  ;;  %v4172_v5 = vld [vmem:[#allocation3 + $0x3c] sm:$0x3]  ;;  %v4044_v49 = vmax.f32 %v10463_v12, 0.0  ;;  %4067 = vst.msk [vmem:[#allocation3 + $0x88] sm:$0xff] %vm82_vm3, %v4042_v41  ;;  %v4138_v15 = vmax.f32 %v4134_v11, %v4136_v35 }
 0x4c7   :  { %4123 = vst.msk [vmem:[#allocation4 + $0xe] sm:$0x1] %vm4082_vm4, %v4122_v54  ;;  %v4152_v26 = vrot.slane %v4150_v0, 1  ;;  %v4166_v23 = vmax.f32 %v4164_v7, %v4165_v46  ;;  %v4173_v25 = vld [vmem:[#allocation3 + $0x46] sm:$0x3]  ;;  %v4045_v61 = vmax.f32 %v10466_v19, 0.0  ;;  %v4146_v1 = vmax.f32 %v4142_v58, %v4144_v45 }
 0x4c8   :  { %v4180_v50 = vld [vmem:[#allocation3 + $0x3e] sm:$0x3]  ;;  %4068 = vst.msk [vmem:[#allocation3 + $0x90] sm:$0xff] %vm82_vm3, %v4043_v17  ;;  %v4160_v63 = vrot.slane %v4158_v55, 1  ;;  %v4174_v29 = vmax.f32 %v4172_v5, %v4173_v25  ;;  %v4181_v6 = vld [vmem:[#allocation3 + $0x48] sm:$0x3] }
 0x4c9   :  { %4131 = vst.msk [vmem:[#allocation4 + $0xf] sm:$0x1] %vm4082_vm4, %v4130_v27  ;;  %v4188_v40 = vld [vmem:[#allocation3 + $0x40] sm:$0x3]  ;;  %v4046_v33 = vmax.f32 %v10469_v36, 0.0  ;;  %v4154_v21 = vmax.f32 %v4150_v0, %v4152_v26  ;;  %v4168_v12 = vrot.slane %v4166_v23, 1  ;;  %v4182_v39 = vmax.f32 %v4180_v50, %v4181_v6 }
 0x4ca   :  { %4069 = vst.msk [vmem:[#allocation3 + $0x98] sm:$0xff] %vm82_vm3, %v4044_v49  ;;  %v4189_v22 = vld [vmem:[#allocation3 + $0x4a] sm:$0x3]  ;;  %v4196_v13 = vld [vmem:[#allocation3 + $0x42] sm:$0x3]  ;;  %v4047_v42 = vmax.f32 %v10472_v2, 0.0  ;;  %v4162_v19 = vmax.f32 %v4158_v55, %v4160_v63 }
 0x4cb   :  { %4139 = vst.msk [vmem:[#allocation4 + $0x10] sm:$0x1] %vm4082_vm4, %v4138_v15  ;;  %4147 = vst.msk [vmem:[#allocation4 + $0x13] sm:$0x1] %vm4082_vm4, %v4146_v1  ;;  %v4176_v30 = vrot.slane %v4174_v29, 1  ;;  %v4190_v48 = vmax.f32 %v4188_v40, %v4189_v22  ;;  %v4170_v16 = vmax.f32 %v4166_v23, %v4168_v12  ;;  %v4184_v43 = vrot.slane %v4182_v39, 1 }
 0x4cc   :  { %4070 = vst.msk [vmem:[#allocation3 + $0xa0] sm:$0xff] %vm82_vm3, %v4045_v61  ;;  %v4197_v32 = vld [vmem:[#allocation3 + $0x4c] sm:$0x3]  ;;  %v4204_v36 = vld [vmem:[#allocation3 + $0x64] sm:$0x3]  ;;  %4071 = vst.msk [vmem:[#allocation3 + $0xa8] sm:$0xff] %vm82_vm3, %v4046_v33 }
 0x4cd   :  { %4155 = vst.msk [vmem:[#allocation4 + $0x14] sm:$0x1] %vm4082_vm4, %v4154_v21  ;;  %v4198_v9 = vmax.f32 %v4196_v13, %v4197_v32  ;;  %v4205_v37 = vld [vmem:[#allocation3 + $0x6e] sm:$0x3]  ;;  %v4212_v60 = vld [vmem:[#allocation3 + $0x66] sm:$0x3]  ;;  %v4178_v2 = vmax.f32 %v4174_v29, %v4176_v30  ;;  %v4186_v47 = vmax.f32 %v4182_v39, %v4184_v43 }
 0x4ce   :  { %4072 = vst.msk [vmem:[#allocation3 + $0xb0] sm:$0xff] %vm82_vm3, %v4047_v42  ;;  %v4192_v20 = vrot.slane %v4190_v48, 1  ;;  %v4206_v34 = vmax.f32 %v4204_v36, %v4205_v37  ;;  %v4213_v62 = vld [vmem:[#allocation3 + $0x70] sm:$0x3]  ;;  %v4220_v8 = vld [vmem:[#allocation3 + $0x68] sm:$0x3] }
 0x4cf   :  { %4163 = vst.msk [vmem:[#allocation4 + $0x15] sm:$0x1] %vm4082_vm4, %v4162_v19  ;;  %v4332_v10 = vld [vmem:[#allocation4] sm:$0xff]  ;;  %4171 = vst.msk [vmem:[#allocation4 + $0x16] sm:$0x1] %vm4082_vm4, %v4170_v16  ;;  %v4200_v53 = vrot.slane %v4198_v9, 1  ;;  %v4214_v18 = vmax.f32 %v4212_v60, %v4213_v62 }
 0x4d0   :  { %v4221_v31 = vld [vmem:[#allocation3 + $0x72] sm:$0x3]  ;;  %v4228_v57 = vld [vmem:[#allocation3 + $0x6a] sm:$0x3]  ;;  %4179 = vst.msk [vmem:[#allocation4 + $0x19] sm:$0x1] %vm4082_vm4, %v4178_v2  ;;  %v4194_v11 = vmax.f32 %v4190_v48, %v4192_v20 }
 0x4d1   :  { %v4354_v3 = vld [vmem:[#allocation4 + $0x1] sm:$0xff]  ;;  %v4208_v56 = vrot.slane %v4206_v34, 1  ;;  %v4222_v59 = vmax.f32 %v4220_v8, %v4221_v31  ;;  %v4229_v38 = vld [vmem:[#allocation3 + $0x74] sm:$0x3]  ;;  %v7319_v51 = vld [vmem:[%s10982_s7 + $0x58] sm:$0xff]   ;;  %v4202_v44 = vmax.f32 %v4198_v9, %v4200_v53  ;;  %v4216_v52 = vrot.slane %v4214_v18, 1 }
 0x4d2   :  { %v4236_v4 = vld [vmem:[#allocation3 + $0x78] sm:$0x3]  ;;  %v10504_v58 = vld [vmem:[#allocation4 + $0x8] sm:$0xff]  ;;  %4187 = vst.msk [vmem:[#allocation4 + $0x1a] sm:$0x1] %vm4082_vm4, %v4186_v47  ;;  %v4230_v41 = vmax.f32 %v4228_v57, %v4229_v38  ;;  %v7323_v57 = vld [vmem:[%s10982_s7 + $0x48] sm:$0xff]  }
 0x4d3   :  { %v4237_v54 = vld [vmem:[#allocation3 + $0x82] sm:$0x3]  ;;  %v4244_v35 = vld [vmem:[#allocation3 + $0x7a] sm:$0x3]  ;;  %v4355_v0 = vld [vmem:[#allocation4 + $0x9] sm:$0xff]  ;;  %v4341_v28 = vpack.c.bf16 %v10504_v58, %v4332_v10  ;;  %v4210_v7 = vmax.f32 %v4206_v34, %v4208_v56  ;;  %v4224_v17 = vrot.slane %v4222_v59, 1  ;;  %v4218_v5 = vmax.f32 %v4214_v18, %v4216_v52 }
 0x4d4   :  { %4195 = vst.msk [vmem:[#allocation4 + $0x1b] sm:$0x1] %vm4082_vm4, %v4194_v11  ;;  %v4238_v27 = vmax.f32 %v4236_v4, %v4237_v54  ;;  %v4245_v45 = vld [vmem:[#allocation3 + $0x84] sm:$0x3]  ;;  %v4252_v55 = vld [vmem:[#allocation3 + $0x7c] sm:$0x3]  ;;  %v4363_v46 = vpack.c.bf16 %v4355_v0, %v4354_v3 }
 0x4d5   :  { %4203 = vst.msk [vmem:[#allocation4 + $0x1c] sm:$0x1] %vm4082_vm4, %v4202_v44  ;;  %v4232_v49 = vrot.slane %v4230_v41, 1  ;;  %v4246_v15 = vmax.f32 %v4244_v35, %v4245_v45  ;;  %v4253_v26 = vld [vmem:[#allocation3 + $0x86] sm:$0x3]  ;;  %v7320_v25 = vld [vmem:[%s10982_s7 + $0x78] sm:$0xff]   ;;  %7015 = vmatmul.mubr.msk.bf16.vlgmr.msra.gmra.mxu0 %vm82_vm3, %v4341_v28  ;;  %v4226_v50 = vmax.f32 %v4222_v59, %v4224_v17 }
 0x4d6   :  { %v4260_v23 = vld [vmem:[#allocation3 + $0x7e] sm:$0x3]  ;;  %4211 = vst.msk [vmem:[#allocation4 + $0x2b] sm:$0x1] %vm4082_vm4, %v4210_v7  ;;  %v4240_v61 = vrot.slane %v4238_v27, 1  ;;  %v4254_v1 = vmax.f32 %v4252_v55, %v4253_v26  ;;  %6987 = vmatmul.mubr.msk.bf16.vlgmr.msra.gmra.mxu1 %vm82_vm3, %v4363_v46  ;;  %7018 = vmatprep.mubr.msk.bf16.mxu0 %vm7358_vm2, %v11221_v24  ;;  %v7321_v30 = vld [vmem:[%s10982_s7 + $0x50] sm:$0xff]  }
 0x4d7   :  { %v4261_v63 = vld [vmem:[#allocation3 + $0x88] sm:$0x3]  ;;  %v4268_v29 = vld [vmem:[#allocation3 + $0x8c] sm:$0x3]  ;;  %4219 = vst.msk [vmem:[#allocation4 + $0x2c] sm:$0x1] %vm4082_vm4, %v4218_v5  ;;  %v4234_v6 = vmax.f32 %v4230_v41, %v4232_v49  ;;  %6990 = vmatprep.mubr.msk.bf16.mxu1 %vm7358_vm2, %v11221_v24  ;;  %7035 = vmatpush3.bf16.msra.mxu1 %v7319_v51 }
 0x4d8   :  { %v4248_v40 = vrot.slane %v4246_v15, 1  ;;  %v4262_v33 = vmax.f32 %v4260_v23, %v4261_v63  ;;  %v4269_v21 = vld [vmem:[#allocation3 + $0x96] sm:$0x3]  ;;  %v4276_v12 = vld [vmem:[#allocation3 + $0x8e] sm:$0x3]  ;;  %v10521_v39 = vld [vmem:[#allocation4 + $0x10] sm:$0xff]  ;;  %v4242_v22 = vmax.f32 %v4238_v27, %v4240_v61  ;;  %7063 = vmatpush3.bf16.msra.mxu0 %v7320_v25  ;;  %7036 = vmatprep.subr.bf16.mxu1 %v11221_v24 }
 0x4d9   :  { %4227 = vst.msk [vmem:[#allocation4 + $0x2d] sm:$0x1] %vm4082_vm4, %v4226_v50  ;;  %v4256_v13 = vrot.slane %v4254_v1, 1  ;;  %v4270_v42 = vmax.f32 %v4268_v29, %v4269_v21  ;;  %v4277_v19 = vld [vmem:[#allocation3 + $0x98] sm:$0x3]  ;;  %v7322_v9 = vld [vmem:[%s10982_s7 + $0x70] sm:$0xff]   ;;  %v5033_v37 = vpack.c.bf16 %v10521_v39, %v10504_v58  ;;  %7064 = vmatprep.subr.bf16.mxu0 %v11221_v24 }
 0x4da   :  { %4235 = vst.msk [vmem:[#allocation4 + $0x2e] sm:$0x1] %vm4082_vm4, %v4234_v6  ;;  %v4250_v48 = vmax.f32 %v4246_v15, %v4248_v40  ;;  %v4264_v32 = vrot.slane %v4262_v33, 1  ;;  %v4278_v36 = vmax.f32 %v4276_v12, %v4277_v19  ;;  %v4284_v16 = vld [vmem:[#allocation3 + $0x90] sm:$0x3]  ;;  %v4356_v60 = vld [vmem:[#allocation4 + $0x11] sm:$0xff] }
 0x4db   :  { %v4285_v43 = vld [vmem:[#allocation3 + $0x9a] sm:$0x3]  ;;  %4243 = vst.msk [vmem:[#allocation4 + $0x31] sm:$0x1] %vm4082_vm4, %v4242_v22  ;;  %v4258_v2 = vmax.f32 %v4254_v1, %v4256_v13  ;;  %v4272_v20 = vrot.slane %v4270_v42, 1  ;;  %7037 = vmatpush3.bf16.msra.mxu1 %v7321_v30  ;;  %v7324_v0 = vld [vmem:[%s10982_s7 + $0x68] sm:$0xff]  }
 0x4dc   :  { %v4286_v34 = vmax.f32 %v4284_v16, %v4285_v43  ;;  %v4292_v62 = vld [vmem:[#allocation3 + $0x92] sm:$0x3]  ;;  %v4293_v8 = vld [vmem:[#allocation3 + $0x9c] sm:$0x3]  ;;  %4251 = vst.msk [vmem:[#allocation4 + $0x32] sm:$0x1] %vm4082_vm4, %v4250_v48  ;;  %v4266_v10 = vmax.f32 %v4262_v33, %v4264_v32  ;;  %7065 = vmatpush3.bf16.msra.mxu0 %v7322_v9  ;;  %7038 = vmatprep.subr.bf16.mxu1 %v11221_v24 }
 0x4dd   :  { %v4280_v47 = vrot.slane %v4278_v36, 1  ;;  %v4294_v53 = vmax.f32 %v4292_v62, %v4293_v8  ;;  %v4300_v18 = vld [vmem:[#allocation3 + $0xa0] sm:$0x3]  ;;  %v4301_v31 = vld [vmem:[#allocation3 + $0xaa] sm:$0x3]  ;;  %v4274_v56 = vmax.f32 %v4270_v42, %v4272_v20  ;;  %7066 = vmatprep.subr.bf16.mxu0 %v11221_v24  ;;  %v10564_v50 = vld [vmem:[#allocation4 + $0xe] sm:$0xff] }
 0x4de   :  { %v4357_v3 = vld [vmem:[#allocation4 + $0x19] sm:$0xff]  ;;  %4259 = vst.msk [vmem:[#allocation4 + $0x33] sm:$0x1] %vm4082_vm4, %v4258_v2  ;;  %v4288_v59 = vrot.slane %v4286_v34, 1  ;;  %v4302_v38 = vmax.f32 %v4300_v18, %v4301_v31  ;;  %4267 = vst.msk [vmem:[#allocation4 + $0x34] sm:$0x1] %vm4082_vm4, %v4266_v10 }
 0x4df   :  { %v10540_v11 = vld [vmem:[#allocation4 + $0x18] sm:$0xff]  ;;  %v4364_v4 = vpack.c.bf16 %v4357_v3, %v4356_v60  ;;  %v4282_v52 = vmax.f32 %v4278_v36, %v4280_v47  ;;  %v4296_v41 = vrot.slane %v4294_v53, 1  ;;  %v4309_v54 = vld [vmem:[#allocation3 + $0xac] sm:$0x3]  ;;  %4275 = vst.msk [vmem:[#allocation4 + $0x37] sm:$0x1] %vm4082_vm4, %v4274_v56  ;;  %7039 = vmatpush3.bf16.msra.mxu1 %v7323_v57 }
 0x4e0   :  { %v4308_v51 = vld [vmem:[#allocation3 + $0xa2] sm:$0x3]  ;;  %v4342_v44 = vpack.c.bf16 %v10540_v11, %v10521_v39  ;;  %v4316_v35 = vld [vmem:[#allocation3 + $0xa4] sm:$0x3]  ;;  %v10550_v28 = vld [vmem:[#allocation4 + $0x20] sm:$0xff]  ;;  %v4290_v7 = vmax.f32 %v4286_v34, %v4288_v59  ;;  %v4304_v17 = vrot.slane %v4302_v38, 1  ;;  %7067 = vmatpush3.bf16.msra.mxu0 %v7324_v0  ;;  %7040 = vmatprep.subr.bf16.mxu1 %v11221_v24 }
 0x4e1   :  { %v4310_v27 = vmax.f32 %v4308_v51, %v4309_v54  ;;  %v4317_v45 = vld [vmem:[#allocation3 + $0xae] sm:$0x3]  ;;  %v4324_v55 = vld [vmem:[#allocation3 + $0xa6] sm:$0x3]  ;;  %6991 = vmatmul.mubr.msk.bf16.gmra.mxu1 %vm82_vm3, %v4364_v4  ;;  %4283 = vst.msk [vmem:[#allocation4 + $0x38] sm:$0x1] %vm4082_vm4, %v4282_v52  ;;  %v4298_v46 = vmax.f32 %v4294_v53, %v4296_v41  ;;  %v5034_v40 = vpack.c.bf16 %v10550_v28, %v10540_v11 }
 0x4e2   :  { %7019 = vmatmul.mubr.msk.bf16.gmra.mxu0 %vm82_vm3, %v4342_v44  ;;  %v4318_v5 = vmax.f32 %v4316_v35, %v4317_v45  ;;  %v4325_v49 = vld [vmem:[#allocation3 + $0xb0] sm:$0x3]  ;;  %v10557_v15 = vld [vmem:[#allocation4 + $0x1e] sm:$0xff]  ;;  %6994 = vmatprep.mubr.msk.bf16.mxu1 %vm7358_vm2, %v11221_v24  ;;  %4291 = vst.msk [vmem:[#allocation4 + $0x39] sm:$0x1] %vm4082_vm4, %v4290_v7  ;;  %v4306_v26 = vmax.f32 %v4302_v38, %v4304_v17  ;;  %v10566_v61 = vld [vmem:[#allocation4 + $0x16] sm:$0xff] }
 0x4e3   :  { %7022 = vmatprep.mubr.msk.bf16.mxu0 %vm7358_vm2, %v11221_v24  ;;  %v4312_v23 = vrot.slane %v4310_v27, 1  ;;  %v4326_v25 = vmax.f32 %v4324_v55, %v4325_v49  ;;  %v10568_v1 = vld [vmem:[#allocation4 + $0x26] sm:$0xff]  ;;  %4299 = vst.msk [vmem:[#allocation4 + $0x3a] sm:$0x1] %vm4082_vm4, %v4298_v46  ;;  %v7325_v29 = vld [vmem:[%s10982_s7 + $0x40] sm:$0xff]   ;;  %7068 = vmatprep.subr.bf16.mxu0 %v11221_v24  ;;  %v5459_v19 = vpack.c.bf16 %v10566_v61, %v10564_v50  ;;  %v7327_v51 = vld [vmem:[%s10982_s7 + $0x98] sm:$0xff]  }
 0x4e4   :  { %v4320_v63 = vrot.slane %v4318_v5, 1  ;;  %v7326_v6 = vld [vmem:[%s10982_s7 + $0x60] sm:$0xff]   ;;  %v4358_v33 = vld [vmem:[#allocation4 + $0x21] sm:$0xff]  ;;  %v4359_v21 = vld [vmem:[#allocation4 + $0x29] sm:$0xff]  ;;  %4307 = vst.msk [vmem:[#allocation4 + $0x3d] sm:$0x1] %vm4082_vm4, %v4306_v26  ;;  %v5460_v30 = vpack.c.bf16 %v10568_v1, %v10557_v15  ;;  %7041 = vmatpush3.bf16.msra.mxu1 %v7325_v29  ;;  %v4750_v0 = vpack.c.bf16 %v10557_v15, %v10566_v61 }
 0x4e5   :  { %v10579_v12 = vld [vmem:[#allocation4 + $0x28] sm:$0xff]  ;;  %v4314_v22 = vmax.f32 %v4310_v27, %v4312_v23  ;;  %v4328_v13 = vrot.slane %v4326_v25, 1  ;;  %v4365_v32 = vpack.c.bf16 %v4359_v21, %v4358_v33  ;;  %7069 = vmatpush3.bf16.msra.mxu0 %v7326_v6  ;;  %7090 = vmatprep.subr.bf16.mxu1 %v11221_v24  ;;  %v7328_v44 = vld [vmem:[%s10982_s7 + $0xb8] sm:$0xff]   ;;  %v4601_v35 = vld [vmem:[#allocation4 + $0x1a] sm:$0xff] }
 0x4e6   :  { %v4322_v42 = vmax.f32 %v4318_v5, %v4320_v63  ;;  %v4343_v36 = vpack.c.bf16 %v10579_v12, %v10550_v28  ;;  %v10592_v16 = vld [vmem:[#allocation4 + $0x30] sm:$0xff]  ;;  %7118 = vmatprep.subr.bf16.mxu0 %v11221_v24  ;;  %v4362_v18 = vld [vmem:[#allocation4 + $0x41] sm:$0xff]  ;;  %v7333_v45 = vld [vmem:[%s10982_s7 + $0x80] sm:$0xff]  }
 0x4e7   :  { %4315 = vst.msk [vmem:[#allocation4 + $0x3e] sm:$0x1] %vm4082_vm4, %v4314_v22  ;;  %v4330_v48 = vmax.f32 %v4326_v25, %v4328_v13  ;;  %v5035_v43 = vpack.c.bf16 %v10592_v16, %v10579_v12  ;;  %v10601_v9 = vld [vmem:[#allocation4 + $0x2e] sm:$0xff]  ;;  %v4367_v31 = vpack.c.bf16 %v4362_v18, %v4362_v18  ;;  %v4740_v3 = vld [vmem:[#allocation4 + $0x6] sm:$0xff]  ;;  %v7334_v55 = vld [vmem:[%s10982_s7 + $0xa0] sm:$0xff]  }
 0x4e8   :  { %4323 = vst.msk [vmem:[#allocation4 + $0x3f] sm:$0x1] %vm4082_vm4, %v4322_v42  ;;  %v4360_v20 = vld [vmem:[#allocation4 + $0x31] sm:$0xff]  ;;  %v4598_v56 = vld [vmem:[#allocation4 + $0x2] sm:$0xff]  ;;  %v4749_v38 = vpack.c.bf16 %v10564_v50, %v4740_v3  ;;  %v4751_v49 = vpack.c.bf16 %v10601_v9, %v10568_v1 }
 0x4e9   :  { %4331 = vst.msk [vmem:[#allocation4 + $0x40] sm:$0x1] %vm4082_vm4, %v4330_v48  ;;  %6995 = vmatmul.mubr.msk.bf16.gmra.mxu1 %vm82_vm3, %v4365_v32  ;;  %v4599_v59 = vld [vmem:[#allocation4 + $0xa] sm:$0xff]  ;;  %v4600_v54 = vld [vmem:[#allocation4 + $0x12] sm:$0xff]  ;;  %v7331_v7 = vld [vmem:[%s10982_s7 + $0x88] sm:$0xff]  }
 0x4ea   :  { %7023 = vmatmul.mubr.msk.bf16.gmra.mxu0 %vm82_vm3, %v4343_v36  ;;  %6998 = vmatprep.mubr.msk.bf16.mxu1 %vm7358_vm2, %v11221_v24  ;;  %v4607_v4 = vpack.c.bf16 %v4599_v59, %v4598_v56  ;;  %v7329_v52 = vld [vmem:[%s10982_s7 + $0x90] sm:$0xff]   ;;  %v4608_v17 = vpack.c.bf16 %v4601_v35, %v4600_v54  ;;  %v7332_v27 = vld [vmem:[%s10982_s7 + $0xa8] sm:$0xff]   ;;  %v4604_v25 = vld [vmem:[#allocation4 + $0x32] sm:$0xff] }
 0x4eb   :  { %7026 = vmatprep.mubr.msk.bf16.mxu0 %vm7358_vm2, %v11221_v24  ;;  %v10607_v60 = vld [vmem:[#allocation4 + $0x36] sm:$0xff]  ;;  %v7330_v41 = vld [vmem:[%s10982_s7 + $0xb0] sm:$0xff]   ;;  %v7340_v18 = vld [vmem:[%s10982_s7 + $0xe8] sm:$0xff]  }
 0x4ec   :  { %v5461_v2 = vpack.c.bf16 %v10607_v60, %v10601_v9  ;;  %v4602_v46 = vld [vmem:[#allocation4 + $0x22] sm:$0xff]  ;;  %v4603_v5 = vld [vmem:[#allocation4 + $0x2a] sm:$0xff]  ;;  %v4884_v39 = vld [vmem:[#allocation4 + $0x17] sm:$0xff] }
 0x4ed   :  { %v4609_v26 = vpack.c.bf16 %v4603_v5, %v4602_v46  ;;  %v4606_v33 = vld [vmem:[#allocation4 + $0x42] sm:$0xff]  ;;  %v4883_v48 = vld [vmem:[#allocation4 + $0xf] sm:$0xff]  ;;  %v7342_v11 = vld [vmem:[%s10982_s7 + $0xe0] sm:$0xff]  }
 0x4ee   :  { %v10698_v21 = vld [vmem:[#allocation4 + $0x46] sm:$0xff]  ;;  %v4611_v13 = vpack.c.bf16 %v4606_v33, %v4606_v33  ;;  %v7335_v32 = vld [vmem:[%s10982_s7 + $0xd8] sm:$0xff]   ;;  %v5310_v54 = vld [vmem:[#allocation4 + $0x1d] sm:$0xff] }
 0x4ef   :  { %v10611_v34 = vld [vmem:[#allocation4 + $0x38] sm:$0xff]  ;;  %v4753_v22 = vpack.c.bf16 %v10698_v21, %v10698_v21  ;;  %v4882_v42 = vld [vmem:[#allocation4 + $0x7] sm:$0xff] }
 0x4f0   :  { %v4361_v62 = vld [vmem:[#allocation4 + $0x39] sm:$0xff]  ;;  %v4344_v8 = vpack.c.bf16 %v10611_v34, %v10592_v16  ;;  %v4891_v36 = vpack.c.bf16 %v4883_v48, %v4882_v42  ;;  %v7338_v58 = vld [vmem:[%s10982_s7 + $0xf0] sm:$0xff]  }
 0x4f1   :  { %v10615_v10 = vld [vmem:[#allocation4 + $0x40] sm:$0xff]  ;;  %v4366_v47 = vpack.c.bf16 %v4361_v62, %v4360_v20  ;;  %v7336_v20 = vld [vmem:[%s10982_s7 + $0xf8] sm:$0xff]   ;;  %v7337_v62 = vld [vmem:[%s10982_s7 + $0xd0] sm:$0xff]  }
 0x4f2   :  { %v5036_v53 = vpack.c.bf16 %v10615_v10, %v10611_v34  ;;  %7027 = vmatmul.mubr.msk.bf16.gmra.mxu0 %vm82_vm3, %v4344_v8  ;;  %v4345_v57 = vpack.c.bf16 %v10615_v10, %v10615_v10  ;;  %v10688_v23 = vld [vmem:[#allocation4 + $0x3e] sm:$0xff]  ;;  %v4886_v28 = vld [vmem:[#allocation4 + $0x27] sm:$0xff]  ;;  %v5309_v10 = vld [vmem:[#allocation4 + $0x15] sm:$0xff] }
 0x4f3   :  { %6999 = vmatmul.mubr.msk.bf16.gmra.mxu1 %vm82_vm3, %v4366_v47  ;;  %7030 = vmatprep.mubr.msk.bf16.mxu0 %vm7358_vm2, %v11221_v24  ;;  %v4605_v63 = vld [vmem:[#allocation4 + $0x3a] sm:$0xff]  ;;  %v4752_v29 = vpack.c.bf16 %v10688_v23, %v10607_v60  ;;  %v5032_v12 = vld [vmem:[#allocation4 + $0x48] sm:$0xff]  ;;  %v5462_v50 = vpack.c.bf16 %v10698_v21, %v10688_v23 }
 0x4f4   :  { %7002 = vmatprep.mubr.msk.bf16.mxu1 %vm7358_vm2, %v11221_v24  ;;  %v4610_v6 = vpack.c.bf16 %v4605_v63, %v4604_v25  ;;  %v7339_v8 = vld [vmem:[%s10982_s7 + $0xc8] sm:$0xff]   ;;  %v4888_v3 = vld [vmem:[#allocation4 + $0x37] sm:$0xff]  ;;  %v5308_v34 = vld [vmem:[#allocation4 + $0xd] sm:$0xff] }
 0x4f5   :  { %v4889_v56 = vld [vmem:[#allocation4 + $0x3f] sm:$0xff]  ;;  %v4890_v16 = vld [vmem:[#allocation4 + $0x47] sm:$0xff]  ;;  %v5313_v5 = vld [vmem:[#allocation4 + $0x35] sm:$0xff] }
 0x4f6   :  { %v4894_v59 = vpack.c.bf16 %v4889_v56, %v4888_v3  ;;  %v5311_v35 = vld [vmem:[#allocation4 + $0x25] sm:$0xff]  ;;  %v5312_v46 = vld [vmem:[#allocation4 + $0x2d] sm:$0xff]  ;;  %v5172_v33 = vld [vmem:[#allocation4 + $0x3c] sm:$0xff] }
 0x4f7   :  { %v5319_v25 = vpack.c.bf16 %v5313_v5, %v5312_v46  ;;  %v5316_v48 = vld [vmem:[#allocation4 + $0x4d] sm:$0xff] }
 0x4f8   :  { %v5458_v15 = vld [vmem:[#allocation4 + $0x4e] sm:$0xff] }
 0x4f9   :  { %v5463_v61 = vpack.c.bf16 %v5458_v15, %v5458_v15 }
 0x4fa   :  { %7031 = vmatmul.mubr.msk.bf16.gmra.mxu0 %vm82_vm3, %v4345_v57 }
 0x4fb   :  { %7003 = vmatmul.mubr.msk.bf16.gmra.mxu1 %vm82_vm3, %v4367_v31  ;;  %7070 = vmatprep.mubr.msk.bf16.mxu0 %vm7358_vm2, %v11221_v24  ;;  %v7341_v31 = vld [vmem:[%s10982_s7 + $0xc0] sm:$0xff]  }
 0x4fc   :  { %7042 = vmatprep.mubr.msk.bf16.mxu1 %vm7358_vm2, %v11221_v24 }
 0x502   :  { %7071 = vmatmul.mubr.msk.bf16.vlgmr.msra.gmra.mxu0 %vm82_vm3, %v4749_v38  ;;  %v4895_v38 = vpack.c.bf16 %v4890_v16, %v4890_v16 }
 0x503   :  { %7043 = vmatmul.mubr.msk.bf16.vlgmr.msra.gmra.mxu1 %vm82_vm3, %v4607_v4  ;;  %7074 = vmatprep.mubr.msk.bf16.mxu0 %vm7358_vm2, %v11221_v24  ;;  %v5317_v4 = vpack.c.bf16 %v5309_v10, %v5308_v34 }
 0x504   :  { %7046 = vmatprep.mubr.msk.bf16.mxu1 %vm7358_vm2, %v11221_v24  ;;  %7091 = vmatpush3.bf16.msra.mxu1 %v7327_v51  ;;  %v5167_v51 = vld [vmem:[#allocation4 + $0x14] sm:$0xff] }
 0x505   :  { %7119 = vmatpush3.bf16.msra.mxu0 %v7328_v44  ;;  %7092 = vmatprep.subr.bf16.mxu1 %v11221_v24  ;;  %v7343_v44 = vld [vmem:[%s10982_s7 + $0x118] sm:$0xff]  }
 0x506   :  { %7120 = vmatprep.subr.bf16.mxu0 %v11221_v24 }
 0x508   :  { %7093 = vmatpush3.bf16.msra.mxu1 %v7329_v52 }
 0x509   :  { %7121 = vmatpush3.bf16.msra.mxu0 %v7330_v41  ;;  %7094 = vmatprep.subr.bf16.mxu1 %v11221_v24  ;;  %v7344_v41 = vld [vmem:[%s10982_s7 + $0x110] sm:$0xff]  }
 0x50a   :  { %7075 = vmatmul.mubr.msk.bf16.gmra.mxu0 %vm82_vm3, %v4750_v0  ;;  %7122 = vmatprep.subr.bf16.mxu0 %v11221_v24  ;;  %v5168_v0 = vld [vmem:[#allocation4 + $0x1c] sm:$0xff] }
 0x50b   :  { %7047 = vmatmul.mubr.msk.bf16.gmra.mxu1 %vm82_vm3, %v4608_v17  ;;  %7078 = vmatprep.mubr.msk.bf16.mxu0 %vm7358_vm2, %v11221_v24  ;;  %v5318_v17 = vpack.c.bf16 %v5311_v35, %v5310_v54 }
 0x50c   :  { %7050 = vmatprep.mubr.msk.bf16.mxu1 %vm7358_vm2, %v11221_v24  ;;  %7095 = vmatpush3.bf16.msra.mxu1 %v7331_v7  ;;  %v5169_v7 = vld [vmem:[#allocation4 + $0x24] sm:$0xff] }
 0x50d   :  { %7123 = vmatpush3.bf16.msra.mxu0 %v7332_v27  ;;  %7096 = vmatprep.subr.bf16.mxu1 %v11221_v24  ;;  %v7345_v27 = vld [vmem:[%s10982_s7 + $0x108] sm:$0xff]  }
 0x50e   :  { %7124 = vmatprep.subr.bf16.mxu0 %v11221_v24 }
 0x510   :  { %7097 = vmatpush3.bf16.msra.mxu1 %v7333_v45  ;;  %v5176_v45 = vpack.c.bf16 %v5169_v7, %v5168_v0 }
 0x511   :  { %7125 = vmatpush3.bf16.msra.mxu0 %v7334_v55  ;;  %7146 = vmatprep.subr.bf16.mxu1 %v11221_v24  ;;  %v7346_v55 = vld [vmem:[%s10982_s7 + $0x100] sm:$0xff]  }
 0x512   :  { %7079 = vmatmul.mubr.msk.bf16.gmra.mxu0 %vm82_vm3, %v4751_v49  ;;  %7174 = vmatprep.subr.bf16.mxu0 %v11221_v24  ;;  %v5170_v49 = vld [vmem:[#allocation4 + $0x2c] sm:$0xff] }
 0x513   :  { %7051 = vmatmul.mubr.msk.bf16.gmra.mxu1 %vm82_vm3, %v4609_v26  ;;  %7082 = vmatprep.mubr.msk.bf16.mxu0 %vm7358_vm2, %v11221_v24  ;;  %v5171_v26 = vld [vmem:[#allocation4 + $0x34] sm:$0xff] }
 0x514   :  { %7054 = vmatprep.mubr.msk.bf16.mxu1 %vm7358_vm2, %v11221_v24  ;;  %v5177_v63 = vpack.c.bf16 %v5171_v26, %v5170_v49 }
 0x51a   :  { %7083 = vmatmul.mubr.msk.bf16.gmra.mxu0 %vm82_vm3, %v4752_v29  ;;  %v5314_v29 = vld [vmem:[#allocation4 + $0x3d] sm:$0xff] }
 0x51b   :  { %7055 = vmatmul.mubr.msk.bf16.gmra.mxu1 %vm82_vm3, %v4610_v6  ;;  %7086 = vmatprep.mubr.msk.bf16.mxu0 %vm7358_vm2, %v11221_v24  ;;  %v5315_v6 = vld [vmem:[#allocation4 + $0x45] sm:$0xff] }
 0x51c   :  { %7058 = vmatprep.mubr.msk.bf16.mxu1 %vm7358_vm2, %v11221_v24 }
 0x522   :  { %7087 = vmatmul.mubr.msk.bf16.gmra.mxu0 %vm82_vm3, %v4753_v22  ;;  %v5173_v22 = vld [vmem:[#allocation4 + $0x44] sm:$0xff] }
 0x523   :  { %7059 = vmatmul.mubr.msk.bf16.gmra.mxu1 %vm82_vm3, %v4611_v13  ;;  %7126 = vmatprep.mubr.msk.bf16.mxu0 %vm7358_vm2, %v11221_v24  ;;  %v5320_v13 = vpack.c.bf16 %v5315_v6, %v5314_v29  ;;  %v5178_v42 = vpack.c.bf16 %v5173_v22, %v5172_v33 }
 0x524   :  { %7098 = vmatprep.mubr.msk.bf16.mxu1 %vm7358_vm2, %v11221_v24 }
 0x52a   :  { %7127 = vmatmul.mubr.msk.bf16.vlgmr.msra.gmra.mxu0 %vm82_vm3, %v5033_v37  ;;  %v4885_v37 = vld [vmem:[#allocation4 + $0x1f] sm:$0xff] }
 0x52b   :  { %7099 = vmatmul.mubr.msk.bf16.vlgmr.msra.gmra.mxu1 %vm82_vm3, %v4891_v36  ;;  %7130 = vmatprep.mubr.msk.bf16.mxu0 %vm7358_vm2, %v11221_v24  ;;  %v4892_v47 = vpack.c.bf16 %v4885_v37, %v4884_v39  ;;  %v5321_v36 = vpack.c.bf16 %v5316_v48, %v5316_v48 }
 0x52c   :  { %7102 = vmatprep.mubr.msk.bf16.mxu1 %vm7358_vm2, %v11221_v24  ;;  %7147 = vmatpush3.bf16.msra.mxu1 %v7335_v32  ;;  %v5174_v32 = vld [vmem:[#allocation4 + $0x4c] sm:$0xff] }
 0x52d   :  { %7175 = vmatpush3.bf16.msra.mxu0 %v7336_v20  ;;  %7148 = vmatprep.subr.bf16.mxu1 %v11221_v24  ;;  %v5179_v20 = vpack.c.bf16 %v5174_v32, %v5174_v32 }
 0x52e   :  { %7176 = vmatprep.subr.bf16.mxu0 %v11221_v24 }
 0x530   :  { %7149 = vmatpush3.bf16.msra.mxu1 %v7337_v62 }
 0x531   :  { %7177 = vmatpush3.bf16.msra.mxu0 %v7338_v58  ;;  %7150 = vmatprep.subr.bf16.mxu1 %v11221_v24 }
 0x532   :  { %7131 = vmatmul.mubr.msk.bf16.gmra.mxu0 %vm82_vm3, %v5034_v40  ;;  %7178 = vmatprep.subr.bf16.mxu0 %v11221_v24  ;;  %v4887_v40 = vld [vmem:[#allocation4 + $0x2f] sm:$0xff] }
 0x533   :  { %7103 = vmatmul.mubr.msk.bf16.gmra.mxu1 %vm82_vm3, %v4892_v47  ;;  %7134 = vmatprep.mubr.msk.bf16.mxu0 %vm7358_vm2, %v11221_v24  ;;  %v4893_v57 = vpack.c.bf16 %v4887_v40, %v4886_v28 }
 0x534   :  { %7106 = vmatprep.mubr.msk.bf16.mxu1 %vm7358_vm2, %v11221_v24  ;;  %7151 = vmatpush3.bf16.msra.mxu1 %v7339_v8 }
 0x535   :  { %7179 = vmatpush3.bf16.msra.mxu0 %v7340_v18  ;;  %7152 = vmatprep.subr.bf16.mxu1 %v11221_v24 }
 0x536   :  { %7180 = vmatprep.subr.bf16.mxu0 %v11221_v24 }
 0x538   :  { %7153 = vmatpush3.bf16.msra.mxu1 %v7341_v31 }
 0x539   :  { %7181 = vmatpush3.bf16.msra.mxu0 %v7342_v11  ;;  %7202 = vmatprep.subr.bf16.mxu1 %v11221_v24 }
 0x53a   :  { %7135 = vmatmul.mubr.msk.bf16.gmra.mxu0 %vm82_vm3, %v5035_v43  ;;  %7230 = vmatprep.subr.mxu0 %v11221_v24  ;;  %v5037_v43 = vpack.c.bf16 %v5032_v12, %v5032_v12 }
 0x53b   :  { %7107 = vmatmul.mubr.msk.bf16.gmra.mxu1 %vm82_vm3, %v4893_v57  ;;  %7138 = vmatprep.mubr.msk.bf16.mxu0 %vm7358_vm2, %v11221_v24 }
 0x53c   :  { %7110 = vmatprep.mubr.msk.bf16.mxu1 %vm7358_vm2, %v11221_v24 }
 0x542   :  { %7139 = vmatmul.mubr.msk.bf16.gmra.mxu0 %vm82_vm3, %v5036_v53  ;;  %v5166_v53 = vld [vmem:[#allocation4 + $0xc] sm:$0xff] }
 0x543   :  { %7111 = vmatmul.mubr.msk.bf16.gmra.mxu1 %vm82_vm3, %v4894_v59  ;;  %7142 = vmatprep.mubr.msk.bf16.mxu0 %vm7358_vm2, %v11221_v24  ;;  %v5175_v52 = vpack.c.bf16 %v5167_v51, %v5166_v53 }
 0x544   :  { %7114 = vmatprep.mubr.msk.bf16.mxu1 %vm7358_vm2, %v11221_v24 }
 0x54a   :  { %7143 = vmatmul.mubr.msk.bf16.gmra.mxu0 %vm82_vm3, %v5037_v43 }
 0x54b   :  { %7115 = vmatmul.mubr.msk.bf16.gmra.mxu1 %vm82_vm3, %v4895_v38  ;;  %7182 = vmatprep.mubr.msk.bf16.mxu0 %vm7358_vm2, %v11221_v24 }
 0x54c   :  { %7154 = vmatprep.mubr.msk.bf16.mxu1 %vm7358_vm2, %v11221_v24 }
 0x552   :  { %7183 = vmatmul.mubr.msk.bf16.vlgmr.msra.gmra.mxu0 %vm82_vm3, %v5317_v4 }
 0x553   :  { %7155 = vmatmul.mubr.msk.bf16.vlgmr.msra.gmra.mxu1 %vm82_vm3, %v5175_v52  ;;  %7186 = vmatprep.mubr.msk.bf16.mxu0 %vm7358_vm2, %v11221_v24 }
 0x554   :  { %7158 = vmatprep.mubr.msk.bf16.mxu1 %vm7358_vm2, %v11221_v24  ;;  %7203 = vmatpush3.bf16.msra.mxu1 %v7343_v44 }
 0x555   :  { %7204 = vmatprep.subr.bf16.mxu1 %v11221_v24 }
 0x558   :  { %7205 = vmatpush3.bf16.msra.mxu1 %v7344_v41 }
 0x559   :  { %7206 = vmatprep.subr.bf16.mxu1 %v11221_v24 }
 0x55a   :  { %7187 = vmatmul.mubr.msk.bf16.gmra.mxu0 %vm82_vm3, %v5318_v17 }
 0x55b   :  { %7159 = vmatmul.mubr.msk.bf16.gmra.mxu1 %vm82_vm3, %v5176_v45  ;;  %7190 = vmatprep.mubr.msk.bf16.mxu0 %vm7358_vm2, %v11221_v24 }
 0x55c   :  { %7162 = vmatprep.mubr.msk.bf16.mxu1 %vm7358_vm2, %v11221_v24  ;;  %7207 = vmatpush3.bf16.msra.mxu1 %v7345_v27 }
 0x55d   :  { %7208 = vmatprep.subr.bf16.mxu1 %v11221_v24 }
 0x560   :  { %7209 = vmatpush3.bf16.msra.mxu1 %v7346_v55 }
 0x562   :  { %7191 = vmatmul.mubr.msk.bf16.gmra.mxu0 %vm82_vm3, %v5319_v25 }
 0x563   :  { %7163 = vmatmul.mubr.msk.bf16.gmra.mxu1 %vm82_vm3, %v5177_v63  ;;  %7194 = vmatprep.mubr.msk.bf16.mxu0 %vm7358_vm2, %v11221_v24 }
 0x564   :  { %7166 = vmatprep.mubr.msk.bf16.mxu1 %vm7358_vm2, %v11221_v24 }
 0x56a   :  { %7195 = vmatmul.mubr.msk.bf16.gmra.mxu0 %vm82_vm3, %v5320_v13 }
 0x56b   :  { %7167 = vmatmul.mubr.msk.bf16.gmra.mxu1 %vm82_vm3, %v5178_v42  ;;  %7198 = vmatprep.mubr.msk.bf16.mxu0 %vm7358_vm2, %v11221_v24 }
 0x56c   :  { %7170 = vmatprep.mubr.msk.bf16.mxu1 %vm7358_vm2, %v11221_v24 }
 0x572   :  { %7199 = vmatmul.mubr.msk.bf16.gmra.mxu0 %vm82_vm3, %v5321_v36 }
 0x573   :  { %7171 = vmatmul.mubr.msk.bf16.gmra.mxu1 %vm82_vm3, %v5179_v20  ;;  %7248 = vmatprep.mubr.msk.f32.mxu0 %vm7358_vm2, %v11221_v24 }
 0x574   :  { %7210 = vmatprep.mubr.msk.bf16.mxu1 %vm7358_vm2, %v11221_v24 }
 0x57b   :  { %7211 = vmatmul.mubr.msk.bf16.vlgmr.msra.gmra.mxu1 %vm82_vm3, %v5459_v19 }
 0x57c   :  { %7214 = vmatprep.mubr.msk.bf16.mxu1 %vm7358_vm2, %v11221_v24 }
 0x583   :  { %7215 = vmatmul.mubr.msk.bf16.gmra.mxu1 %vm82_vm3, %v5460_v30 }
 0x584   :  { %7218 = vmatprep.mubr.msk.bf16.mxu1 %vm7358_vm2, %v11221_v24 }
 0x58b   :  { %7219 = vmatmul.mubr.msk.bf16.gmra.mxu1 %vm82_vm3, %v5461_v2 }
 0x58c   :  { %7222 = vmatprep.mubr.msk.bf16.mxu1 %vm7358_vm2, %v11221_v24 }
 0x593   :  { %7223 = vmatmul.mubr.msk.bf16.gmra.mxu1 %vm82_vm3, %v5462_v50 }
 0x594   :  { %7226 = vmatprep.mubr.msk.bf16.mxu1 %vm7358_vm2, %v11221_v24 }
 0x595   :  { %v4560_v1 = vpop.f32.mrf.mxu0 }
 0x596   :  { %v4449_v19 = vpop.f32.mrf.mxu1 }
 0x597   :  { %v4561_v30 = vadd.f32 %v4560_v1, %v4449_v19  ;;  %v7016_v9 = vpop.f32.mrf.mxu0 }
 0x598   :  { %v6988_v60 = vpop.f32.mrf.mxu1 }
 0x599   :  { %v4563_v2 = vpop.f32.mrf.mxu0 }
 0x59a   :  { %v4452_v62 = vpop.f32.mrf.mxu1 }
 0x59b   :  { %7227 = vmatmul.mubr.msk.bf16.gmra.mxu1 %vm82_vm3, %v5463_v61  ;;  %v4564_v58 = vadd.f32 %v4563_v2, %v4452_v62  ;;  %v7017_v39 = vpop.f32.mrf.mxu0 }
 0x59c   :  { %v6989_v37 = vpop.f32.mrf.mxu1 }
 0x5a1   :  { %v4457_v23 = vpop.f32.mrf.mxu1 }
 0x5a2   :  { %v4568_v21 = vpop.f32.mrf.mxu0 }
 0x5a3   :  { %v4569_v8 = vadd.f32 %v4568_v21, %v4457_v23  ;;  %v6992_v47 = vpop.f32.mrf.mxu1 }
 0x5a4   :  { %v7020_v18 = vpop.f32.mrf.mxu0 }
 0x5a5   :  { %v4460_v31 = vpop.f32.mrf.mxu1 }
 0x5a6   :  { %v4571_v11 = vpop.f32.mrf.mxu0 }
 0x5a7   :  { %v4572_v28 = vadd.f32 %v4571_v11, %v4460_v31  ;;  %v6993_v40 = vpop.f32.mrf.mxu1 }
 0x5a8   :  { %v7021_v57 = vpop.f32.mrf.mxu0 }
 0x5a9   :  { %v4465_v3 = vpop.f32.mrf.mxu1 }
 0x5aa   :  { %v4576_v56 = vpop.f32.mrf.mxu0 }
 0x5ab   :  { %v4577_v59 = vadd.f32 %v4576_v56, %v4465_v3  ;;  %v6996_v12 = vpop.f32.mrf.mxu1 }
 0x5ac   :  { %v7024_v16 = vpop.f32.mrf.mxu0 }
 0x5ad   :  { %v4468_v43 = vpop.f32.mrf.mxu1 }
 0x5ae   :  { %v4579_v38 = vpop.f32.mrf.mxu0 }
 0x5af   :  { %v4580_v34 = vadd.f32 %v4579_v38, %v4468_v43  ;;  %v6997_v10 = vpop.f32.mrf.mxu1 }
 0x5b0   :  { %v7025_v53 = vpop.f32.mrf.mxu0 }
 0x5b2   :  { %v4584_v51 = vpop.f32.mrf.mxu0 }
 0x5b3   :  { %v4473_v4 = vpop.f32.mrf.mxu1 }
 0x5b4   :  { %v4585_v44 = vadd.f32 %v4584_v51, %v4473_v4  ;;  %v7028_v52 = vpop.f32.mrf.mxu0 }
 0x5b5   :  { %v7000_v41 = vpop.f32.mrf.mxu1 }
 0x5b6   :  { %v4587_v54 = vpop.f32.mrf.mxu0 }
 0x5b7   :  { %v4476_v35 = vpop.f32.mrf.mxu1 }
 0x5b8   :  { %v4588_v0 = vadd.f32 %v4587_v54, %v4476_v35  ;;  %v7029_v7 = vpop.f32.mrf.mxu0 }
 0x5b9   :  { %v7001_v17 = vpop.f32.mrf.mxu1 }
 0x5ba   :  { %v4592_v27 = vpop.f32.mrf.mxu0 }
 0x5bb   :  { %v4481_v45 = vpop.f32.mrf.mxu1 }
 0x5bc   :  { %v4593_v55 = vadd.f32 %v4592_v27, %v4481_v45  ;;  %v7032_v46 = vpop.f32.mrf.mxu0 }
 0x5bd   :  { %v7004_v5 = vpop.f32.mrf.mxu1 }
 0x5be   :  { %v4595_v49 = vpop.f32.mrf.mxu0 }
 0x5bf   :  { %v4484_v26 = vpop.f32.mrf.mxu1 }
 0x5c0   :  { %v7033_v25 = vpop.f32.mrf.mxu0 }
 0x5c1   :  { %v7005_v63 = vpop.f32.mrf.mxu1 }
 0x5c2   :  { %v4835_v29 = vpop.f32.mrf.mxu0 }
 0x5c3   :  { %v4693_v6 = vpop.f32.mrf.mxu1 }
 0x5c4   :  { %v4731_v33 = vadd.f32 %v4693_v6, %v4561_v30  ;;  %v7072_v22 = vpop.f32.mrf.mxu0 }
 0x5c5   :  { %v7044_v13 = vpop.f32.mrf.mxu1 }
 0x5c6   :  { %v4873_v42 = vadd.f32 %v4835_v29, %v4731_v33  ;;  %v4838_v48 = vpop.f32.mrf.mxu0 }
 0x5c7   :  { %v4696_v32 = vpop.f32.mrf.mxu1 }
 0x5c8   :  { %v4732_v36 = vadd.f32 %v4696_v32, %v4564_v58  ;;  %v7073_v20 = vpop.f32.mrf.mxu0 }
 0x5c9   :  { %v7045_v50 = vpop.f32.mrf.mxu1 }
 0x5ca   :  { %v4874_v15 = vadd.f32 %v4838_v48, %v4732_v36  ;;  %v4843_v61 = vpop.f32.mrf.mxu0 }
 0x5cb   :  { %v4701_v1 = vpop.f32.mrf.mxu1 }
 0x5cc   :  { %v4733_v19 = vadd.f32 %v4701_v1, %v4569_v8  ;;  %v7076_v9 = vpop.f32.mrf.mxu0 }
 0x5cd   :  { %v7048_v60 = vpop.f32.mrf.mxu1 }
 0x5ce   :  { %v4875_v2 = vadd.f32 %v4843_v61, %v4733_v19  ;;  %v4846_v62 = vpop.f32.mrf.mxu0 }
 0x5cf   :  { %v4704_v39 = vpop.f32.mrf.mxu1 }
 0x5d0   :  { %v4734_v37 = vadd.f32 %v4704_v39, %v4572_v28  ;;  %v7077_v23 = vpop.f32.mrf.mxu0 }
 0x5d1   :  { %v7049_v30 = vpop.f32.mrf.mxu1 }
 0x5d2   :  { %v4876_v21 = vadd.f32 %v4846_v62, %v4734_v37  ;;  %v4851_v47 = vpop.f32.mrf.mxu0 }
 0x5d3   :  { %v4709_v18 = vpop.f32.mrf.mxu1 }
 0x5d4   :  { %v4735_v31 = vadd.f32 %v4709_v18, %v4577_v59  ;;  %v7080_v11 = vpop.f32.mrf.mxu0 }
 0x5d5   :  { %v7052_v58 = vpop.f32.mrf.mxu1 }
 0x5d6   :  { %v4877_v40 = vadd.f32 %v4851_v47, %v4735_v31  ;;  %v4854_v57 = vpop.f32.mrf.mxu0 }
 0x5d7   :  { %v4712_v3 = vpop.f32.mrf.mxu1 }
 0x5d8   :  { %v4736_v56 = vadd.f32 %v4712_v3, %v4580_v34  ;;  %v7081_v12 = vpop.f32.mrf.mxu0 }
 0x5d9   :  { %v7053_v8 = vpop.f32.mrf.mxu1 }
 0x5da   :  { %v4878_v16 = vadd.f32 %v4854_v57, %v4736_v56  ;;  %v4859_v43 = vpop.f32.mrf.mxu0 }
 0x5db   :  { %v4717_v38 = vpop.f32.mrf.mxu1 }
 0x5dc   :  { %v4737_v10 = vadd.f32 %v4717_v38, %v4585_v44  ;;  %v7084_v53 = vpop.f32.mrf.mxu0 }
 0x5dd   :  { %v7056_v28 = vpop.f32.mrf.mxu1 }
 0x5de   :  { %v4879_v51 = vadd.f32 %v4859_v43, %v4737_v10  ;;  %v4862_v4 = vpop.f32.mrf.mxu0 }
 0x5df   :  { %v4720_v52 = vpop.f32.mrf.mxu1 }
 0x5e0   :  { %v4738_v41 = vadd.f32 %v4720_v52, %v4588_v0  ;;  %v7085_v54 = vpop.f32.mrf.mxu0 }
 0x5e1   :  { %v7057_v59 = vpop.f32.mrf.mxu1 }
 0x5e2   :  { %v4880_v35 = vadd.f32 %v4862_v4, %v4738_v41  ;;  %v4867_v7 = vpop.f32.mrf.mxu0 }
 0x5e3   :  { %v4725_v17 = vpop.f32.mrf.mxu1 }
 0x5e4   :  { %v4739_v27 = vadd.f32 %v4725_v17, %v4593_v55  ;;  %v7088_v45 = vpop.f32.mrf.mxu0 }
 0x5e5   :  { %v7060_v34 = vpop.f32.mrf.mxu1 }
 0x5e6   :  { %v4881_v46 = vadd.f32 %v4867_v7, %v4739_v27  ;;  %v4870_v5 = vpop.f32.mrf.mxu0 }
 0x5e7   :  { %v4728_v49 = vpop.f32.mrf.mxu1 }
 0x5e8   :  { %v7089_v26 = vpop.f32.mrf.mxu0 }
 0x5e9   :  { %v7061_v25 = vpop.f32.mrf.mxu1 }
 0x5ea   :  { %v5119_v44 = vpop.f32.mrf.mxu0 }
 0x5eb   :  { %v4977_v63 = vpop.f32.mrf.mxu1 }
 0x5ec   :  { %v5015_v29 = vadd.f32 %v4977_v63, %v4873_v42  ;;  %v7128_v6 = vpop.f32.mrf.mxu0 }
 0x5ed   :  { %v7100_v33 = vpop.f32.mrf.mxu1 }
 0x5ee   :  { %v10851_v22 = vadd.f32 %v5119_v44, %v5015_v29  ;;  %v5122_v0 = vpop.f32.mrf.mxu0 }
 0x5ef   :  { %v4980_v13 = vpop.f32.mrf.mxu1 }
 0x5f0   :  { %v5016_v48 = vadd.f32 %v4980_v13, %v4874_v15  ;;  %v7129_v32 = vpop.f32.mrf.mxu0 }
 0x5f1   :  { %v7101_v36 = vpop.f32.mrf.mxu1 }
 0x5f2   :  { %v10853_v55 = vadd.f32 %v5122_v0, %v5016_v48  ;;  %v5127_v20 = vpop.f32.mrf.mxu0 }
 0x5f3   :  { %v4985_v50 = vpop.f32.mrf.mxu1 }
 0x5f4   :  { %v5017_v61 = vadd.f32 %v4985_v50, %v4875_v2  ;;  %v7132_v1 = vpop.f32.mrf.mxu0 }
 0x5f5   :  { %v7104_v19 = vpop.f32.mrf.mxu1 }
 0x5f6   :  { %v10855_v9 = vadd.f32 %v5127_v20, %v5017_v61  ;;  %v5130_v60 = vpop.f32.mrf.mxu0 }
 0x5f7   :  { %v4988_v42 = vpop.f32.mrf.mxu1 }
 0x5f8   :  { %v5018_v62 = vadd.f32 %v4988_v42, %v4876_v21  ;;  %v7133_v39 = vpop.f32.mrf.mxu0 }
 0x5f9   :  { %v7105_v37 = vpop.f32.mrf.mxu1 }
 0x5fa   :  { %v10857_v23 = vadd.f32 %v5130_v60, %v5018_v62  ;;  %v5135_v30 = vpop.f32.mrf.mxu0 }
 0x5fb   :  { %v4993_v15 = vpop.f32.mrf.mxu1 }
 0x5fc   :  { %v5019_v47 = vadd.f32 %v4993_v15, %v4877_v40  ;;  %v7136_v18 = vpop.f32.mrf.mxu0 }
 0x5fd   :  { %v7108_v31 = vpop.f32.mrf.mxu1 }
 0x5fe   :  { %v10859_v11 = vadd.f32 %v5135_v30, %v5019_v47  ;;  %v5138_v58 = vpop.f32.mrf.mxu0 }
 0x5ff   :  { %v4996_v2 = vpop.f32.mrf.mxu1 }
 0x600   :  { %v5020_v57 = vadd.f32 %v4996_v2, %v4878_v16  ;;  %v7137_v3 = vpop.f32.mrf.mxu0 }
 0x601   :  { %v7109_v56 = vpop.f32.mrf.mxu1 }
 0x602   :  { %v10861_v12 = vadd.f32 %v5138_v58, %v5020_v57  ;;  %v5143_v8 = vpop.f32.mrf.mxu0 }
 0x603   :  { %v5001_v21 = vpop.f32.mrf.mxu1 }
 0x604   :  { %v5021_v43 = vadd.f32 %v5001_v21, %v4879_v51  ;;  %v7140_v38 = vpop.f32.mrf.mxu0 }
 0x605   :  { %v7112_v10 = vpop.f32.mrf.mxu1 }
 0x606   :  { %v10863_v53 = vadd.f32 %v5143_v8, %v5021_v43  ;;  %v5146_v28 = vpop.f32.mrf.mxu0 }
 0x607   :  { %v5004_v40 = vpop.f32.mrf.mxu1 }
 0x608   :  { %v5022_v4 = vadd.f32 %v5004_v40, %v4880_v35  ;;  %v7141_v52 = vpop.f32.mrf.mxu0 }
 0x609   :  { %v7113_v41 = vpop.f32.mrf.mxu1 }
 0x60a   :  { %v10865_v54 = vadd.f32 %v5146_v28, %v5022_v4  ;;  %v5151_v59 = vpop.f32.mrf.mxu0 }
 0x60b   :  { %v5009_v16 = vpop.f32.mrf.mxu1 }
 0x60c   :  { %v5023_v7 = vadd.f32 %v5009_v16, %v4881_v46  ;;  %v7144_v17 = vpop.f32.mrf.mxu0 }
 0x60d   :  { %v7116_v27 = vpop.f32.mrf.mxu1 }
 0x60e   :  { %v10867_v45 = vadd.f32 %v5151_v59, %v5023_v7  ;;  %v5154_v34 = vpop.f32.mrf.mxu0  ;;  %v5606_v27 = vpop.permute.xlu1 %5605 }
 0x60f   :  { %v5012_v51 = vpop.f32.mrf.mxu1 }
 0x610   :  { %v7145_v5 = vpop.f32.mrf.mxu0 }
 0x611   :  { %v7117_v49 = vpop.f32.mrf.mxu1 }
 0x612   :  { %v5403_v26 = vpop.f32.mrf.mxu0 }
 0x613   :  { %v5261_v25 = vpop.f32.mrf.mxu1 }
 0x614   :  { %v7184_v44 = vpop.f32.mrf.mxu0  ;;  %v5299_v43 = vadd.f32 %v5261_v25, %v10851_v22  ;;  %v5611_v22 = vpop.permute.xlu0 %5610 }
 0x615   :  { %v7156_v63 = vpop.f32.mrf.mxu1 }
 0x616   :  { %v5406_v35 = vpop.f32.mrf.mxu0  ;;  %v5441_v4 = vadd.f32 %v5403_v26, %v5299_v43 }
 0x617   :  { %v5264_v29 = vpop.f32.mrf.mxu1 }
 0x618   :  { %v7185_v6 = vpop.f32.mrf.mxu0  ;;  %v5300_v52 = vadd.f32 %v5264_v29, %v10853_v55 }
 0x619   :  { %v7157_v33 = vpop.f32.mrf.mxu1 }
 0x61a   :  { %v5411_v0 = vpop.f32.mrf.mxu0  ;;  %v5442_v7 = vadd.f32 %v5406_v35, %v5300_v52 }
 0x61b   :  { %v5269_v13 = vpop.f32.mrf.mxu1 }
 0x61c   :  { %v7188_v48 = vpop.f32.mrf.mxu0  ;;  %v5301_v17 = vadd.f32 %v5269_v13, %v10855_v9  ;;  %v5616_v9 = vpop.permute.xlu1 %5615 }
 0x61d   :  { %v7160_v46 = vpop.f32.mrf.mxu1 }
 0x61e   :  { %v5414_v32 = vpop.f32.mrf.mxu0  ;;  %v5443_v25 = vadd.f32 %v5411_v0, %v5301_v17 }
 0x61f   :  { %v5272_v36 = vpop.f32.mrf.mxu1 }
 0x620   :  { %v7189_v20 = vpop.f32.mrf.mxu0  ;;  %v5302_v26 = vadd.f32 %v5272_v36, %v10857_v23  ;;  %v5621_v36 = vpop.permute.xlu0 %5620 }
 0x621   :  { %v7161_v50 = vpop.f32.mrf.mxu1 }
 0x622   :  { %v5419_v61 = vpop.f32.mrf.mxu0  ;;  %v5444_v13 = vadd.f32 %v5414_v32, %v5302_v26 }
 0x623   :  { %v5277_v1 = vpop.f32.mrf.mxu1 }
 0x624   :  { %v7192_v19 = vpop.f32.mrf.mxu0  ;;  %v5303_v48 = vadd.f32 %v5277_v1, %v10859_v11  ;;  %v5626_v1 = vpop.permute.xlu1 %5625 }
 0x625   :  { %v7164_v60 = vpop.f32.mrf.mxu1 }
 0x626   :  { %v10869_v42 = vpop.f32.mrf.mxu0 }
 0x627   :  { %v5280_v62 = vpop.f32.mrf.mxu1 }
 0x628   :  { %v7193_v39 = vpop.f32.mrf.mxu0 }
 0x629   :  { %v7165_v37 = vpop.f32.mrf.mxu1  ;;  %v5445_v39 = vadd.f32 %v5419_v61, %v5303_v48 }
 0x62a   :  { %v10871_v30 = vpop.f32.mrf.mxu0  ;;  %v5304_v37 = vadd.f32 %v5280_v62, %v10861_v12 }
 0x62b   :  { %v5285_v15 = vpop.f32.mrf.mxu1 }
 0x62c   :  { %v7196_v47 = vpop.f32.mrf.mxu0  ;;  %v5305_v43 = vadd.f32 %v5285_v15, %v10863_v53 }
 0x62d   :  { %v7168_v18 = vpop.f32.mrf.mxu1 }
 0x62e   :  { %v10873_v31 = vpop.f32.mrf.mxu0  ;;  %v5447_v52 = vadd.f32 %v10871_v30, %v5305_v43 }
 0x62f   :  { %v10875_v58 = vpop.f32.mrf.mxu1 }
 0x630   :  { %v7197_v2 = vpop.f32.mrf.mxu0 }
 0x631   :  { %v7169_v57 = vpop.f32.mrf.mxu1 }
 0x632   :  { %v10877_v3 = vpop.f32.mrf.mxu0 }
 0x633   :  { %v10879_v56 = vpop.f32.mrf.mxu1 }
 0x634   :  { %v7200_v8 = vpop.f32.mrf.mxu0 }
 0x635   :  { %v7172_v21 = vpop.f32.mrf.mxu1 }
 0x636   :  { %v5438_v38 = vpop.f32.mrf.mxu0  ;;  %v5446_v21 = vadd.f32 %v10869_v42, %v5304_v37 }
 0x637   :  { %v5296_v10 = vpop.f32.mrf.mxu1 }
 0x638   :  { %v7201_v28 = vpop.f32.mrf.mxu0 }
 0x639   :  { %v7173_v40 = vpop.f32.mrf.mxu1 }
 0x63a   :  { %v5631_v40 = vpop.permute.xlu0 %5630 }
 0x63b   :  { %v5545_v41 = vpop.f32.mrf.mxu1 }
 0x63c   :  { %v10883_v59 = vadd.f32 %v5545_v41, %v5441_v4  ;;  %v5306_v41 = vadd.f32 %v10875_v58, %v10865_v54 }
 0x63d   :  { %v7212_v16 = vpop.f32.mrf.mxu1 }
 0x63e   :  { %v5648_v51 = vmul.f32 %v5606_v27, %v10883_v59  ;;  %v5636_v27 = vpop.permute.xlu1 %5635 }
 0x63f   :  { %v5548_v34 = vpop.f32.mrf.mxu1 }
 0x640   :  { %v10887_v5 = vadd.f32 %v5548_v34, %v5442_v7  ;;  %v5671_v63 = vmul.f32 %v5648_v51, %v5648_v51 }
 0x641   :  { %v7213_v49 = vpop.f32.mrf.mxu1 }
 0x642   :  { %v5649_v55 = vmul.f32 %v5611_v22, %v10887_v5  ;;  %v5307_v22 = vadd.f32 %v10879_v56, %v10867_v45  ;;  %v5646_v48 = vpop.permute.xlu1 %5645 }
 0x643   :  { %v5553_v44 = vpop.f32.mrf.mxu1 }
 0x644   :  { %v5657_v29 = vadd.f32 %v5649_v55, %v5648_v51  ;;  %v5672_v6 = vmul.f32 %v5649_v55, %v5649_v55  ;;  %v10891_v35 = vadd.f32 %v5553_v44, %v5443_v25  ;;  %v5448_v51 = vadd.f32 %v10873_v31, %v5306_v41  ;;  %v5641_v55 = vpop.permute.xlu0 %5640 }
 0x645   :  { %v7216_v33 = vpop.f32.mrf.mxu1 }
 0x646   :  { %v5680_v46 = vadd.f32 %v5672_v6, %v5671_v63  ;;  %v5650_v20 = vmul.f32 %v5616_v9, %v10891_v35  ;;  %v5449_v63 = vadd.f32 %v10877_v3, %v5307_v22 }
 0x647   :  { %v5556_v50 = vpop.f32.mrf.mxu1 }
 0x648   :  { %v5658_v0 = vadd.f32 %v5657_v29, %v5650_v20  ;;  %v5673_v19 = vmul.f32 %v5650_v20, %v5650_v20  ;;  %v10895_v23 = vadd.f32 %v5556_v50, %v5444_v13 }
 0x649   :  { %v7217_v60 = vpop.f32.mrf.mxu1 }
 0x64a   :  { %v5681_v47 = vadd.f32 %v5680_v46, %v5673_v19  ;;  %v5651_v18 = vmul.f32 %v5621_v36, %v10895_v23 }
 0x64b   :  { %v5561_v2 = vpop.f32.mrf.mxu1 }
 0x64c   :  { %v5659_v32 = vadd.f32 %v5658_v0, %v5651_v18  ;;  %v5674_v57 = vmul.f32 %v5651_v18, %v5651_v18  ;;  %v10899_v11 = vadd.f32 %v5561_v2, %v5445_v39 }
 0x64d   :  { %v7220_v8 = vpop.f32.mrf.mxu1 }
 0x64e   :  { %v5682_v38 = vadd.f32 %v5681_v47, %v5674_v57  ;;  %v5652_v10 = vmul.f32 %v5626_v1, %v10899_v11 }
 0x64f   :  { %v5564_v61 = vpop.f32.mrf.mxu1 }
 0x650   :  { %v5660_v28 = vadd.f32 %v5659_v32, %v5652_v10  ;;  %v5675_v12 = vmul.f32 %v5652_v10, %v5652_v10  ;;  %v10904_v62 = vadd.f32 %v5564_v61, %v5446_v21 }
 0x651   :  { %v7221_v4 = vpop.f32.mrf.mxu1 }
 0x652   :  { %v5683_v16 = vadd.f32 %v5682_v38, %v5675_v12  ;;  %v5653_v42 = vmul.f32 %v5631_v40, %v10904_v62 }
 0x653   :  { %v5569_v7 = vpop.f32.mrf.mxu1 }
 0x654   :  { %v5661_v53 = vadd.f32 %v5660_v28, %v5653_v42  ;;  %v5676_v15 = vmul.f32 %v5653_v42, %v5653_v42  ;;  %v10910_v17 = vadd.f32 %v5569_v7, %v5447_v52 }
 0x655   :  { %v7224_v34 = vpop.f32.mrf.mxu1 }
 0x656   :  { %v5684_v49 = vadd.f32 %v5683_v16, %v5676_v15  ;;  %v5654_v30 = vmul.f32 %v5636_v27, %v10910_v17  ;;  %v5592_v15 = vld [vmem:[%s10985_s8] sm:$0x1] }
 0x657   :  { %v5572_v25 = vpop.f32.mrf.mxu1 }
 0x658   :  { %v5662_v54 = vadd.f32 %v5661_v53, %v5654_v30  ;;  %v5677_v58 = vmul.f32 %v5654_v30, %v5654_v30  ;;  %v5590_v26 = vadd.f32 %v5572_v25, %v5448_v51 }
 0x659   :  { %v7225_v44 = vpop.f32.mrf.mxu1 }
 0x65a   :  { %v5685_v29 = vadd.f32 %v5684_v49, %v5677_v58  ;;  %v5655_v6 = vmul.f32 %v5641_v55, %v5590_v26  ;;  %v5757_v58 = vld [vmem:[%s10987_s10 + $0x40] sm:$0xff]  ;;  %v5756_v44 = vld [vmem:[%s10987_s10 + $0x38] sm:$0xff] }
 0x65b   :  { %v5577_v9 = vpop.f32.mrf.mxu1 }
 0x65c   :  { %v5663_v33 = vadd.f32 %v5662_v54, %v5655_v6  ;;  %v5678_v13 = vmul.f32 %v5655_v6, %v5655_v6  ;;  %v5591_v31 = vadd.f32 %v5577_v9, %v5449_v63  ;;  %v5755_v9 = vld [vmem:[%s10987_s10 + $0x30] sm:$0xff] }
 0x65d   :  { %v7228_v46 = vpop.f32.mrf.mxu1 }
 0x65e   :  { %v5686_v45 = vadd.f32 %v5685_v29, %v5678_v13  ;;  %v5656_v56 = vmul.f32 %v5646_v48, %v5591_v31  ;;  %v5754_v46 = vld [vmem:[%s10987_s10 + $0x28] sm:$0xff] }
 0x65f   :  { %v5580_v20 = vpop.f32.mrf.mxu1 }
 0x660   :  { %v5664_v50 = vadd.f32 %v5663_v33, %v5656_v56  ;;  %v5679_v0 = vmul.f32 %v5656_v56, %v5656_v56 }
 0x661   :  { %v7229_v19 = vpop.f32.mrf.mxu1 }
 0x662   :  { %v5665_v36 = vrot.slane %v5664_v50, 4  ;;  %v5687_v60 = vadd.f32 %v5686_v45, %v5679_v0 }
 0x664   :  { %v5666_v39 = vadd.f32 %v5665_v36, %v5664_v50  ;;  %v5688_v37 = vrot.slane %v5687_v60, 4  ;;  %v5753_v50 = vld [vmem:[%s10987_s10 + $0x20] sm:$0xff] }
 0x666   :  { %v5667_v47 = vrot.slane %v5666_v39, 2  ;;  %v5689_v3 = vadd.f32 %v5688_v37, %v5687_v60  ;;  %v5752_v60 = vld [vmem:[%s10987_s10 + $0x18] sm:$0xff] }
 0x668   :  { %v5668_v18 = vadd.f32 %v5667_v47, %v5666_v39  ;;  %v5690_v2 = vrot.slane %v5689_v3, 2 }
 0x66a   :  { %v5669_v32 = vrot.slane %v5668_v18, 1  ;;  %v5691_v57 = vadd.f32 %v5690_v2, %v5689_v3  ;;  %v5751_v3 = vld [vmem:[%s10987_s10 + $0x10] sm:$0xff] }
 0x66c   :  { %v5670_v1 = vadd.f32 %v5669_v32, %v5668_v18  ;;  %v5692_v8 = vrot.slane %v5691_v57, 1  ;;  %v5750_v32 = vld [vmem:[%s10987_s10 + $0x8] sm:$0xff] }
 0x66e   :  { %v5693_v21 = vadd.f32 %v5692_v8, %v5691_v57  ;;  %v5694_v43 = vmul.f32 0.03125, %v5670_v1  ;;  %v5749_v8 = vld [vmem:[%s10987_s10] sm:$0xff] }
 0x670   :  { %v5695_v38 = vmul.f32 0.03125, %v5693_v21  ;;  %v5696_v10 = vmul.f32 %v5694_v43, %v5694_v43  ;;  %v5709_v61 = vsub.f32 %v5591_v31, %v5694_v43  ;;  %v5708_v28 = vsub.f32 %v5590_v26, %v5694_v43 }
 0x671   :  { %v5707_v12 = vsub.f32 %v10910_v17, %v5694_v43  ;;  %v5706_v40 = vsub.f32 %v10904_v62, %v5694_v43  ;;  %v5705_v4 = vsub.f32 %v10899_v11, %v5694_v43  ;;  %v5704_v52 = vsub.f32 %v10895_v23, %v5694_v43  ;;  %v6146_v23 = vld [vmem:[%s10986_s9] ss:$0 sm:$0xff] }
 0x672   :  { %v5697_v41 = vsub.f32 %v5695_v38, %v5696_v10  ;;  %v5703_v16 = vsub.f32 %v10891_v35, %v5694_v43  ;;  %v5702_v42 = vsub.f32 %v10887_v5, %v5694_v43  ;;  %v5701_v7 = vsub.f32 %v10883_v59, %v5694_v43  ;;  %v5767_v38 = vld [vmem:[%s10988_s14] sm:$0xff] }
 0x673   :  { %v20_v10 = vstv %s10989_s11 }
 0x674   :  { %v5698_v53 = vadd.f32 1e-05, %v5697_v41  ;;  %21 = vst [vmem:[#allocation5] sm:$0x1] %v20_v10 }
 0x676   :  { %7351 = vrsqrt.f32 %v5698_v53 }
 0x683   :  { %v7352_v17 = vpop.eup %7351 }
 0x684   :  { %v5700_v27 = vmul.f32 %v7352_v17, %v5592_v15 }
 0x686   :  { %v5714_v62 = vrot.slane %v5700_v27, %v11394_v14 }
 0x688   :  { %v5724_v11 = vmul.f32 %v5714_v62, %v5709_v61  ;;  %v5723_v35 = vmul.f32 %v5714_v62, %v5708_v28  ;;  %v5722_v34 = vmul.f32 %v5714_v62, %v5707_v12  ;;  %v5721_v5 = vmul.f32 %v5714_v62, %v5706_v40  ;;  %v6148_v12 = vld [vmem:[#allocation5] ss:$0 sm:$0xff] }
 0x689   :  { %v5720_v51 = vmul.f32 %v5714_v62, %v5705_v4  ;;  %v5719_v59 = vmul.f32 %v5714_v62, %v5704_v52  ;;  %v5718_v22 = vmul.f32 %v5714_v62, %v5703_v16  ;;  %v5717_v49 = vmul.f32 %v5714_v62, %v5702_v42 }
 0x68a   :  { %v5739_v30 = vadd.f32 %v6146_v23, %v5724_v11  ;;  %v5738_v25 = vadd.f32 %v6146_v23, %v5723_v35  ;;  %v5737_v54 = vadd.f32 %v6146_v23, %v5722_v34  ;;  %v5736_v55 = vadd.f32 %v6146_v23, %v5721_v5 }
 0x68b   :  { %v5735_v6 = vadd.f32 %v6146_v23, %v5720_v51  ;;  %v5734_v31 = vadd.f32 %v6146_v23, %v5719_v59  ;;  %v5716_v48 = vmul.f32 %v5714_v62, %v5701_v7  ;;  %v5733_v20 = vadd.f32 %v6146_v23, %v5718_v22 }
 0x68c   :  { %v5748_v14 = vmax.f32 %v5739_v30, 0.0  ;;  %v5747_v26 = vmax.f32 %v5738_v25, 0.0  ;;  %v5746_v29 = vmax.f32 %v5737_v54, 0.0  ;;  %v5745_v13 = vmax.f32 %v5736_v55, 0.0 }
 0x68d   :  { %v5744_v56 = vmax.f32 %v5735_v6, 0.0  ;;  %v5743_v19 = vmax.f32 %v5734_v31, 0.0  ;;  %v5732_v36 = vadd.f32 %v6146_v23, %v5717_v49  ;;  %v5742_v37 = vmax.f32 %v5733_v20, 0.0 }
 0x68e   :  { %v5766_v63 = vmul.f32 %v5757_v58, %v5748_v14  ;;  %v5765_v33 = vmul.f32 %v5756_v44, %v5747_v26  ;;  %v5764_v45 = vmul.f32 %v5755_v9, %v5746_v29  ;;  %v5763_v0 = vmul.f32 %v5754_v46, %v5745_v13 }
 0x68f   :  { %v5762_v39 = vmul.f32 %v5753_v50, %v5744_v56  ;;  %v5731_v47 = vadd.f32 %v6146_v23, %v5716_v48  ;;  %v5761_v18 = vmul.f32 %v5752_v60, %v5743_v19  ;;  %v5741_v2 = vmax.f32 %v5732_v36, 0.0 }
 0x690   :  { %7231 = vmatpush3.msra.mxu0 %v5766_v63  ;;  %v5760_v57 = vmul.f32 %v5751_v3, %v5742_v37 }
 0x691   :  { %7232 = vmatprep.subr.mxu0 %v11221_v24  ;;  %v5740_v1 = vmax.f32 %v5731_v47, 0.0  ;;  %v5759_v21 = vmul.f32 %v5750_v32, %v5741_v2 }
 0x692   :  { %7233 = vmatpush3.msra.mxu0 %v5765_v33 }
 0x693   :  { %7234 = vmatprep.subr.mxu0 %v11221_v24  ;;  %v5758_v43 = vmul.f32 %v5749_v8, %v5740_v1 }
 0x694   :  { %7235 = vmatpush3.msra.mxu0 %v5764_v45 }
 0x695   :  { %7236 = vmatprep.subr.mxu0 %v11221_v24 }
 0x696   :  { %7237 = vmatpush3.msra.mxu0 %v5763_v0 }
 0x697   :  { %7238 = vmatprep.subr.mxu0 %v11221_v24 }
 0x698   :  { %7239 = vmatpush3.msra.mxu0 %v5762_v39 }
 0x699   :  { %7240 = vmatprep.subr.mxu0 %v11221_v24 }
 0x69a   :  { %7241 = vmatpush3.msra.mxu0 %v5761_v18 }
 0x69b   :  { %7242 = vmatprep.subr.mxu0 %v11221_v24 }
 0x69c   :  { %7243 = vmatpush3.msra.mxu0 %v5760_v57 }
 0x69d   :  { %7244 = vmatprep.subr.mxu0 %v11221_v24 }
 0x69e   :  { %7245 = vmatpush3.msra.mxu0 %v5759_v21 }
 0x69f   :  { %7246 = vmatprep.subr.mxu0 %v11221_v24 }
 0x6a0   :  { %7247 = vmatpush3.msra.mxu0 %v5758_v43 }
 0x6a1   :  { %7249 = vmatmul.mubr.msk.f32.vlgmr.msra.gmra.mxu0 %vm5768_vm5, %v5767_v38 }
 0x761   :  { %v5838_v61 = vpop.f32.mrf.mxu0 }
 0x762   :  { %5842 = vadd.xlane.f32.xlu0 %v5838_v61 }
 0x763   :  { %v7250_v28 = vpop.f32.mrf.mxu0 }
 0x7eb   :  { %v5843_v40 = vpop.xlane.xlu0 %5842 }
 0x7ec   :  { %v5851_v4 = vadd.f32 %v6148_v12, %v5843_v40 }
 0x7ee   :  { %v5852_v52 = vsub.f32 0.0, %v5851_v4 }
 0x7f0   :  { %v5853_v41 = vmul.f32 1.442695, %v5852_v52 }
 0x7f2   :  { %7353 = vpow2.f32 %v5853_v41 }
 0x7ff   :  { %v7354_v16 = vpop.eup %7353 }
 0x800   :  { %v5855_v42 = vadd.f32 1.0, %v7354_v16 }
 0x802   :  { %7355 = vrcp.f32 %v5855_v42 }
 0x80f   :  { %v7356_v24 = vpop.eup %7355 }
 0x810   :  { %5858 = vst.msk [vmem:[%s10990_s15] sm:$0x3] %vm5857_vm6, %v7356_v24 }

</bundles_post_ra>
